<compile_context>
chip_gen: v5e
topology: v5e:2x2
jax: 0.10.0
libtpu: 0.0.40
codegen_flags: <defaults>
</compile_context>

<pallas_src>
import jax
import jax.numpy as jnp
import numpy as np
from jax import lax
from jax.experimental import pallas as pl
from jax.experimental.pallas import tpu as pltpu


def se_basic_block_kernel(x_ref, w1_ref, s1_ref, b1_ref,
                          w2t_ref, s2_ref, b2_ref,
                          sew1_ref, sew2_ref,
                          wdt_ref, sd_ref, bd_ref,
                          out_ref,
                          xpad_ref, opad_ref, col1_ref, col2_ref):
    _, H, W, Cin = x_ref.shape
    Cout = out_ref.shape[1]
    HW = H * W
    Hp, Wp = H + 2, W + 2

    # ---- stage conv1 input with its halo: zero only the 1-wide frame, write interior once
    xpad_ref[0:1, :, :] = jnp.zeros((1, Wp, Cin), jnp.float32)
    xpad_ref[Hp - 1:Hp, :, :] = jnp.zeros((1, Wp, Cin), jnp.float32)
    xpad_ref[:, 0:1, :] = jnp.zeros((Hp, 1, Cin), jnp.float32)
    xpad_ref[:, Wp - 1:Wp, :] = jnp.zeros((Hp, 1, Cin), jnp.float32)
    xpad_ref[1:H + 1, 1:W + 1, :] = x_ref[0].astype(jnp.float32)

    # ---- im2col for conv1: one (H*W, 9*Cin) bf16 patch matrix -> single MXU matmul
    for t in range(9):
        ky, kx = t // 3, t % 3
        col1_ref[:, t * Cin:(t + 1) * Cin] = (
            xpad_ref[ky:ky + H, kx:kx + W, :].reshape(HW, Cin).astype(jnp.bfloat16))

    # conv1 (K = 9*Cin), bn1 (folded scale/bias), relu
    p1 = jnp.dot(col1_ref[...], w1_ref[...], preferred_element_type=jnp.float32)
    a1 = jnp.maximum(p1 * s1_ref[...] + b1_ref[...], 0.0)          # (HW, Cout) f32

    # ---- stage conv2 input with its halo (same frame-only zeroing)
    opad_ref[0:1, :, :] = jnp.zeros((1, Wp, Cout), jnp.float32)
    opad_ref[Hp - 1:Hp, :, :] = jnp.zeros((1, Wp, Cout), jnp.float32)
    opad_ref[:, 0:1, :] = jnp.zeros((Hp, 1, Cout), jnp.float32)
    opad_ref[:, Wp - 1:Wp, :] = jnp.zeros((Hp, 1, Cout), jnp.float32)
    opad_ref[1:H + 1, 1:W + 1, :] = a1.reshape(H, W, Cout)

    # ---- im2col for conv2: one (H*W, 9*Cout) bf16 patch matrix
    for t in range(9):
        ky, kx = t // 3, t % 3
        col2_ref[:, t * Cout:(t + 1) * Cout] = (
            opad_ref[ky:ky + H, kx:kx + W, :].reshape(HW, Cout).astype(jnp.bfloat16))

    # conv2 computed transposed: (Cout, HW) = w2t @ col2^T  -> lane-dense epilogue
    out2 = lax.dot_general(w2t_ref[...], col2_ref[...],
                           dimension_numbers=(((1,), (1,)), ((), ())),
                           preferred_element_type=jnp.float32)
    out2 = out2 * s2_ref[...] + b2_ref[...]                         # bn2, (Cout, HW)

    # ---- SE: global avg pool as sum * 1/(H*W), two tiny FCs on VPU/XLU, sigmoid gate
    y = jnp.sum(out2, axis=1, keepdims=True) * (1.0 / HW)           # (Cout, 1)
    h = jnp.maximum(jnp.sum(sew1_ref[...] * y, axis=0, keepdims=True), 0.0)   # (1, hidden)
    g = jax.nn.sigmoid(jnp.sum(sew2_ref[...] * h, axis=1, keepdims=True))     # (Cout, 1)

    # ---- downsample branch: 1x1 conv, reusing the centre tap of the conv1 im2col
    xc = col1_ref[:, 4 * Cin:5 * Cin]                               # (HW, Cin) = original x
    res = lax.dot_general(wdt_ref[...], xc,
                          dimension_numbers=(((1,), (1,)), ((), ())),
                          preferred_element_type=jnp.float32)
    res = res * sd_ref[...] + bd_ref[...]                           # (Cout, HW)

    # SE channel scale + residual add + final relu, lane-dense (Cout, HW) store
    out_ref[...] = jnp.maximum(out2 * g + res, 0.0)[None]


def se_basic_block(x_nchw, p):
    """x_nchw: (B, Cin, H, W) float32. Returns (B, Cout, H, W) float32."""
    B, Cin, H, W = x_nchw.shape
    Cout = p["w1"].shape[-1]
    hidden = p["se_w1"].shape[-1]
    HW = H * W

    # only wrapper op on the activation: NCHW -> NHWC (+ bf16 cast to halve input DMA).
    # padding is done in-kernel; the output is produced directly in NCHW layout.
    x_nhwc = jnp.transpose(x_nchw, (0, 2, 3, 1)).astype(jnp.bfloat16)

    # kernel-layout weights (bf16 for the MXU)
    w1r = p["w1"].reshape(9 * Cin, Cout).astype(jnp.bfloat16)        # (9*Cin, Cout)
    w2t = p["w2"].reshape(9 * Cout, Cout).T.astype(jnp.bfloat16)     # (Cout, 9*Cout)
    wdt = p["wd"].T.astype(jnp.bfloat16)                             # (Cout, Cin)
    s1 = p["s1"].reshape(1, Cout)
    b1 = p["b1"].reshape(1, Cout)
    s2 = p["s2"].reshape(Cout, 1)
    b2 = p["b2"].reshape(Cout, 1)
    sd = p["sd"].reshape(Cout, 1)
    bd = p["bd"].reshape(Cout, 1)

    def full(shape):
        return pl.BlockSpec(shape, lambda b, _s=shape: tuple(0 for _ in _s))

    out_flat = pl.pallas_call(
        se_basic_block_kernel,
        out_shape=jax.ShapeDtypeStruct((B, Cout, HW), jnp.float32),
        grid_spec=pltpu.PrefetchScalarGridSpec(
            num_scalar_prefetch=0,
            grid=(B,),
            in_specs=[
                pl.BlockSpec((1, H, W, Cin), lambda b: (b, 0, 0, 0)),
                full((9 * Cin, Cout)),
                full((1, Cout)), full((1, Cout)),
                full((Cout, 9 * Cout)),
                full((Cout, 1)), full((Cout, 1)),
                full((Cout, hidden)), full((Cout, hidden)),
                full((Cout, Cin)),
                full((Cout, 1)), full((Cout, 1)),
            ],
            out_specs=pl.BlockSpec((1, Cout, HW), lambda b: (b, 0, 0)),
            scratch_shapes=[
                pltpu.VMEM((H + 2, W + 2, Cin), jnp.float32),    # conv1 halo staging
                pltpu.VMEM((H + 2, W + 2, Cout), jnp.float32),   # conv2 halo staging
                pltpu.VMEM((HW, 9 * Cin), jnp.bfloat16),         # conv1 im2col
                pltpu.VMEM((HW, 9 * Cout), jnp.bfloat16),        # conv2 im2col
            ]),
        compiler_params=pltpu.CompilerParams(
            dimension_semantics=("parallel",),                   # shards batch on v7x's 2 TCs
            vmem_limit_bytes=32 * 1024 * 1024),
    )(x_nhwc, w1r, s1, b1, w2t, s2, b2,
      p["se_w1"], p["se_w2"], wdt, sd, bd)

    # pure metadata reshape: (B, Cout, H*W) -> (B, Cout, H, W) NCHW
    return out_flat.reshape(B, Cout, H, W)


def make_params(key, in_planes, planes, reduction=8, eps=1e-5):
    """Deterministic synthetic parameters (PyTorch-layout weights converted to the
    layouts used by the kernel / reference). BN folded into eval-mode scale/bias."""
    ks = jax.random.split(key, 17)
    hidden = planes // reduction

    w1_oihw = jax.random.normal(ks[0], (planes, in_planes, 3, 3), jnp.float32) * 0.1
    w2_oihw = jax.random.normal(ks[1], (planes, planes, 3, 3), jnp.float32) * 0.1
    wd_oihw = jax.random.normal(ks[2], (planes, in_planes, 1, 1), jnp.float32) * 0.1
    fc1_w = jax.random.normal(ks[3], (hidden, planes), jnp.float32) * 0.2   # nn.Linear(planes, hidden)
    fc2_w = jax.random.normal(ks[4], (planes, hidden), jnp.float32) * 0.2   # nn.Linear(hidden, planes)

    def folded_bn(kg, kb, km, kv, c):
        gamma = jax.random.uniform(kg, (c,), jnp.float32, 0.5, 1.5)
        beta = jax.random.normal(kb, (c,), jnp.float32) * 0.1
        mean = jax.random.normal(km, (c,), jnp.float32) * 0.1
        var = jax.random.uniform(kv, (c,), jnp.float32, 0.5, 1.5)
        scale = gamma / jnp.sqrt(var + eps)
        return scale, beta - mean * scale

    s1, b1 = folded_bn(ks[5], ks[6], ks[7], ks[8], planes)
    s2, b2 = folded_bn(ks[9], ks[10], ks[11], ks[12], planes)
    sd, bd = folded_bn(ks[13], ks[14], ks[15], ks[16], planes)

    return {
        "w1": jnp.transpose(w1_oihw, (2, 3, 1, 0)),   # HWIO (3, 3, Cin, Cout)
        "w2": jnp.transpose(w2_oihw, (2, 3, 1, 0)),   # HWIO (3, 3, Cout, Cout)
        "wd": wd_oihw[:, :, 0, 0].T,                  # (Cin, Cout)
        "s1": s1, "b1": b1, "s2": s2, "b2": b2, "sd": sd, "bd": bd,
        "se_w1": fc1_w.T,                             # (Cout, hidden) = fc1.weight.T
        "se_w2": fc2_w,                               # (Cout, hidden) = fc2.weight
    }


def reference_forward(x_nchw, p):
    """Pure-JAX (XLA, f32) reference of the same forward pass."""
    x = jnp.transpose(x_nchw, (0, 2, 3, 1))

    def conv3x3(v, w):
        return lax.conv_general_dilated(
            v, w, (1, 1), ((1, 1), (1, 1)),
            dimension_numbers=("NHWC", "HWIO", "NHWC"))

    o = jnp.maximum(conv3x3(x, p["w1"]) * p["s1"] + p["b1"], 0.0)
    o = conv3x3(o, p["w2"]) * p["s2"] + p["b2"]
    y = jnp.mean(o, axis=(1, 2))
    h = jnp.maximum(y @ p["se_w1"], 0.0)
    g = jax.nn.sigmoid(h @ p["se_w2"].T)
    o = o * g[:, None, None, :]
    res = jnp.einsum("bhwc,cd->bhwd", x, p["wd"]) * p["sd"] + p["bd"]
    o = jnp.maximum(o + res, 0.0)
    return jnp.transpose(o, (0, 3, 1, 2))


if __name__ == "__main__":
    # stride=1, in_planes != planes -> projection shortcut active (matches the kernel)
    B, in_planes, planes, H, W = 2, 16, 32, 16, 16
    key = jax.random.PRNGKey(0)
    kx, kp = jax.random.split(key)
    x = jax.random.normal(kx, (B, in_planes, H, W), jnp.float32)
    params = make_params(kp, in_planes, planes, reduction=8)

    out = jax.block_until_ready(se_basic_block(x, params))
    ref = jax.block_until_ready(reference_forward(x, params))

    assert out.shape == (B, planes, H, W), out.shape
    # bf16 matmul inputs with f32 accumulation -> relaxed tolerance vs. the f32 reference
    np.testing.assert_allclose(np.asarray(out), np.asarray(ref), rtol=5e-2, atol=5e-2)
    print("KERNEL_OK")
</pallas_src>

<mosaic_0001>
module attributes {stable_mosaic.version = 11 : i64} {
  func.func @se_basic_block_kernel(%arg0: i32, %arg1: memref<1x16x16x16xbf16, #tpu.memory_space<vmem>>, %arg2: memref<144x32xbf16, #tpu.memory_space<vmem>>, %arg3: memref<1x32xf32, #tpu.memory_space<vmem>>, %arg4: memref<1x32xf32, #tpu.memory_space<vmem>>, %arg5: memref<32x288xbf16, #tpu.memory_space<vmem>>, %arg6: memref<32x1xf32, #tpu.memory_space<vmem>>, %arg7: memref<32x1xf32, #tpu.memory_space<vmem>>, %arg8: memref<32x4xf32, #tpu.memory_space<vmem>>, %arg9: memref<32x4xf32, #tpu.memory_space<vmem>>, %arg10: memref<32x16xbf16, #tpu.memory_space<vmem>>, %arg11: memref<32x1xf32, #tpu.memory_space<vmem>>, %arg12: memref<32x1xf32, #tpu.memory_space<vmem>>, %arg13: memref<1x32x256xf32, #tpu.memory_space<vmem>>, %arg14: memref<18x18x16xf32, #tpu.memory_space<vmem>>, %arg15: memref<18x18x32xf32, #tpu.memory_space<vmem>>, %arg16: memref<256x144xbf16, #tpu.memory_space<vmem>>, %arg17: memref<256x288xbf16, #tpu.memory_space<vmem>>) attributes {dimension_semantics = [#tpu.dimension_semantics<parallel>], iteration_bounds = array<i64: 2>, scalar_prefetch = 0 : i64, scratch_operands = 4 : i64, tpu.core_type = #tpu.core_type<tc>, window_params = [{transform_indices = @transform_0, window_bounds = array<i64: 1, 16, 16, 16>}, {pipeline_mode = #tpu.pipeline_mode<synchronous>, transform_indices = @transform_1, window_bounds = array<i64: 144, 32>}, {pipeline_mode = #tpu.pipeline_mode<synchronous>, transform_indices = @transform_2, window_bounds = array<i64: 1, 32>}, {pipeline_mode = #tpu.pipeline_mode<synchronous>, transform_indices = @transform_3, window_bounds = array<i64: 1, 32>}, {pipeline_mode = #tpu.pipeline_mode<synchronous>, transform_indices = @transform_4, window_bounds = array<i64: 32, 288>}, {pipeline_mode = #tpu.pipeline_mode<synchronous>, transform_indices = @transform_5, window_bounds = array<i64: 32, 1>}, {pipeline_mode = #tpu.pipeline_mode<synchronous>, transform_indices = @transform_6, window_bounds = array<i64: 32, 1>}, {pipeline_mode = #tpu.pipeline_mode<synchronous>, transform_indices = @transform_7, window_bounds = array<i64: 32, 4>}, {pipeline_mode = #tpu.pipeline_mode<synchronous>, transform_indices = @transform_8, window_bounds = array<i64: 32, 4>}, {pipeline_mode = #tpu.pipeline_mode<synchronous>, transform_indices = @transform_9, window_bounds = array<i64: 32, 16>}, {pipeline_mode = #tpu.pipeline_mode<synchronous>, transform_indices = @transform_10, window_bounds = array<i64: 32, 1>}, {pipeline_mode = #tpu.pipeline_mode<synchronous>, transform_indices = @transform_11, window_bounds = array<i64: 32, 1>}, {transform_indices = @transform_12, window_bounds = array<i64: 1, 32, 256>}]} {
    %cst = arith.constant 0.000000e+00 : f32
    %0 = vector.broadcast %cst : f32 to vector<1x18x16xf32>
    %c0 = arith.constant 0 : index
    %c0_0 = arith.constant 0 : index
    %c0_1 = arith.constant 0 : index
    %1 = vector.load %arg14[%c0, %c0_0, %c0_1] : memref<18x18x16xf32, #tpu.memory_space<vmem>>, vector<1x18x16xf32>
    tpu.vector_store %arg14[%c0, %c0_0, %c0_1], %0 {strides = array<i32>} : memref<18x18x16xf32, #tpu.memory_space<vmem>>, vector<1x18x16xf32>,
    %cst_2 = arith.constant 0.000000e+00 : f32
    %2 = vector.broadcast %cst_2 : f32 to vector<1x18x16xf32>
    %c17 = arith.constant 17 : index
    %c0_3 = arith.constant 0 : index
    %c0_4 = arith.constant 0 : index
    %3 = vector.load %arg14[%c17, %c0_3, %c0_4] : memref<18x18x16xf32, #tpu.memory_space<vmem>>, vector<1x18x16xf32>
    tpu.vector_store %arg14[%c17, %c0_3, %c0_4], %2 {strides = array<i32>} : memref<18x18x16xf32, #tpu.memory_space<vmem>>, vector<1x18x16xf32>,
    %cst_5 = arith.constant 0.000000e+00 : f32
    %4 = vector.broadcast %cst_5 : f32 to vector<18x1x16xf32>
    %c0_6 = arith.constant 0 : index
    %c0_7 = arith.constant 0 : index
    %c0_8 = arith.constant 0 : index
    %5 = vector.load %arg14[%c0_6, %c0_7, %c0_8] : memref<18x18x16xf32, #tpu.memory_space<vmem>>, vector<18x1x16xf32>
    tpu.vector_store %arg14[%c0_6, %c0_7, %c0_8], %4 {strides = array<i32>} : memref<18x18x16xf32, #tpu.memory_space<vmem>>, vector<18x1x16xf32>,
    %cst_9 = arith.constant 0.000000e+00 : f32
    %6 = vector.broadcast %cst_9 : f32 to vector<18x1x16xf32>
    %c0_10 = arith.constant 0 : index
    %c17_11 = arith.constant 17 : index
    %c0_12 = arith.constant 0 : index
    %7 = vector.load %arg14[%c0_10, %c17_11, %c0_12] : memref<18x18x16xf32, #tpu.memory_space<vmem>>, vector<18x1x16xf32>
    tpu.vector_store %arg14[%c0_10, %c17_11, %c0_12], %6 {strides = array<i32>} : memref<18x18x16xf32, #tpu.memory_space<vmem>>, vector<18x1x16xf32>,
    %c0_13 = arith.constant 0 : index
    %c0_14 = arith.constant 0 : index
    %c0_15 = arith.constant 0 : index
    %c0_16 = arith.constant 0 : index
    %8 = vector.load %arg1[%c0_13, %c0_14, %c0_15, %c0_16] : memref<1x16x16x16xbf16, #tpu.memory_space<vmem>>, vector<1x16x16x16xbf16>
    %9 = vector.shape_cast %8 : vector<1x16x16x16xbf16> to vector<16x16x16xbf16>
    %10 = arith.extf %9 : vector<16x16x16xbf16> to vector<16x16x16xf32>
    %c1 = arith.constant 1 : index
    %c1_17 = arith.constant 1 : index
    %c0_18 = arith.constant 0 : index
    %11 = vector.load %arg14[%c1, %c1_17, %c0_18] : memref<18x18x16xf32, #tpu.memory_space<vmem>>, vector<16x16x16xf32>
    tpu.vector_store %arg14[%c1, %c1_17, %c0_18], %10 {strides = array<i32>} : memref<18x18x16xf32, #tpu.memory_space<vmem>>, vector<16x16x16xf32>,
    %c0_19 = arith.constant 0 : index
    %c0_20 = arith.constant 0 : index
    %c0_21 = arith.constant 0 : index
    %12 = vector.load %arg14[%c0_19, %c0_20, %c0_21] : memref<18x18x16xf32, #tpu.memory_space<vmem>>, vector<16x16x16xf32>
    %13 = vector.shape_cast %12 : vector<16x16x16xf32> to vector<256x16xf32>
    %14 = arith.truncf %13 : vector<256x16xf32> to vector<256x16xbf16>
    %c0_22 = arith.constant 0 : index
    %c0_23 = arith.constant 0 : index
    %15 = vector.load %arg16[%c0_22, %c0_23] : memref<256x144xbf16, #tpu.memory_space<vmem>>, vector<256x16xbf16>
    tpu.vector_store %arg16[%c0_22, %c0_23], %14 {strides = array<i32>} : memref<256x144xbf16, #tpu.memory_space<vmem>>, vector<256x16xbf16>,
    %c0_24 = arith.constant 0 : index
    %c1_25 = arith.constant 1 : index
    %c0_26 = arith.constant 0 : index
    %16 = vector.load %arg14[%c0_24, %c1_25, %c0_26] : memref<18x18x16xf32, #tpu.memory_space<vmem>>, vector<16x16x16xf32>
    %17 = vector.shape_cast %16 : vector<16x16x16xf32> to vector<256x16xf32>
    %18 = arith.truncf %17 : vector<256x16xf32> to vector<256x16xbf16>
    %c0_27 = arith.constant 0 : index
    %c16 = arith.constant 16 : index
    %19 = vector.load %arg16[%c0_27, %c16] : memref<256x144xbf16, #tpu.memory_space<vmem>>, vector<256x16xbf16>
    tpu.vector_store %arg16[%c0_27, %c16], %18 {strides = array<i32>} : memref<256x144xbf16, #tpu.memory_space<vmem>>, vector<256x16xbf16>,
    %c0_28 = arith.constant 0 : index
    %c2 = arith.constant 2 : index
    %c0_29 = arith.constant 0 : index
    %20 = vector.load %arg14[%c0_28, %c2, %c0_29] : memref<18x18x16xf32, #tpu.memory_space<vmem>>, vector<16x16x16xf32>
    %21 = vector.shape_cast %20 : vector<16x16x16xf32> to vector<256x16xf32>
    %22 = arith.truncf %21 : vector<256x16xf32> to vector<256x16xbf16>
    %c0_30 = arith.constant 0 : index
    %c32 = arith.constant 32 : index
    %23 = vector.load %arg16[%c0_30, %c32] : memref<256x144xbf16, #tpu.memory_space<vmem>>, vector<256x16xbf16>
    tpu.vector_store %arg16[%c0_30, %c32], %22 {strides = array<i32>} : memref<256x144xbf16, #tpu.memory_space<vmem>>, vector<256x16xbf16>,
    %c1_31 = arith.constant 1 : index
    %c0_32 = arith.constant 0 : index
    %c0_33 = arith.constant 0 : index
    %24 = vector.load %arg14[%c1_31, %c0_32, %c0_33] : memref<18x18x16xf32, #tpu.memory_space<vmem>>, vector<16x16x16xf32>
    %25 = vector.shape_cast %24 : vector<16x16x16xf32> to vector<256x16xf32>
    %26 = arith.truncf %25 : vector<256x16xf32> to vector<256x16xbf16>
    %c0_34 = arith.constant 0 : index
    %c48 = arith.constant 48 : index
    %27 = vector.load %arg16[%c0_34, %c48] : memref<256x144xbf16, #tpu.memory_space<vmem>>, vector<256x16xbf16>
    tpu.vector_store %arg16[%c0_34, %c48], %26 {strides = array<i32>} : memref<256x144xbf16, #tpu.memory_space<vmem>>, vector<256x16xbf16>,
    %c1_35 = arith.constant 1 : index
    %c1_36 = arith.constant 1 : index
    %c0_37 = arith.constant 0 : index
    %28 = vector.load %arg14[%c1_35, %c1_36, %c0_37] : memref<18x18x16xf32, #tpu.memory_space<vmem>>, vector<16x16x16xf32>
    %29 = vector.shape_cast %28 : vector<16x16x16xf32> to vector<256x16xf32>
    %30 = arith.truncf %29 : vector<256x16xf32> to vector<256x16xbf16>
    %c0_38 = arith.constant 0 : index
    %c64 = arith.constant 64 : index
    %31 = vector.load %arg16[%c0_38, %c64] : memref<256x144xbf16, #tpu.memory_space<vmem>>, vector<256x16xbf16>
    tpu.vector_store %arg16[%c0_38, %c64], %30 {strides = array<i32>} : memref<256x144xbf16, #tpu.memory_space<vmem>>, vector<256x16xbf16>,
    %c1_39 = arith.constant 1 : index
    %c2_40 = arith.constant 2 : index
    %c0_41 = arith.constant 0 : index
    %32 = vector.load %arg14[%c1_39, %c2_40, %c0_41] : memref<18x18x16xf32, #tpu.memory_space<vmem>>, vector<16x16x16xf32>
    %33 = vector.shape_cast %32 : vector<16x16x16xf32> to vector<256x16xf32>
    %34 = arith.truncf %33 : vector<256x16xf32> to vector<256x16xbf16>
    %c0_42 = arith.constant 0 : index
    %c80 = arith.constant 80 : index
    %35 = vector.load %arg16[%c0_42, %c80] : memref<256x144xbf16, #tpu.memory_space<vmem>>, vector<256x16xbf16>
    tpu.vector_store %arg16[%c0_42, %c80], %34 {strides = array<i32>} : memref<256x144xbf16, #tpu.memory_space<vmem>>, vector<256x16xbf16>,
    %c2_43 = arith.constant 2 : index
    %c0_44 = arith.constant 0 : index
    %c0_45 = arith.constant 0 : index
    %36 = vector.load %arg14[%c2_43, %c0_44, %c0_45] : memref<18x18x16xf32, #tpu.memory_space<vmem>>, vector<16x16x16xf32>
    %37 = vector.shape_cast %36 : vector<16x16x16xf32> to vector<256x16xf32>
    %38 = arith.truncf %37 : vector<256x16xf32> to vector<256x16xbf16>
    %c0_46 = arith.constant 0 : index
    %c96 = arith.constant 96 : index
    %39 = vector.load %arg16[%c0_46, %c96] : memref<256x144xbf16, #tpu.memory_space<vmem>>, vector<256x16xbf16>
    tpu.vector_store %arg16[%c0_46, %c96], %38 {strides = array<i32>} : memref<256x144xbf16, #tpu.memory_space<vmem>>, vector<256x16xbf16>,
    %c2_47 = arith.constant 2 : index
    %c1_48 = arith.constant 1 : index
    %c0_49 = arith.constant 0 : index
    %40 = vector.load %arg14[%c2_47, %c1_48, %c0_49] : memref<18x18x16xf32, #tpu.memory_space<vmem>>, vector<16x16x16xf32>
    %41 = vector.shape_cast %40 : vector<16x16x16xf32> to vector<256x16xf32>
    %42 = arith.truncf %41 : vector<256x16xf32> to vector<256x16xbf16>
    %c0_50 = arith.constant 0 : index
    %c112 = arith.constant 112 : index
    %43 = vector.load %arg16[%c0_50, %c112] : memref<256x144xbf16, #tpu.memory_space<vmem>>, vector<256x16xbf16>
    tpu.vector_store %arg16[%c0_50, %c112], %42 {strides = array<i32>} : memref<256x144xbf16, #tpu.memory_space<vmem>>, vector<256x16xbf16>,
    %c2_51 = arith.constant 2 : index
    %c2_52 = arith.constant 2 : index
    %c0_53 = arith.constant 0 : index
    %44 = vector.load %arg14[%c2_51, %c2_52, %c0_53] : memref<18x18x16xf32, #tpu.memory_space<vmem>>, vector<16x16x16xf32>
    %45 = vector.shape_cast %44 : vector<16x16x16xf32> to vector<256x16xf32>
    %46 = arith.truncf %45 : vector<256x16xf32> to vector<256x16xbf16>
    %c0_54 = arith.constant 0 : index
    %c128 = arith.constant 128 : index
    %47 = vector.load %arg16[%c0_54, %c128] : memref<256x144xbf16, #tpu.memory_space<vmem>>, vector<256x16xbf16>
    tpu.vector_store %arg16[%c0_54, %c128], %46 {strides = array<i32>} : memref<256x144xbf16, #tpu.memory_space<vmem>>, vector<256x16xbf16>,
    %c0_55 = arith.constant 0 : index
    %c0_56 = arith.constant 0 : index
    %48 = vector.load %arg16[%c0_55, %c0_56] : memref<256x144xbf16, #tpu.memory_space<vmem>>, vector<256x144xbf16>
    %c0_57 = arith.constant 0 : index
    %c0_58 = arith.constant 0 : index
    %49 = vector.load %arg2[%c0_57, %c0_58] : memref<144x32xbf16, #tpu.memory_space<vmem>>, vector<144x32xbf16>
    %cst_59 = arith.constant dense<0.000000e+00> : vector<256x32xf32>
    %50 = tpu.matmul %48, %49, %cst_59 {dimension_numbers = #tpu.dot_dimension_numbers<[1], [0], [0], [1], [0, 0, 1, 1], [], []>} : vector<256x144xbf16>, vector<144x32xbf16>, vector<256x32xf32> -> vector<256x32xf32>
    %c0_60 = arith.constant 0 : index
    %c0_61 = arith.constant 0 : index
    %51 = vector.load %arg3[%c0_60, %c0_61] : memref<1x32xf32, #tpu.memory_space<vmem>>, vector<1x32xf32>
    %52 = vector.broadcast %51 : vector<1x32xf32> to vector<256x32xf32>
    %53 = arith.mulf %50, %52 : vector<256x32xf32>
    %c0_62 = arith.constant 0 : index
    %c0_63 = arith.constant 0 : index
    %54 = vector.load %arg4[%c0_62, %c0_63] : memref<1x32xf32, #tpu.memory_space<vmem>>, vector<1x32xf32>
    %55 = vector.broadcast %54 : vector<1x32xf32> to vector<256x32xf32>
    %56 = arith.addf %53, %55 : vector<256x32xf32>
    %cst_64 = arith.constant 0.000000e+00 : f32
    %57 = vector.broadcast %cst_64 : f32 to vector<256x32xf32>
    %58 = arith.maximumf %56, %57 : vector<256x32xf32>
    %cst_65 = arith.constant 0.000000e+00 : f32
    %59 = vector.broadcast %cst_65 : f32 to vector<1x18x32xf32>
    %c0_66 = arith.constant 0 : index
    %c0_67 = arith.constant 0 : index
    %c0_68 = arith.constant 0 : index
    %60 = vector.load %arg15[%c0_66, %c0_67, %c0_68] : memref<18x18x32xf32, #tpu.memory_space<vmem>>, vector<1x18x32xf32>
    tpu.vector_store %arg15[%c0_66, %c0_67, %c0_68], %59 {strides = array<i32>} : memref<18x18x32xf32, #tpu.memory_space<vmem>>, vector<1x18x32xf32>,
    %cst_69 = arith.constant 0.000000e+00 : f32
    %61 = vector.broadcast %cst_69 : f32 to vector<1x18x32xf32>
    %c17_70 = arith.constant 17 : index
    %c0_71 = arith.constant 0 : index
    %c0_72 = arith.constant 0 : index
    %62 = vector.load %arg15[%c17_70, %c0_71, %c0_72] : memref<18x18x32xf32, #tpu.memory_space<vmem>>, vector<1x18x32xf32>
    tpu.vector_store %arg15[%c17_70, %c0_71, %c0_72], %61 {strides = array<i32>} : memref<18x18x32xf32, #tpu.memory_space<vmem>>, vector<1x18x32xf32>,
    %cst_73 = arith.constant 0.000000e+00 : f32
    %63 = vector.broadcast %cst_73 : f32 to vector<18x1x32xf32>
    %c0_74 = arith.constant 0 : index
    %c0_75 = arith.constant 0 : index
    %c0_76 = arith.constant 0 : index
    %64 = vector.load %arg15[%c0_74, %c0_75, %c0_76] : memref<18x18x32xf32, #tpu.memory_space<vmem>>, vector<18x1x32xf32>
    tpu.vector_store %arg15[%c0_74, %c0_75, %c0_76], %63 {strides = array<i32>} : memref<18x18x32xf32, #tpu.memory_space<vmem>>, vector<18x1x32xf32>,
    %cst_77 = arith.constant 0.000000e+00 : f32
    %65 = vector.broadcast %cst_77 : f32 to vector<18x1x32xf32>
    %c0_78 = arith.constant 0 : index
    %c17_79 = arith.constant 17 : index
    %c0_80 = arith.constant 0 : index
    %66 = vector.load %arg15[%c0_78, %c17_79, %c0_80] : memref<18x18x32xf32, #tpu.memory_space<vmem>>, vector<18x1x32xf32>
    tpu.vector_store %arg15[%c0_78, %c17_79, %c0_80], %65 {strides = array<i32>} : memref<18x18x32xf32, #tpu.memory_space<vmem>>, vector<18x1x32xf32>,
    %67 = vector.shape_cast %58 : vector<256x32xf32> to vector<16x16x32xf32>
    %c1_81 = arith.constant 1 : index
    %c1_82 = arith.constant 1 : index
    %c0_83 = arith.constant 0 : index
    %68 = vector.load %arg15[%c1_81, %c1_82, %c0_83] : memref<18x18x32xf32, #tpu.memory_space<vmem>>, vector<16x16x32xf32>
    tpu.vector_store %arg15[%c1_81, %c1_82, %c0_83], %67 {strides = array<i32>} : memref<18x18x32xf32, #tpu.memory_space<vmem>>, vector<16x16x32xf32>,
    %c0_84 = arith.constant 0 : index
    %c0_85 = arith.constant 0 : index
    %c0_86 = arith.constant 0 : index
    %69 = vector.load %arg15[%c0_84, %c0_85, %c0_86] : memref<18x18x32xf32, #tpu.memory_space<vmem>>, vector<16x16x32xf32>
    %70 = vector.shape_cast %69 : vector<16x16x32xf32> to vector<256x32xf32>
    %71 = arith.truncf %70 : vector<256x32xf32> to vector<256x32xbf16>
    %c0_87 = arith.constant 0 : index
    %c0_88 = arith.constant 0 : index
    %72 = vector.load %arg17[%c0_87, %c0_88] : memref<256x288xbf16, #tpu.memory_space<vmem>>, vector<256x32xbf16>
    tpu.vector_store %arg17[%c0_87, %c0_88], %71 {strides = array<i32>} : memref<256x288xbf16, #tpu.memory_space<vmem>>, vector<256x32xbf16>,
    %c0_89 = arith.constant 0 : index
    %c1_90 = arith.constant 1 : index
    %c0_91 = arith.constant 0 : index
    %73 = vector.load %arg15[%c0_89, %c1_90, %c0_91] : memref<18x18x32xf32, #tpu.memory_space<vmem>>, vector<16x16x32xf32>
    %74 = vector.shape_cast %73 : vector<16x16x32xf32> to vector<256x32xf32>
    %75 = arith.truncf %74 : vector<256x32xf32> to vector<256x32xbf16>
    %c0_92 = arith.constant 0 : index
    %c32_93 = arith.constant 32 : index
    %76 = vector.load %arg17[%c0_92, %c32_93] : memref<256x288xbf16, #tpu.memory_space<vmem>>, vector<256x32xbf16>
    tpu.vector_store %arg17[%c0_92, %c32_93], %75 {strides = array<i32>} : memref<256x288xbf16, #tpu.memory_space<vmem>>, vector<256x32xbf16>,
    %c0_94 = arith.constant 0 : index
    %c2_95 = arith.constant 2 : index
    %c0_96 = arith.constant 0 : index
    %77 = vector.load %arg15[%c0_94, %c2_95, %c0_96] : memref<18x18x32xf32, #tpu.memory_space<vmem>>, vector<16x16x32xf32>
    %78 = vector.shape_cast %77 : vector<16x16x32xf32> to vector<256x32xf32>
    %79 = arith.truncf %78 : vector<256x32xf32> to vector<256x32xbf16>
    %c0_97 = arith.constant 0 : index
    %c64_98 = arith.constant 64 : index
    %80 = vector.load %arg17[%c0_97, %c64_98] : memref<256x288xbf16, #tpu.memory_space<vmem>>, vector<256x32xbf16>
    tpu.vector_store %arg17[%c0_97, %c64_98], %79 {strides = array<i32>} : memref<256x288xbf16, #tpu.memory_space<vmem>>, vector<256x32xbf16>,
    %c1_99 = arith.constant 1 : index
    %c0_100 = arith.constant 0 : index
    %c0_101 = arith.constant 0 : index
    %81 = vector.load %arg15[%c1_99, %c0_100, %c0_101] : memref<18x18x32xf32, #tpu.memory_space<vmem>>, vector<16x16x32xf32>
    %82 = vector.shape_cast %81 : vector<16x16x32xf32> to vector<256x32xf32>
    %83 = arith.truncf %82 : vector<256x32xf32> to vector<256x32xbf16>
    %c0_102 = arith.constant 0 : index
    %c96_103 = arith.constant 96 : index
    %84 = vector.load %arg17[%c0_102, %c96_103] : memref<256x288xbf16, #tpu.memory_space<vmem>>, vector<256x32xbf16>
    tpu.vector_store %arg17[%c0_102, %c96_103], %83 {strides = array<i32>} : memref<256x288xbf16, #tpu.memory_space<vmem>>, vector<256x32xbf16>,
    %c1_104 = arith.constant 1 : index
    %c1_105 = arith.constant 1 : index
    %c0_106 = arith.constant 0 : index
    %85 = vector.load %arg15[%c1_104, %c1_105, %c0_106] : memref<18x18x32xf32, #tpu.memory_space<vmem>>, vector<16x16x32xf32>
    %86 = vector.shape_cast %85 : vector<16x16x32xf32> to vector<256x32xf32>
    %87 = arith.truncf %86 : vector<256x32xf32> to vector<256x32xbf16>
    %c0_107 = arith.constant 0 : index
    %c128_108 = arith.constant 128 : index
    %88 = vector.load %arg17[%c0_107, %c128_108] : memref<256x288xbf16, #tpu.memory_space<vmem>>, vector<256x32xbf16>
    tpu.vector_store %arg17[%c0_107, %c128_108], %87 {strides = array<i32>} : memref<256x288xbf16, #tpu.memory_space<vmem>>, vector<256x32xbf16>,
    %c1_109 = arith.constant 1 : index
    %c2_110 = arith.constant 2 : index
    %c0_111 = arith.constant 0 : index
    %89 = vector.load %arg15[%c1_109, %c2_110, %c0_111] : memref<18x18x32xf32, #tpu.memory_space<vmem>>, vector<16x16x32xf32>
    %90 = vector.shape_cast %89 : vector<16x16x32xf32> to vector<256x32xf32>
    %91 = arith.truncf %90 : vector<256x32xf32> to vector<256x32xbf16>
    %c0_112 = arith.constant 0 : index
    %c160 = arith.constant 160 : index
    %92 = vector.load %arg17[%c0_112, %c160] : memref<256x288xbf16, #tpu.memory_space<vmem>>, vector<256x32xbf16>
    tpu.vector_store %arg17[%c0_112, %c160], %91 {strides = array<i32>} : memref<256x288xbf16, #tpu.memory_space<vmem>>, vector<256x32xbf16>,
    %c2_113 = arith.constant 2 : index
    %c0_114 = arith.constant 0 : index
    %c0_115 = arith.constant 0 : index
    %93 = vector.load %arg15[%c2_113, %c0_114, %c0_115] : memref<18x18x32xf32, #tpu.memory_space<vmem>>, vector<16x16x32xf32>
    %94 = vector.shape_cast %93 : vector<16x16x32xf32> to vector<256x32xf32>
    %95 = arith.truncf %94 : vector<256x32xf32> to vector<256x32xbf16>
    %c0_116 = arith.constant 0 : index
    %c192 = arith.constant 192 : index
    %96 = vector.load %arg17[%c0_116, %c192] : memref<256x288xbf16, #tpu.memory_space<vmem>>, vector<256x32xbf16>
    tpu.vector_store %arg17[%c0_116, %c192], %95 {strides = array<i32>} : memref<256x288xbf16, #tpu.memory_space<vmem>>, vector<256x32xbf16>,
    %c2_117 = arith.constant 2 : index
    %c1_118 = arith.constant 1 : index
    %c0_119 = arith.constant 0 : index
    %97 = vector.load %arg15[%c2_117, %c1_118, %c0_119] : memref<18x18x32xf32, #tpu.memory_space<vmem>>, vector<16x16x32xf32>
    %98 = vector.shape_cast %97 : vector<16x16x32xf32> to vector<256x32xf32>
    %99 = arith.truncf %98 : vector<256x32xf32> to vector<256x32xbf16>
    %c0_120 = arith.constant 0 : index
    %c224 = arith.constant 224 : index
    %100 = vector.load %arg17[%c0_120, %c224] : memref<256x288xbf16, #tpu.memory_space<vmem>>, vector<256x32xbf16>
    tpu.vector_store %arg17[%c0_120, %c224], %99 {strides = array<i32>} : memref<256x288xbf16, #tpu.memory_space<vmem>>, vector<256x32xbf16>,
    %c2_121 = arith.constant 2 : index
    %c2_122 = arith.constant 2 : index
    %c0_123 = arith.constant 0 : index
    %101 = vector.load %arg15[%c2_121, %c2_122, %c0_123] : memref<18x18x32xf32, #tpu.memory_space<vmem>>, vector<16x16x32xf32>
    %102 = vector.shape_cast %101 : vector<16x16x32xf32> to vector<256x32xf32>
    %103 = arith.truncf %102 : vector<256x32xf32> to vector<256x32xbf16>
    %c0_124 = arith.constant 0 : index
    %c256 = arith.constant 256 : index
    %104 = vector.load %arg17[%c0_124, %c256] : memref<256x288xbf16, #tpu.memory_space<vmem>>, vector<256x32xbf16>
    tpu.vector_store %arg17[%c0_124, %c256], %103 {strides = array<i32>} : memref<256x288xbf16, #tpu.memory_space<vmem>>, vector<256x32xbf16>,
    %c0_125 = arith.constant 0 : index
    %c0_126 = arith.constant 0 : index
    %105 = vector.load %arg5[%c0_125, %c0_126] : memref<32x288xbf16, #tpu.memory_space<vmem>>, vector<32x288xbf16>
    %c0_127 = arith.constant 0 : index
    %c0_128 = arith.constant 0 : index
    %106 = vector.load %arg17[%c0_127, %c0_128] : memref<256x288xbf16, #tpu.memory_space<vmem>>, vector<256x288xbf16>
    %cst_129 = arith.constant dense<0.000000e+00> : vector<32x256xf32>
    %107 = tpu.matmul %105, %106, %cst_129 {dimension_numbers = #tpu.dot_dimension_numbers<[1], [1], [0], [0], [0, 0, 1, 0], [], []>} : vector<32x288xbf16>, vector<256x288xbf16>, vector<32x256xf32> -> vector<32x256xf32>
    %c0_130 = arith.constant 0 : index
    %c0_131 = arith.constant 0 : index
    %108 = vector.load %arg6[%c0_130, %c0_131] : memref<32x1xf32, #tpu.memory_space<vmem>>, vector<32x1xf32>
    %109 = vector.broadcast %108 : vector<32x1xf32> to vector<32x256xf32>
    %110 = arith.mulf %107, %109 : vector<32x256xf32>
    %c0_132 = arith.constant 0 : index
    %c0_133 = arith.constant 0 : index
    %111 = vector.load %arg7[%c0_132, %c0_133] : memref<32x1xf32, #tpu.memory_space<vmem>>, vector<32x1xf32>
    %112 = vector.broadcast %111 : vector<32x1xf32> to vector<32x256xf32>
    %113 = arith.addf %110, %112 : vector<32x256xf32>
    %cst_134 = arith.constant dense<0.000000e+00> : vector<32xf32>
    %114 = vector.multi_reduction <add>, %113, %cst_134 [1] : vector<32x256xf32> to vector<32xf32>
    %115 = vector.shape_cast %114 : vector<32xf32> to vector<32x1xf32>
    %cst_135 = arith.constant 3.906250e-03 : f32
    %116 = vector.broadcast %cst_135 : f32 to vector<32x1xf32>
    %117 = arith.mulf %115, %116 : vector<32x1xf32>
    %c0_136 = arith.constant 0 : index
    %c0_137 = arith.constant 0 : index
    %118 = vector.load %arg8[%c0_136, %c0_137] : memref<32x4xf32, #tpu.memory_space<vmem>>, vector<32x4xf32>
    %119 = vector.broadcast %117 : vector<32x1xf32> to vector<32x4xf32>
    %120 = arith.mulf %118, %119 : vector<32x4xf32>
    %cst_138 = arith.constant dense<0.000000e+00> : vector<4xf32>
    %121 = vector.multi_reduction <add>, %120, %cst_138 [0] : vector<32x4xf32> to vector<4xf32>
    %122 = vector.shape_cast %121 : vector<4xf32> to vector<1x4xf32>
    %cst_139 = arith.constant 0.000000e+00 : f32
    %123 = vector.broadcast %cst_139 : f32 to vector<1x4xf32>
    %124 = arith.maximumf %122, %123 : vector<1x4xf32>
    %c0_140 = arith.constant 0 : index
    %c0_141 = arith.constant 0 : index
    %125 = vector.load %arg9[%c0_140, %c0_141] : memref<32x4xf32, #tpu.memory_space<vmem>>, vector<32x4xf32>
    %126 = vector.broadcast %124 : vector<1x4xf32> to vector<32x4xf32>
    %127 = arith.mulf %125, %126 : vector<32x4xf32>
    %cst_142 = arith.constant dense<0.000000e+00> : vector<32xf32>
    %128 = vector.multi_reduction <add>, %127, %cst_142 [1] : vector<32x4xf32> to vector<32xf32>
    %129 = vector.shape_cast %128 : vector<32xf32> to vector<32x1xf32>
    %130 = arith.negf %129 : vector<32x1xf32>
    %131 = math.exp %130 : vector<32x1xf32>
    %cst_143 = arith.constant 1.000000e+00 : f32
    %132 = vector.broadcast %cst_143 : f32 to vector<32x1xf32>
    %133 = arith.addf %132, %131 : vector<32x1xf32>
    %134 = arith.divf %132, %133 : vector<32x1xf32>
    %c0_144 = arith.constant 0 : index
    %c64_145 = arith.constant 64 : index
    %135 = vector.load %arg16[%c0_144, %c64_145] : memref<256x144xbf16, #tpu.memory_space<vmem>>, vector<256x16xbf16>
    %c0_146 = arith.constant 0 : index
    %c0_147 = arith.constant 0 : index
    %136 = vector.load %arg10[%c0_146, %c0_147] : memref<32x16xbf16, #tpu.memory_space<vmem>>, vector<32x16xbf16>
    %cst_148 = arith.constant dense<0.000000e+00> : vector<32x256xf32>
    %137 = tpu.matmul %136, %135, %cst_148 {dimension_numbers = #tpu.dot_dimension_numbers<[1], [1], [0], [0], [0, 0, 1, 0], [], []>} : vector<32x16xbf16>, vector<256x16xbf16>, vector<32x256xf32> -> vector<32x256xf32>
    %c0_149 = arith.constant 0 : index
    %c0_150 = arith.constant 0 : index
    %138 = vector.load %arg11[%c0_149, %c0_150] : memref<32x1xf32, #tpu.memory_space<vmem>>, vector<32x1xf32>
    %139 = vector.broadcast %138 : vector<32x1xf32> to vector<32x256xf32>
    %140 = arith.mulf %137, %139 : vector<32x256xf32>
    %c0_151 = arith.constant 0 : index
    %c0_152 = arith.constant 0 : index
    %141 = vector.load %arg12[%c0_151, %c0_152] : memref<32x1xf32, #tpu.memory_space<vmem>>, vector<32x1xf32>
    %142 = vector.broadcast %141 : vector<32x1xf32> to vector<32x256xf32>
    %143 = arith.addf %140, %142 : vector<32x256xf32>
    %144 = vector.broadcast %134 : vector<32x1xf32> to vector<32x256xf32>
    %145 = arith.mulf %113, %144 : vector<32x256xf32>
    %146 = arith.addf %145, %143 : vector<32x256xf32>
    %cst_153 = arith.constant 0.000000e+00 : f32
    %147 = vector.broadcast %cst_153 : f32 to vector<32x256xf32>
    %148 = arith.maximumf %146, %147 : vector<32x256xf32>
    %149 = vector.shape_cast %148 : vector<32x256xf32> to vector<1x32x256xf32>
    %c0_154 = arith.constant 0 : index
    %c0_155 = arith.constant 0 : index
    %c0_156 = arith.constant 0 : index
    %150 = vector.load %arg13[%c0_154, %c0_155, %c0_156] : memref<1x32x256xf32, #tpu.memory_space<vmem>>, vector<1x32x256xf32>
    tpu.vector_store %arg13[%c0_154, %c0_155, %c0_156], %149 {strides = array<i32>} : memref<1x32x256xf32, #tpu.memory_space<vmem>>, vector<1x32x256xf32>,
    return
  }
  func.func @transform_0(%arg0: i32) -> (i32, i32, i32, i32) {
    %c0_i32 = arith.constant 0 : i32
    %c0_i32_0 = arith.constant 0 : i32
    %c0_i32_1 = arith.constant 0 : i32
    %c0_i32_2 = arith.constant 0 : i32
    return %arg0, %c0_i32, %c0_i32_0, %c0_i32_1 : i32, i32, i32, i32
  }
  func.func @transform_1(%arg0: i32) -> (i32, i32) {
    %c0_i32 = arith.constant 0 : i32
    %c0_i32_0 = arith.constant 0 : i32
    %c0_i32_1 = arith.constant 0 : i32
    return %c0_i32, %c0_i32_0 : i32, i32
  }
  func.func @transform_2(%arg0: i32) -> (i32, i32) {
    %c0_i32 = arith.constant 0 : i32
    %c0_i32_0 = arith.constant 0 : i32
    %c0_i32_1 = arith.constant 0 : i32
    return %c0_i32, %c0_i32_0 : i32, i32
  }
  func.func @transform_3(%arg0: i32) -> (i32, i32) {
    %c0_i32 = arith.constant 0 : i32
    %c0_i32_0 = arith.constant 0 : i32
    %c0_i32_1 = arith.constant 0 : i32
    return %c0_i32, %c0_i32_0 : i32, i32
  }
  func.func @transform_4(%arg0: i32) -> (i32, i32) {
    %c0_i32 = arith.constant 0 : i32
    %c0_i32_0 = arith.constant 0 : i32
    %c0_i32_1 = arith.constant 0 : i32
    return %c0_i32, %c0_i32_0 : i32, i32
  }
  func.func @transform_5(%arg0: i32) -> (i32, i32) {
    %c0_i32 = arith.constant 0 : i32
    %c0_i32_0 = arith.constant 0 : i32
    %c0_i32_1 = arith.constant 0 : i32
    return %c0_i32, %c0_i32_0 : i32, i32
  }
  func.func @transform_6(%arg0: i32) -> (i32, i32) {
    %c0_i32 = arith.constant 0 : i32
    %c0_i32_0 = arith.constant 0 : i32
    %c0_i32_1 = arith.constant 0 : i32
    return %c0_i32, %c0_i32_0 : i32, i32
  }
  func.func @transform_7(%arg0: i32) -> (i32, i32) {
    %c0_i32 = arith.constant 0 : i32
    %c0_i32_0 = arith.constant 0 : i32
    %c0_i32_1 = arith.constant 0 : i32
    return %c0_i32, %c0_i32_0 : i32, i32
  }
  func.func @transform_8(%arg0: i32) -> (i32, i32) {
    %c0_i32 = arith.constant 0 : i32
    %c0_i32_0 = arith.constant 0 : i32
    %c0_i32_1 = arith.constant 0 : i32
    return %c0_i32, %c0_i32_0 : i32, i32
  }
  func.func @transform_9(%arg0: i32) -> (i32, i32) {
    %c0_i32 = arith.constant 0 : i32
    %c0_i32_0 = arith.constant 0 : i32
    %c0_i32_1 = arith.constant 0 : i32
    return %c0_i32, %c0_i32_0 : i32, i32
  }
  func.func @transform_10(%arg0: i32) -> (i32, i32) {
    %c0_i32 = arith.constant 0 : i32
    %c0_i32_0 = arith.constant 0 : i32
    %c0_i32_1 = arith.constant 0 : i32
    return %c0_i32, %c0_i32_0 : i32, i32
  }
  func.func @transform_11(%arg0: i32) -> (i32, i32) {
    %c0_i32 = arith.constant 0 : i32
    %c0_i32_0 = arith.constant 0 : i32
    %c0_i32_1 = arith.constant 0 : i32
    return %c0_i32, %c0_i32_0 : i32, i32
  }
  func.func @transform_12(%arg0: i32) -> (i32, i32, i32) {
    %c0_i32 = arith.constant 0 : i32
    %c0_i32_0 = arith.constant 0 : i32
    %c0_i32_1 = arith.constant 0 : i32
    return %arg0, %c0_i32, %c0_i32_0 : i32, i32, i32
  }
}

</mosaic_0001>

<bundles_post_ra>
// kernel: tpu_custom_call.1
= control target key start
LH: loop header
LB: loop body
LE: loop exit
PB: predicated region body
PF: predicated region fallthrough
CT: control target
= control target key end

     0   :  { %17 = vsyncpa [#allocation7], 0  ;;  %s9152_s0 = inlined_call_operand.hbm [shape: bf16[2,16,16,16], index: 0, kind: input, shape index: {}]   ;;  %s9153_s1 = inlined_call_operand.vmem [shape: bf16[144,32], index: 1, kind: input, shape index: {}]   ;;  %s9154_s2 = inlined_call_operand.vmem [shape: f32[1,32], index: 2, kind: input, shape index: {}]   ;;  %s9155_s3 = inlined_call_operand.vmem [shape: f32[1,32], index: 3, kind: input, shape index: {}]   ;;  %s9156_s4 = inlined_call_operand.vmem [shape: bf16[32,288], index: 4, kind: input, shape index: {}]   ;;  %s9157_s5 = inlined_call_operand.vmem [shape: f32[32,1], index: 5, kind: input, shape index: {}]   ;;  %s9158_s6 = inlined_call_operand.vmem [shape: f32[32,1], index: 6, kind: input, shape index: {}]   ;;  %s9159_s7 = inlined_call_operand.vmem [shape: f32[32,4], index: 7, kind: input, shape index: {}]   ;;  %s9160_s8 = inlined_call_operand.vmem [shape: f32[32,4], index: 8, kind: input, shape index: {}]   ;;  %s9161_s9 = inlined_call_operand.vmem [shape: bf16[32,16], index: 9, kind: input, shape index: {}]   ;;  %s9162_s10 = inlined_call_operand.vmem [shape: f32[32,1], index: 10, kind: input, shape index: {}]   ;;  %s9163_s11 = inlined_call_operand.vmem [shape: f32[32,1], index: 11, kind: input, shape index: {}]   ;;  %s9164_s12 = inlined_call_operand.hbm [shape: f32[2,32,256], index: 12, kind: output, shape index: {}]  }
   0x1   :  { %19 = vsyncpa [#allocation7 + $0x1], 0 }
   0x2   :  { %20 = vsyncpa [#allocation8], 0 }
   0x3   :  { %22 = vsyncpa [#allocation8 + $0x1], 0  ;;  %s6729_s21 = smov 0   ;;  %s6731_s22 = smov 0  }
   0x4   :  { %s6733_s23 = smov 0   ;;  %s6735_s24 = smov 0  }
   0x5 LB: > { %9203 = sst [smem:[#allocation12_spill]] %s6638_s21  ;;  %s6750_s25 = sadd.s32 4294967295, %s6650_s24   ;;  %s6650_s24 = sphi %s6735_s24, %s9286_s24   ;;  %s6646_s23 = sphi %s6733_s23, %s9288_s23   ;;  %s6642_s22 = sphi %s6731_s22, %s9290_s22   ;;  %s6638_s21 = sphi %s6729_s21, %s9289_s21  }
   0x6   : > { %9204 = sst [smem:[#allocation13_spill]] %s6646_s23  ;;  %s5785_s26 = sadd.s32 4294967294, %s6650_s24  }
   0x7   : > { %s6754_s27 = sadd.s32 1, %s6650_s24   ;;  %s35_s28 = sadd.s32 1, %s6646_s23 }
   0x8   : > { %9205 = sst [smem:[#allocation14_spill]] %s6754_s27  ;;  %s32_s29 = ssub.s32 %s6650_s24, %s6754_s27 }
   0x9   : > { %p42_p0 = scmp.ne.s32.totalorder %s6646_s23, %s6642_s22  ;;  %p33_p1 = scmp.eq.s32.totalorder %s32_s29, 0 }
   0xa   : > { %p43_p2 = scmp.eq.s32.totalorder %s6650_s24, 0  ;;  %p48_p3 = scmp.ne.s32.totalorder %s6642_s22, %s6638_s21 }
   0xb   : > { %p49_p4 = scmp.eq.s32.totalorder %s6750_s25, 0  ;;  %p303_p7 = scmp.eq.s32.totalorder %s6750_s25, 1 }
   0xc   : > { %s6766_s30 = scalar_select %p33_p1, %s6646_s23, %s35_s28  }
   0xd   : > { %p6768_p5 = por %p43_p2, %p42_p0  ;;  %p6772_p6 = por %p49_p4, %p48_p3 }
   0xe   : > { %9206 = sst [smem:[#allocation15_spill]] %s6766_s30  ;;  %p309_p8 = scmp.eq.s32.totalorder %s5785_s26, 1 }
   0xf   : > { %p6485_p10 = scmp.lt.s32.totalorder %s6650_s24, 2  ;;  %p6779_p11 = por %p303_p7, %p42_p0 }
  0x10   : > { %p6783_p12 = por %p309_p8, %p48_p3  ;;  %s362_s17 = sand.u32 1, %s6646_s23  }
  0x11   : > { %s9209_s15 = scalar_select %p6779_p11, 1, 0 }
  0x12   : > { %s9211_s16 = scalar_select %p6783_p12, 1, 0 }
  0x13   : > { %9210 = sst [smem:[#allocation16_spill]] %s9209_s15  ;;  %s6279_s18 = sshll.u32 %s6650_s24, 7 }
  0x14   : > { %9212 = sst [smem:[#allocation17_spill]] %s9211_s16  ;;  %s5788_s19 = sshll.u32 %s362_s17, 7 }
  0x15   : > { %s371_s29 = scalar_lea.hbm %s9152_s0, %s6279_s18  ;;  %s366_s26 = scalar_lea.vmem [#allocation6], %s5788_s19 }
  0x16   : > { %s372_s30 = sshll.u32 %s371_s29, 4  ;;  %s374_s27 = sshll.u32 %s366_s26, 4  ;;  %s373_s30 = int_to_ptr.hbm [resolvable:$true] %s372_s30  ;;  %s375_s27 = int_to_ptr.vmem [resolvable:$true] %s374_s27 }
  0x17   : > { %p6794_p13 = pnand %p6485_p10, %p6768_p5  ;;  %p5791_p0 = scmp.ge.s32.totalorder %s6650_s24, 1 }
  0x18   : > { %p382_p1 = scmp.lt.s32.totalorder %s6650_s24, 3  ;;  %s363_s23 = scalar_lea.sflag [#allocation7], %s362_s17 }
  0x19   : > { %s6554_s16 = sshra.s32 %s373_s30, 4  ;;  %p6558_p3 = pneg %p6794_p13  ;;  %s6555_s16 = int_to_ptr.hbm [resolvable:$true] %s6554_s16 }
  0x1a   : > { %s6556_s15 = scalar_lea.hbm %s6555_s16, 128  ;;  %s6561_s13 = scalar_lea.hbm %s9152_s0, 256 }
  0x1b   : > { %p6557_p2 = scmp.ne.s32.totalorder %s6555_s16, %s6556_s15  ;;  %p6562_p5 = scmp.lt.s32.totalorder %s6555_s16, %s9152_s0 }
  0x1c   : > { %p6563_p8 = scmp.lt.s32.totalorder %s6561_s13, %s6556_s15 }
  0x1d   : > { %p6559_p4 = pnand %p6558_p3, %p6557_p2 }
  0x1e   : > { %p6564_p10 = por %p6563_p8, %p6562_p5 }
  0x1f   : > { %p6560_p7 = pneg %p6559_p4 }
  0x21   : > { %p6565_p9 = pnand %p6564_p10, %p6560_p7 }
  0x23   : > { %6568 = shalt.err (!%p6565_p9)
}
  0x24   : > { %s6652_s17 = smov 64   ;;  %s6653_s29 = smov 4  }
  0x25   : > { %6480 = dma.hbm_to_vmem [thread:$0]  (!%p6794_p13), %s373_s30, 2048, %s375_s27, %s363_s23, %s6652_s17, %s6652_s17, %s6653_s29  }
  0x26   : > { %p383_p2 = pnand %p5791_p0, %p382_p1 }
  0x28   : > { %386 = sbr.rel (%p383_p2) target bundleno = 2111 (0x83f), region = 68 }
  0x2d   : > { %s6815_s26 = sand.u32 1, %s6642_s22  }
  0x2e   : > { %s5792_s15 = sshll.u32 %s6815_s26, 7  ;;  %s389_s16 = scalar_lea.sflag [#allocation7], %s6815_s26 }
  0x2f   : > { %s6819_s18 = scalar_lea.vmem [#allocation6], %s5792_s15 }
  0x30   : > { %6629 = dma.done.wait (%p6772_p6), %s389_s16, 2048  }
  0x31   : > { %6631 = vsyncadd (%p6772_p6), %s389_s16, 4294965248  ;;  %vm435_vm0 = vcmask 130048   ;;  %v6654_v0 = vmov 0.0   ;;  %vm444_vm1 = vcmask 122880   ;;  %v6395_v1 = vld [vmem:[%s6819_s18] sm:$0xff]   ;;  %s6655_s21 = smov 16  }
  0x32   : > { %436 = vst.msk [vmem:[#allocation2] sm:$0xff] %vm435_vm0, %v6654_v0  ;;  %v6396_v2 = vunpack.c.l.bf16 %v6395_v1  ;;  %v6397_v3 = vunpack.c.h.bf16 %v6395_v1  ;;  %v6459_v10 = vld [vmem:[%s6819_s18 + $0x10] sm:$0xff]   ;;  %vm438_vm2 = vcmask 123904   ;;  %v6458_v12 = vld [vmem:[%s6819_s18 + $0x8] sm:$0xff]   ;;  %v6461_v14 = vld [vmem:[%s6819_s18 + $0x20] sm:$0xff]   ;;  %vm642_vm3 = vcmask 125952  }
  0x33   : > { %437 = vst.msk [vmem:[#allocation2 + $0x8] sm:$0xff] %vm435_vm0, %v6654_v0  ;;  %v6405_v11 = vunpack.c.h.bf16 %v6459_v10  ;;  %v6404_v13 = vunpack.c.l.bf16 %v6459_v10  ;;  %v6400_v15 = vunpack.c.l.bf16 %v6458_v12  ;;  %v6460_v16 = vld [vmem:[%s6819_s18 + $0x18] sm:$0xff]   ;;  %v6401_v17 = vunpack.c.h.bf16 %v6458_v12  ;;  %v6462_v18 = vld [vmem:[%s6819_s18 + $0x28] sm:$0xff]   ;;  %v6463_v25 = vld [vmem:[%s6819_s18 + $0x30] sm:$0xff]   ;;  %s6656_s23 = smov 32   ;;  %s6657_s27 = smov 48  }
  0x34   : > { %445 = vst.msk [vmem:[#allocation2] sm:$0x1] %vm444_vm1, %v6654_v0  ;;  %v6412_v19 = vunpack.c.l.bf16 %v6461_v14  ;;  %v6409_v20 = vunpack.c.h.bf16 %v6460_v16  ;;  %v6417_v21 = vunpack.c.h.bf16 %v6462_v18  ;;  %v6464_v22 = vld [vmem:[%s6819_s18 + $0x38] sm:$0xff]   ;;  %v6416_v24 = vunpack.c.l.bf16 %v6462_v18  ;;  %v6465_v29 = vld [vmem:[%s6819_s18 + $0x40] sm:$0xff]   ;;  %v6934_v38 = vld [vmem:[%s6819_s18 + $0x50] sm:$0xff]   ;;  %s6658_s30 = smov 64  }
  0x35   : > { %441 = vst.msk [vmem:[#allocation2 + $0x198] sm:$0xff] %vm435_vm0, %v6654_v0  ;;  %v6408_v27 = vunpack.c.l.bf16 %v6460_v16  ;;  %v6424_v28 = vunpack.c.l.bf16 %v6464_v22  ;;  %v6421_v31 = vunpack.c.h.bf16 %v6463_v25  ;;  %v6413_v33 = vunpack.c.h.bf16 %v6461_v14  ;;  %v6466_v39 = vld [vmem:[%s6819_s18 + $0x48] sm:$0xff]   ;;  %v6468_v50 = vld [vmem:[%s6819_s18 + $0x58] sm:$0xff]   ;;  %v6469_v61 = vld [vmem:[%s6819_s18 + $0x60] sm:$0xff]   ;;  %s6659_s14 = smov 80   ;;  %s6660_s19 = smov 96  }
  0x36   : > { %442 = vst.msk [vmem:[#allocation2 + $0x1a0] sm:$0xff] %vm435_vm0, %v6654_v0  ;;  %v6429_v35 = vunpack.c.h.bf16 %v6465_v29  ;;  %v6428_v37 = vunpack.c.l.bf16 %v6465_v29  ;;  %v6420_v42 = vunpack.c.l.bf16 %v6463_v25  ;;  %v6436_v44 = vunpack.c.l.bf16 %v6934_v38  ;;  %v6470_v60 = vld [vmem:[%s6819_s18 + $0x68] sm:$0xff]   ;;  %s6661_s13 = smov 112  }
  0x37   : > { %446 = vst.msk [vmem:[#allocation2 + $0x18] sm:$0x1] %vm444_vm1, %v6654_v0  ;;  %v6433_v45 = vunpack.c.h.bf16 %v6466_v39  ;;  %v6425_v53 = vunpack.c.h.bf16 %v6464_v22  ;;  %v6441_v54 = vunpack.c.h.bf16 %v6468_v50  ;;  %v6440_v55 = vunpack.c.l.bf16 %v6468_v50 }
  0x38   : > { %447 = vst.msk [vmem:[#allocation2 + $0x30] sm:$0x1] %vm444_vm1, %v6654_v0  ;;  %v6432_v1 = vunpack.c.l.bf16 %v6466_v39  ;;  %vm867_vm4 = vcmask 257152   ;;  %vm1092_vm5 = vcmask 388352   ;;  %vm1317_vm6 = vcmask 519552  }
  0x39   : > { %448 = vst.msk [vmem:[#allocation2 + $0x48] sm:$0x1] %vm444_vm1, %v6654_v0  ;;  %vm1542_vm7 = vcmask 650752   ;;  %vm1767_vm8 = vcmask 781952   ;;  %vm1993_vm9 = vcmask 913152   ;;  %vm2218_vm10 = vcmask 1044352  }
  0x3a   : > { %v675_v4 = vld [vmem:[#allocation2 + $0x1] sm:$0xff]  ;;  %449 = vst.msk [vmem:[#allocation2 + $0x60] sm:$0x1] %vm444_vm1, %v6654_v0  ;;  %vm2925_vm11 = vcmask 261120   ;;  %vm2934_vm12 = vcmask 253952   ;;  %vm2928_vm13 = vcmask 254976  }
  0x3b   : > { %546 = vst.msk [vmem:[#allocation2 + $0x19] sm:$0xff] %vm435_vm0, %v6396_v2  ;;  %v707_v5 = vpack.c.bf16 %v675_v4, %v675_v4  ;;  %v6448_v2 = vunpack.c.l.bf16 %v6470_v60  ;;  %v578_v50 = vld [vmem:[#allocation2] sm:$0xff]  ;;  %vm3068_vm14 = vcmask 257024   ;;  %vm3293_vm15 = vcmask 519424  }
  0x3c   : > { %547 = vst.msk [vmem:[#allocation2 + $0x21] sm:$0xff] %vm435_vm0, %v6397_v3  ;;  %v6445_v3 = vunpack.c.h.bf16 %v6469_v61 }
  0x3d   : > { %771 = vrot.lane.b32.xlu0 %v707_v5, %s6655_s21  ;;  %450 = vst.msk [vmem:[#allocation2 + $0x78] sm:$0x1] %vm444_vm1, %v6654_v0 }
  0x3e   : > { %451 = vst.msk [vmem:[#allocation2 + $0x90] sm:$0x1] %vm444_vm1, %v6654_v0 }
  0x3f   : > { %452 = vst.msk [vmem:[#allocation2 + $0xa8] sm:$0x1] %vm444_vm1, %v6654_v0 }
  0x40   : > { %453 = vst.msk [vmem:[#allocation2 + $0xc0] sm:$0x1] %vm444_vm1, %v6654_v0 }
  0x41   : > { %454 = vst.msk [vmem:[#allocation2 + $0xd8] sm:$0x1] %vm444_vm1, %v6654_v0 }
  0x42   : > { %v677_v6 = vld [vmem:[#allocation2 + $0x19] sm:$0xff]  ;;  %455 = vst.msk [vmem:[#allocation2 + $0xf0] sm:$0x1] %vm444_vm1, %v6654_v0 }
  0x43   : > { %v709_v7 = vpack.c.bf16 %v677_v6, %v677_v6  ;;  %456 = vst.msk [vmem:[#allocation2 + $0x108] sm:$0x1] %vm444_vm1, %v6654_v0  ;;  %v678_v8 = vld [vmem:[#allocation2 + $0x21] sm:$0xff] }
  0x44   : > { %457 = vst.msk [vmem:[#allocation2 + $0x120] sm:$0x1] %vm444_vm1, %v6654_v0  ;;  %v710_v9 = vpack.c.bf16 %v678_v8, %v678_v8  ;;  %v6471_v8 = vld [vmem:[%s6819_s18 + $0x70] sm:$0xff]  }
  0x45   : > { %775 = vrot.lane.b32.xlu1 %v709_v7, %s6655_s21  ;;  %458 = vst.msk [vmem:[#allocation2 + $0x138] sm:$0x1] %vm444_vm1, %v6654_v0  ;;  %v6453_v12 = vunpack.c.h.bf16 %v6471_v8 }
  0x46   : > { %459 = vst.msk [vmem:[#allocation2 + $0x150] sm:$0x1] %vm444_vm1, %v6654_v0 }
  0x47   : > { %460 = vst.msk [vmem:[#allocation2 + $0x168] sm:$0x1] %vm444_vm1, %v6654_v0 }
  0x48   : > { %461 = vst.msk [vmem:[#allocation2 + $0x180] sm:$0x1] %vm444_vm1, %v6654_v0 }
  0x49   : > { %464 = vst.msk [vmem:[#allocation2 + $0x29] sm:$0x1] %vm444_vm1, %v6654_v0 }
  0x4a   : > { %465 = vst.msk [vmem:[#allocation2 + $0x41] sm:$0x1] %vm444_vm1, %v6654_v0 }
  0x4b   : > { %466 = vst.msk [vmem:[#allocation2 + $0x59] sm:$0x1] %vm444_vm1, %v6654_v0 }
  0x4c   : > { %467 = vst.msk [vmem:[#allocation2 + $0x71] sm:$0x1] %vm444_vm1, %v6654_v0 }
  0x4d   : > { %468 = vst.msk [vmem:[#allocation2 + $0x89] sm:$0x1] %vm444_vm1, %v6654_v0  ;;  %777 = vrot.lane.b32.xlu1 %v710_v9, %s6655_s21 }
  0x4e   : > { %469 = vst.msk [vmem:[#allocation2 + $0xa1] sm:$0x1] %vm444_vm1, %v6654_v0 }
  0x4f   : > { %470 = vst.msk [vmem:[#allocation2 + $0xb9] sm:$0x1] %vm444_vm1, %v6654_v0 }
  0x50   : > { %471 = vst.msk [vmem:[#allocation2 + $0xd1] sm:$0x1] %vm444_vm1, %v6654_v0 }
  0x51   : > { %472 = vst.msk [vmem:[#allocation2 + $0xe9] sm:$0x1] %vm444_vm1, %v6654_v0 }
  0x52   : > { %473 = vst.msk [vmem:[#allocation2 + $0x101] sm:$0x1] %vm444_vm1, %v6654_v0 }
  0x53   : > { %474 = vst.msk [vmem:[#allocation2 + $0x119] sm:$0x1] %vm444_vm1, %v6654_v0 }
  0x54   : > { %475 = vst.msk [vmem:[#allocation2 + $0x131] sm:$0x1] %vm444_vm1, %v6654_v0 }
  0x55   : > { %476 = vst.msk [vmem:[#allocation2 + $0x149] sm:$0x1] %vm444_vm1, %v6654_v0 }
  0x56   : > { %477 = vst.msk [vmem:[#allocation2 + $0x161] sm:$0x1] %vm444_vm1, %v6654_v0 }
  0x57   : > { %478 = vst.msk [vmem:[#allocation2 + $0x179] sm:$0x1] %vm444_vm1, %v6654_v0 }
  0x58   : > { %479 = vst.msk [vmem:[#allocation2 + $0x191] sm:$0x1] %vm444_vm1, %v6654_v0 }
  0x59   : > { %462 = vst.msk [vmem:[#allocation2 + $0x198] sm:$0x1] %vm444_vm1, %v6654_v0 }
  0x5a   : > { %439 = vst.msk [vmem:[#allocation2 + $0x10] sm:$0x3] %vm438_vm2, %v6654_v0 }
  0x5b   : > { %443 = vst.msk [vmem:[#allocation2 + $0x1a8] sm:$0x3] %vm438_vm2, %v6654_v0  ;;  %vm3743_vm2 = vcmask 1044224  }
  0x5c   : > { %463 = vst.msk [vmem:[#allocation2 + $0x11] sm:$0x1] %vm444_vm1, %v6654_v0 }
  0x5d   : > { %551 = vst.msk [vmem:[#allocation2 + $0x51] sm:$0xff] %vm435_vm0, %v6405_v11  ;;  %v6437_v11 = vunpack.c.h.bf16 %v6934_v38 }
  0x5e   : > { %480 = vst.msk [vmem:[#allocation2 + $0x1a9] sm:$0x1] %vm444_vm1, %v6654_v0  ;;  %vm3518_vm1 = vcmask 781824  }
  0x5f   : > { %550 = vst.msk [vmem:[#allocation2 + $0x49] sm:$0xff] %vm435_vm0, %v6404_v13  ;;  %v6452_v13 = vunpack.c.l.bf16 %v6471_v8 }
  0x60   : > { %548 = vst.msk [vmem:[#allocation2 + $0x31] sm:$0xff] %vm435_vm0, %v6400_v15 }
  0x61   : > { %v676_v23 = vld [vmem:[#allocation2 + $0x9] sm:$0xff]  ;;  %549 = vst.msk [vmem:[#allocation2 + $0x39] sm:$0xff] %vm435_vm0, %v6401_v17 }
  0x62   : > { %v708_v26 = vpack.c.bf16 %v676_v23, %v676_v23  ;;  %554 = vst.msk [vmem:[#allocation2 + $0x79] sm:$0xff] %vm435_vm0, %v6412_v19 }
  0x63   : > { %553 = vst.msk [vmem:[#allocation2 + $0x69] sm:$0xff] %vm435_vm0, %v6409_v20  ;;  %v6444_v20 = vunpack.c.l.bf16 %v6469_v61 }
  0x64   : > { %773 = vrot.lane.b32.xlu0 %v708_v26, %s6655_s21  ;;  %v682_v30 = vld [vmem:[#allocation2 + $0x51] sm:$0xff]  ;;  %557 = vst.msk [vmem:[#allocation2 + $0x99] sm:$0xff] %vm435_vm0, %v6417_v21 }
  0x65   : > { %v714_v32 = vpack.c.bf16 %v682_v30, %v682_v30  ;;  %556 = vst.msk [vmem:[#allocation2 + $0x91] sm:$0xff] %vm435_vm0, %v6416_v24 }
  0x66   : > { %v681_v34 = vld [vmem:[#allocation2 + $0x49] sm:$0xff]  ;;  %552 = vst.msk [vmem:[#allocation2 + $0x61] sm:$0xff] %vm435_vm0, %v6408_v27  ;;  %v6449_v27 = vunpack.c.h.bf16 %v6470_v60 }
  0x67   : > { %785 = vrot.lane.b32.xlu1 %v714_v32, %s6655_s21  ;;  %v679_v36 = vld [vmem:[#allocation2 + $0x31] sm:$0xff]  ;;  %560 = vst.msk [vmem:[#allocation2 + $0xc1] sm:$0xff] %vm435_vm0, %v6424_v28  ;;  %v713_v40 = vpack.c.bf16 %v681_v34, %v681_v34 }
  0x68   : > { %v711_v41 = vpack.c.bf16 %v679_v36, %v679_v36  ;;  %559 = vst.msk [vmem:[#allocation2 + $0xb1] sm:$0xff] %vm435_vm0, %v6421_v31  ;;  %v680_v47 = vld [vmem:[#allocation2 + $0x39] sm:$0xff] }
  0x69   : > { %v685_v43 = vld [vmem:[#allocation2 + $0x79] sm:$0xff]  ;;  %555 = vst.msk [vmem:[#allocation2 + $0x81] sm:$0xff] %vm435_vm0, %v6413_v33  ;;  %v712_v49 = vpack.c.bf16 %v680_v47, %v680_v47 }
  0x6a   : > { %779 = vrot.lane.b32.xlu2 %v711_v41, %s6655_s21  ;;  %563 = vst.msk [vmem:[#allocation2 + $0xe1] sm:$0xff] %vm435_vm0, %v6429_v35  ;;  %v717_v46 = vpack.c.bf16 %v685_v43, %v685_v43  ;;  %v684_v48 = vld [vmem:[#allocation2 + $0x69] sm:$0xff]  ;;  %v583_v61 = vld [vmem:[#allocation2 + $0x38] sm:$0xff] }
  0x6b   : > { %562 = vst.msk [vmem:[#allocation2 + $0xd9] sm:$0xff] %vm435_vm0, %v6428_v37  ;;  %v716_v51 = vpack.c.bf16 %v684_v48, %v684_v48  ;;  %v688_v52 = vld [vmem:[#allocation2 + $0x99] sm:$0xff]  ;;  %v582_v48 = vld [vmem:[#allocation2 + $0x30] sm:$0xff] }
  0x6c   : > { %783 = vrot.lane.b32.xlu0 %v713_v40, %s6655_s21  ;;  %558 = vst.msk [vmem:[#allocation2 + $0xa9] sm:$0xff] %vm435_vm0, %v6420_v42  ;;  %v720_v56 = vpack.c.bf16 %v688_v52, %v688_v52  ;;  %v687_v58 = vld [vmem:[#allocation2 + $0x91] sm:$0xff] }
  0x6d   : > { %566 = vst.msk [vmem:[#allocation2 + $0x109] sm:$0xff] %vm435_vm0, %v6436_v44  ;;  %v683_v57 = vld [vmem:[#allocation2 + $0x61] sm:$0xff]  ;;  %v719_v62 = vpack.c.bf16 %v687_v58, %v687_v58 }
  0x6e   : > { %565 = vst.msk [vmem:[#allocation2 + $0xf9] sm:$0xff] %vm435_vm0, %v6433_v45  ;;  %v715_v59 = vpack.c.bf16 %v683_v57, %v683_v57  ;;  %v691_v63 = vld [vmem:[#allocation2 + $0xc1] sm:$0xff] }
  0x6f   : > { %791 = vrot.lane.b32.xlu1 %v717_v46, %s6655_s21  ;;  %561 = vst.msk [vmem:[#allocation2 + $0xc9] sm:$0xff] %vm435_vm0, %v6425_v53  ;;  %v723_v4 = vpack.c.bf16 %v691_v63, %v691_v63  ;;  %v690_v6 = vld [vmem:[#allocation2 + $0xb1] sm:$0xff]  ;;  %v902_v45 = vld [vmem:[#allocation2 + $0x1a] sm:$0xff]  ;;  %v579_v63 = vld [vmem:[#allocation2 + $0x8] sm:$0xff] }
  0x70   : > { %569 = vst.msk [vmem:[#allocation2 + $0x129] sm:$0xff] %vm435_vm0, %v6441_v54  ;;  %v686_v5 = vld [vmem:[#allocation2 + $0x81] sm:$0xff]  ;;  %v722_v9 = vpack.c.bf16 %v690_v6, %v690_v6  ;;  %v934_v47 = vpack.c.bf16 %v902_v45, %v902_v45  ;;  %v901_v53 = vld [vmem:[#allocation2 + $0xa] sm:$0xff]  ;;  %v610_v54 = vpack.c.bf16 %v578_v50, %v578_v50 }
  0x71   : > { %568 = vst.msk [vmem:[#allocation2 + $0x121] sm:$0xff] %vm435_vm0, %v6440_v55  ;;  %v718_v7 = vpack.c.bf16 %v686_v5, %v686_v5  ;;  %v694_v10 = vld [vmem:[#allocation2 + $0xe1] sm:$0xff]  ;;  %v933_v57 = vpack.c.bf16 %v901_v53, %v901_v53 }
  0x72   : > { %781 = vrot.lane.b32.xlu2 %v712_v49, %s6655_s21  ;;  %564 = vst.msk [vmem:[#allocation2 + $0xf1] sm:$0xff] %vm435_vm0, %v6432_v1  ;;  %v726_v14 = vpack.c.bf16 %v694_v10, %v694_v10  ;;  %v693_v16 = vld [vmem:[#allocation2 + $0xd9] sm:$0xff]  ;;  %v7000_v1 = vpack.c.bf16 %v583_v61, %v583_v61  ;;  %v908_v8 = vld [vmem:[#allocation2 + $0x62] sm:$0xff] }
  0x73   : > { %572 = vst.msk [vmem:[#allocation2 + $0x151] sm:$0xff] %vm435_vm0, %v6448_v2  ;;  %v689_v15 = vld [vmem:[#allocation2 + $0xa9] sm:$0xff]  ;;  %v725_v18 = vpack.c.bf16 %v693_v16, %v693_v16  ;;  %v580_v49 = vld [vmem:[#allocation2 + $0x18] sm:$0xff]  ;;  %v940_v10 = vpack.c.bf16 %v908_v8, %v908_v8  ;;  %v594_v53 = vld [vmem:[#allocation2 + $0xc0] sm:$0xff] }
  0x74   : > { %789 = vrot.lane.b32.xlu0 %v716_v51, %s6655_s21  ;;  %571 = vst.msk [vmem:[#allocation2 + $0x141] sm:$0xff] %vm435_vm0, %v6445_v3  ;;  %v721_v17 = vpack.c.bf16 %v689_v15, %v689_v15  ;;  %v697_v19 = vld [vmem:[#allocation2 + $0x109] sm:$0xff]  ;;  %v6987_v51 = vpack.c.bf16 %v582_v48, %v582_v48  ;;  %v6989_v52 = vpack.c.bf16 %v580_v49, %v580_v49  ;;  %v905_v58 = vld [vmem:[#allocation2 + $0x3a] sm:$0xff]  ;;  %v904_v3 = vld [vmem:[#allocation2 + $0x32] sm:$0xff] }
  0x75   : > { %567 = vst.msk [vmem:[#allocation2 + $0x111] sm:$0xff] %vm435_vm0, %v6437_v11  ;;  %v729_v21 = vpack.c.bf16 %v697_v19, %v697_v19  ;;  %v696_v23 = vld [vmem:[#allocation2 + $0xf9] sm:$0xff]  ;;  %v937_v60 = vpack.c.bf16 %v905_v58, %v905_v58 }
  0x76   : > { %575 = vst.msk [vmem:[#allocation2 + $0x171] sm:$0xff] %vm435_vm0, %v6453_v12  ;;  %v692_v22 = vld [vmem:[#allocation2 + $0xc9] sm:$0xff]  ;;  %v728_v25 = vpack.c.bf16 %v696_v23, %v696_v23  ;;  %v586_v11 = vld [vmem:[#allocation2 + $0x60] sm:$0xff]  ;;  %v907_v16 = vld [vmem:[#allocation2 + $0x52] sm:$0xff] }
  0x77   : > { %797 = vrot.lane.b32.xlu1 %v720_v56, %s6655_s21  ;;  %574 = vst.msk [vmem:[#allocation2 + $0x169] sm:$0xff] %vm435_vm0, %v6452_v13  ;;  %v724_v24 = vpack.c.bf16 %v692_v22, %v692_v22  ;;  %v700_v26 = vld [vmem:[#allocation2 + $0x129] sm:$0xff]  ;;  %v912_v48 = vld [vmem:[#allocation2 + $0x92] sm:$0xff] }
  0x78   : > { %570 = vst.msk [vmem:[#allocation2 + $0x139] sm:$0xff] %vm435_vm0, %v6444_v20  ;;  %v732_v28 = vpack.c.bf16 %v700_v26, %v700_v26  ;;  %v699_v30 = vld [vmem:[#allocation2 + $0x121] sm:$0xff]  ;;  %v585_v12 = vld [vmem:[#allocation2 + $0x50] sm:$0xff]  ;;  %v939_v20 = vpack.c.bf16 %v907_v16, %v907_v16  ;;  %v944_v61 = vpack.c.bf16 %v912_v48, %v912_v48  ;;  %v596_v8 = vld [vmem:[#allocation2 + $0xd8] sm:$0xff] }
  0x79   : > { %573 = vst.msk [vmem:[#allocation2 + $0x159] sm:$0xff] %vm435_vm0, %v6449_v27  ;;  %v695_v29 = vld [vmem:[#allocation2 + $0xf1] sm:$0xff]  ;;  %v731_v32 = vpack.c.bf16 %v699_v30, %v699_v30  ;;  %v584_v13 = vld [vmem:[#allocation2 + $0x48] sm:$0xff]  ;;  %v7015_v15 = vpack.c.bf16 %v585_v12, %v585_v12 }
  0x7a   : > { %787 = vrot.lane.b32.xlu2 %v715_v59, %s6655_s21  ;;  %v727_v31 = vpack.c.bf16 %v695_v29, %v695_v29  ;;  %v703_v33 = vld [vmem:[#allocation2 + $0x151] sm:$0xff]  ;;  %647 = vst.msk [vmem:[#allocation4 + $0x20] sm:$0xf] %vm642_vm3, %v6987_v51  ;;  %v900_v59 = vld [vmem:[#allocation2 + $0x2] sm:$0xff] }
  0x7b   : > { %v735_v34 = vpack.c.bf16 %v703_v33, %v703_v33  ;;  %v702_v36 = vld [vmem:[#allocation2 + $0x141] sm:$0xff]  ;;  %645 = vst.msk [vmem:[#allocation4 + $0x10] sm:$0xf] %vm642_vm3, %v6989_v52  ;;  %v932_v5 = vpack.c.bf16 %v900_v59, %v900_v59  ;;  %v906_v22 = vld [vmem:[#allocation2 + $0x4a] sm:$0xff] }
  0x7c   : > { %795 = vrot.lane.b32.xlu0 %v719_v62, %s6655_s21  ;;  %v698_v35 = vld [vmem:[#allocation2 + $0x111] sm:$0xff]  ;;  %v734_v38 = vpack.c.bf16 %v702_v36, %v702_v36  ;;  %643 = vst.msk [vmem:[#allocation4] sm:$0xf] %vm642_vm3, %v610_v54  ;;  %v581_v62 = vld [vmem:[#allocation2 + $0x20] sm:$0xff]  ;;  %v587_v26 = vld [vmem:[#allocation2 + $0x68] sm:$0xff] }
  0x7d   : > { %v730_v37 = vpack.c.bf16 %v698_v35, %v698_v35  ;;  %v706_v39 = vld [vmem:[#allocation2 + $0x171] sm:$0xff]  ;;  %v7002_v2 = vpack.c.bf16 %v581_v62, %v581_v62  ;;  %648 = vst.msk [vmem:[#allocation4 + $0x28] sm:$0xf] %vm642_vm3, %v7000_v1  ;;  %v7033_v30 = vpack.c.bf16 %v587_v26, %v587_v26  ;;  %v595_v50 = vld [vmem:[#allocation2 + $0xc8] sm:$0xff] }
  0x7e   : > { %v738_v40 = vpack.c.bf16 %v706_v39, %v706_v39  ;;  %v705_v42 = vld [vmem:[#allocation2 + $0x169] sm:$0xff]  ;;  %650 = vst.msk [vmem:[#allocation4 + $0x38] sm:$0xf] %vm642_vm3, %v7015_v15  ;;  %v599_v26 = vld [vmem:[#allocation2 + $0xf8] sm:$0xff] }
  0x7f   : > { %803 = vrot.lane.b32.xlu1 %v723_v4, %s6655_s21  ;;  %v701_v41 = vld [vmem:[#allocation2 + $0x139] sm:$0xff]  ;;  %v737_v44 = vpack.c.bf16 %v705_v42, %v705_v42  ;;  %v611_v4 = vpack.c.bf16 %v579_v63, %v579_v63  ;;  %646 = vst.msk [vmem:[#allocation4 + $0x18] sm:$0xf] %vm642_vm3, %v7002_v2  ;;  %v909_v35 = vld [vmem:[#allocation2 + $0x6a] sm:$0xff]  ;;  %v916_v58 = vld [vmem:[#allocation2 + $0xc2] sm:$0xff] }
  0x80   : > { %v733_v43 = vpack.c.bf16 %v701_v41, %v701_v41  ;;  %v704_v46 = vld [vmem:[#allocation2 + $0x159] sm:$0xff]  ;;  %652 = vst.msk [vmem:[#allocation4 + $0x48] sm:$0xf] %vm642_vm3, %v7033_v30  ;;  %v590_v39 = vld [vmem:[#allocation2 + $0x90] sm:$0xff]  ;;  %v941_v45 = vpack.c.bf16 %v909_v35, %v909_v35  ;;  %v948_v62 = vpack.c.bf16 %v916_v58, %v916_v58  ;;  %v919_v12 = vld [vmem:[#allocation2 + $0xe2] sm:$0xff] }
  0x81   : > { %v736_v55 = vpack.c.bf16 %v704_v46, %v704_v46  ;;  %644 = vst.msk [vmem:[#allocation4 + $0x8] sm:$0xf] %vm642_vm3, %v611_v4  ;;  %v593_v54 = vld [vmem:[#allocation2 + $0xb0] sm:$0xff] }
  0x82   : > { %793 = vrot.lane.b32.xlu2 %v718_v7, %s6655_s21  ;;  %v936_v7 = vpack.c.bf16 %v904_v3, %v904_v3  ;;  %v7066_v59 = vpack.c.bf16 %v593_v54, %v593_v54  ;;  %v920_v63 = vld [vmem:[#allocation2 + $0xf2] sm:$0xff]  ;;  %2926 = vst.msk [vmem:[#allocation3] sm:$0xff] %vm2925_vm11, %v6654_v0 }
  0x83   : > { %v915_v4 = vld [vmem:[#allocation2 + $0xb2] sm:$0xff]  ;;  %2927 = vst.msk [vmem:[#allocation3 + $0x8] sm:$0xff] %vm2925_vm11, %v6654_v0 }
  0x84   : > { %801 = vrot.lane.b32.xlu0 %v722_v9, %s6655_s21  ;;  %v903_v9 = vld [vmem:[#allocation2 + $0x22] sm:$0xff]  ;;  %658 = vst.msk [vmem:[#allocation4 + $0x78] sm:$0xf] %vm642_vm3, %v7066_v59 }
  0x85   : > { %2931 = vst.msk [vmem:[#allocation3 + $0x198] sm:$0xff] %vm2925_vm11, %v6654_v0 }
  0x86   : > { %2932 = vst.msk [vmem:[#allocation3 + $0x1a0] sm:$0xff] %vm2925_vm11, %v6654_v0 }
  0x87   : > { %809 = vrot.lane.b32.xlu1 %v726_v14, %s6655_s21  ;;  %v7013_v14 = vpack.c.bf16 %v586_v11, %v586_v11  ;;  %2935 = vst.msk [vmem:[#allocation3] sm:$0x1] %vm2934_vm12, %v6654_v0 }
  0x88   : > { %2936 = vst.msk [vmem:[#allocation3 + $0x18] sm:$0x1] %vm2934_vm12, %v6654_v0 }
  0x89   : > { %651 = vst.msk [vmem:[#allocation4 + $0x40] sm:$0xf] %vm642_vm3, %v7013_v14 }
  0x8a   : > { %799 = vrot.lane.b32.xlu2 %v721_v17, %s6655_s21  ;;  %v7017_v17 = vpack.c.bf16 %v584_v13, %v584_v13  ;;  %v7084_v13 = vpack.c.bf16 %v596_v8, %v596_v8  ;;  %2937 = vst.msk [vmem:[#allocation3 + $0x30] sm:$0x1] %vm2934_vm12, %v6654_v0 }
  0x8b   : > { %2938 = vst.msk [vmem:[#allocation3 + $0x48] sm:$0x1] %vm2934_vm12, %v6654_v0 }
  0x8c   : > { %807 = vrot.lane.b32.xlu0 %v725_v18, %s6655_s21  ;;  %v935_v18 = vpack.c.bf16 %v903_v9, %v903_v9  ;;  %649 = vst.msk [vmem:[#allocation4 + $0x30] sm:$0xf] %vm642_vm3, %v7017_v17 }
  0x8d   : > { %661 = vst.msk [vmem:[#allocation4 + $0x90] sm:$0xf] %vm642_vm3, %v7084_v13 }
  0x8e   : > { %2939 = vst.msk [vmem:[#allocation3 + $0x60] sm:$0x1] %vm2934_vm12, %v6654_v0 }
  0x8f   : > { %815 = vrot.lane.b32.xlu1 %v729_v21, %s6655_s21  ;;  %v911_v21 = vld [vmem:[#allocation2 + $0x82] sm:$0xff]  ;;  %2940 = vst.msk [vmem:[#allocation3 + $0x78] sm:$0x1] %vm2934_vm12, %v6654_v0 }
  0x90   : > { %v943_v23 = vpack.c.bf16 %v911_v21, %v911_v21  ;;  %2941 = vst.msk [vmem:[#allocation3 + $0x90] sm:$0x1] %vm2934_vm12, %v6654_v0 }
  0x91   : > { %2942 = vst.msk [vmem:[#allocation3 + $0xa8] sm:$0x1] %vm2934_vm12, %v6654_v0 }
  0x92   : > { %805 = vrot.lane.b32.xlu2 %v724_v24, %s6655_s21  ;;  %v589_v24 = vld [vmem:[#allocation2 + $0x80] sm:$0xff]  ;;  %2943 = vst.msk [vmem:[#allocation3 + $0xc0] sm:$0x1] %vm2934_vm12, %v6654_v0 }
  0x93   : > { %2944 = vst.msk [vmem:[#allocation3 + $0xd8] sm:$0x1] %vm2934_vm12, %v6654_v0 }
  0x94   : > { %813 = vrot.lane.b32.xlu0 %v728_v25, %s6655_s21  ;;  %v588_v25 = vld [vmem:[#allocation2 + $0x78] sm:$0xff]  ;;  %2945 = vst.msk [vmem:[#allocation3 + $0xf0] sm:$0x1] %vm2934_vm12, %v6654_v0 }
  0x95   : > { %v7031_v29 = vpack.c.bf16 %v588_v25, %v588_v25  ;;  %v600_v25 = vld [vmem:[#allocation2 + $0x108] sm:$0xff]  ;;  %2946 = vst.msk [vmem:[#allocation3 + $0x108] sm:$0x1] %vm2934_vm12, %v6654_v0 }
  0x96   : > { %2947 = vst.msk [vmem:[#allocation3 + $0x120] sm:$0x1] %vm2934_vm12, %v6654_v0 }
  0x97   : > { %821 = vrot.lane.b32.xlu1 %v732_v28, %s6655_s21  ;;  %v7029_v28 = vpack.c.bf16 %v589_v24, %v589_v24  ;;  %653 = vst.msk [vmem:[#allocation4 + $0x50] sm:$0xf] %vm642_vm3, %v7031_v29  ;;  %v601_v24 = vld [vmem:[#allocation2 + $0x110] sm:$0xff] }
  0x98   : > { %2948 = vst.msk [vmem:[#allocation3 + $0x138] sm:$0x1] %vm2934_vm12, %v6654_v0 }
  0x99   : > { %654 = vst.msk [vmem:[#allocation4 + $0x58] sm:$0xf] %vm642_vm3, %v7029_v28 }
  0x9a   : > { %811 = vrot.lane.b32.xlu2 %v727_v31, %s6655_s21  ;;  %v910_v31 = vld [vmem:[#allocation2 + $0x7a] sm:$0xff]  ;;  %2949 = vst.msk [vmem:[#allocation3 + $0x150] sm:$0x1] %vm2934_vm12, %v6654_v0 }
  0x9b   : > { %v942_v33 = vpack.c.bf16 %v910_v31, %v910_v31  ;;  %v7100_v31 = vpack.c.bf16 %v601_v24, %v601_v24  ;;  %v609_v24 = vld [vmem:[#allocation2 + $0x170] sm:$0xff]  ;;  %2950 = vst.msk [vmem:[#allocation3 + $0x168] sm:$0x1] %vm2934_vm12, %v6654_v0 }
  0x9c   : > { %819 = vrot.lane.b32.xlu0 %v731_v32, %s6655_s21  ;;  %v938_v32 = vpack.c.bf16 %v906_v22, %v906_v22  ;;  %v918_v22 = vld [vmem:[#allocation2 + $0xda] sm:$0xff]  ;;  %2951 = vst.msk [vmem:[#allocation3 + $0x180] sm:$0x1] %vm2934_vm12, %v6654_v0 }
  0x9d   : > { %666 = vst.msk [vmem:[#allocation4 + $0xb8] sm:$0xf] %vm642_vm3, %v7100_v31 }
  0x9e   : > { %2952 = vst.msk [vmem:[#allocation3 + $0x198] sm:$0x1] %vm2934_vm12, %v6654_v0 }
  0x9f   : > { %827 = vrot.lane.b32.xlu1 %v735_v34, %s6655_s21  ;;  %v914_v34 = vld [vmem:[#allocation2 + $0xaa] sm:$0xff]  ;;  %2954 = vst.msk [vmem:[#allocation3 + $0x29] sm:$0x1] %vm2934_vm12, %v6654_v0 }
  0xa0   : > { %v946_v36 = vpack.c.bf16 %v914_v34, %v914_v34  ;;  %v7105_v34 = vpack.c.bf16 %v599_v26, %v599_v26  ;;  %2955 = vst.msk [vmem:[#allocation3 + $0x41] sm:$0x1] %vm2934_vm12, %v6654_v0 }
  0xa1   : > { %2956 = vst.msk [vmem:[#allocation3 + $0x59] sm:$0x1] %vm2934_vm12, %v6654_v0 }
  0xa2   : > { %817 = vrot.lane.b32.xlu2 %v730_v37, %s6655_s21  ;;  %v592_v37 = vld [vmem:[#allocation2 + $0xa8] sm:$0xff]  ;;  %664 = vst.msk [vmem:[#allocation4 + $0xa8] sm:$0xf] %vm642_vm3, %v7105_v34 }
  0xa3   : > { %v7045_v41 = vpack.c.bf16 %v592_v37, %v592_v37  ;;  %2957 = vst.msk [vmem:[#allocation3 + $0x71] sm:$0x1] %vm2934_vm12, %v6654_v0 }
  0xa4   : > { %825 = vrot.lane.b32.xlu0 %v734_v38, %s6655_s21  ;;  %v591_v38 = vld [vmem:[#allocation2 + $0x98] sm:$0xff]  ;;  %2958 = vst.msk [vmem:[#allocation3 + $0x89] sm:$0x1] %vm2934_vm12, %v6654_v0 }
  0xa5   : > { %v7047_v42 = vpack.c.bf16 %v591_v38, %v591_v38  ;;  %657 = vst.msk [vmem:[#allocation4 + $0x70] sm:$0xf] %vm642_vm3, %v7045_v41  ;;  %v926_v38 = vld [vmem:[#allocation2 + $0x13a] sm:$0xff] }
  0xa6   : > { %2959 = vst.msk [vmem:[#allocation3 + $0xa1] sm:$0x1] %vm2934_vm12, %v6654_v0 }
  0xa7   : > { %833 = vrot.lane.b32.xlu1 %v738_v40, %s6655_s21  ;;  %656 = vst.msk [vmem:[#allocation4 + $0x68] sm:$0xf] %vm642_vm3, %v7047_v42 }
  0xa8   : > { %2960 = vst.msk [vmem:[#allocation3 + $0xb9] sm:$0x1] %vm2934_vm12, %v6654_v0 }
  0xa9   : > { %2961 = vst.msk [vmem:[#allocation3 + $0xd1] sm:$0x1] %vm2934_vm12, %v6654_v0 }
  0xaa   : > { %823 = vrot.lane.b32.xlu2 %v733_v43, %s6655_s21  ;;  %v7049_v43 = vpack.c.bf16 %v590_v39, %v590_v39  ;;  %2962 = vst.msk [vmem:[#allocation3 + $0xe9] sm:$0x1] %vm2934_vm12, %v6654_v0 }
  0xab   : > { %2963 = vst.msk [vmem:[#allocation3 + $0x101] sm:$0x1] %vm2934_vm12, %v6654_v0 }
  0xac   : > { %831 = vrot.lane.b32.xlu0 %v737_v44, %s6655_s21  ;;  %v913_v44 = vld [vmem:[#allocation2 + $0x9a] sm:$0xff]  ;;  %655 = vst.msk [vmem:[#allocation4 + $0x60] sm:$0xf] %vm642_vm3, %v7049_v43 }
  0xad   : > { %v945_v46 = vpack.c.bf16 %v913_v44, %v913_v44  ;;  %v958_v44 = vpack.c.bf16 %v926_v38, %v926_v38  ;;  %2964 = vst.msk [vmem:[#allocation3 + $0x119] sm:$0x1] %vm2934_vm12, %v6654_v0 }
  0xae   : > { %2965 = vst.msk [vmem:[#allocation3 + $0x131] sm:$0x1] %vm2934_vm12, %v6654_v0 }
  0xaf   : > { %1000 = vrot.lane.b32.xlu1 %v934_v47, %s6656_s23  ;;  %v772_v56 = vpop.permute.xlu0 %771  ;;  %v917_v47 = vld [vmem:[#allocation2 + $0xca] sm:$0xff]  ;;  %2966 = vst.msk [vmem:[#allocation3 + $0x149] sm:$0x1] %vm2934_vm12, %v6654_v0 }
  0xb0   : > { %868 = vst.msk [vmem:[#allocation4] sm:$0xf] %vm867_vm4, %v772_v56  ;;  %v949_v49 = vpack.c.bf16 %v917_v47, %v917_v47  ;;  %v7061_v56 = vpack.c.bf16 %v595_v50, %v595_v50  ;;  %v602_v47 = vld [vmem:[#allocation2 + $0x120] sm:$0xff] }
  0xb1   : > { %v7126_v54 = vpack.c.bf16 %v602_v47, %v602_v47  ;;  %2967 = vst.msk [vmem:[#allocation3 + $0x161] sm:$0x1] %vm2934_vm12, %v6654_v0 }
  0xb2   : > { %829 = vrot.lane.b32.xlu2 %v736_v55, %s6655_s21  ;;  %660 = vst.msk [vmem:[#allocation4 + $0x88] sm:$0xf] %vm642_vm3, %v7061_v56 }
  0xb3   : > { %667 = vst.msk [vmem:[#allocation4 + $0xc0] sm:$0xf] %vm642_vm3, %v7126_v54 }
  0xb4   : > { %998 = vrot.lane.b32.xlu0 %v933_v57, %s6656_s23  ;;  %v7063_v57 = vpack.c.bf16 %v594_v53, %v594_v53  ;;  %v925_v53 = vld [vmem:[#allocation2 + $0x12a] sm:$0xff]  ;;  %2968 = vst.msk [vmem:[#allocation3 + $0x179] sm:$0x1] %vm2934_vm12, %v6654_v0 }
  0xb5   : > { %2969 = vst.msk [vmem:[#allocation3 + $0x191] sm:$0x1] %vm2934_vm12, %v6654_v0 }
  0xb6   : > { %659 = vst.msk [vmem:[#allocation4 + $0x80] sm:$0xf] %vm642_vm3, %v7063_v57 }
  0xb7   : > { %1006 = vrot.lane.b32.xlu1 %v937_v60, %s6656_s23  ;;  %v776_v6 = vpop.permute.xlu1 %775  ;;  %2929 = vst.msk [vmem:[#allocation3 + $0x10] sm:$0x3] %vm2928_vm13, %v6654_v0 }
  0xb8   : > { %870 = vst.msk [vmem:[#allocation4 + $0x10] sm:$0xf] %vm867_vm4, %v776_v6  ;;  %v598_v6 = vld [vmem:[#allocation2 + $0xf0] sm:$0xff] }
  0xb9   : > { %2933 = vst.msk [vmem:[#allocation3 + $0x1a8] sm:$0x3] %vm2928_vm13, %v6654_v0 }
  0xba   : > { %996 = vrot.lane.b32.xlu2 %v932_v5, %s6656_s23  ;;  %v952_v5 = vpack.c.bf16 %v920_v63, %v920_v63  ;;  %v924_v63 = vld [vmem:[#allocation2 + $0x122] sm:$0xff]  ;;  %2953 = vst.msk [vmem:[#allocation3 + $0x11] sm:$0x1] %vm2934_vm12, %v6654_v0 }
  0xbb   : > { %2970 = vst.msk [vmem:[#allocation3 + $0x1a9] sm:$0x1] %vm2934_vm12, %v6654_v0 }
  0xbc   : > { %1004 = vrot.lane.b32.xlu0 %v936_v7, %s6656_s23  ;;  %v597_v7 = vld [vmem:[#allocation2 + $0xe0] sm:$0xff] }
  0xbd   : > { %v7081_v11 = vpack.c.bf16 %v597_v7, %v597_v7 }
  0xbf   : > { %1012 = vrot.lane.b32.xlu1 %v940_v10, %s6656_s23  ;;  %v778_v19 = vpop.permute.xlu1 %777  ;;  %v7079_v10 = vpack.c.bf16 %v598_v6, %v598_v6  ;;  %662 = vst.msk [vmem:[#allocation4 + $0x98] sm:$0xf] %vm642_vm3, %v7081_v11  ;;  %v605_v6 = vld [vmem:[#allocation2 + $0x140] sm:$0xff] }
  0xc0   : > { %871 = vst.msk [vmem:[#allocation4 + $0x18] sm:$0xf] %vm867_vm4, %v778_v19  ;;  %v951_v19 = vpack.c.bf16 %v919_v12, %v919_v12  ;;  %v928_v12 = vld [vmem:[#allocation2 + $0x152] sm:$0xff] }
  0xc1   : > { %663 = vst.msk [vmem:[#allocation4 + $0xa0] sm:$0xf] %vm642_vm3, %v7079_v10 }
  0xc2   : > { %1002 = vrot.lane.b32.xlu2 %v935_v18, %s6656_s23  ;;  %v7086_v18 = vpack.c.bf16 %v915_v4, %v915_v4  ;;  %v607_v4 = vld [vmem:[#allocation2 + $0x158] sm:$0xff] }
  0xc3   : > { %v7142_v8 = vpack.c.bf16 %v607_v4, %v607_v4  ;;  %v1351_v4 = vld [vmem:[#allocation2 + $0x21] sm:$0xff] }
  0xc4   : > { %1010 = vrot.lane.b32.xlu0 %v939_v20, %s6656_s23  ;;  %v780_v27 = vpop.permute.xlu2 %779  ;;  %v923_v20 = vld [vmem:[#allocation2 + $0x112] sm:$0xff] }
  0xc5   : > { %872 = vst.msk [vmem:[#allocation4 + $0x20] sm:$0xf] %vm867_vm4, %v780_v27 }
  0xc6   : > { %672 = vst.msk [vmem:[#allocation4 + $0xe8] sm:$0xf] %vm642_vm3, %v7142_v8 }
  0xc7   : > { %1018 = vrot.lane.b32.xlu1 %v943_v23, %s6656_s23  ;;  %v955_v23 = vpack.c.bf16 %v923_v20, %v923_v20  ;;  %v7149_v20 = vpack.c.bf16 %v924_v63, %v924_v63 }
  0xca   : > { %1008 = vrot.lane.b32.xlu2 %v938_v32, %s6656_s23  ;;  %v7102_v32 = vpack.c.bf16 %v600_v25, %v600_v25  ;;  %v608_v25 = vld [vmem:[#allocation2 + $0x168] sm:$0xff] }
  0xcc   : > { %1016 = vrot.lane.b32.xlu0 %v942_v33, %s6656_s23  ;;  %v782_v40 = vpop.permute.xlu2 %781  ;;  %v922_v33 = vld [vmem:[#allocation2 + $0x10a] sm:$0xff]  ;;  %665 = vst.msk [vmem:[#allocation4 + $0xb0] sm:$0xf] %vm642_vm3, %v7102_v32 }
  0xcd   : > { %873 = vst.msk [vmem:[#allocation4 + $0x28] sm:$0xf] %vm867_vm4, %v782_v40  ;;  %v954_v37 = vpack.c.bf16 %v922_v33, %v922_v33  ;;  %v921_v40 = vld [vmem:[#allocation2 + $0xfa] sm:$0xff]  ;;  %v7168_v33 = vpack.c.bf16 %v608_v25, %v608_v25 }
  0xce   : > { %v7128_v58 = vpack.c.bf16 %v921_v40, %v921_v40 }
  0xcf   : > { %1024 = vrot.lane.b32.xlu1 %v946_v36, %s6656_s23  ;;  %v7107_v36 = vpack.c.bf16 %v918_v22, %v918_v22  ;;  %673 = vst.msk [vmem:[#allocation4 + $0xf0] sm:$0xf] %vm642_vm3, %v7168_v33 }
  0xd2   : > { %1014 = vrot.lane.b32.xlu2 %v941_v45, %s6656_s23  ;;  %v604_v45 = vld [vmem:[#allocation2 + $0x138] sm:$0xff] }
  0xd4   : > { %1022 = vrot.lane.b32.xlu0 %v945_v46, %s6656_s23  ;;  %v788_v55 = vpop.permute.xlu2 %787  ;;  %v603_v46 = vld [vmem:[#allocation2 + $0x128] sm:$0xff] }
  0xd5   : > { %876 = vst.msk [vmem:[#allocation4 + $0x40] sm:$0xf] %vm867_vm4, %v788_v55  ;;  %v7123_v50 = vpack.c.bf16 %v603_v46, %v603_v46 }
  0xd6   : > { %v774_v60 = vpop.permute.xlu0 %773 }
  0xd7   : > { %869 = vst.msk [vmem:[#allocation4 + $0x8] sm:$0xf] %vm867_vm4, %v774_v60  ;;  %1030 = vrot.lane.b32.xlu1 %v949_v49, %s6656_s23  ;;  %v7121_v49 = vpack.c.bf16 %v604_v45, %v604_v45  ;;  %v957_v60 = vpack.c.bf16 %v925_v53, %v925_v53 }
  0xd8   : > { %668 = vst.msk [vmem:[#allocation4 + $0xc8] sm:$0xf] %vm642_vm3, %v7123_v50 }
  0xd9   : > { %v786_v3 = vpop.permute.xlu1 %785  ;;  %669 = vst.msk [vmem:[#allocation4 + $0xd0] sm:$0xf] %vm642_vm3, %v7121_v49 }
  0xda   : > { %875 = vst.msk [vmem:[#allocation4 + $0x38] sm:$0xf] %vm867_vm4, %v786_v3  ;;  %1020 = vrot.lane.b32.xlu2 %v944_v61, %s6656_s23  ;;  %v929_v61 = vld [vmem:[#allocation2 + $0x15a] sm:$0xff] }
  0xdb   : > { %v961_v3 = vpack.c.bf16 %v929_v61, %v929_v61 }
  0xdc   : > { %1028 = vrot.lane.b32.xlu0 %v948_v62, %s6656_s23  ;;  %v794_v9 = vpop.permute.xlu2 %793 }
  0xdd   : > { %879 = vst.msk [vmem:[#allocation4 + $0x58] sm:$0xf] %vm867_vm4, %v794_v9 }
  0xde   : > { %v784_v16 = vpop.permute.xlu0 %783 }
  0xdf   : > { %874 = vst.msk [vmem:[#allocation4 + $0x30] sm:$0xf] %vm867_vm4, %v784_v16  ;;  %1036 = vrot.lane.b32.xlu1 %v952_v5, %s6656_s23  ;;  %v606_v5 = vld [vmem:[#allocation2 + $0x150] sm:$0xff]  ;;  %v7147_v16 = vpack.c.bf16 %v605_v6, %v605_v6 }
  0xe0   : > { %v7144_v9 = vpack.c.bf16 %v606_v5, %v606_v5 }
  0xe1   : > { %v792_v21 = vpop.permute.xlu1 %791  ;;  %670 = vst.msk [vmem:[#allocation4 + $0xd8] sm:$0xf] %vm642_vm3, %v7147_v16 }
  0xe2   : > { %878 = vst.msk [vmem:[#allocation4 + $0x50] sm:$0xf] %vm867_vm4, %v792_v21  ;;  %1026 = vrot.lane.b32.xlu2 %v7086_v18, %s6656_s23  ;;  %v7155_v21 = vpack.c.bf16 %v928_v12, %v928_v12  ;;  %v1354_v12 = vld [vmem:[#allocation2 + $0x49] sm:$0xff] }
  0xe3   : > { %671 = vst.msk [vmem:[#allocation4 + $0xe0] sm:$0xf] %vm642_vm3, %v7144_v9 }
  0xe4   : > { %1034 = vrot.lane.b32.xlu0 %v951_v19, %s6656_s23  ;;  %v800_v27 = vpop.permute.xlu2 %799 }
  0xe5   : > { %882 = vst.msk [vmem:[#allocation4 + $0x70] sm:$0xf] %vm867_vm4, %v800_v27  ;;  %v7166_v27 = vpack.c.bf16 %v609_v24, %v609_v24  ;;  %v1353_v24 = vld [vmem:[#allocation2 + $0x39] sm:$0xff] }
  0xe6   : > { %v790_v35 = vpop.permute.xlu0 %789 }
  0xe7   : > { %877 = vst.msk [vmem:[#allocation4 + $0x48] sm:$0xf] %vm867_vm4, %v790_v35  ;;  %1042 = vrot.lane.b32.xlu1 %v955_v23, %s6656_s23  ;;  %v927_v23 = vld [vmem:[#allocation2 + $0x142] sm:$0xff]  ;;  %v931_v35 = vld [vmem:[#allocation2 + $0x172] sm:$0xff] }
  0xe8   : > { %v7171_v38 = vpack.c.bf16 %v927_v23, %v927_v23  ;;  %674 = vst.msk [vmem:[#allocation4 + $0xf8] sm:$0xf] %vm642_vm3, %v7166_v27 }
  0xe9   : > { %v798_v39 = vpop.permute.xlu1 %797 }
  0xea   : > { %881 = vst.msk [vmem:[#allocation4 + $0x68] sm:$0xf] %vm867_vm4, %v798_v39  ;;  %1032 = vrot.lane.b32.xlu2 %v7107_v36, %s6656_s23  ;;  %v7178_v39 = vpack.c.bf16 %v931_v35, %v931_v35 }
  0xec   : > { %1040 = vrot.lane.b32.xlu0 %v954_v37, %s6656_s23  ;;  %v806_v48 = vpop.permute.xlu2 %805 }
  0xed   : > { %885 = vst.msk [vmem:[#allocation4 + $0x88] sm:$0xf] %vm867_vm4, %v806_v48 }
  0xee   : > { %v796_v55 = vpop.permute.xlu0 %795 }
  0xef   : > { %880 = vst.msk [vmem:[#allocation4 + $0x60] sm:$0xf] %vm867_vm4, %v796_v55  ;;  %1048 = vrot.lane.b32.xlu1 %v958_v44, %s6656_s23  ;;  %v930_v44 = vld [vmem:[#allocation2 + $0x16a] sm:$0xff] }
  0xf1   : > { %v804_v62 = vpop.permute.xlu1 %803 }
  0xf2   : > { %884 = vst.msk [vmem:[#allocation4 + $0x80] sm:$0xf] %vm867_vm4, %v804_v62  ;;  %1038 = vrot.lane.b32.xlu2 %v7128_v58, %s6656_s23 }
  0xf4   : > { %1046 = vrot.lane.b32.xlu0 %v957_v60, %s6656_s23  ;;  %v812_v7 = vpop.permute.xlu2 %811  ;;  %v6472_v60 = vld [vmem:[%s6819_s18 + $0x78] sm:$0xff]   ;;  %s5793_s18 = sshll.u32 %s6815_s26, 6 }
  0xf5   : > { %888 = vst.msk [vmem:[#allocation4 + $0xa0] sm:$0xf] %vm867_vm4, %v812_v7  ;;  %v1350_v7 = vld [vmem:[#allocation2 + $0x19] sm:$0xff] }
  0xf6   : > { %v802_v19 = vpop.permute.xlu0 %801 }
  0xf7   : > { %883 = vst.msk [vmem:[#allocation4 + $0x78] sm:$0xf] %vm867_vm4, %v802_v19  ;;  %1054 = vrot.lane.b32.xlu1 %v961_v3, %s6656_s23 }
  0xf9   : > { %v810_v22 = vpop.permute.xlu1 %809 }
  0xfa   : > { %887 = vst.msk [vmem:[#allocation4 + $0x98] sm:$0xf] %vm867_vm4, %v810_v22  ;;  %1044 = vrot.lane.b32.xlu2 %v7149_v20, %s6656_s23 }
  0xfc   : > { %1052 = vrot.lane.b32.xlu0 %v7155_v21, %s6656_s23  ;;  %v818_v26 = vpop.permute.xlu2 %817 }
  0xfd   : > { %891 = vst.msk [vmem:[#allocation4 + $0xb8] sm:$0xf] %vm867_vm4, %v818_v26 }
  0xfe   : > { %v808_v37 = vpop.permute.xlu0 %807 }
  0xff   : > { %886 = vst.msk [vmem:[#allocation4 + $0x90] sm:$0xf] %vm867_vm4, %v808_v37  ;;  %1221 = vrot.lane.b32.xlu1 %v6989_v52, %s6657_s27  ;;  %v7188_v52 = vpack.c.bf16 %v930_v44, %v930_v44 }
 0x101   : > { %v816_v40 = vpop.permute.xlu1 %815 }
 0x102   : > { %890 = vst.msk [vmem:[#allocation4 + $0xb0] sm:$0xf] %vm867_vm4, %v816_v40  ;;  %1050 = vrot.lane.b32.xlu2 %v7171_v38, %s6656_s23  ;;  %v1352_v40 = vld [vmem:[#allocation2 + $0x31] sm:$0xff] }
 0x104   : > { %1058 = vrot.lane.b32.xlu0 %v7178_v39, %s6656_s23  ;;  %v824_v45 = vpop.permute.xlu2 %823 }
 0x105   : > { %894 = vst.msk [vmem:[#allocation4 + $0xd0] sm:$0xf] %vm867_vm4, %v824_v45  ;;  %v1356_v45 = vld [vmem:[#allocation2 + $0x61] sm:$0xff] }
 0x106   : > { %v814_v46 = vpop.permute.xlu0 %813 }
 0x107   : > { %889 = vst.msk [vmem:[#allocation4 + $0xa8] sm:$0xf] %vm867_vm4, %v814_v46  ;;  %1227 = vrot.lane.b32.xlu1 %v7000_v1, %s6657_s27 }
 0x109   : > { %v822_v47 = vpop.permute.xlu1 %821 }
 0x10a   : > { %893 = vst.msk [vmem:[#allocation4 + $0xc8] sm:$0xf] %vm867_vm4, %v822_v47  ;;  %1056 = vrot.lane.b32.xlu2 %v7188_v52, %s6656_s23  ;;  %v7306_v47 = vpack.c.bf16 %v1352_v40, %v1352_v40 }
 0x10c   : > { %1225 = vrot.lane.b32.xlu0 %v6987_v51, %s6657_s27  ;;  %v830_v48 = vpop.permute.xlu2 %829 }
 0x10d   : > { %897 = vst.msk [vmem:[#allocation4 + $0xe8] sm:$0xf] %vm867_vm4, %v830_v48  ;;  %v7311_v48 = vpack.c.bf16 %v1356_v45, %v1356_v45 }
 0x10e   : > { %v820_v53 = vpop.permute.xlu0 %819 }
 0x10f   : > { %892 = vst.msk [vmem:[#allocation4 + $0xc0] sm:$0xf] %vm867_vm4, %v820_v53  ;;  %1233 = vrot.lane.b32.xlu1 %v7013_v14, %s6657_s27  ;;  %v1360_v53 = vld [vmem:[#allocation2 + $0x91] sm:$0xff] }
 0x111   : > { %v828_v55 = vpop.permute.xlu1 %827 }
 0x112   : > { %896 = vst.msk [vmem:[#allocation4 + $0xe0] sm:$0xf] %vm867_vm4, %v828_v55  ;;  %1223 = vrot.lane.b32.xlu2 %v7002_v2, %s6657_s27 }
 0x114   : > { %1231 = vrot.lane.b32.xlu0 %v7015_v15, %s6657_s27  ;;  %v997_v51 = vpop.permute.xlu2 %996 }
 0x115   : > { %1093 = vst.msk [vmem:[#allocation4] sm:$0xf] %vm1092_vm5, %v997_v51  ;;  %v1392_v51 = vpack.c.bf16 %v1360_v53, %v1360_v53 }
 0x116   : > { %v826_v1 = vpop.permute.xlu0 %825 }
 0x117   : > { %895 = vst.msk [vmem:[#allocation4 + $0xd8] sm:$0xf] %vm867_vm4, %v826_v1  ;;  %1239 = vrot.lane.b32.xlu1 %v7029_v28, %s6657_s27  ;;  %v1355_v1 = vld [vmem:[#allocation2 + $0x51] sm:$0xff] }
 0x119   : > { %v834_v14 = vpop.permute.xlu1 %833 }
 0x11a   : > { %899 = vst.msk [vmem:[#allocation4 + $0xf8] sm:$0xf] %vm867_vm4, %v834_v14  ;;  %1229 = vrot.lane.b32.xlu2 %v7017_v17, %s6657_s27 }
 0x11c   : > { %1237 = vrot.lane.b32.xlu0 %v7031_v29, %s6657_s27  ;;  %v1003_v2 = vpop.permute.xlu2 %1002 }
 0x11d   : > { %1096 = vst.msk [vmem:[#allocation4 + $0x18] sm:$0xf] %vm1092_vm5, %v1003_v2  ;;  %v1359_v2 = vld [vmem:[#allocation2 + $0x81] sm:$0xff] }
 0x11e   : > { %v832_v15 = vpop.permute.xlu0 %831 }
 0x11f   : > { %898 = vst.msk [vmem:[#allocation4 + $0xf0] sm:$0xf] %vm867_vm4, %v832_v15  ;;  %1245 = vrot.lane.b32.xlu1 %v7045_v41, %s6657_s27  ;;  %v6456_v41 = vunpack.c.l.bf16 %v6472_v60 }
 0x121   : > { %v1001_v28 = vpop.permute.xlu1 %1000  ;;  %576 = vst.msk [vmem:[#allocation2 + $0x181] sm:$0xff] %vm435_vm0, %v6456_v41 }
 0x122   : > { %1095 = vst.msk [vmem:[#allocation4 + $0x10] sm:$0xf] %vm1092_vm5, %v1001_v28  ;;  %1235 = vrot.lane.b32.xlu2 %v7033_v30, %s6657_s27  ;;  %v7319_v28 = vpack.c.bf16 %v1355_v1, %v1355_v1  ;;  %v1374_v1 = vld [vmem:[#allocation2 + $0x139] sm:$0xff] }
 0x124   : > { %1243 = vrot.lane.b32.xlu0 %v7047_v42, %s6657_s27  ;;  %v1009_v17 = vpop.permute.xlu2 %1008 }
 0x125   : > { %1099 = vst.msk [vmem:[#allocation4 + $0x30] sm:$0xf] %vm1092_vm5, %v1009_v17  ;;  %v7323_v17 = vpack.c.bf16 %v1359_v2, %v1359_v2 }
 0x126   : > { %v999_v29 = vpop.permute.xlu0 %998 }
 0x127   : > { %1094 = vst.msk [vmem:[#allocation4 + $0x8] sm:$0xf] %vm1092_vm5, %v999_v29  ;;  %1251 = vrot.lane.b32.xlu1 %v7061_v56, %s6657_s27  ;;  %v1363_v29 = vld [vmem:[#allocation2 + $0xb1] sm:$0xff] }
 0x128   : > { %v1395_v41 = vpack.c.bf16 %v1363_v29, %v1363_v29  ;;  %v1579_v29 = vld [vmem:[#allocation2 + $0x4a] sm:$0xff] }
 0x129   : > { %v1007_v61 = vpop.permute.xlu1 %1006 }
 0x12a   : > { %1098 = vst.msk [vmem:[#allocation4 + $0x28] sm:$0xf] %vm1092_vm5, %v1007_v61  ;;  %1241 = vrot.lane.b32.xlu2 %v7049_v43, %s6657_s27  ;;  %v1358_v61 = vld [vmem:[#allocation2 + $0x79] sm:$0xff] }
 0x12c   : > { %1249 = vrot.lane.b32.xlu0 %v7063_v57, %s6657_s27  ;;  %v1015_v30 = vpop.permute.xlu2 %1014 }
 0x12d   : > { %1102 = vst.msk [vmem:[#allocation4 + $0x48] sm:$0xf] %vm1092_vm5, %v1015_v30 }
 0x12e   : > { %v1005_v42 = vpop.permute.xlu0 %1004 }
 0x12f   : > { %1097 = vst.msk [vmem:[#allocation4 + $0x20] sm:$0xf] %vm1092_vm5, %v1005_v42  ;;  %1257 = vrot.lane.b32.xlu1 %v7079_v10, %s6657_s27  ;;  %v1362_v42 = vld [vmem:[#allocation2 + $0xa9] sm:$0xff] }
 0x131   : > { %v1013_v56 = vpop.permute.xlu1 %1012 }
 0x132   : > { %1101 = vst.msk [vmem:[#allocation4 + $0x40] sm:$0xf] %vm1092_vm5, %v1013_v56  ;;  %1247 = vrot.lane.b32.xlu2 %v7066_v59, %s6657_s27 }
 0x134   : > { %1255 = vrot.lane.b32.xlu0 %v7081_v11, %s6657_s27  ;;  %v1021_v43 = vpop.permute.xlu2 %1020  ;;  %v6457_v11 = vunpack.c.h.bf16 %v6472_v60 }
 0x135   : > { %1105 = vst.msk [vmem:[#allocation4 + $0x60] sm:$0xf] %vm1092_vm5, %v1021_v43  ;;  %v7331_v43 = vpack.c.bf16 %v1358_v61, %v1358_v61 }
 0x136   : > { %v1011_v57 = vpop.permute.xlu0 %1010  ;;  %577 = vst.msk [vmem:[#allocation2 + $0x189] sm:$0xff] %vm435_vm0, %v6457_v11  ;;  %v1361_v11 = vld [vmem:[#allocation2 + $0x99] sm:$0xff] }
 0x137   : > { %1100 = vst.msk [vmem:[#allocation4 + $0x38] sm:$0xf] %vm1092_vm5, %v1011_v57  ;;  %1263 = vrot.lane.b32.xlu1 %v7100_v31, %s6657_s27  ;;  %v7335_v57 = vpack.c.bf16 %v1362_v42, %v1362_v42 }
 0x139   : > { %v1019_v62 = vpop.permute.xlu1 %1018 }
 0x13a   : > { %1104 = vst.msk [vmem:[#allocation4 + $0x58] sm:$0xf] %vm1092_vm5, %v1019_v62  ;;  %1253 = vrot.lane.b32.xlu2 %v7084_v13, %s6657_s27  ;;  %v1366_v62 = vld [vmem:[#allocation2 + $0xd9] sm:$0xff] }
 0x13c   : > { %1261 = vrot.lane.b32.xlu0 %v7102_v32, %s6657_s27  ;;  %v1027_v59 = vpop.permute.xlu2 %1026 }
 0x13d   : > { %1108 = vst.msk [vmem:[#allocation4 + $0x78] sm:$0xf] %vm1092_vm5, %v1027_v59  ;;  %v1156_v22 = vld [vmem:[#allocation2 + $0x188] sm:$0xff] }
 0x13e   : > { %v1017_v10 = vpop.permute.xlu0 %1016  ;;  %v7291_v26 = vpack.c.bf16 %v1156_v22, %v1156_v22  ;;  %v1367_v22 = vld [vmem:[#allocation2 + $0xe1] sm:$0xff] }
 0x13f   : > { %1103 = vst.msk [vmem:[#allocation4 + $0x50] sm:$0xf] %vm1092_vm5, %v1017_v10  ;;  %1269 = vrot.lane.b32.xlu1 %v7121_v49, %s6657_s27  ;;  %v1155_v49 = vld [vmem:[#allocation2 + $0x180] sm:$0xff]  ;;  %v1398_v10 = vpack.c.bf16 %v1366_v62, %v1366_v62  ;;  %v1373_v62 = vld [vmem:[#allocation2 + $0x129] sm:$0xff] }
 0x141   : > { %v1025_v31 = vpop.permute.xlu1 %1024 }
 0x142   : > { %1107 = vst.msk [vmem:[#allocation4 + $0x70] sm:$0xf] %vm1092_vm5, %v1025_v31  ;;  %1259 = vrot.lane.b32.xlu2 %v7105_v34, %s6657_s27  ;;  %v1187_v34 = vpack.c.bf16 %v1155_v49, %v1155_v49  ;;  %v7343_v49 = vpack.c.bf16 %v1361_v11, %v1361_v11 }
 0x144   : > { %1267 = vrot.lane.b32.xlu0 %v7123_v50, %s6657_s27  ;;  %v1033_v13 = vpop.permute.xlu2 %1032 }
 0x145   : > { %1111 = vst.msk [vmem:[#allocation4 + $0x90] sm:$0xf] %vm1092_vm5, %v1033_v13  ;;  %v1365_v13 = vld [vmem:[#allocation2 + $0xc9] sm:$0xff] }
 0x146   : > { %v1023_v32 = vpop.permute.xlu0 %1022 }
 0x147   : > { %1106 = vst.msk [vmem:[#allocation4 + $0x68] sm:$0xf] %vm1092_vm5, %v1023_v32  ;;  %1275 = vrot.lane.b32.xlu1 %v7142_v8, %s6657_s27 }
 0x149   : > { %v1031_v63 = vpop.permute.xlu1 %1030 }
 0x14a   : > { %1110 = vst.msk [vmem:[#allocation4 + $0x88] sm:$0xf] %vm1092_vm5, %v1031_v63  ;;  %1265 = vrot.lane.b32.xlu2 %v7126_v54, %s6657_s27  ;;  %v1383_v54 = vpack.c.bf16 %v1351_v4, %v1351_v4  ;;  %v7347_v63 = vpack.c.bf16 %v1365_v13, %v1365_v13  ;;  %v1364_v4 = vld [vmem:[#allocation2 + $0xc1] sm:$0xff]  ;;  %v1582_v13 = vld [vmem:[#allocation2 + $0x6a] sm:$0xff] }
 0x14c   : > { %1273 = vrot.lane.b32.xlu0 %v7144_v9, %s6657_s27  ;;  %v1039_v50 = vpop.permute.xlu2 %1038  ;;  %v1382_v9 = vpack.c.bf16 %v1350_v7, %v1350_v7  ;;  %v7355_v7 = vpack.c.bf16 %v1364_v4, %v1364_v4 }
 0x14d   : > { %1114 = vst.msk [vmem:[#allocation4 + $0xa8] sm:$0xf] %vm1092_vm5, %v1039_v50 }
 0x14e   : > { %v1029_v3 = vpop.permute.xlu0 %1028 }
 0x14f   : > { %1109 = vst.msk [vmem:[#allocation4 + $0x80] sm:$0xf] %vm1092_vm5, %v1029_v3  ;;  %1281 = vrot.lane.b32.xlu1 %v1187_v34, %s6657_s27  ;;  %v1369_v34 = vld [vmem:[#allocation2 + $0xf9] sm:$0xff] }
 0x150   : > { %v1401_v3 = vpack.c.bf16 %v1369_v34, %v1369_v34  ;;  %v1381_v34 = vld [vmem:[#allocation2 + $0x189] sm:$0xff] }
 0x151   : > { %v1037_v5 = vpop.permute.xlu1 %1036  ;;  %v1413_v4 = vpack.c.bf16 %v1381_v34, %v1381_v34 }
 0x152   : > { %1113 = vst.msk [vmem:[#allocation4 + $0xa0] sm:$0xf] %vm1092_vm5, %v1037_v5  ;;  %1271 = vrot.lane.b32.xlu2 %v7147_v16, %s6657_s27  ;;  %v7287_v16 = vpack.c.bf16 %v1354_v12, %v1354_v12 }
 0x154   : > { %1279 = vrot.lane.b32.xlu0 %v7166_v27, %s6657_s27  ;;  %v1045_v6 = vpop.permute.xlu2 %1044  ;;  %v7296_v27 = vpack.c.bf16 %v1353_v24, %v1353_v24  ;;  %v1371_v24 = vld [vmem:[#allocation2 + $0x111] sm:$0xff] }
 0x155   : > { %1117 = vst.msk [vmem:[#allocation4 + $0xc0] sm:$0xf] %vm1092_vm5, %v1045_v6  ;;  %v1403_v40 = vpack.c.bf16 %v1371_v24, %v1371_v24  ;;  %v1379_v24 = vld [vmem:[#allocation2 + $0x171] sm:$0xff] }
 0x156   : > { %v1035_v8 = vpop.permute.xlu0 %1034 }
 0x157   : > { %1112 = vst.msk [vmem:[#allocation4 + $0x98] sm:$0xf] %vm1092_vm5, %v1035_v8  ;;  %1448 = vrot.lane.b32.xlu1 %v1383_v54, %s6658_s30  ;;  %v1368_v54 = vld [vmem:[#allocation2 + $0xf1] sm:$0xff] }
 0x158   : > { %v1400_v8 = vpack.c.bf16 %v1368_v54, %v1368_v54 }
 0x159   : > { %v1043_v19 = vpop.permute.xlu1 %1042 }
 0x15a   : > { %1116 = vst.msk [vmem:[#allocation4 + $0xb8] sm:$0xf] %vm1092_vm5, %v1043_v19  ;;  %1277 = vrot.lane.b32.xlu2 %v7168_v33, %s6657_s27  ;;  %v1357_v33 = vld [vmem:[#allocation2 + $0x69] sm:$0xff] }
 0x15b   : > { %v7301_v37 = vpack.c.bf16 %v1357_v33, %v1357_v33  ;;  %v7364_v33 = vpack.c.bf16 %v1367_v22, %v1367_v22 }
 0x15c   : > { %1446 = vrot.lane.b32.xlu0 %v1382_v9, %s6658_s30  ;;  %v1051_v23 = vpop.permute.xlu2 %1050  ;;  %v1372_v9 = vld [vmem:[#allocation2 + $0x121] sm:$0xff] }
 0x15d   : > { %1120 = vst.msk [vmem:[#allocation4 + $0xd8] sm:$0xf] %vm1092_vm5, %v1051_v23  ;;  %v1404_v19 = vpack.c.bf16 %v1372_v9, %v1372_v9 }
 0x15e   : > { %v1041_v25 = vpop.permute.xlu0 %1040 }
 0x15f   : > { %1115 = vst.msk [vmem:[#allocation4 + $0xb0] sm:$0xf] %vm1092_vm5, %v1041_v25  ;;  %1454 = vrot.lane.b32.xlu1 %v7287_v16, %s6658_s30 }
 0x161   : > { %v1049_v35 = vpop.permute.xlu1 %1048 }
 0x162   : > { %1119 = vst.msk [vmem:[#allocation4 + $0xd0] sm:$0xf] %vm1092_vm5, %v1049_v35  ;;  %1283 = vrot.lane.b32.xlu2 %v7291_v26, %s6657_s27  ;;  %v1577_v35 = vld [vmem:[#allocation2 + $0x32] sm:$0xff]  ;;  %s9098_s27 = scalar_lea.vmem [#allocation9], %s5793_s18  ;;  %s6604_s18 = scalar_lea.hbm %s9164_s12, 128 }
 0x164   : > { %1452 = vrot.lane.b32.xlu0 %v7296_v27, %s6658_s30  ;;  %v1057_v44 = vpop.permute.xlu2 %1056 }
 0x165   : > { %1123 = vst.msk [vmem:[#allocation4 + $0xf0] sm:$0xf] %vm1092_vm5, %v1057_v44  ;;  %v1375_v44 = vld [vmem:[#allocation2 + $0x141] sm:$0xff] }
 0x166   : > { %v1047_v46 = vpop.permute.xlu0 %1046  ;;  %v1407_v53 = vpack.c.bf16 %v1375_v44, %v1375_v44  ;;  %v1411_v44 = vpack.c.bf16 %v1379_v24, %v1379_v24 }
 0x167   : > { %1118 = vst.msk [vmem:[#allocation4 + $0xc8] sm:$0xf] %vm1092_vm5, %v1047_v46  ;;  %1460 = vrot.lane.b32.xlu1 %v7301_v37, %s6658_s30  ;;  %v7368_v46 = vpack.c.bf16 %v1577_v35, %v1577_v35  ;;  %v1576_v35 = vld [vmem:[#allocation2 + $0x22] sm:$0xff] }
 0x169   : > { %v1055_v55 = vpop.permute.xlu1 %1054  ;;  %2315 = vst.msk [vmem:[#allocation4 + $0x4] sm:$0xf] %vm642_vm3, %v7368_v46 }
 0x16a   : > { %1122 = vst.msk [vmem:[#allocation4 + $0xe8] sm:$0xf] %vm1092_vm5, %v1055_v55  ;;  %1450 = vrot.lane.b32.xlu2 %v7306_v47, %s6658_s30  ;;  %v1370_v55 = vld [vmem:[#allocation2 + $0x109] sm:$0xff] }
 0x16b   : > { %v1402_v2 = vpack.c.bf16 %v1370_v55, %v1370_v55 }
 0x16c   : > { %1458 = vrot.lane.b32.xlu0 %v7311_v48, %s6658_s30  ;;  %v1224_v14 = vpop.permute.xlu2 %1223 }
 0x16d   : > { %1319 = vst.msk [vmem:[#allocation4 + $0x8] sm:$0xf] %vm1317_vm6, %v1224_v14 }
 0x16e   : > { %v1053_v15 = vpop.permute.xlu0 %1052 }
 0x16f   : > { %1121 = vst.msk [vmem:[#allocation4 + $0xe0] sm:$0xf] %vm1092_vm5, %v1053_v15  ;;  %1466 = vrot.lane.b32.xlu1 %v1392_v51, %s6658_s30  ;;  %v1580_v15 = vld [vmem:[#allocation2 + $0x52] sm:$0xff] }
 0x170   : > { %v1612_v42 = vpack.c.bf16 %v1580_v15, %v1580_v15 }
 0x171   : > { %v1222_v60 = vpop.permute.xlu1 %1221 }
 0x172   : > { %1318 = vst.msk [vmem:[#allocation4] sm:$0xf] %vm1317_vm6, %v1222_v60  ;;  %1456 = vrot.lane.b32.xlu2 %v7319_v28, %s6658_s30  ;;  %v1406_v60 = vpack.c.bf16 %v1374_v1, %v1374_v1  ;;  %v1575_v1 = vld [vmem:[#allocation2 + $0x1a] sm:$0xff] }
 0x173   : > { %2318 = vst.msk [vmem:[#allocation4 + $0x1c] sm:$0xf] %vm642_vm3, %v1612_v42  ;;  %v1607_v15 = vpack.c.bf16 %v1575_v1, %v1575_v1 }
 0x174   : > { %1464 = vrot.lane.b32.xlu0 %v7323_v17, %s6658_s30  ;;  %v1230_v30 = vpop.permute.xlu2 %1229 }
 0x175   : > { %1322 = vst.msk [vmem:[#allocation4 + $0x20] sm:$0xf] %vm1317_vm6, %v1230_v30  ;;  %v7379_v30 = vpack.c.bf16 %v1579_v29, %v1579_v29  ;;  %v1583_v29 = vld [vmem:[#allocation2 + $0x7a] sm:$0xff] }
 0x176   : > { %v1059_v56 = vpop.permute.xlu0 %1058 }
 0x177   : > { %1124 = vst.msk [vmem:[#allocation4 + $0xf8] sm:$0xf] %vm1092_vm5, %v1059_v56  ;;  %1472 = vrot.lane.b32.xlu1 %v1395_v41, %s6658_s30  ;;  %v1378_v41 = vld [vmem:[#allocation2 + $0x169] sm:$0xff] }
 0x178   : > { %v1410_v56 = vpack.c.bf16 %v1378_v41, %v1378_v41  ;;  %2317 = vst.msk [vmem:[#allocation4 + $0x14] sm:$0xf] %vm642_vm3, %v7379_v30 }
 0x179   : > { %v1228_v59 = vpop.permute.xlu1 %1227 }
 0x17a   : > { %1321 = vst.msk [vmem:[#allocation4 + $0x18] sm:$0xf] %vm1317_vm6, %v1228_v59  ;;  %1462 = vrot.lane.b32.xlu2 %v7331_v43, %s6658_s30 }
 0x17c   : > { %1470 = vrot.lane.b32.xlu0 %v7335_v57, %s6658_s30  ;;  %v1236_v31 = vpop.permute.xlu2 %1235 }
 0x17d   : > { %1325 = vst.msk [vmem:[#allocation4 + $0x38] sm:$0xf] %vm1317_vm6, %v1236_v31  ;;  %v1405_v31 = vpack.c.bf16 %v1373_v62, %v1373_v62 }
 0x17e   : > { %v1226_v32 = vpop.permute.xlu0 %1225 }
 0x17f   : > { %1320 = vst.msk [vmem:[#allocation4 + $0x10] sm:$0xf] %vm1317_vm6, %v1226_v32  ;;  %1478 = vrot.lane.b32.xlu1 %v1398_v10, %s6658_s30  ;;  %v1377_v10 = vld [vmem:[#allocation2 + $0x159] sm:$0xff] }
 0x180   : > { %v1409_v32 = vpack.c.bf16 %v1377_v10, %v1377_v10 }
 0x181   : > { %v1234_v50 = vpop.permute.xlu1 %1233 }
 0x182   : > { %1324 = vst.msk [vmem:[#allocation4 + $0x30] sm:$0xf] %vm1317_vm6, %v1234_v50  ;;  %1468 = vrot.lane.b32.xlu2 %v7343_v49, %s6658_s30 }
 0x184   : > { %1476 = vrot.lane.b32.xlu0 %v7347_v63, %s6658_s30  ;;  %v1242_v5 = vpop.permute.xlu2 %1241 }
 0x185   : > { %1328 = vst.msk [vmem:[#allocation4 + $0x50] sm:$0xf] %vm1317_vm6, %v1242_v5  ;;  %v1376_v5 = vld [vmem:[#allocation2 + $0x151] sm:$0xff] }
 0x186   : > { %v1232_v6 = vpop.permute.xlu0 %1231  ;;  %v1408_v9 = vpack.c.bf16 %v1376_v5, %v1376_v5  ;;  %v1592_v5 = vld [vmem:[#allocation2 + $0xe2] sm:$0xff] }
 0x187   : > { %1323 = vst.msk [vmem:[#allocation4 + $0x28] sm:$0xf] %vm1317_vm6, %v1232_v6  ;;  %1484 = vrot.lane.b32.xlu1 %v1401_v3, %s6658_s30  ;;  %v7390_v3 = vpack.c.bf16 %v1582_v13, %v1582_v13  ;;  %v1380_v6 = vld [vmem:[#allocation2 + $0x181] sm:$0xff] }
 0x189   : > { %v1240_v12 = vpop.permute.xlu1 %1239  ;;  %2320 = vst.msk [vmem:[#allocation4 + $0x2c] sm:$0xf] %vm642_vm3, %v7390_v3 }
 0x18a   : > { %1327 = vst.msk [vmem:[#allocation4 + $0x48] sm:$0xf] %vm1317_vm6, %v1240_v12  ;;  %1474 = vrot.lane.b32.xlu2 %v7355_v7, %s6658_s30  ;;  %v1578_v12 = vld [vmem:[#allocation2 + $0x3a] sm:$0xff] }
 0x18c   : > { %1482 = vrot.lane.b32.xlu0 %v1400_v8, %s6658_s30  ;;  %v1248_v23 = vpop.permute.xlu2 %1247 }
 0x18d   : > { %1331 = vst.msk [vmem:[#allocation4 + $0x68] sm:$0xf] %vm1317_vm6, %v1248_v23  ;;  %v1610_v23 = vpack.c.bf16 %v1578_v12, %v1578_v12 }
 0x18e   : > { %v1238_v25 = vpop.permute.xlu0 %1237 }
 0x18f   : > { %1326 = vst.msk [vmem:[#allocation4 + $0x40] sm:$0xf] %vm1317_vm6, %v1238_v25  ;;  %1490 = vrot.lane.b32.xlu1 %v1404_v19, %s6658_s30  ;;  %v1412_v19 = vpack.c.bf16 %v1380_v6, %v1380_v6  ;;  %v1624_v6 = vpack.c.bf16 %v1592_v5, %v1592_v5  ;;  %v1807_v5 = vld [vmem:[#allocation2 + $0x78] sm:$0xff] }
 0x190   : > { %2316 = vst.msk [vmem:[#allocation4 + $0xc] sm:$0xf] %vm642_vm3, %v1610_v23 }
 0x191   : > { %v1246_v45 = vpop.permute.xlu1 %1245 }
 0x192   : > { %1330 = vst.msk [vmem:[#allocation4 + $0x60] sm:$0xf] %vm1317_vm6, %v1246_v45  ;;  %1480 = vrot.lane.b32.xlu2 %v7364_v33, %s6658_s30  ;;  %v1581_v45 = vld [vmem:[#allocation2 + $0x62] sm:$0xff] }
 0x194   : > { %1488 = vrot.lane.b32.xlu0 %v1403_v40, %s6658_s30  ;;  %v1254_v51 = vpop.permute.xlu2 %1253 }
 0x195   : > { %1334 = vst.msk [vmem:[#allocation4 + $0x80] sm:$0xf] %vm1317_vm6, %v1254_v51  ;;  %v1613_v51 = vpack.c.bf16 %v1581_v45, %v1581_v45 }
 0x196   : > { %v1244_v14 = vpop.permute.xlu0 %1243 }
 0x197   : > { %1329 = vst.msk [vmem:[#allocation4 + $0x58] sm:$0xf] %vm1317_vm6, %v1244_v14  ;;  %1496 = vrot.lane.b32.xlu1 %v1407_v53, %s6658_s30  ;;  %v1608_v53 = vpack.c.bf16 %v1576_v35, %v1576_v35 }
 0x198   : > { %2319 = vst.msk [vmem:[#allocation4 + $0x24] sm:$0xf] %vm642_vm3, %v1613_v51 }
 0x199   : > { %v1252_v61 = vpop.permute.xlu1 %1251 }
 0x19a   : > { %1333 = vst.msk [vmem:[#allocation4 + $0x78] sm:$0xf] %vm1317_vm6, %v1252_v61  ;;  %1486 = vrot.lane.b32.xlu2 %v1402_v2, %s6658_s30  ;;  %v1615_v61 = vpack.c.bf16 %v1583_v29, %v1583_v29 }
 0x19c   : > { %1494 = vrot.lane.b32.xlu0 %v1406_v60, %s6658_s30  ;;  %v1260_v59 = vpop.permute.xlu2 %1259 }
 0x19d   : > { %1337 = vst.msk [vmem:[#allocation4 + $0x98] sm:$0xf] %vm1317_vm6, %v1260_v59 }
 0x19e   : > { %v1250_v11 = vpop.permute.xlu0 %1249 }
 0x19f   : > { %1332 = vst.msk [vmem:[#allocation4 + $0x70] sm:$0xf] %vm1317_vm6, %v1250_v11  ;;  %1502 = vrot.lane.b32.xlu1 %v1410_v56, %s6658_s30  ;;  %v1585_v11 = vld [vmem:[#allocation2 + $0x92] sm:$0xff] }
 0x1a0   : > { %v1617_v13 = vpack.c.bf16 %v1585_v11, %v1585_v11  ;;  %v1804_v11 = vld [vmem:[#allocation2 + $0x50] sm:$0xff] }
 0x1a1   : > { %v1258_v50 = vpop.permute.xlu1 %1257 }
 0x1a2   : > { %1336 = vst.msk [vmem:[#allocation4 + $0x90] sm:$0xf] %vm1317_vm6, %v1258_v50  ;;  %1492 = vrot.lane.b32.xlu2 %v1405_v31, %s6658_s30 }
 0x1a4   : > { %1500 = vrot.lane.b32.xlu0 %v1409_v32, %s6658_s30  ;;  %v1266_v54 = vpop.permute.xlu2 %1265  ;;  %v1589_v32 = vld [vmem:[#allocation2 + $0xc2] sm:$0xff] }
 0x1a5   : > { %1340 = vst.msk [vmem:[#allocation4 + $0xb0] sm:$0xf] %vm1317_vm6, %v1266_v54  ;;  %v1621_v50 = vpack.c.bf16 %v1589_v32, %v1589_v32 }
 0x1a6   : > { %v1256_v8 = vpop.permute.xlu0 %1255 }
 0x1a7   : > { %1335 = vst.msk [vmem:[#allocation4 + $0x88] sm:$0xf] %vm1317_vm6, %v1256_v8  ;;  %1508 = vrot.lane.b32.xlu1 %v1413_v4, %s6658_s30  ;;  %v1587_v8 = vld [vmem:[#allocation2 + $0xaa] sm:$0xff] }
 0x1a9   : > { %v1264_v22 = vpop.permute.xlu1 %1263 }
 0x1aa   : > { %1339 = vst.msk [vmem:[#allocation4 + $0xa8] sm:$0xf] %vm1317_vm6, %v1264_v22  ;;  %1498 = vrot.lane.b32.xlu2 %v1408_v9, %s6658_s30  ;;  %v1595_v22 = vld [vmem:[#allocation2 + $0x10a] sm:$0xff] }
 0x1ab   : > { %v1627_v24 = vpack.c.bf16 %v1595_v22, %v1595_v22 }
 0x1ac   : > { %1506 = vrot.lane.b32.xlu0 %v1412_v19, %s6658_s30  ;;  %v1272_v25 = vpop.permute.xlu2 %1271  ;;  %v1619_v19 = vpack.c.bf16 %v1587_v8, %v1587_v8  ;;  %v1802_v8 = vld [vmem:[#allocation2 + $0x38] sm:$0xff] }
 0x1ad   : > { %1343 = vst.msk [vmem:[#allocation4 + $0xc8] sm:$0xf] %vm1317_vm6, %v1272_v25  ;;  %v1590_v25 = vld [vmem:[#allocation2 + $0xca] sm:$0xff]  ;;  %v1834_v22 = vpack.c.bf16 %v1802_v8, %v1802_v8  ;;  %v1823_v8 = vld [vmem:[#allocation2 + $0x138] sm:$0xff] }
 0x1ae   : > { %v1262_v40 = vpop.permute.xlu0 %1261 }
 0x1af   : > { %1338 = vst.msk [vmem:[#allocation4 + $0xa0] sm:$0xf] %vm1317_vm6, %v1262_v40  ;;  %1675 = vrot.lane.b32.xlu1 %v7368_v46, %s6659_s14  ;;  %v1584_v46 = vld [vmem:[#allocation2 + $0x82] sm:$0xff]  ;;  %v1622_v40 = vpack.c.bf16 %v1590_v25, %v1590_v25 }
 0x1b0   : > { %v1616_v41 = vpack.c.bf16 %v1584_v46, %v1584_v46 }
 0x1b1   : > { %v1270_v55 = vpop.permute.xlu1 %1269 }
 0x1b2   : > { %1342 = vst.msk [vmem:[#allocation4 + $0xc0] sm:$0xf] %vm1317_vm6, %v1270_v55  ;;  %1504 = vrot.lane.b32.xlu2 %v1411_v44, %s6658_s30  ;;  %v1598_v44 = vld [vmem:[#allocation2 + $0x12a] sm:$0xff]  ;;  %v1593_v55 = vld [vmem:[#allocation2 + $0xf2] sm:$0xff] }
 0x1b3   : > { %2322 = vst.msk [vmem:[#allocation4 + $0x3c] sm:$0xf] %vm642_vm3, %v1616_v41  ;;  %v1625_v1 = vpack.c.bf16 %v1593_v55, %v1593_v55 }
 0x1b4   : > { %1673 = vrot.lane.b32.xlu0 %v1608_v53, %s6659_s14  ;;  %v1278_v14 = vpop.permute.xlu2 %1277  ;;  %v1630_v53 = vpack.c.bf16 %v1598_v44, %v1598_v44  ;;  %v1809_v44 = vld [vmem:[#allocation2 + $0x90] sm:$0xff] }
 0x1b5   : > { %1346 = vst.msk [vmem:[#allocation4 + $0xe0] sm:$0xf] %vm1317_vm6, %v1278_v14  ;;  %v1841_v55 = vpack.c.bf16 %v1809_v44, %v1809_v44 }
 0x1b6   : > { %v1268_v2 = vpop.permute.xlu0 %1267 }
 0x1b7   : > { %1341 = vst.msk [vmem:[#allocation4 + $0xb8] sm:$0xf] %vm1317_vm6, %v1268_v2  ;;  %1681 = vrot.lane.b32.xlu1 %v1612_v42, %s6659_s14  ;;  %v1586_v42 = vld [vmem:[#allocation2 + $0x9a] sm:$0xff]  ;;  %v1596_v2 = vld [vmem:[#allocation2 + $0x112] sm:$0xff] }
 0x1b8   : > { %v1618_v10 = vpack.c.bf16 %v1586_v42, %v1586_v42  ;;  %v1628_v46 = vpack.c.bf16 %v1596_v2, %v1596_v2  ;;  %v1602_v42 = vld [vmem:[#allocation2 + $0x15a] sm:$0xff] }
 0x1b9   : > { %v1276_v60 = vpop.permute.xlu1 %1275 }
 0x1ba   : > { %1345 = vst.msk [vmem:[#allocation4 + $0xd8] sm:$0xf] %vm1317_vm6, %v1276_v60  ;;  %1671 = vrot.lane.b32.xlu2 %v1607_v15, %s6659_s14  ;;  %v1599_v60 = vld [vmem:[#allocation2 + $0x13a] sm:$0xff] }
 0x1bc   : > { %1679 = vrot.lane.b32.xlu0 %v7379_v30, %s6659_s14  ;;  %v1284_v56 = vpop.permute.xlu2 %1283 }
 0x1bd   : > { %1349 = vst.msk [vmem:[#allocation4 + $0xf8] sm:$0xf] %vm1317_vm6, %v1284_v56 }
 0x1be   : > { %v1274_v62 = vpop.permute.xlu0 %1273 }
 0x1bf   : > { %1344 = vst.msk [vmem:[#allocation4 + $0xd0] sm:$0xf] %vm1317_vm6, %v1274_v62  ;;  %1687 = vrot.lane.b32.xlu1 %v1615_v61, %s6659_s14  ;;  %v1631_v61 = vpack.c.bf16 %v1599_v60, %v1599_v60  ;;  %v1816_v60 = vld [vmem:[#allocation2 + $0xe0] sm:$0xff] }
 0x1c1   : > { %v1282_v59 = vpop.permute.xlu1 %1281 }
 0x1c2   : > { %1348 = vst.msk [vmem:[#allocation4 + $0xf0] sm:$0xf] %vm1317_vm6, %v1282_v59  ;;  %1677 = vrot.lane.b32.xlu2 %v1610_v23, %s6659_s14  ;;  %v1606_v59 = vld [vmem:[#allocation2 + $0x18a] sm:$0xff] }
 0x1c4   : > { %1685 = vrot.lane.b32.xlu0 %v7390_v3, %s6659_s14  ;;  %v1451_v30 = vpop.permute.xlu2 %1450 }
 0x1c5   : > { %1545 = vst.msk [vmem:[#allocation4 + $0x10] sm:$0xf] %vm1542_vm7, %v1451_v30  ;;  %v1634_v30 = vpack.c.bf16 %v1602_v42, %v1602_v42 }
 0x1c6   : > { %v1280_v31 = vpop.permute.xlu0 %1279 }
 0x1c7   : > { %1347 = vst.msk [vmem:[#allocation4 + $0xe8] sm:$0xf] %vm1317_vm6, %v1280_v31  ;;  %1693 = vrot.lane.b32.xlu1 %v1618_v10, %s6659_s14 }
 0x1c9   : > { %v1449_v34 = vpop.permute.xlu1 %1448 }
 0x1ca   : > { %1544 = vst.msk [vmem:[#allocation4 + $0x8] sm:$0xf] %vm1542_vm7, %v1449_v34  ;;  %1683 = vrot.lane.b32.xlu2 %v1613_v51, %s6659_s14  ;;  %v1803_v34 = vld [vmem:[#allocation2 + $0x48] sm:$0xff] }
 0x1cc   : > { %1691 = vrot.lane.b32.xlu0 %v1617_v13, %s6659_s14  ;;  %v1457_v3 = vpop.permute.xlu2 %1456  ;;  %v1836_v13 = vpack.c.bf16 %v1804_v11, %v1804_v11 }
 0x1cd   : > { %1548 = vst.msk [vmem:[#allocation4 + $0x28] sm:$0xf] %vm1542_vm7, %v1457_v3 }
 0x1ce   : > { %v1447_v4 = vpop.permute.xlu0 %1446 }
 0x1cf   : > { %1543 = vst.msk [vmem:[#allocation4] sm:$0xf] %vm1542_vm7, %v1447_v4  ;;  %1699 = vrot.lane.b32.xlu1 %v1621_v50, %s6659_s14  ;;  %v1835_v4 = vpack.c.bf16 %v1803_v34, %v1803_v34 }
 0x1d1   : > { %v1455_v54 = vpop.permute.xlu1 %1454 }
 0x1d2   : > { %1547 = vst.msk [vmem:[#allocation4 + $0x20] sm:$0xf] %vm1542_vm7, %v1455_v54  ;;  %1689 = vrot.lane.b32.xlu2 %v1616_v41, %s6659_s14 }
 0x1d4   : > { %1697 = vrot.lane.b32.xlu0 %v7086_v18, %s6659_s14  ;;  %v1463_v9 = vpop.permute.xlu2 %1462 }
 0x1d5   : > { %1551 = vst.msk [vmem:[#allocation4 + $0x40] sm:$0xf] %vm1542_vm7, %v1463_v9 }
 0x1d6   : > { %v1453_v12 = vpop.permute.xlu0 %1452 }
 0x1d7   : > { %1546 = vst.msk [vmem:[#allocation4 + $0x18] sm:$0xf] %vm1542_vm7, %v1453_v12  ;;  %1705 = vrot.lane.b32.xlu1 %v1624_v6, %s6659_s14  ;;  %v1839_v6 = vpack.c.bf16 %v1807_v5, %v1807_v5  ;;  %v1806_v12 = vld [vmem:[#allocation2 + $0x68] sm:$0xff] }
 0x1d9   : > { %v1461_v23 = vpop.permute.xlu1 %1460 }
 0x1da   : > { %1550 = vst.msk [vmem:[#allocation4 + $0x38] sm:$0xf] %vm1542_vm7, %v1461_v23  ;;  %1695 = vrot.lane.b32.xlu2 %v1619_v19, %s6659_s14  ;;  %v1838_v23 = vpack.c.bf16 %v1806_v12, %v1806_v12  ;;  %v1855_v12 = vpack.c.bf16 %v1823_v8, %v1823_v8 }
 0x1dc   : > { %1703 = vrot.lane.b32.xlu0 %v7107_v36, %s6659_s14  ;;  %v1469_v18 = vpop.permute.xlu2 %1468 }
 0x1dd   : > { %1554 = vst.msk [vmem:[#allocation4 + $0x58] sm:$0xf] %vm1542_vm7, %v1469_v18 }
 0x1de   : > { %v1459_v35 = vpop.permute.xlu0 %1458 }
 0x1df   : > { %1549 = vst.msk [vmem:[#allocation4 + $0x30] sm:$0xf] %vm1542_vm7, %v1459_v35  ;;  %1711 = vrot.lane.b32.xlu1 %v1627_v24, %s6659_s14  ;;  %v1810_v24 = vld [vmem:[#allocation2 + $0x98] sm:$0xff]  ;;  %v1805_v35 = vld [vmem:[#allocation2 + $0x60] sm:$0xff] }
 0x1e0   : > { %v1842_v18 = vpack.c.bf16 %v1810_v24, %v1810_v24 }
 0x1e1   : > { %v1467_v45 = vpop.permute.xlu1 %1466 }
 0x1e2   : > { %1553 = vst.msk [vmem:[#allocation4 + $0x50] sm:$0xf] %vm1542_vm7, %v1467_v45  ;;  %1701 = vrot.lane.b32.xlu2 %v1622_v40, %s6659_s14 }
 0x1e4   : > { %1709 = vrot.lane.b32.xlu0 %v7128_v58, %s6659_s14  ;;  %v1475_v36 = vpop.permute.xlu2 %1474 }
 0x1e5   : > { %1557 = vst.msk [vmem:[#allocation4 + $0x70] sm:$0xf] %vm1542_vm7, %v1475_v36  ;;  %v1813_v36 = vld [vmem:[#allocation2 + $0xc0] sm:$0xff] }
 0x1e6   : > { %v1465_v51 = vpop.permute.xlu0 %1464 }
 0x1e7   : > { %1552 = vst.msk [vmem:[#allocation4 + $0x48] sm:$0xf] %vm1542_vm7, %v1465_v51  ;;  %1717 = vrot.lane.b32.xlu1 %v1630_v53, %s6659_s14  ;;  %v1837_v53 = vpack.c.bf16 %v1805_v35, %v1805_v35 }
 0x1e9   : > { %v1473_v14 = vpop.permute.xlu1 %1472 }
 0x1ea   : > { %1556 = vst.msk [vmem:[#allocation4 + $0x68] sm:$0xf] %vm1542_vm7, %v1473_v14  ;;  %1707 = vrot.lane.b32.xlu2 %v1625_v1, %s6659_s14  ;;  %v1845_v1 = vpack.c.bf16 %v1813_v36, %v1813_v36  ;;  %v1808_v14 = vld [vmem:[#allocation2 + $0x80] sm:$0xff] }
 0x1ec   : > { %1715 = vrot.lane.b32.xlu0 %v7149_v20, %s6659_s14  ;;  %v1481_v15 = vpop.permute.xlu2 %1480 }
 0x1ed   : > { %1560 = vst.msk [vmem:[#allocation4 + $0x88] sm:$0xf] %vm1542_vm7, %v1481_v15  ;;  %v1812_v15 = vld [vmem:[#allocation2 + $0xb0] sm:$0xff] }
 0x1ee   : > { %v1471_v58 = vpop.permute.xlu0 %1470 }
 0x1ef   : > { %1555 = vst.msk [vmem:[#allocation4 + $0x60] sm:$0xf] %vm1542_vm7, %v1471_v58  ;;  %1723 = vrot.lane.b32.xlu1 %v7155_v21, %s6659_s14  ;;  %v1801_v21 = vld [vmem:[#allocation2 + $0x30] sm:$0xff] }
 0x1f0   : > { %v1833_v62 = vpack.c.bf16 %v1801_v21, %v1801_v21 }
 0x1f1   : > { %v1479_v29 = vpop.permute.xlu1 %1478 }
 0x1f2   : > { %1559 = vst.msk [vmem:[#allocation4 + $0x80] sm:$0xf] %vm1542_vm7, %v1479_v29  ;;  %1713 = vrot.lane.b32.xlu2 %v1628_v46, %s6659_s14  ;;  %v1840_v46 = vpack.c.bf16 %v1808_v14, %v1808_v14  ;;  %v1844_v29 = vpack.c.bf16 %v1812_v15, %v1812_v15  ;;  %v1826_v14 = vld [vmem:[#allocation2 + $0x158] sm:$0xff] }
 0x1f4   : > { %1721 = vrot.lane.b32.xlu0 %v7171_v38, %s6659_s14  ;;  %v1487_v20 = vpop.permute.xlu2 %1486 }
 0x1f5   : > { %1563 = vst.msk [vmem:[#allocation4 + $0xa0] sm:$0xf] %vm1542_vm7, %v1487_v20 }
 0x1f6   : > { %v1477_v41 = vpop.permute.xlu0 %1476 }
 0x1f7   : > { %1558 = vst.msk [vmem:[#allocation4 + $0x78] sm:$0xf] %vm1542_vm7, %v1477_v41  ;;  %1729 = vrot.lane.b32.xlu1 %v7178_v39, %s6659_s14  ;;  %v1638_v39 = vpack.c.bf16 %v1606_v59, %v1606_v59  ;;  %v1848_v41 = vpack.c.bf16 %v1816_v60, %v1816_v60  ;;  %v1819_v59 = vld [vmem:[#allocation2 + $0x108] sm:$0xff] }
 0x1f9   : > { %v1485_v56 = vpop.permute.xlu1 %1484 }
 0x1fa   : > { %1562 = vst.msk [vmem:[#allocation4 + $0x98] sm:$0xf] %vm1542_vm7, %v1485_v56  ;;  %1719 = vrot.lane.b32.xlu2 %v1631_v61, %s6659_s14  ;;  %v1811_v61 = vld [vmem:[#allocation2 + $0xa8] sm:$0xff]  ;;  %v1815_v56 = vld [vmem:[#allocation2 + $0xd8] sm:$0xff] }
 0x1fb   : > { %v1843_v42 = vpack.c.bf16 %v1811_v61, %v1811_v61 }
 0x1fc   : > { %1727 = vrot.lane.b32.xlu0 %v7188_v52, %s6659_s14  ;;  %v1493_v38 = vpop.permute.xlu2 %1492  ;;  %v1605_v52 = vld [vmem:[#allocation2 + $0x182] sm:$0xff] }
 0x1fd   : > { %1566 = vst.msk [vmem:[#allocation4 + $0xb8] sm:$0xf] %vm1542_vm7, %v1493_v38  ;;  %v1637_v3 = vpack.c.bf16 %v1605_v52, %v1605_v52  ;;  %v1847_v38 = vpack.c.bf16 %v1815_v56, %v1815_v56 }
 0x1fe   : > { %v1483_v10 = vpop.permute.xlu0 %1482 }
 0x1ff   : > { %1561 = vst.msk [vmem:[#allocation4 + $0x90] sm:$0xf] %vm1542_vm7, %v1483_v10  ;;  %1897 = vrot.lane.b32.xlu1 %v1833_v62, %s6660_s19 }
 0x201   : > { %v1491_v31 = vpop.permute.xlu1 %1490 }
 0x202   : > { %1565 = vst.msk [vmem:[#allocation4 + $0xb0] sm:$0xf] %vm1542_vm7, %v1491_v31  ;;  %1725 = vrot.lane.b32.xlu2 %v1634_v30, %s6659_s14  ;;  %v1851_v30 = vpack.c.bf16 %v1819_v59, %v1819_v59  ;;  %v1818_v31 = vld [vmem:[#allocation2 + $0xf8] sm:$0xff] }
 0x204   : > { %1733 = vrot.lane.b32.xlu0 %v1638_v39, %s6659_s14  ;;  %v1499_v32 = vpop.permute.xlu2 %1498  ;;  %v1814_v39 = vld [vmem:[#allocation2 + $0xc8] sm:$0xff] }
 0x205   : > { %1569 = vst.msk [vmem:[#allocation4 + $0xd0] sm:$0xf] %vm1542_vm7, %v1499_v32  ;;  %v1846_v52 = vpack.c.bf16 %v1814_v39, %v1814_v39  ;;  %v1850_v32 = vpack.c.bf16 %v1818_v31, %v1818_v31 }
 0x206   : > { %v1489_v50 = vpop.permute.xlu0 %1488 }
 0x207   : > { %1564 = vst.msk [vmem:[#allocation4 + $0xa8] sm:$0xf] %vm1542_vm7, %v1489_v50  ;;  %1903 = vrot.lane.b32.xlu1 %v1836_v13, %s6660_s19  ;;  %v1817_v50 = vld [vmem:[#allocation2 + $0xf0] sm:$0xff] }
 0x209   : > { %v1497_v54 = vpop.permute.xlu1 %1496 }
 0x20a   : > { %1568 = vst.msk [vmem:[#allocation4 + $0xc8] sm:$0xf] %vm1542_vm7, %v1497_v54  ;;  %1731 = vrot.lane.b32.xlu2 %v1637_v3, %s6659_s14  ;;  %v1849_v54 = vpack.c.bf16 %v1817_v50, %v1817_v50  ;;  %s6393_s14 = sshll.u32 %s6750_s25, 6  ;;  %s5709_s25 = sshll.u32 %s9098_s27, 4  ;;  %s5710_s25 = int_to_ptr.vmem [resolvable:$true] %s5709_s25 }
 0x20c   : > { %1901 = vrot.lane.b32.xlu0 %v1835_v4, %s6660_s19  ;;  %v1505_v9 = vpop.permute.xlu2 %1504  ;;  %v1821_v4 = vld [vmem:[#allocation2 + $0x120] sm:$0xff] }
 0x20d   : > { %1572 = vst.msk [vmem:[#allocation4 + $0xe8] sm:$0xf] %vm1542_vm7, %v1505_v9 }
 0x20e   : > { %v1495_v19 = vpop.permute.xlu0 %1494 }
 0x20f   : > { %1567 = vst.msk [vmem:[#allocation4 + $0xc0] sm:$0xf] %vm1542_vm7, %v1495_v19  ;;  %1909 = vrot.lane.b32.xlu1 %v1839_v6, %s6660_s19  ;;  %v1853_v6 = vpack.c.bf16 %v1821_v4, %v1821_v4  ;;  %v1820_v19 = vld [vmem:[#allocation2 + $0x110] sm:$0xff]  ;;  %v6316_v4 = vld [vmem:[%s9153_s1 + $0x20] sm:$0xff] }
 0x211   : > { %v1503_v25 = vpop.permute.xlu1 %1502 }
 0x212   : > { %1571 = vst.msk [vmem:[#allocation4 + $0xe0] sm:$0xf] %vm1542_vm7, %v1503_v25  ;;  %1899 = vrot.lane.b32.xlu2 %v1834_v22, %s6660_s19  ;;  %v1852_v25 = vpack.c.bf16 %v1820_v19, %v1820_v19  ;;  %v6280_v19 = vld [vmem:[#allocation4 + $0x4] sm:$0xf] }
 0x214   : > { %1907 = vrot.lane.b32.xlu0 %v1838_v23, %s6660_s19  ;;  %v1672_v40 = vpop.permute.xlu2 %1671  ;;  %v1822_v23 = vld [vmem:[#allocation2 + $0x128] sm:$0xff] }
 0x215   : > { %1768 = vst.msk [vmem:[#allocation4] sm:$0xf] %vm1767_vm8, %v1672_v40  ;;  %v1825_v40 = vld [vmem:[#allocation2 + $0x150] sm:$0xff] }
 0x216   : > { %v1501_v45 = vpop.permute.xlu0 %1500 }
 0x217   : > { %1570 = vst.msk [vmem:[#allocation4 + $0xd8] sm:$0xf] %vm1542_vm7, %v1501_v45  ;;  %1915 = vrot.lane.b32.xlu1 %v1842_v18, %s6660_s19  ;;  %v1857_v45 = vpack.c.bf16 %v1825_v40, %v1825_v40  ;;  %v2042_v40 = vld [vmem:[#allocation2 + $0xf1] sm:$0xff] }
 0x219   : > { %v1509_v51 = vpop.permute.xlu1 %1508 }
 0x21a   : > { %1574 = vst.msk [vmem:[#allocation4 + $0xf8] sm:$0xf] %vm1542_vm7, %v1509_v51  ;;  %1905 = vrot.lane.b32.xlu2 %v1837_v53, %s6660_s19  ;;  %v1827_v53 = vld [vmem:[#allocation2 + $0x168] sm:$0xff]  ;;  %v1824_v51 = vld [vmem:[#allocation2 + $0x140] sm:$0xff] }
 0x21b   : > { %v1859_v36 = vpack.c.bf16 %v1827_v53, %v1827_v53  ;;  %v1856_v15 = vpack.c.bf16 %v1824_v51, %v1824_v51  ;;  %v5806_v51 = vld [vmem:[#allocation4 + $0x18] sm:$0xf0] }
 0x21c   : > { %1913 = vrot.lane.b32.xlu0 %v1841_v55, %s6660_s19  ;;  %v1678_v2 = vpop.permute.xlu2 %1677 }
 0x21d   : > { %1771 = vst.msk [vmem:[#allocation4 + $0x18] sm:$0xf] %vm1767_vm8, %v1678_v2 }
 0x21e   : > { %v1507_v58 = vpop.permute.xlu0 %1506 }
 0x21f   : > { %1573 = vst.msk [vmem:[#allocation4 + $0xf0] sm:$0xf] %vm1542_vm7, %v1507_v58  ;;  %1921 = vrot.lane.b32.xlu1 %v1845_v1, %s6660_s19 }
 0x221   : > { %v1676_v20 = vpop.permute.xlu1 %1675 }
 0x222   : > { %1770 = vst.msk [vmem:[#allocation4 + $0x10] sm:$0xf] %vm1767_vm8, %v1676_v20  ;;  %1911 = vrot.lane.b32.xlu2 %v1840_v46, %s6660_s19  ;;  %v1828_v20 = vld [vmem:[#allocation2 + $0x170] sm:$0xff] }
 0x223   : > { %v1860_v56 = vpack.c.bf16 %v1828_v20, %v1828_v20 }
 0x224   : > { %1919 = vrot.lane.b32.xlu0 %v1844_v29, %s6660_s19  ;;  %v1684_v21 = vpop.permute.xlu2 %1683  ;;  %v1831_v29 = vld [vmem:[#allocation2 + $0x198] sm:$0xff] }
 0x225   : > { %1774 = vst.msk [vmem:[#allocation4 + $0x30] sm:$0xf] %vm1767_vm8, %v1684_v21 }
 0x226   : > { %v1674_v62 = vpop.permute.xlu0 %1673 }
 0x227   : > { %1769 = vst.msk [vmem:[#allocation4 + $0x8] sm:$0xf] %vm1767_vm8, %v1674_v62  ;;  %1927 = vrot.lane.b32.xlu1 %v1848_v41, %s6660_s19  ;;  %v1863_v41 = vpack.c.bf16 %v1831_v29, %v1831_v29 }
 0x229   : > { %v1682_v10 = vpop.permute.xlu1 %1681 }
 0x22a   : > { %1773 = vst.msk [vmem:[#allocation4 + $0x28] sm:$0xf] %vm1767_vm8, %v1682_v10  ;;  %1917 = vrot.lane.b32.xlu2 %v1843_v42, %s6660_s19 }
 0x22c   : > { %1925 = vrot.lane.b32.xlu0 %v1847_v38, %s6660_s19  ;;  %v1690_v11 = vpop.permute.xlu2 %1689 }
 0x22d   : > { %1777 = vst.msk [vmem:[#allocation4 + $0x48] sm:$0xf] %vm1767_vm8, %v1690_v11  ;;  %v2034_v11 = vld [vmem:[#allocation2 + $0x91] sm:$0xff] }
 0x22e   : > { %v1680_v13 = vpop.permute.xlu0 %1679 }
 0x22f   : > { %1772 = vst.msk [vmem:[#allocation4 + $0x20] sm:$0xf] %vm1767_vm8, %v1680_v13  ;;  %1933 = vrot.lane.b32.xlu1 %v1851_v30, %s6660_s19  ;;  %v2066_v13 = vpack.c.bf16 %v2034_v11, %v2034_v11 }
 0x231   : > { %v1688_v34 = vpop.permute.xlu1 %1687 }
 0x232   : > { %1776 = vst.msk [vmem:[#allocation4 + $0x40] sm:$0xf] %vm1767_vm8, %v1688_v34  ;;  %1923 = vrot.lane.b32.xlu2 %v1846_v52, %s6660_s19  ;;  %v2037_v34 = vld [vmem:[#allocation2 + $0xb1] sm:$0xff] }
 0x233   : > { %v2069_v50 = vpack.c.bf16 %v2037_v34, %v2037_v34 }
 0x234   : > { %1931 = vrot.lane.b32.xlu0 %v1850_v32, %s6660_s19  ;;  %v1696_v3 = vpop.permute.xlu2 %1695 }
 0x235   : > { %1780 = vst.msk [vmem:[#allocation4 + $0x60] sm:$0xf] %vm1767_vm8, %v1696_v3 }
 0x236   : > { %v1686_v5 = vpop.permute.xlu0 %1685 }
 0x237   : > { %1775 = vst.msk [vmem:[#allocation4 + $0x38] sm:$0xf] %vm1767_vm8, %v1686_v5  ;;  %2122 = vrot.lane.b32.xlu1 %v7306_v47, %s6661_s13  ;;  %v1854_v47 = vpack.c.bf16 %v1822_v23, %v1822_v23 }
 0x239   : > { %v1694_v9 = vpop.permute.xlu1 %1693 }
 0x23a   : > { %1779 = vst.msk [vmem:[#allocation4 + $0x58] sm:$0xf] %vm1767_vm8, %v1694_v9  ;;  %1929 = vrot.lane.b32.xlu2 %v1849_v54, %s6660_s19  ;;  %v6315_v54 = vld [vmem:[%s9153_s1 + $0x18] sm:$0xff] }
 0x23c   : > { %1937 = vrot.lane.b32.xlu0 %v1853_v6, %s6660_s19  ;;  %v1702_v22 = vpop.permute.xlu2 %1701  ;;  %v6320_v6 = vld [vmem:[%s9153_s1 + $0x40] sm:$0xff] }
 0x23d   : > { %1783 = vst.msk [vmem:[#allocation4 + $0x78] sm:$0xf] %vm1767_vm8, %v1702_v22  ;;  %2739 = vmatpush.bf16.msra.mxu1 %v6320_v6  ;;  %v5798_v22 = vld [vmem:[#allocation4 + $0x8] sm:$0xf0] }
 0x23e   : > { %v1692_v24 = vpop.permute.xlu0 %1691  ;;  %v5801_v23 = vor.u32 %v6280_v19, %v5798_v22 }
 0x23f   : > { %1778 = vst.msk [vmem:[#allocation4 + $0x50] sm:$0xf] %vm1767_vm8, %v1692_v24  ;;  %1941 = vrot.lane.b32.xlu1 %v1855_v12, %s6660_s19  ;;  %v6313_v24 = vld [vmem:[%s9153_s1 + $0x8] sm:$0xff] }
 0x240   : > { %5958 = vmatmul.msk.bf16.vlgmr.msra.gmra.mxu1 %vm435_vm0, %v5801_v23 }
 0x241   : > { %v1700_v18 = vpop.permute.xlu1 %1699 }
 0x242   : > { %1782 = vst.msk [vmem:[#allocation4 + $0x70] sm:$0xf] %vm1767_vm8, %v1700_v18  ;;  %1935 = vrot.lane.b32.xlu2 %v1852_v25, %s6660_s19 }
 0x244   : > { %1939 = vrot.lane.b32.xlu0 %v1854_v47, %s6660_s19  ;;  %v1708_v35 = vpop.permute.xlu2 %1707  ;;  %v6312_v47 = vld [vmem:[%s9153_s1] sm:$0xff] }
 0x245   : > { %1786 = vst.msk [vmem:[#allocation4 + $0x90] sm:$0xf] %vm1767_vm8, %v1708_v35 }
 0x246   : > { %v1698_v44 = vpop.permute.xlu0 %1697 }
 0x247   : > { %1781 = vst.msk [vmem:[#allocation4 + $0x68] sm:$0xf] %vm1767_vm8, %v1698_v44  ;;  %2126 = vrot.lane.b32.xlu1 %v7287_v16, %s6661_s13  ;;  %v1858_v16 = vpack.c.bf16 %v1826_v14, %v1826_v14  ;;  %v2074_v44 = vpack.c.bf16 %v2042_v40, %v2042_v40  ;;  %v2040_v14 = vld [vmem:[#allocation2 + $0xd9] sm:$0xff] }
 0x249   : > { %v1706_v55 = vpop.permute.xlu1 %1705 }
 0x24a   : > { %1785 = vst.msk [vmem:[#allocation4 + $0x88] sm:$0xf] %vm1767_vm8, %v1706_v55  ;;  %2124 = vrot.lane.b32.xlu2 %v7296_v27, %s6661_s13 }
 0x24c   : > { %1945 = vrot.lane.b32.xlu0 %v1857_v45, %s6660_s19  ;;  %v1714_v1 = vpop.permute.xlu2 %1713 }
 0x24d   : > { %1789 = vst.msk [vmem:[#allocation4 + $0xa8] sm:$0xf] %vm1767_vm8, %v1714_v1 }
 0x24e   : > { %v1704_v2 = vpop.permute.xlu0 %1703 }
 0x24f   : > { %1784 = vst.msk [vmem:[#allocation4 + $0x80] sm:$0xf] %vm1767_vm8, %v1704_v2  ;;  %1949 = vrot.lane.b32.xlu1 %v1859_v36, %s6660_s19  ;;  %v6282_v36 = vld [vmem:[#allocation4 + $0x14] sm:$0xf]  ;;  %v2072_v2 = vpack.c.bf16 %v2040_v14, %v2040_v14 }
 0x250   : > { %v5809_v1 = vor.u32 %v6282_v36, %v5806_v51 }
 0x251   : > { %v1712_v58 = vpop.permute.xlu1 %1711 }
 0x252   : > { %1788 = vst.msk [vmem:[#allocation4 + $0xa0] sm:$0xf] %vm1767_vm8, %v1712_v58  ;;  %1943 = vrot.lane.b32.xlu2 %v1856_v15, %s6660_s19  ;;  %5959 = vmatmul.msk.bf16.gmra.mxu1 %vm435_vm0, %v5809_v1 }
 0x254   : > { %1947 = vrot.lane.b32.xlu0 %v1858_v16, %s6660_s19  ;;  %v1720_v27 = vpop.permute.xlu2 %1719 }
 0x255   : > { %1792 = vst.msk [vmem:[#allocation4 + $0xc0] sm:$0xf] %vm1767_vm8, %v1720_v27  ;;  %v2045_v27 = vld [vmem:[#allocation2 + $0x111] sm:$0xff] }
 0x256   : > { %v1710_v46 = vpop.permute.xlu0 %1709  ;;  %v2077_v29 = vpack.c.bf16 %v2045_v27, %v2045_v27 }
 0x257   : > { %1787 = vst.msk [vmem:[#allocation4 + $0x98] sm:$0xf] %vm1767_vm8, %v1710_v46  ;;  %2132 = vrot.lane.b32.xlu1 %v7301_v37, %s6661_s13  ;;  %v1832_v37 = vld [vmem:[#allocation2 + $0x1a0] sm:$0xff]  ;;  %v2044_v46 = vld [vmem:[#allocation2 + $0x109] sm:$0xff] }
 0x258   : > { %v1864_v42 = vpack.c.bf16 %v1832_v37, %v1832_v37 }
 0x259   : > { %v1718_v60 = vpop.permute.xlu1 %1717 }
 0x25a   : > { %1791 = vst.msk [vmem:[#allocation4 + $0xb8] sm:$0xf] %vm1767_vm8, %v1718_v60  ;;  %2128 = vrot.lane.b32.xlu2 %v7319_v28, %s6661_s13  ;;  %v1829_v28 = vld [vmem:[#allocation2 + $0x180] sm:$0xff]  ;;  %v2076_v60 = vpack.c.bf16 %v2044_v46, %v2044_v46 }
 0x25b   : > { %v1861_v59 = vpack.c.bf16 %v1829_v28, %v1829_v28  ;;  %v2043_v28 = vld [vmem:[#allocation2 + $0xf9] sm:$0xff] }
 0x25c   : > { %2130 = vrot.lane.b32.xlu0 %v7311_v48, %s6661_s13  ;;  %v1726_v61 = vpop.permute.xlu2 %1725 }
 0x25d   : > { %1795 = vst.msk [vmem:[#allocation4 + $0xd8] sm:$0xf] %vm1767_vm8, %v1726_v61 }
 0x25e   : > { %v1716_v21 = vpop.permute.xlu0 %1715 }
 0x25f   : > { %1790 = vst.msk [vmem:[#allocation4 + $0xb0] sm:$0xf] %vm1767_vm8, %v1716_v21  ;;  %1957 = vrot.lane.b32.xlu1 %v1863_v41, %s6660_s19  ;;  %v6284_v21 = vld [vmem:[#allocation4 + $0x24] sm:$0xf] }
 0x261   : > { %v1724_v62 = vpop.permute.xlu1 %1723 }
 0x262   : > { %1794 = vst.msk [vmem:[#allocation4 + $0xd0] sm:$0xf] %vm1767_vm8, %v1724_v62  ;;  %1951 = vrot.lane.b32.xlu2 %v1860_v56, %s6660_s19  ;;  %v5814_v56 = vld [vmem:[#allocation4 + $0x28] sm:$0xf0] }
 0x263   : > { %v5817_v62 = vor.u32 %v6284_v21, %v5814_v56 }
 0x264   : > { %1955 = vrot.lane.b32.xlu0 %v7291_v26, %s6660_s19  ;;  %v1732_v48 = vpop.permute.xlu2 %1731 }
 0x265   : > { %1798 = vst.msk [vmem:[#allocation4 + $0xf0] sm:$0xf] %vm1767_vm8, %v1732_v48  ;;  %5960 = vmatmul.msk.bf16.gmra.mxu1 %vm435_vm0, %v5817_v62  ;;  %v2264_v62 = vld [vmem:[#allocation2 + $0xca] sm:$0xff] }
 0x266   : > { %v1722_v38 = vpop.permute.xlu0 %1721 }
 0x267   : > { %1793 = vst.msk [vmem:[#allocation4 + $0xc8] sm:$0xf] %vm1767_vm8, %v1722_v38  ;;  %1959 = vrot.lane.b32.xlu1 %v1864_v42, %s6660_s19  ;;  %v2075_v42 = vpack.c.bf16 %v2043_v28, %v2043_v28 }
 0x269   : > { %v1730_v10 = vpop.permute.xlu1 %1729 }
 0x26a   : > { %1797 = vst.msk [vmem:[#allocation4 + $0xe8] sm:$0xf] %vm1767_vm8, %v1730_v10  ;;  %1953 = vrot.lane.b32.xlu2 %v1861_v59, %s6660_s19 }
 0x26c   : > { %2136 = vrot.lane.b32.xlu0 %v7323_v17, %s6661_s13  ;;  %v1900_v30 = vpop.permute.xlu2 %1899 }
 0x26d   : > { %1995 = vst.msk [vmem:[#allocation4 + $0x8] sm:$0xf] %vm1993_vm9, %v1900_v30  ;;  %v2257_v30 = vld [vmem:[#allocation2 + $0x7a] sm:$0xff] }
 0x26e   : > { %v1728_v26 = vpop.permute.xlu0 %1727 }
 0x26f   : > { %1796 = vst.msk [vmem:[#allocation4 + $0xe0] sm:$0xf] %vm1767_vm8, %v1728_v26  ;;  %2142 = vrot.lane.b32.xlu1 %v7335_v57, %s6661_s13  ;;  %v6319_v57 = vld [vmem:[%s9153_s1 + $0x38] sm:$0xff]  ;;  %v2289_v26 = vpack.c.bf16 %v2257_v30, %v2257_v30 }
 0x270   : > { %2643 = vmatpush.bf16.msra.mxu0 %v6319_v57 }
 0x271   : > { %v1898_v39 = vpop.permute.xlu1 %1897  ;;  %2321 = vst.msk [vmem:[#allocation4 + $0x34] sm:$0xf] %vm642_vm3, %v2289_v26 }
 0x272   : > { %1994 = vst.msk [vmem:[#allocation4] sm:$0xf] %vm1993_vm9, %v1898_v39  ;;  %2134 = vrot.lane.b32.xlu2 %v7331_v43, %s6661_s13  ;;  %v6318_v43 = vld [vmem:[%s9153_s1 + $0x30] sm:$0xff] }
 0x274   : > { %2140 = vrot.lane.b32.xlu0 %v7343_v49, %s6661_s13  ;;  %v1906_v17 = vpop.permute.xlu2 %1905  ;;  %2644 = vmatpush.bf16.msra.mxu0 %v6318_v43 }
 0x275   : > { %1998 = vst.msk [vmem:[#allocation4 + $0x20] sm:$0xf] %vm1993_vm9, %v1906_v17  ;;  %v2047_v17 = vld [vmem:[#allocation2 + $0x129] sm:$0xff] }
 0x276   : > { %v1734_v31 = vpop.permute.xlu0 %1733 }
 0x277   : > { %1799 = vst.msk [vmem:[#allocation4 + $0xf8] sm:$0xf] %vm1767_vm8, %v1734_v31  ;;  %2148 = vrot.lane.b32.xlu1 %v7347_v63, %s6661_s13  ;;  %v6317_v63 = vld [vmem:[%s9153_s1 + $0x28] sm:$0xff]  ;;  %v2079_v31 = vpack.c.bf16 %v2047_v17, %v2047_v17 }
 0x278   : > { %2645 = vmatpush.bf16.msra.mxu0 %v6317_v63 }
 0x279   : > { %v1904_v52 = vpop.permute.xlu1 %1903 }
 0x27a   : > { %1997 = vst.msk [vmem:[#allocation4 + $0x18] sm:$0xf] %vm1993_vm9, %v1904_v52  ;;  %2138 = vrot.lane.b32.xlu2 %v2066_v13, %s6661_s13  ;;  %v5822_v52 = vld [vmem:[#allocation4 + $0x38] sm:$0xf0] }
 0x27c   : > { %v1912_v49 = vpop.permute.xlu2 %1911  ;;  %2146 = vrot.lane.b32.xlu0 %v7355_v7, %s6661_s13  ;;  %2646 = vmatpush.bf16.msra.mxu0 %v6316_v4  ;;  %v2259_v4 = vld [vmem:[#allocation2 + $0x92] sm:$0xff] }
 0x27d   : > { %2001 = vst.msk [vmem:[#allocation4 + $0x38] sm:$0xf] %vm1993_vm9, %v1912_v49  ;;  %v6286_v49 = vld [vmem:[#allocation4 + $0x34] sm:$0xf] }
 0x27e   : > { %v1902_v32 = vpop.permute.xlu0 %1901 }
 0x27f   : > { %1996 = vst.msk [vmem:[#allocation4 + $0x10] sm:$0xf] %vm1993_vm9, %v1902_v32  ;;  %2154 = vrot.lane.b32.xlu1 %v2074_v44, %s6661_s13  ;;  %v5825_v32 = vor.u32 %v6286_v49, %v5822_v52  ;;  %v2261_v44 = vld [vmem:[#allocation2 + $0xaa] sm:$0xff]  ;;  %v2265_v52 = vld [vmem:[#allocation2 + $0xda] sm:$0xff] }
 0x280   : > { %2647 = vmatpush.bf16.msra.mxu0 %v6315_v54 }
 0x281   : > { %v1910_v3 = vpop.permute.xlu1 %1909  ;;  %5961 = vmatmul.msk.bf16.gmra.mxu1 %vm435_vm0, %v5825_v32  ;;  %v2297_v32 = vpack.c.bf16 %v2265_v52, %v2265_v52 }
 0x282   : > { %2000 = vst.msk [vmem:[#allocation4 + $0x30] sm:$0xf] %vm1993_vm9, %v1910_v3  ;;  %2144 = vrot.lane.b32.xlu2 %v2069_v50, %s6661_s13 }
 0x283   : > { %2329 = vst.msk [vmem:[#allocation4 + $0x74] sm:$0xf] %vm642_vm3, %v2297_v32 }
 0x284   : > { %v1918_v7 = vpop.permute.xlu2 %1917  ;;  %2152 = vrot.lane.b32.xlu0 %v7364_v33, %s6661_s13  ;;  %v6314_v33 = vld [vmem:[%s9153_s1 + $0x10] sm:$0xff] }
 0x285   : > { %2004 = vst.msk [vmem:[#allocation4 + $0x50] sm:$0xf] %vm1993_vm9, %v1918_v7  ;;  %2648 = vmatpush.bf16.msra.mxu0 %v6314_v33  ;;  %v2260_v7 = vld [vmem:[#allocation2 + $0x9a] sm:$0xff] }
 0x286   : > { %v1908_v5 = vpop.permute.xlu0 %1907  ;;  %v2292_v54 = vpack.c.bf16 %v2260_v7, %v2260_v7  ;;  %v2048_v33 = vld [vmem:[#allocation2 + $0x139] sm:$0xff] }
 0x287   : > { %1999 = vst.msk [vmem:[#allocation4 + $0x28] sm:$0xf] %vm1993_vm9, %v1908_v5  ;;  %2160 = vrot.lane.b32.xlu1 %v2077_v29, %s6661_s13  ;;  %v2291_v5 = vpack.c.bf16 %v2259_v4, %v2259_v4 }
 0x288   : > { %2324 = vst.msk [vmem:[#allocation4 + $0x4c] sm:$0xf] %vm642_vm3, %v2292_v54 }
 0x289   : > { %v1916_v8 = vpop.permute.xlu1 %1915  ;;  %2649 = vmatpush.bf16.msra.mxu0 %v6313_v24  ;;  %2323 = vst.msk [vmem:[#allocation4 + $0x44] sm:$0xf] %vm642_vm3, %v2291_v5 }
 0x28a   : > { %2003 = vst.msk [vmem:[#allocation4 + $0x48] sm:$0xf] %vm1993_vm9, %v1916_v8  ;;  %2150 = vrot.lane.b32.xlu2 %v2072_v2, %s6661_s13  ;;  %v2051_v2 = vld [vmem:[#allocation2 + $0x159] sm:$0xff]  ;;  %v6294_v54 = vld [vmem:[#allocation4 + $0x74] sm:$0xf] }
 0x28c   : > { %v1924_v9 = vpop.permute.xlu2 %1923  ;;  %2158 = vrot.lane.b32.xlu0 %v2076_v60, %s6661_s13 }
 0x28d   : > { %2007 = vst.msk [vmem:[#allocation4 + $0x68] sm:$0xf] %vm1993_vm9, %v1924_v9  ;;  %2650 = vmatpush.bf16.msra.mxu0 %v6312_v47  ;;  %v2046_v9 = vld [vmem:[#allocation2 + $0x121] sm:$0xff] }
 0x28e   : > { %v1914_v12 = vpop.permute.xlu0 %1913  ;;  %v2078_v19 = vpack.c.bf16 %v2046_v9, %v2046_v9 }
 0x28f   : > { %2002 = vst.msk [vmem:[#allocation4 + $0x40] sm:$0xf] %vm1993_vm9, %v1914_v12  ;;  %v2080_v12 = vpack.c.bf16 %v2048_v33, %v2048_v33 }
 0x290   : > { %v6288_v24 = vld [vmem:[#allocation4 + $0x44] sm:$0xf] }
 0x291   : > { %v1922_v25 = vpop.permute.xlu1 %1921  ;;  %2166 = vrot.lane.b32.xlu1 %v2080_v12, %s6661_s13  ;;  %v2267_v12 = vld [vmem:[#allocation2 + $0xf2] sm:$0xff] }
 0x292   : > { %2006 = vst.msk [vmem:[#allocation4 + $0x60] sm:$0xf] %vm1993_vm9, %v1922_v25  ;;  %2156 = vrot.lane.b32.xlu2 %v2075_v42, %s6661_s13  ;;  %v5830_v25 = vld [vmem:[#allocation4 + $0x48] sm:$0xf0]  ;;  %v2296_v42 = vpack.c.bf16 %v2264_v62, %v2264_v62 }
 0x294   : > { %v1930_v18 = vpop.permute.xlu2 %1929  ;;  %2164 = vrot.lane.b32.xlu0 %v2079_v31, %s6661_s13  ;;  %2328 = vst.msk [vmem:[#allocation4 + $0x6c] sm:$0xf] %vm642_vm3, %v2296_v42  ;;  %v2056_v42 = vld [vmem:[#allocation2 + $0x199] sm:$0xff] }
 0x295   : > { %2010 = vst.msk [vmem:[#allocation4 + $0x80] sm:$0xf] %vm1993_vm9, %v1930_v18  ;;  %v5833_v18 = vor.u32 %v6288_v24, %v5830_v25  ;;  %v2055_v25 = vld [vmem:[#allocation2 + $0x189] sm:$0xff] }
 0x296   : > { %v1920_v35 = vpop.permute.xlu0 %1919 }
 0x297   : > { %2005 = vst.msk [vmem:[#allocation4 + $0x58] sm:$0xf] %vm1993_vm9, %v1920_v35  ;;  %5962 = vmatmul.msk.bf16.gmra.mxu1 %vm435_vm0, %v5833_v18 }
 0x299   : > { %v1928_v45 = vpop.permute.xlu1 %1927 }
 0x29a   : > { %2009 = vst.msk [vmem:[#allocation4 + $0x78] sm:$0xf] %vm1993_vm9, %v1928_v45  ;;  %2162 = vrot.lane.b32.xlu2 %v2078_v19, %s6661_s13  ;;  %v2262_v45 = vld [vmem:[#allocation2 + $0xb2] sm:$0xff]  ;;  %v2268_v19 = vld [vmem:[#allocation2 + $0xfa] sm:$0xff] }
 0x29b   : > { %v5846_v17 = vld [vmem:[#allocation4 + $0x68] sm:$0xf0]  ;;  %v2300_v24 = vpack.c.bf16 %v2268_v19, %v2268_v19 }
 0x29c   : > { %v1936_v53 = vpop.permute.xlu2 %1935 }
 0x29d   : > { %2013 = vst.msk [vmem:[#allocation4 + $0x98] sm:$0xf] %vm1993_vm9, %v1936_v53  ;;  %v2293_v53 = vpack.c.bf16 %v2261_v44, %v2261_v44 }
 0x29e   : > { %v1926_v55 = vpop.permute.xlu0 %1925  ;;  %2332 = vst.msk [vmem:[#allocation4 + $0x8c] sm:$0xf] %vm642_vm3, %v2300_v24 }
 0x29f   : > { %2008 = vst.msk [vmem:[#allocation4 + $0x70] sm:$0xf] %vm1993_vm9, %v1926_v55  ;;  %v2294_v55 = vpack.c.bf16 %v2262_v45, %v2262_v45 }
 0x2a0   : > { %2325 = vst.msk [vmem:[#allocation4 + $0x54] sm:$0xf] %vm642_vm3, %v2293_v53 }
 0x2a1   : > { %v1934_v15 = vpop.permute.xlu1 %1933  ;;  %2326 = vst.msk [vmem:[#allocation4 + $0x5c] sm:$0xf] %vm642_vm3, %v2294_v55 }
 0x2a2   : > { %2012 = vst.msk [vmem:[#allocation4 + $0x90] sm:$0xf] %vm1993_vm9, %v1934_v15  ;;  %v2050_v15 = vld [vmem:[#allocation2 + $0x151] sm:$0xff] }
 0x2a3   : > { %v2082_v27 = vpack.c.bf16 %v2050_v15, %v2050_v15 }
 0x2a4   : > { %v2125_v16 = vpop.permute.xlu2 %2124 }
 0x2a5   : > { %2220 = vst.msk [vmem:[#allocation4 + $0x8] sm:$0xf] %vm2218_vm10, %v2125_v16  ;;  %v2049_v16 = vld [vmem:[#allocation2 + $0x141] sm:$0xff]  ;;  %2170 = vrot.lane.b32.xlu0 %v2082_v27, %s6661_s13  ;;  %v5862_v45 = vld [vmem:[#allocation4 + $0x88] sm:$0xf0] }
 0x2a6   : > { %v1932_v58 = vpop.permute.xlu0 %1931  ;;  %v2081_v46 = vpack.c.bf16 %v2049_v16, %v2049_v16 }
 0x2a7   : > { %2011 = vst.msk [vmem:[#allocation4 + $0x88] sm:$0xf] %vm1993_vm9, %v1932_v58  ;;  %v2083_v58 = vpack.c.bf16 %v2051_v2, %v2051_v2 }
 0x2a8   : > { %2168 = vrot.lane.b32.xlu2 %v2081_v46, %s6661_s13 }
 0x2a9   : > { %v2123_v20 = vpop.permute.xlu1 %2122  ;;  %2172 = vrot.lane.b32.xlu1 %v2083_v58, %s6661_s13 }
 0x2aa   : > { %2219 = vst.msk [vmem:[#allocation4] sm:$0xf] %vm2218_vm10, %v2123_v20  ;;  %v6290_v20 = vld [vmem:[#allocation4 + $0x54] sm:$0xf] }
 0x2ac   : > { %v1944_v41 = vpop.permute.xlu2 %1943  ;;  %v6281_v37 = vld [vmem:[#allocation4 + $0x4] sm:$0xf0] }
 0x2ad   : > { %2017 = vst.msk [vmem:[#allocation4 + $0xb8] sm:$0xf] %vm1993_vm9, %v1944_v41  ;;  %v5838_v41 = vld [vmem:[#allocation4 + $0x58] sm:$0xf0] }
 0x2ae   : > { %v1938_v61 = vpop.permute.xlu0 %1937  ;;  %v5841_v21 = vor.u32 %v6290_v20, %v5838_v41 }
 0x2af   : > { %2014 = vst.msk [vmem:[#allocation4 + $0xa0] sm:$0xf] %vm1993_vm9, %v1938_v61 }
 0x2b0   : > { %5963 = vmatmul.msk.bf16.gmra.mxu1 %vm435_vm0, %v5841_v21 }
 0x2b1   : > { %v1942_v48 = vpop.permute.xlu1 %1941  ;;  %v5796_v38 = vld [vmem:[#allocation4] sm:$0xf] }
 0x2b2   : > { %2016 = vst.msk [vmem:[#allocation4 + $0xb0] sm:$0xf] %vm1993_vm9, %v1942_v48  ;;  %v5797_v59 = vor.u32 %v6281_v37, %v5796_v38  ;;  %v2263_v37 = vld [vmem:[#allocation2 + $0xc2] sm:$0xff] }
 0x2b3   : > { %v2295_v28 = vpack.c.bf16 %v2263_v37, %v2263_v37 }
 0x2b4   : > { %2651 = vmatmul.bf16.vlgmr.msra.gmra.mxu0 %v5797_v59  ;;  %v2129_v10 = vpop.permute.xlu2 %2128 }
 0x2b5   : > { %2222 = vst.msk [vmem:[#allocation4 + $0x18] sm:$0xf] %vm2218_vm10, %v2129_v10  ;;  %v2053_v10 = vld [vmem:[#allocation2 + $0x171] sm:$0xff] }
 0x2b6   : > { %v1940_v39 = vpop.permute.xlu0 %1939  ;;  %2327 = vst.msk [vmem:[#allocation4 + $0x64] sm:$0xf] %vm642_vm3, %v2295_v28  ;;  %v2085_v26 = vpack.c.bf16 %v2053_v10, %v2053_v10  ;;  %v3101_v28 = vld [vmem:[#allocation3 + $0x1] sm:$0xff]  ;;  %v7760_v10 = vld [vmem:[%s9154_s2] ss:$0 sm:$0xff] }
 0x2b7   : > { %2015 = vst.msk [vmem:[#allocation4 + $0xa8] sm:$0xf] %vm1993_vm9, %v1940_v39 }
 0x2b8   : > { %2176 = vrot.lane.b32.xlu0 %v2085_v26, %s6661_s13  ;;  %v7767_v26 = vld [vmem:[%s9155_s3] ss:$0 sm:$0xff] }
 0x2b9   : > { %v2127_v11 = vpop.permute.xlu1 %2126 }
 0x2ba   : > { %2221 = vst.msk [vmem:[#allocation4 + $0x10] sm:$0xf] %vm2218_vm10, %v2127_v11 }
 0x2bc   : > { %v1952_v13 = vpop.permute.xlu2 %1951  ;;  %v6283_v43 = vld [vmem:[#allocation4 + $0x14] sm:$0xf0] }
 0x2bd   : > { %2021 = vst.msk [vmem:[#allocation4 + $0xd8] sm:$0xf] %vm1993_vm9, %v1952_v13  ;;  %v6292_v11 = vld [vmem:[#allocation4 + $0x64] sm:$0xf] }
 0x2be   : > { %v1946_v57 = vpop.permute.xlu0 %1945  ;;  %v5849_v31 = vor.u32 %v6292_v11, %v5846_v17 }
 0x2bf   : > { %2018 = vst.msk [vmem:[#allocation4 + $0xc0] sm:$0xf] %vm1993_vm9, %v1946_v57 }
 0x2c0   : > { %5964 = vmatmul.msk.bf16.gmra.mxu1 %vm435_vm0, %v5849_v31 }
 0x2c1   : > { %v1950_v63 = vpop.permute.xlu1 %1949  ;;  %v5804_v34 = vld [vmem:[#allocation4 + $0x10] sm:$0xf] }
 0x2c2   : > { %2020 = vst.msk [vmem:[#allocation4 + $0xd0] sm:$0xf] %vm1993_vm9, %v1950_v63  ;;  %v5805_v50 = vor.u32 %v6283_v43, %v5804_v34  ;;  %v2266_v43 = vld [vmem:[#allocation2 + $0xe2] sm:$0xff] }
 0x2c3   : > { %v2298_v63 = vpack.c.bf16 %v2266_v43, %v2266_v43  ;;  %v2054_v34 = vld [vmem:[#allocation2 + $0x181] sm:$0xff] }
 0x2c4   : > { %2656 = vmatmul.bf16.gmra.mxu0 %v5805_v50  ;;  %v1954_v3 = vpop.permute.xlu2 %1953  ;;  %v2086_v4 = vpack.c.bf16 %v2054_v34, %v2054_v34 }
 0x2c5   : > { %2022 = vst.msk [vmem:[#allocation4 + $0xe0] sm:$0xf] %vm1993_vm9, %v1954_v3  ;;  %v2052_v3 = vld [vmem:[#allocation2 + $0x169] sm:$0xff] }
 0x2c6   : > { %v1948_v6 = vpop.permute.xlu0 %1947  ;;  %2330 = vst.msk [vmem:[#allocation4 + $0x7c] sm:$0xf] %vm642_vm3, %v2298_v63  ;;  %v2084_v7 = vpack.c.bf16 %v2052_v3, %v2052_v3  ;;  %2178 = vrot.lane.b32.xlu1 %v2086_v4, %s6661_s13  ;;  %v2272_v3 = vld [vmem:[#allocation2 + $0x12a] sm:$0xff] }
 0x2c7   : > { %2019 = vst.msk [vmem:[#allocation4 + $0xc8] sm:$0xf] %vm1993_vm9, %v1948_v6 }
 0x2c8   : > { %2174 = vrot.lane.b32.xlu2 %v2084_v7, %s6661_s13 }
 0x2c9   : > { %v2133_v8 = vpop.permute.xlu1 %2132 }
 0x2ca   : > { %2224 = vst.msk [vmem:[#allocation4 + $0x28] sm:$0xf] %vm2218_vm10, %v2133_v8 }
 0x2cc   : > { %v2135_v22 = vpop.permute.xlu2 %2134 }
 0x2cd   : > { %2225 = vst.msk [vmem:[#allocation4 + $0x30] sm:$0xf] %vm2218_vm10, %v2135_v22  ;;  %v5854_v6 = vld [vmem:[#allocation4 + $0x78] sm:$0xf0] }
 0x2ce   : > { %v2131_v23 = vpop.permute.xlu0 %2130  ;;  %v5857_v8 = vor.u32 %v6294_v54, %v5854_v6 }
 0x2cf   : > { %2223 = vst.msk [vmem:[#allocation4 + $0x20] sm:$0xf] %vm2218_vm10, %v2131_v23  ;;  %v2299_v23 = vpack.c.bf16 %v2267_v12, %v2267_v12 }
 0x2d0   : > { %5965 = vmatmul.msk.bf16.gmra.mxu1 %vm435_vm0, %v5857_v8 }
 0x2d1   : > { %v1958_v47 = vpop.permute.xlu1 %1957  ;;  %v6285_v35 = vld [vmem:[#allocation4 + $0x24] sm:$0xf0]  ;;  %2331 = vst.msk [vmem:[#allocation4 + $0x84] sm:$0xf] %vm642_vm3, %v2299_v23  ;;  %v2304_v23 = vpack.c.bf16 %v2272_v3, %v2272_v3 }
 0x2d2   : > { %2024 = vst.msk [vmem:[#allocation4 + $0xf0] sm:$0xf] %vm1993_vm9, %v1958_v47  ;;  %v2087_v47 = vpack.c.bf16 %v2055_v25, %v2055_v25 }
 0x2d3   : > { %2336 = vst.msk [vmem:[#allocation4 + $0xac] sm:$0xf] %vm642_vm3, %v2304_v23 }
 0x2d4   : > { %v2139_v40 = vpop.permute.xlu2 %2138  ;;  %v5820_v56 = vld [vmem:[#allocation4 + $0x30] sm:$0xf]  ;;  %2180 = vrot.lane.b32.xlu2 %v2087_v47, %s6661_s13 }
 0x2d5   : > { %2227 = vst.msk [vmem:[#allocation4 + $0x40] sm:$0xf] %vm2218_vm10, %v2139_v40  ;;  %v7695_v40 = vpop.f32.mrf.mxu1 }
 0x2d6   : > { %v1956_v36 = vpop.permute.xlu0 %1955  ;;  %v5812_v51 = vld [vmem:[#allocation4 + $0x20] sm:$0xf] }
 0x2d7   : > { %2023 = vst.msk [vmem:[#allocation4 + $0xe8] sm:$0xf] %vm1993_vm9, %v1956_v36  ;;  %v5813_v1 = vor.u32 %v6285_v35, %v5812_v51  ;;  %v2269_v51 = vld [vmem:[#allocation2 + $0x10a] sm:$0xff] }
 0x2d8   : > { %v6296_v44 = vld [vmem:[#allocation4 + $0x84] sm:$0xf]  ;;  %v2301_v2 = vpack.c.bf16 %v2269_v51, %v2269_v51 }
 0x2d9   : > { %2661 = vmatmul.bf16.gmra.mxu0 %v5813_v1  ;;  %v1960_v14 = vpop.permute.xlu1 %1959  ;;  %v5865_v53 = vor.u32 %v6296_v44, %v5862_v45  ;;  %v2270_v1 = vld [vmem:[#allocation2 + $0x112] sm:$0xff]  ;;  %v2274_v44 = vld [vmem:[#allocation2 + $0x142] sm:$0xff] }
 0x2da   : > { %2025 = vst.msk [vmem:[#allocation4 + $0xf8] sm:$0xf] %vm1993_vm9, %v1960_v14  ;;  %v2302_v15 = vpack.c.bf16 %v2270_v1, %v2270_v1 }
 0x2db   : > { %2333 = vst.msk [vmem:[#allocation4 + $0x94] sm:$0xf] %vm642_vm3, %v2301_v2  ;;  %v2306_v2 = vpack.c.bf16 %v2274_v44, %v2274_v44 }
 0x2dc   : > { %v2145_v29 = vpop.permute.xlu2 %2144  ;;  %v5828_v13 = vld [vmem:[#allocation4 + $0x40] sm:$0xf]  ;;  %2334 = vst.msk [vmem:[#allocation4 + $0x9c] sm:$0xf] %vm642_vm3, %v2302_v15 }
 0x2dd   : > { %2230 = vst.msk [vmem:[#allocation4 + $0x58] sm:$0xf] %vm2218_vm10, %v2145_v29  ;;  %v7699_v16 = vpop.f32.mrf.mxu1 }
 0x2de   : > { %v2137_v60 = vpop.permute.xlu0 %2136  ;;  %2338 = vst.msk [vmem:[#allocation4 + $0xbc] sm:$0xf] %vm642_vm3, %v2306_v2 }
 0x2df   : > { %2226 = vst.msk [vmem:[#allocation4 + $0x38] sm:$0xf] %vm2218_vm10, %v2137_v60  ;;  %v2057_v60 = vld [vmem:[#allocation2 + $0x1a1] sm:$0xff] }
 0x2e0   : > { %5966 = vmatmul.msk.bf16.gmra.mxu1 %vm435_vm0, %v5865_v53  ;;  %v2089_v41 = vpack.c.bf16 %v2057_v60, %v2057_v60 }
 0x2e1   : > { %v2143_v61 = vpop.permute.xlu1 %2142 }
 0x2e2   : > { %2229 = vst.msk [vmem:[#allocation4 + $0x50] sm:$0xf] %vm2218_vm10, %v2143_v61  ;;  %v6298_v29 = vld [vmem:[#allocation4 + $0x94] sm:$0xf]  ;;  %2184 = vrot.lane.b32.xlu1 %v2089_v41, %s6661_s13 }
 0x2e3   : > { %v5870_v20 = vld [vmem:[#allocation4 + $0x98] sm:$0xf0] }
 0x2e4   : > { %v2151_v5 = vpop.permute.xlu2 %2150  ;;  %v6291_v9 = vld [vmem:[#allocation4 + $0x54] sm:$0xf0]  ;;  %v5873_v61 = vor.u32 %v6298_v29, %v5870_v20 }
 0x2e5   : > { %2233 = vst.msk [vmem:[#allocation4 + $0x70] sm:$0xf] %vm2218_vm10, %v2151_v5  ;;  %v7712_v46 = vpop.f32.mrf.mxu1  ;;  %v3102_v20 = vld [vmem:[#allocation3 + $0x9] sm:$0xff] }
 0x2e6   : > { %v6287_v48 = vld [vmem:[#allocation4 + $0x34] sm:$0xf0]  ;;  %v2141_v38 = vpop.permute.xlu0 %2140 }
 0x2e7   : > { %v5821_v59 = vor.u32 %v6287_v48, %v5820_v56  ;;  %2228 = vst.msk [vmem:[#allocation4 + $0x48] sm:$0xf] %vm2218_vm10, %v2141_v38  ;;  %v3133_v48 = vpack.c.bf16 %v3101_v28, %v3101_v28  ;;  %v2088_v38 = vpack.c.bf16 %v2056_v42, %v2056_v42 }
 0x2e9   : > { %2666 = vmatmul.bf16.gmra.mxu0 %v5821_v59  ;;  %v2149_v30 = vpop.permute.xlu1 %2148  ;;  %v5836_v33 = vld [vmem:[#allocation4 + $0x50] sm:$0xf]  ;;  %3197 = vrot.lane.b32.xlu2 %v3133_v48, %s6656_s23 }
 0x2ea   : > { %2232 = vst.msk [vmem:[#allocation4 + $0x68] sm:$0xf] %vm2218_vm10, %v2149_v30  ;;  %v5837_v22 = vor.u32 %v6291_v9, %v5836_v33  ;;  %2182 = vrot.lane.b32.xlu0 %v2088_v38, %s6661_s13  ;;  %s5697_s13 = scalar_lea.sflag [#allocation8], %s6815_s26 }
 0x2ec   : > { %v2157_v35 = vpop.permute.xlu2 %2156  ;;  %v5852_v21 = vld [vmem:[#allocation4 + $0x70] sm:$0xf] }
 0x2ed   : > { %2236 = vst.msk [vmem:[#allocation4 + $0x88] sm:$0xf] %vm2218_vm10, %v2157_v35  ;;  %v7731_v62 = vpop.f32.mrf.mxu1  ;;  %v2273_v35 = vld [vmem:[#allocation2 + $0x13a] sm:$0xff] }
 0x2ee   : > { %v2147_v39 = vpop.permute.xlu0 %2146  ;;  %v6289_v57 = vld [vmem:[#allocation4 + $0x44] sm:$0xf0] }
 0x2ef   : > { %2231 = vst.msk [vmem:[#allocation4 + $0x60] sm:$0xf] %vm2218_vm10, %v2147_v39  ;;  %v5829_v49 = vor.u32 %v6289_v57, %v5828_v13 }
 0x2f0   : > { %5967 = vmatmul.msk.bf16.gmra.mxu1 %vm435_vm0, %v5873_v61 }
 0x2f1   : > { %v2155_v18 = vpop.permute.xlu1 %2154  ;;  %v6293_v36 = vld [vmem:[#allocation4 + $0x64] sm:$0xf0] }
 0x2f2   : > { %2235 = vst.msk [vmem:[#allocation4 + $0x80] sm:$0xf] %vm2218_vm10, %v2155_v18 }
 0x2f4   : > { %v6297_v17 = vld [vmem:[#allocation4 + $0x84] sm:$0xf0]  ;;  %v2163_v5 = vpop.permute.xlu2 %2162 }
 0x2f5   : > { %v7753_v59 = vpop.f32.mrf.mxu1  ;;  %2239 = vst.msk [vmem:[#allocation4 + $0xa0] sm:$0xf] %vm2218_vm10, %v2163_v5 }
 0x2f6   : > { %v2153_v50 = vpop.permute.xlu0 %2152  ;;  %v5844_v55 = vld [vmem:[#allocation4 + $0x60] sm:$0xf] }
 0x2f7   : > { %2234 = vst.msk [vmem:[#allocation4 + $0x78] sm:$0xf] %vm2218_vm10, %v2153_v50  ;;  %v5845_v14 = vor.u32 %v6293_v36, %v5844_v55  ;;  %v2271_v50 = vld [vmem:[#allocation2 + $0x122] sm:$0xff] }
 0x2f8   : > { %v2303_v33 = vpack.c.bf16 %v2271_v50, %v2271_v50 }
 0x2f9   : > { %2671 = vmatmul.bf16.gmra.mxu0 %v5829_v49  ;;  %v2161_v58 = vpop.permute.xlu1 %2160  ;;  %v5860_v11 = vld [vmem:[#allocation4 + $0x80] sm:$0xf] }
 0x2fa   : > { %2238 = vst.msk [vmem:[#allocation4 + $0x98] sm:$0xf] %vm2218_vm10, %v2161_v58  ;;  %v5861_v13 = vor.u32 %v6297_v17, %v5860_v11  ;;  %v2275_v58 = vld [vmem:[#allocation2 + $0x152] sm:$0xff] }
 0x2fb   : > { %2335 = vst.msk [vmem:[#allocation4 + $0xa4] sm:$0xf] %vm642_vm3, %v2303_v33  ;;  %v5886_v33 = vld [vmem:[#allocation4 + $0xb8] sm:$0xf0] }
 0x2fc   : > { %v5876_v42 = vld [vmem:[#allocation4 + $0xa0] sm:$0xf] }
 0x2fd   : > { %v7784_v52 = vpop.f32.mrf.mxu1 }
 0x2fe   : > { %v2159_v27 = vpop.permute.xlu0 %2158  ;;  %v6295_v56 = vld [vmem:[#allocation4 + $0x74] sm:$0xf0] }
 0x2ff   : > { %2237 = vst.msk [vmem:[#allocation4 + $0x90] sm:$0xf] %vm2218_vm10, %v2159_v27  ;;  %v5853_v37 = vor.u32 %v6295_v56, %v5852_v21  ;;  %v5878_v27 = vld [vmem:[#allocation4 + $0xa8] sm:$0xf0]  ;;  %v3134_v21 = vpack.c.bf16 %v3102_v20, %v3102_v20  ;;  %v2307_v56 = vpack.c.bf16 %v2275_v58, %v2275_v58 }
 0x301   : > { %v6299_v19 = vld [vmem:[#allocation4 + $0x94] sm:$0xf0]  ;;  %3199 = vrot.lane.b32.xlu0 %v3134_v21, %s6656_s23  ;;  %2339 = vst.msk [vmem:[#allocation4 + $0xc4] sm:$0xf] %vm642_vm3, %v2307_v56 }
 0x302   : > { %v2169_v1 = vpop.permute.xlu2 %2168 }
 0x303   : > { %v2167_v18 = vpop.permute.xlu1 %2166  ;;  %2242 = vst.msk [vmem:[#allocation4 + $0xb8] sm:$0xf] %vm2218_vm10, %v2169_v1 }
 0x304   : > { %2241 = vst.msk [vmem:[#allocation4 + $0xb0] sm:$0xf] %vm2218_vm10, %v2167_v18 }
 0x305   : > { %v7806_v4 = vpop.f32.mrf.mxu1 }
 0x306   : > { %v2165_v8 = vpop.permute.xlu0 %2164  ;;  %v5868_v12 = vld [vmem:[#allocation4 + $0x90] sm:$0xf] }
 0x307   : > { %2240 = vst.msk [vmem:[#allocation4 + $0xa8] sm:$0xf] %vm2218_vm10, %v2165_v8  ;;  %v5869_v25 = vor.u32 %v6299_v19, %v5868_v12 }
 0x309   : > { %2676 = vmatmul.bf16.gmra.mxu0 %v5837_v22 }
 0x30a   : > { %v6303_v58 = vld [vmem:[#allocation4 + $0xb4] sm:$0xf0] }
 0x30d   : > { %v7825_v55 = vpop.f32.mrf.mxu1 }
 0x30e   : > { %v6301_v48 = vld [vmem:[#allocation4 + $0xa4] sm:$0xf0] }
 0x315   : > { %v7847_v17 = vpop.f32.mrf.mxu1 }
 0x317   : > { %v2171_v41 = vpop.permute.xlu0 %2170 }
 0x318   : > { %2243 = vst.msk [vmem:[#allocation4 + $0xc0] sm:$0xf] %vm2218_vm10, %v2171_v41 }
 0x319   : > { %2681 = vmatmul.bf16.gmra.mxu0 %v5845_v14  ;;  %v2305_v14 = vpack.c.bf16 %v2273_v35, %v2273_v35 }
 0x31b   : > { %2337 = vst.msk [vmem:[#allocation4 + $0xb4] sm:$0xf] %vm642_vm3, %v2305_v14  ;;  %v2173_v0 = vpop.permute.xlu1 %2172 }
 0x31c   : > { %2244 = vst.msk [vmem:[#allocation4 + $0xc8] sm:$0xf] %vm2218_vm10, %v2173_v0 }
 0x329   : > { %2686 = vmatmul.bf16.gmra.mxu0 %v5853_v37 }
 0x32a   : > { %v2177_v14 = vpop.permute.xlu0 %2176 }
 0x32b   : > { %2246 = vst.msk [vmem:[#allocation4 + $0xd8] sm:$0xf] %vm2218_vm10, %v2177_v14 }
 0x331   : > { %v2652_v30 = vpop.f32.mrf.mxu0 }
 0x332   : > { %v2742_v39 = vadd.f32 %v7695_v40, %v2652_v30 }
 0x334   : > { %v2825_v31 = vmul.f32 %v7760_v10, %v2742_v39 }
 0x336   : > { %v2861_v57 = vadd.f32 %v7767_v26, %v2825_v31 }
 0x338   : > { %v2893_v43 = vmax.f32 %v2861_v57, 0.0  ;;  %v2277_v57 = vld [vmem:[#allocation2 + $0x16a] sm:$0xff] }
 0x339   : > { %2691 = vmatmul.bf16.gmra.mxu0 %v5861_v13  ;;  %v2654_v49 = vpop.f32.mrf.mxu0  ;;  %v5877_v13 = vor.u32 %v6301_v48, %v5876_v42 }
 0x33a   : > { %2972 = vst.msk [vmem:[#allocation3 + $0x19] sm:$0xff] %vm2925_vm11, %v2893_v43  ;;  %v2744_v32 = vadd.f32 %v7699_v16, %v2654_v49  ;;  %v6300_v16 = vld [vmem:[#allocation4 + $0xa4] sm:$0xf]  ;;  %v2278_v43 = vld [vmem:[#allocation2 + $0x172] sm:$0xff] }
 0x33b   : > { %v5881_v60 = vor.u32 %v6300_v16, %v5878_v27  ;;  %v5884_v16 = vld [vmem:[#allocation4 + $0xb0] sm:$0xf] }
 0x33c   : > { %v2826_v63 = vmul.f32 %v7760_v10, %v2744_v32 }
 0x33d   : > { %5968 = vmatmul.msk.bf16.gmra.mxu1 %vm435_vm0, %v5881_v60  ;;  %v5885_v60 = vor.u32 %v6303_v58, %v5884_v16 }
 0x33e   : > { %v2862_v34 = vadd.f32 %v7767_v26, %v2826_v63  ;;  %v2309_v63 = vpack.c.bf16 %v2277_v57, %v2277_v57 }
 0x340   : > { %v2894_v7 = vmax.f32 %v2862_v34, 0.0  ;;  %v2310_v34 = vpack.c.bf16 %v2278_v43, %v2278_v43  ;;  %2341 = vst.msk [vmem:[#allocation4 + $0xd4] sm:$0xf] %vm642_vm3, %v2309_v63 }
 0x341   : > { %v2657_v54 = vpop.f32.mrf.mxu0  ;;  %v3103_v6 = vld [vmem:[#allocation3 + $0x19] sm:$0xff] }
 0x342   : > { %2973 = vst.msk [vmem:[#allocation3 + $0x21] sm:$0xff] %vm2925_vm11, %v2894_v7  ;;  %v2747_v9 = vadd.f32 %v7712_v46, %v2657_v54  ;;  %v3135_v22 = vpack.c.bf16 %v3103_v6, %v3103_v6  ;;  %v2276_v46 = vld [vmem:[#allocation2 + $0x15a] sm:$0xff]  ;;  %v3006_v37 = vld [vmem:[#allocation3 + $0x18] sm:$0xff]  ;;  %v6302_v6 = vld [vmem:[#allocation4 + $0xb4] sm:$0xf] }
 0x343   : > { %v2308_v28 = vpack.c.bf16 %v2276_v46, %v2276_v46  ;;  %v7845_v39 = vpack.c.bf16 %v3006_v37, %v3006_v37  ;;  %v3776_v49 = vld [vmem:[#allocation3 + $0x19] sm:$0xff]  ;;  %2342 = vst.msk [vmem:[#allocation4 + $0xdc] sm:$0xf] %vm642_vm3, %v2310_v34 }
 0x344   : > { %v2827_v24 = vmul.f32 %v7760_v10, %v2747_v9  ;;  %3201 = vrot.lane.b32.xlu1 %v3135_v22, %s6656_s23  ;;  %v3808_v54 = vpack.c.bf16 %v3776_v49, %v3776_v49  ;;  %v2279_v46 = vld [vmem:[#allocation2 + $0x182] sm:$0xff] }
 0x345   : > { %2340 = vst.msk [vmem:[#allocation4 + $0xcc] sm:$0xf] %vm642_vm3, %v2308_v28  ;;  %v2311_v20 = vpack.c.bf16 %v2279_v46, %v2279_v46 }
 0x346   : > { %v2863_v47 = vadd.f32 %v7767_v26, %v2827_v24  ;;  %3071 = vst.msk [vmem:[#allocation5 + $0x18] sm:$0xf] %vm3068_vm14, %v7845_v39 }
 0x347   : > { %3840 = vst.msk [vmem:[#allocation5 + $0x4] sm:$0xf] %vm3068_vm14, %v3808_v54  ;;  %v6306_v58 = vld [vmem:[#allocation4 + $0xd4] sm:$0xf] }
 0x348   : > { %v2895_v40 = vmax.f32 %v2863_v47, 0.0  ;;  %v5889_v47 = vor.u32 %v6302_v6, %v5886_v33  ;;  %2343 = vst.msk [vmem:[#allocation4 + $0xe4] sm:$0xf] %vm642_vm3, %v2311_v20 }
 0x349   : > { %2696 = vmatmul.bf16.gmra.mxu0 %v5869_v25  ;;  %v2659_v45 = vpop.f32.mrf.mxu0  ;;  %v3104_v53 = vld [vmem:[#allocation3 + $0x21] sm:$0xff] }
 0x34a   : > { %2974 = vst.msk [vmem:[#allocation3 + $0x31] sm:$0xff] %vm2925_vm11, %v2895_v40  ;;  %v2749_v36 = vadd.f32 %v7731_v62, %v2659_v45  ;;  %v3136_v51 = vpack.c.bf16 %v3104_v53, %v3104_v53  ;;  %v3007_v61 = vld [vmem:[#allocation3 + $0x20] sm:$0xff]  ;;  %v7879_v45 = vpop.f32.mrf.mxu1 }
 0x34b   : > { %v7842_v38 = vpack.c.bf16 %v3007_v61, %v3007_v61  ;;  %v3777_v40 = vld [vmem:[#allocation3 + $0x21] sm:$0xff] }
 0x34c   : > { %v2828_v15 = vmul.f32 %v7760_v10, %v2749_v36  ;;  %3203 = vrot.lane.b32.xlu2 %v3136_v51, %s6656_s23  ;;  %v2175_v36 = vpop.permute.xlu2 %2174  ;;  %v3809_v2 = vpack.c.bf16 %v3777_v40, %v3777_v40 }
 0x34d   : > { %3072 = vst.msk [vmem:[#allocation5 + $0x24] sm:$0xf] %vm3068_vm14, %v7842_v38  ;;  %5969 = vmatmul.msk.bf16.gmra.mxu1 %vm435_vm0, %v5889_v47 }
 0x34e   : > { %v2864_v29 = vadd.f32 %v7767_v26, %v2828_v15  ;;  %2245 = vst.msk [vmem:[#allocation4 + $0xd0] sm:$0xf] %vm2218_vm10, %v2175_v36 }
 0x34f   : > { %3841 = vst.msk [vmem:[#allocation5 + $0x10] sm:$0xf] %vm3068_vm14, %v3809_v2 }
 0x350   : > { %v2896_v62 = vmax.f32 %v2864_v29, 0.0 }
 0x351   : > { %v3105_v30 = vld [vmem:[#allocation3 + $0x31] sm:$0xff] }
 0x352   : > { %2975 = vst.msk [vmem:[#allocation3 + $0x39] sm:$0xff] %vm2925_vm11, %v2896_v62  ;;  %v3008_v11 = vld [vmem:[#allocation3 + $0x30] sm:$0xff]  ;;  %v3137_v32 = vpack.c.bf16 %v3105_v30, %v3105_v30  ;;  %v7898_v42 = vpop.f32.mrf.mxu1 }
 0x353   : > { %v4321_v31 = vld [vmem:[#allocation3 + $0x31] sm:$0xff]  ;;  %v7853_v50 = vpack.c.bf16 %v3008_v11, %v3008_v11 }
 0x354   : > { %v7857_v7 = vpack.c.bf16 %v4321_v31, %v4321_v31  ;;  %3205 = vrot.lane.b32.xlu0 %v3137_v32, %s6656_s23  ;;  %v6304_v11 = vld [vmem:[#allocation4 + $0xc4] sm:$0xf]  ;;  %v5894_v31 = vld [vmem:[#allocation4 + $0xc8] sm:$0xf0]  ;;  %v2179_v32 = vpop.permute.xlu1 %2178 }
 0x355   : > { %3073 = vst.msk [vmem:[#allocation5 + $0x30] sm:$0xf] %vm3068_vm14, %v7853_v50 }
 0x356   : > { %v2662_v3 = vpop.f32.mrf.mxu0  ;;  %9214 = vst [vmem:[#allocation18_spill] sm:$0xff] %v7857_v7 }
 0x357   : > { %v2752_v5 = vadd.f32 %v7753_v59, %v2662_v3  ;;  %3842 = vst.msk [vmem:[#allocation5 + $0x1c] sm:$0xf] %vm3068_vm14, %v7857_v7 }
 0x358   : > { %2247 = vst.msk [vmem:[#allocation4 + $0xe0] sm:$0xf] %vm2218_vm10, %v2179_v32 }
 0x359   : > { %v2829_v8 = vmul.f32 %v7760_v10, %v2752_v5  ;;  %2701 = vmatmul.bf16.gmra.mxu0 %v5877_v13  ;;  %v3106_v9 = vld [vmem:[#allocation3 + $0x39] sm:$0xff]  ;;  %v5897_v13 = vor.u32 %v6304_v11, %v5894_v31  ;;  %v2181_v5 = vpop.permute.xlu2 %2180 }
 0x35a   : > { %v3009_v12 = vld [vmem:[#allocation3 + $0x38] sm:$0xff]  ;;  %v3138_v19 = vpack.c.bf16 %v3106_v9, %v3106_v9  ;;  %2248 = vst.msk [vmem:[#allocation4 + $0xe8] sm:$0xf] %vm2218_vm10, %v2181_v5 }
 0x35b   : > { %v7866_v22 = vpack.c.bf16 %v3009_v12, %v3009_v12  ;;  %v3875_v59 = vld [vmem:[#allocation3 + $0x3a] sm:$0xff]  ;;  %v2865_v23 = vadd.f32 %v7767_v26, %v2829_v8  ;;  %v4545_v35 = vld [vmem:[#allocation3 + $0x32] sm:$0xff] }
 0x35c   : > { %v7871_v24 = vpack.c.bf16 %v3875_v59, %v3875_v59  ;;  %v4322_v25 = vld [vmem:[#allocation3 + $0x39] sm:$0xff]  ;;  %3207 = vrot.lane.b32.xlu1 %v3138_v19, %s6656_s23  ;;  %v4577_v51 = vpack.c.bf16 %v4545_v35, %v4545_v35  ;;  %v7922_v59 = vpop.f32.mrf.mxu1 }
 0x35d   : > { %3074 = vst.msk [vmem:[#allocation5 + $0x3c] sm:$0xf] %vm3068_vm14, %v7866_v22  ;;  %v7877_v18 = vpack.c.bf16 %v4322_v25, %v4322_v25  ;;  %v2897_v44 = vmax.f32 %v2865_v23, 0.0  ;;  %5970 = vmatmul.msk.bf16.gmra.mxu1 %vm435_vm0, %v5897_v13  ;;  %v6305_v19 = vld [vmem:[#allocation4 + $0xc4] sm:$0xf0] }
 0x35e   : > { %9215 = vst [vmem:[#allocation19_spill] sm:$0xff] %v7871_v24  ;;  %v2664_v53 = vpop.f32.mrf.mxu0  ;;  %v6307_v13 = vld [vmem:[#allocation4 + $0xd4] sm:$0xf0] }
 0x35f   : > { %9216 = vst [vmem:[#allocation20_spill] sm:$0xff] %v7877_v18  ;;  %v2754_v1 = vadd.f32 %v7784_v52, %v2664_v53  ;;  %v2280_v52 = vld [vmem:[#allocation2 + $0x18a] sm:$0xff] }
 0x360   : > { %4610 = vst.msk [vmem:[#allocation5 + $0x14] sm:$0xf] %vm3068_vm14, %v7871_v24  ;;  %v2312_v0 = vpack.c.bf16 %v2280_v52, %v2280_v52 }
 0x361   : > { %3843 = vst.msk [vmem:[#allocation5 + $0x28] sm:$0xf] %vm3068_vm14, %v7877_v18  ;;  %v2830_v15 = vmul.f32 %v7760_v10, %v2754_v1 }
 0x362   : > { %2976 = vst.msk [vmem:[#allocation3 + $0x49] sm:$0xff] %vm2925_vm11, %v2897_v44 }
 0x363   : > { %4609 = vst.msk [vmem:[#allocation5 + $0x8] sm:$0xf] %vm3068_vm14, %v4577_v51  ;;  %v2866_v27 = vadd.f32 %v7767_v26, %v2830_v15 }
 0x364   : > { %2344 = vst.msk [vmem:[#allocation4 + $0xec] sm:$0xf] %vm642_vm3, %v2312_v0  ;;  %v7944_v52 = vpop.f32.mrf.mxu1 }
 0x365   : > { %v2898_v29 = vmax.f32 %v2866_v27, 0.0  ;;  %v5902_v27 = vld [vmem:[#allocation4 + $0xd8] sm:$0xf0] }
 0x366   : > { %v2667_v41 = vpop.f32.mrf.mxu0  ;;  %v5905_v46 = vor.u32 %v6306_v58, %v5902_v27 }
 0x367   : > { %2977 = vst.msk [vmem:[#allocation3 + $0x51] sm:$0xff] %vm2925_vm11, %v2898_v29  ;;  %v2757_v56 = vadd.f32 %v7806_v4, %v2667_v41 }
 0x369   : > { %v3107_v61 = vld [vmem:[#allocation3 + $0x49] sm:$0xff]  ;;  %v2831_v30 = vmul.f32 %v7760_v10, %v2757_v56  ;;  %2706 = vmatmul.bf16.gmra.mxu0 %v5885_v60 }
 0x36a   : > { %v3010_v21 = vld [vmem:[#allocation3 + $0x48] sm:$0xff]  ;;  %v3139_v37 = vpack.c.bf16 %v3107_v61, %v3107_v61 }
 0x36b   : > { %v7896_v62 = vpack.c.bf16 %v3010_v21, %v3010_v21  ;;  %v4323_v28 = vld [vmem:[#allocation3 + $0x49] sm:$0xff]  ;;  %v2867_v4 = vadd.f32 %v7767_v26, %v2831_v30 }
 0x36c   : > { %v7901_v48 = vpack.c.bf16 %v4323_v28, %v4323_v28  ;;  %3209 = vrot.lane.b32.xlu2 %v3139_v37, %s6656_s23 }
 0x36d   : > { %3075 = vst.msk [vmem:[#allocation5 + $0x48] sm:$0xf] %vm3068_vm14, %v7896_v62  ;;  %v2899_v57 = vmax.f32 %v2867_v4, 0.0  ;;  %5971 = vmatmul.msk.bf16.gmra.mxu1 %vm435_vm0, %v5905_v46 }
 0x36e   : > { %9217 = vst [vmem:[#allocation21_spill] sm:$0xff] %v7901_v48  ;;  %v2669_v43 = vpop.f32.mrf.mxu0  ;;  %v3108_v49 = vld [vmem:[#allocation3 + $0x51] sm:$0xff] }
 0x36f   : > { %3844 = vst.msk [vmem:[#allocation5 + $0x34] sm:$0xf] %vm3068_vm14, %v7901_v48  ;;  %v3011_v63 = vld [vmem:[#allocation3 + $0x50] sm:$0xff]  ;;  %v2759_v34 = vadd.f32 %v7825_v55, %v2669_v43  ;;  %v3140_v3 = vpack.c.bf16 %v3108_v49, %v3108_v49 }
 0x370   : > { %2978 = vst.msk [vmem:[#allocation3 + $0x61] sm:$0xff] %vm2925_vm11, %v2899_v57  ;;  %v7913_v54 = vpack.c.bf16 %v3011_v63, %v3011_v63  ;;  %v4324_v6 = vld [vmem:[#allocation3 + $0x51] sm:$0xff] }
 0x371   : > { %v4547_v8 = vld [vmem:[#allocation3 + $0x4a] sm:$0xff]  ;;  %v2832_v33 = vmul.f32 %v7760_v10, %v2759_v34  ;;  %3211 = vrot.lane.b32.xlu0 %v3140_v3, %s6656_s23  ;;  %v7920_v9 = vpack.c.bf16 %v4324_v6, %v4324_v6  ;;  %v4548_v12 = vld [vmem:[#allocation3 + $0x52] sm:$0xff]  ;;  %v7962_v34 = vpop.f32.mrf.mxu1 }
 0x372   : > { %v5892_v55 = vld [vmem:[#allocation4 + $0xc0] sm:$0xf]  ;;  %3076 = vst.msk [vmem:[#allocation5 + $0x54] sm:$0xf] %vm3068_vm14, %v7913_v54  ;;  %v4579_v23 = vpack.c.bf16 %v4547_v8, %v4547_v8  ;;  %v4580_v25 = vpack.c.bf16 %v4548_v12, %v4548_v12  ;;  %v3004_v8 = vld [vmem:[#allocation3] sm:$0xff] }
 0x373   : > { %9218 = vst [vmem:[#allocation22_spill] sm:$0xff] %v7920_v9  ;;  %v2868_v47 = vadd.f32 %v7767_v26, %v2832_v33  ;;  %v5893_v40 = vor.u32 %v6305_v19, %v5892_v55  ;;  %v3036_v55 = vpack.c.bf16 %v3004_v8, %v3004_v8 }
 0x374   : > { %3845 = vst.msk [vmem:[#allocation5 + $0x40] sm:$0xf] %vm3068_vm14, %v7920_v9 }
 0x375   : > { %4611 = vst.msk [vmem:[#allocation5 + $0x20] sm:$0xf] %vm3068_vm14, %v4579_v23  ;;  %v2900_v35 = vmax.f32 %v2868_v47, 0.0  ;;  %v5910_v47 = vld [vmem:[#allocation4 + $0xe8] sm:$0xf0] }
 0x376   : > { %4612 = vst.msk [vmem:[#allocation5 + $0x2c] sm:$0xf] %vm3068_vm14, %v4580_v25  ;;  %v2672_v44 = vpop.f32.mrf.mxu0  ;;  %v6308_v25 = vld [vmem:[#allocation4 + $0xe4] sm:$0xf] }
 0x377   : > { %v3109_v53 = vld [vmem:[#allocation3 + $0x61] sm:$0xff]  ;;  %2979 = vst.msk [vmem:[#allocation3 + $0x69] sm:$0xff] %vm2925_vm11, %v2900_v35  ;;  %v2762_v51 = vadd.f32 %v7847_v17, %v2672_v44 }
 0x378   : > { %v3012_v36 = vld [vmem:[#allocation3 + $0x60] sm:$0xff]  ;;  %v3141_v1 = vpack.c.bf16 %v3109_v53, %v3109_v53  ;;  %3069 = vst.msk [vmem:[#allocation5] sm:$0xf] %vm3068_vm14, %v3036_v55 }
 0x379   : > { %v7933_v14 = vpack.c.bf16 %v3012_v36, %v3012_v36  ;;  %v4325_v2 = vld [vmem:[#allocation3 + $0x61] sm:$0xff]  ;;  %v2833_v16 = vmul.f32 %v7760_v10, %v2762_v51  ;;  %2711 = vmatmul.bf16.gmra.mxu0 %v5893_v40  ;;  %v5913_v40 = vor.u32 %v6308_v25, %v5910_v47  ;;  %v7984_v27 = vpop.f32.mrf.mxu1 }
 0x37a   : > { %v7935_v15 = vpack.c.bf16 %v4325_v2, %v4325_v2  ;;  %3213 = vrot.lane.b32.xlu1 %v3141_v1, %s6656_s23 }
 0x37b   : > { %3077 = vst.msk [vmem:[#allocation5 + $0x60] sm:$0xf] %vm3068_vm14, %v7933_v14  ;;  %v2869_v17 = vadd.f32 %v7767_v26, %v2833_v16 }
 0x37c   : > { %9219 = vst [vmem:[#allocation23_spill] sm:$0xff] %v7935_v15 }
 0x37d   : > { %3846 = vst.msk [vmem:[#allocation5 + $0x4c] sm:$0xf] %vm3068_vm14, %v7935_v15  ;;  %v2901_v29 = vmax.f32 %v2869_v17, 0.0  ;;  %5972 = vmatmul.msk.bf16.gmra.mxu1 %vm435_vm0, %v5913_v40 }
 0x37e   : > { %v2674_v60 = vpop.f32.mrf.mxu0  ;;  %v3110_v20 = vld [vmem:[#allocation3 + $0x69] sm:$0xff] }
 0x37f   : > { %v3013_v0 = vld [vmem:[#allocation3 + $0x68] sm:$0xff]  ;;  %2980 = vst.msk [vmem:[#allocation3 + $0x79] sm:$0xff] %vm2925_vm11, %v2901_v29  ;;  %v2764_v41 = vadd.f32 %v7879_v45, %v2674_v60  ;;  %v3142_v61 = vpack.c.bf16 %v3110_v20, %v3110_v20  ;;  %v5900_v45 = vld [vmem:[#allocation4 + $0xd0] sm:$0xf] }
 0x380   : > { %v7948_v21 = vpack.c.bf16 %v3013_v0, %v3013_v0  ;;  %v4326_v56 = vld [vmem:[#allocation3 + $0x69] sm:$0xff]  ;;  %v5901_v49 = vor.u32 %v6307_v13, %v5900_v45  ;;  %v2185_v13 = vpop.permute.xlu1 %2184 }
 0x381   : > { %v7951_v37 = vpack.c.bf16 %v4326_v56, %v4326_v56  ;;  %v4549_v28 = vld [vmem:[#allocation3 + $0x62] sm:$0xff]  ;;  %v4550_v30 = vld [vmem:[#allocation3 + $0x6a] sm:$0xff]  ;;  %v2834_v11 = vmul.f32 %v7760_v10, %v2764_v41  ;;  %3215 = vrot.lane.b32.xlu2 %v3142_v61, %s6656_s23  ;;  %v6309_v41 = vld [vmem:[#allocation4 + $0xe4] sm:$0xf0]  ;;  %2250 = vst.msk [vmem:[#allocation4 + $0xf8] sm:$0xf] %vm2218_vm10, %v2185_v13 }
 0x382   : > { %3078 = vst.msk [vmem:[#allocation5 + $0x6c] sm:$0xf] %vm3068_vm14, %v7948_v21  ;;  %v4581_v31 = vpack.c.bf16 %v4549_v28, %v4549_v28  ;;  %v4582_v4 = vpack.c.bf16 %v4550_v30, %v4550_v30  ;;  %v5908_v0 = vld [vmem:[#allocation4 + $0xe0] sm:$0xf] }
 0x383   : > { %9220 = vst [vmem:[#allocation24_spill] sm:$0xff] %v7951_v37  ;;  %v2870_v57 = vadd.f32 %v7767_v26, %v2834_v11  ;;  %v5909_v28 = vor.u32 %v6309_v41, %v5908_v0  ;;  %v3005_v0 = vld [vmem:[#allocation3 + $0x8] sm:$0xff] }
 0x384   : > { %3847 = vst.msk [vmem:[#allocation5 + $0x58] sm:$0xf] %vm3068_vm14, %v7951_v37 }
 0x385   : > { %4613 = vst.msk [vmem:[#allocation5 + $0x38] sm:$0xf] %vm3068_vm14, %v4581_v31  ;;  %v2902_v43 = vmax.f32 %v2870_v57, 0.0 }
 0x386   : > { %4614 = vst.msk [vmem:[#allocation5 + $0x44] sm:$0xf] %vm3068_vm14, %v4582_v4  ;;  %v2677_v32 = vpop.f32.mrf.mxu0  ;;  %v3111_v63 = vld [vmem:[#allocation3 + $0x79] sm:$0xff] }
 0x387   : > { %v3014_v3 = vld [vmem:[#allocation3 + $0x78] sm:$0xff]  ;;  %2981 = vst.msk [vmem:[#allocation3 + $0x81] sm:$0xff] %vm2925_vm11, %v2902_v43  ;;  %v2767_v5 = vadd.f32 %v7898_v42, %v2677_v32  ;;  %v3143_v6 = vpack.c.bf16 %v3111_v63, %v3111_v63  ;;  %v3198_v42 = vpop.permute.xlu2 %3197  ;;  %v2778_v63 = vpop.f32.mrf.mxu1 }
 0x388   : > { %v7966_v33 = vpack.c.bf16 %v3014_v3, %v3014_v3  ;;  %v4327_v12 = vld [vmem:[#allocation3 + $0x79] sm:$0xff]  ;;  %3294 = vst.msk [vmem:[#allocation5] sm:$0xf] %vm3293_vm15, %v3198_v42 }
 0x389   : > { %v7968_v19 = vpack.c.bf16 %v4327_v12, %v4327_v12  ;;  %v2835_v23 = vmul.f32 %v7760_v10, %v2767_v5  ;;  %2716 = vmatmul.bf16.gmra.mxu0 %v5901_v49  ;;  %3217 = vrot.lane.b32.xlu0 %v3143_v6, %s6656_s23 }
 0x38a   : > { %3079 = vst.msk [vmem:[#allocation5 + $0x78] sm:$0xf] %vm3068_vm14, %v7966_v33 }
 0x38b   : > { %v2871_v35 = vadd.f32 %v7767_v26, %v2835_v23  ;;  %3848 = vst.msk [vmem:[#allocation5 + $0x64] sm:$0xf] %vm3068_vm14, %v7968_v19  ;;  %v2183_v23 = vpop.permute.xlu0 %2182 }
 0x38c   : > { %2249 = vst.msk [vmem:[#allocation4 + $0xf0] sm:$0xf] %vm2218_vm10, %v2183_v23 }
 0x38d   : > { %v2903_v44 = vmax.f32 %v2871_v35, 0.0 }
 0x38e   : > { %v2679_v53 = vpop.f32.mrf.mxu0  ;;  %v3112_v36 = vld [vmem:[#allocation3 + $0x81] sm:$0xff] }
 0x38f   : > { %v3015_v51 = vld [vmem:[#allocation3 + $0x80] sm:$0xff]  ;;  %2982 = vst.msk [vmem:[#allocation3 + $0x91] sm:$0xff] %vm2925_vm11, %v2903_v44  ;;  %v2769_v1 = vadd.f32 %v7922_v59, %v2679_v53  ;;  %v3144_v2 = vpack.c.bf16 %v3112_v36, %v3112_v36 }
 0x390   : > { %v7981_v16 = vpack.c.bf16 %v3015_v51, %v3015_v51  ;;  %v4328_v58 = vld [vmem:[#allocation3 + $0x81] sm:$0xff]  ;;  %v2781_v51 = vpop.f32.mrf.mxu1 }
 0x391   : > { %v7986_v17 = vpack.c.bf16 %v4328_v58, %v4328_v58  ;;  %v4551_v46 = vld [vmem:[#allocation3 + $0x7a] sm:$0xff]  ;;  %v4552_v29 = vld [vmem:[#allocation3 + $0x82] sm:$0xff]  ;;  %v2836_v60 = vmul.f32 %v7760_v10, %v2769_v1  ;;  %3219 = vrot.lane.b32.xlu1 %v3144_v2, %s6656_s23 }
 0x392   : > { %3080 = vst.msk [vmem:[#allocation5 + $0x84] sm:$0xf] %vm3068_vm14, %v7981_v16  ;;  %v4583_v59 = vpack.c.bf16 %v4551_v46, %v4551_v46  ;;  %v4584_v20 = vpack.c.bf16 %v4552_v29, %v4552_v29 }
 0x393   : > { %9221 = vst [vmem:[#allocation25_spill] sm:$0xff] %v7986_v17  ;;  %v2872_v61 = vadd.f32 %v7767_v26, %v2836_v60 }
 0x394   : > { %3849 = vst.msk [vmem:[#allocation5 + $0x70] sm:$0xf] %vm3068_vm14, %v7986_v17 }
 0x395   : > { %4615 = vst.msk [vmem:[#allocation5 + $0x50] sm:$0xf] %vm3068_vm14, %v4583_v59  ;;  %v2904_v56 = vmax.f32 %v2872_v61, 0.0 }
 0x396   : > { %4616 = vst.msk [vmem:[#allocation5 + $0x5c] sm:$0xf] %vm3068_vm14, %v4584_v20  ;;  %v2682_v30 = vpop.f32.mrf.mxu0  ;;  %v3113_v11 = vld [vmem:[#allocation3 + $0x91] sm:$0xff] }
 0x397   : > { %v3016_v31 = vld [vmem:[#allocation3 + $0x90] sm:$0xff]  ;;  %2983 = vst.msk [vmem:[#allocation3 + $0x99] sm:$0xff] %vm2925_vm11, %v2904_v56  ;;  %v2772_v4 = vadd.f32 %v7944_v52, %v2682_v30  ;;  %v3145_v45 = vpack.c.bf16 %v3113_v11, %v3113_v11  ;;  %v3037_v56 = vpack.c.bf16 %v3005_v0, %v3005_v0 }
 0x398   : > { %v7999_v57 = vpack.c.bf16 %v3016_v31, %v3016_v31  ;;  %v4329_v43 = vld [vmem:[#allocation3 + $0x91] sm:$0xff] }
 0x399   : > { %v8002_v49 = vpack.c.bf16 %v4329_v43, %v4329_v43  ;;  %v2837_v32 = vmul.f32 %v7760_v10, %v2772_v4  ;;  %2721 = vmatmul.bf16.gmra.mxu0 %v5909_v28  ;;  %3221 = vrot.lane.b32.xlu2 %v3145_v45, %s6656_s23  ;;  %3070 = vst.msk [vmem:[#allocation5 + $0xc] sm:$0xf] %vm3068_vm14, %v3037_v56  ;;  %v2783_v4 = vpop.f32.mrf.mxu1 }
 0x39a   : > { %3081 = vst.msk [vmem:[#allocation5 + $0x90] sm:$0xf] %vm3068_vm14, %v7999_v57 }
 0x39b   : > { %3850 = vst.msk [vmem:[#allocation5 + $0x7c] sm:$0xf] %vm3068_vm14, %v8002_v49  ;;  %v2873_v52 = vadd.f32 %v7767_v26, %v2837_v32 }
 0x39d   : > { %v2905_v3 = vmax.f32 %v2873_v52, 0.0 }
 0x39e   : > { %v2684_v5 = vpop.f32.mrf.mxu0  ;;  %v3114_v6 = vld [vmem:[#allocation3 + $0x99] sm:$0xff] }
 0x39f   : > { %v3017_v8 = vld [vmem:[#allocation3 + $0x98] sm:$0xff]  ;;  %2984 = vst.msk [vmem:[#allocation3 + $0xa9] sm:$0xff] %vm2925_vm11, %v2905_v3  ;;  %v2774_v12 = vadd.f32 %v7962_v34, %v2684_v5  ;;  %v3146_v55 = vpack.c.bf16 %v3114_v6, %v3114_v6 }
 0x3a0   : > { %v8013_v25 = vpack.c.bf16 %v3017_v8, %v3017_v8  ;;  %v4330_v47 = vld [vmem:[#allocation3 + $0x99] sm:$0xff] }
 0x3a1   : > { %v4553_v42 = vld [vmem:[#allocation3 + $0x92] sm:$0xff]  ;;  %v8016_v35 = vpack.c.bf16 %v4330_v47, %v4330_v47  ;;  %v4554_v40 = vld [vmem:[#allocation3 + $0x9a] sm:$0xff]  ;;  %v2838_v53 = vmul.f32 %v7760_v10, %v2774_v12  ;;  %3223 = vrot.lane.b32.xlu0 %v3146_v55, %s6656_s23 }
 0x3a2   : > { %v4585_v44 = vpack.c.bf16 %v4553_v42, %v4553_v42  ;;  %3082 = vst.msk [vmem:[#allocation5 + $0x9c] sm:$0xf] %vm3068_vm14, %v8013_v25  ;;  %v4586_v34 = vpack.c.bf16 %v4554_v40, %v4554_v40 }
 0x3a3   : > { %3851 = vst.msk [vmem:[#allocation5 + $0x88] sm:$0xf] %vm3068_vm14, %v8016_v35  ;;  %v2874_v36 = vadd.f32 %v7767_v26, %v2838_v53 }
 0x3a4   : > { %4617 = vst.msk [vmem:[#allocation5 + $0x68] sm:$0xf] %vm3068_vm14, %v4585_v44 }
 0x3a5   : > { %4618 = vst.msk [vmem:[#allocation5 + $0x74] sm:$0xf] %vm3068_vm14, %v4586_v34  ;;  %v2906_v1 = vmax.f32 %v2874_v36, 0.0 }
 0x3a6   : > { %v2687_v2 = vpop.f32.mrf.mxu0  ;;  %v3115_v58 = vld [vmem:[#allocation3 + $0xa9] sm:$0xff]  ;;  %v3204_v46 = vpop.permute.xlu2 %3203 }
 0x3a7   : > { %v3018_v29 = vld [vmem:[#allocation3 + $0xa8] sm:$0xff]  ;;  %2985 = vst.msk [vmem:[#allocation3 + $0xb1] sm:$0xff] %vm2925_vm11, %v2906_v1  ;;  %v2777_v59 = vadd.f32 %v7984_v27, %v2687_v2  ;;  %v3147_v20 = vpack.c.bf16 %v3115_v58, %v3115_v58  ;;  %v2786_v58 = vpop.f32.mrf.mxu1 }
 0x3a8   : > { %v4331_v60 = vld [vmem:[#allocation3 + $0xa9] sm:$0xff]  ;;  %v8029_v41 = vpack.c.bf16 %v3018_v29, %v3018_v29  ;;  %3297 = vst.msk [vmem:[#allocation5 + $0x24] sm:$0xf] %vm3293_vm15, %v3204_v46 }
 0x3a9   : > { %v8031_v61 = vpack.c.bf16 %v4331_v60, %v4331_v60  ;;  %v2839_v28 = vmul.f32 %v7760_v10, %v2777_v59  ;;  %3225 = vrot.lane.b32.xlu1 %v3147_v20, %s6656_s23 }
 0x3aa   : > { %3083 = vst.msk [vmem:[#allocation5 + $0xa8] sm:$0xf] %vm3068_vm14, %v8029_v41 }
 0x3ab   : > { %v2875_v27 = vadd.f32 %v7767_v26, %v2839_v28  ;;  %3852 = vst.msk [vmem:[#allocation5 + $0x94] sm:$0xf] %vm3068_vm14, %v8031_v61 }
 0x3ad   : > { %v2907_v30 = vmax.f32 %v2875_v27, 0.0 }
 0x3ae   : > { %v2689_v11 = vpop.f32.mrf.mxu0  ;;  %v3116_v31 = vld [vmem:[#allocation3 + $0xb1] sm:$0xff] }
 0x3af   : > { %v3019_v45 = vld [vmem:[#allocation3 + $0xb0] sm:$0xff]  ;;  %2986 = vst.msk [vmem:[#allocation3 + $0xc1] sm:$0xff] %vm2925_vm11, %v2907_v30  ;;  %v2779_v13 = vadd.f32 %v2778_v63, %v2689_v11  ;;  %v3148_v43 = vpack.c.bf16 %v3116_v31, %v3116_v31 }
 0x3b0   : > { %v8043_v32 = vpack.c.bf16 %v3019_v45, %v3019_v45  ;;  %v4332_v52 = vld [vmem:[#allocation3 + $0xb1] sm:$0xff] }
 0x3b1   : > { %v4555_v3 = vld [vmem:[#allocation3 + $0xaa] sm:$0xff]  ;;  %v8045_v5 = vpack.c.bf16 %v4332_v52, %v4332_v52  ;;  %v4556_v6 = vld [vmem:[#allocation3 + $0xb2] sm:$0xff]  ;;  %v2840_v12 = vmul.f32 %v7760_v10, %v2779_v13  ;;  %3227 = vrot.lane.b32.xlu2 %v3148_v43, %s6656_s23  ;;  %v2788_v43 = vpop.f32.mrf.mxu1 }
 0x3b2   : > { %v4587_v8 = vpack.c.bf16 %v4555_v3, %v4555_v3  ;;  %3084 = vst.msk [vmem:[#allocation5 + $0xb4] sm:$0xf] %vm3068_vm14, %v8043_v32  ;;  %v4588_v55 = vpack.c.bf16 %v4556_v6, %v4556_v6  ;;  %v3200_v3 = vpop.permute.xlu0 %3199 }
 0x3b3   : > { %3853 = vst.msk [vmem:[#allocation5 + $0xa0] sm:$0xf] %vm3068_vm14, %v8045_v5  ;;  %v2876_v63 = vadd.f32 %v7767_v26, %v2840_v12 }
 0x3b4   : > { %4619 = vst.msk [vmem:[#allocation5 + $0x80] sm:$0xf] %vm3068_vm14, %v4587_v8 }
 0x3b5   : > { %4620 = vst.msk [vmem:[#allocation5 + $0x8c] sm:$0xf] %vm3068_vm14, %v4588_v55  ;;  %v2908_v23 = vmax.f32 %v2876_v63, 0.0 }
 0x3b6   : > { %v2692_v47 = vpop.f32.mrf.mxu0  ;;  %v3117_v42 = vld [vmem:[#allocation3 + $0xc1] sm:$0xff]  ;;  %v3202_v40 = vpop.permute.xlu1 %3201  ;;  %3295 = vst.msk [vmem:[#allocation5 + $0xc] sm:$0xf] %vm3293_vm15, %v3200_v3 }
 0x3b7   : > { %v3020_v44 = vld [vmem:[#allocation3 + $0xc0] sm:$0xff]  ;;  %2987 = vst.msk [vmem:[#allocation3 + $0xc9] sm:$0xff] %vm2925_vm11, %v2908_v23  ;;  %v2782_v34 = vadd.f32 %v2781_v51, %v2692_v47  ;;  %v3149_v36 = vpack.c.bf16 %v3117_v42, %v3117_v42 }
 0x3b8   : > { %v4333_v53 = vld [vmem:[#allocation3 + $0xc1] sm:$0xff]  ;;  %v8057_v1 = vpack.c.bf16 %v3020_v44, %v3020_v44  ;;  %3296 = vst.msk [vmem:[#allocation5 + $0x18] sm:$0xf] %vm3293_vm15, %v3202_v40 }
 0x3b9   : > { %v8059_v2 = vpack.c.bf16 %v4333_v53, %v4333_v53  ;;  %v2841_v46 = vmul.f32 %v7760_v10, %v2782_v34  ;;  %3229 = vrot.lane.b32.xlu0 %v3149_v36, %s6656_s23 }
 0x3ba   : > { %3085 = vst.msk [vmem:[#allocation5 + $0xc0] sm:$0xf] %vm3068_vm14, %v8057_v1 }
 0x3bb   : > { %3854 = vst.msk [vmem:[#allocation5 + $0xac] sm:$0xf] %vm3068_vm14, %v8059_v2  ;;  %v2877_v51 = vadd.f32 %v7767_v26, %v2841_v46  ;;  %v2791_v46 = vpop.f32.mrf.mxu1 }
 0x3bd   : > { %v2909_v29 = vmax.f32 %v2877_v51, 0.0 }
 0x3be   : > { %v2694_v60 = vpop.f32.mrf.mxu0  ;;  %v3118_v59 = vld [vmem:[#allocation3 + $0xc9] sm:$0xff] }
 0x3bf   : > { %v3021_v20 = vld [vmem:[#allocation3 + $0xc8] sm:$0xff]  ;;  %2988 = vst.msk [vmem:[#allocation3 + $0xd9] sm:$0xff] %vm2925_vm11, %v2909_v29  ;;  %v2784_v0 = vadd.f32 %v2783_v4, %v2694_v60  ;;  %v3150_v56 = vpack.c.bf16 %v3118_v59, %v3118_v59 }
 0x3c0   : > { %v8070_v28 = vpack.c.bf16 %v3021_v20, %v3021_v20  ;;  %v4334_v27 = vld [vmem:[#allocation3 + $0xc9] sm:$0xff] }
 0x3c1   : > { %v4557_v30 = vld [vmem:[#allocation3 + $0xc2] sm:$0xff]  ;;  %v8072_v11 = vpack.c.bf16 %v4334_v27, %v4334_v27  ;;  %v4558_v31 = vld [vmem:[#allocation3 + $0xca] sm:$0xff]  ;;  %v2842_v13 = vmul.f32 %v7760_v10, %v2784_v0  ;;  %3231 = vrot.lane.b32.xlu1 %v3150_v56, %s6656_s23 }
 0x3c2   : > { %v4589_v45 = vpack.c.bf16 %v4557_v30, %v4557_v30  ;;  %3086 = vst.msk [vmem:[#allocation5 + $0xcc] sm:$0xf] %vm3068_vm14, %v8070_v28  ;;  %v4590_v4 = vpack.c.bf16 %v4558_v31, %v4558_v31  ;;  %v3343_v24 = vld [vmem:[#allocation3 + $0xca] sm:$0xff] }
 0x3c3   : > { %3855 = vst.msk [vmem:[#allocation5 + $0xb8] sm:$0xf] %vm3068_vm14, %v8072_v11  ;;  %v2878_v52 = vadd.f32 %v7767_v26, %v2842_v13 }
 0x3c4   : > { %4621 = vst.msk [vmem:[#allocation5 + $0x98] sm:$0xf] %vm3068_vm14, %v4589_v45 }
 0x3c5   : > { %v2910_v8 = vmax.f32 %v2878_v52, 0.0  ;;  %4622 = vst.msk [vmem:[#allocation5 + $0xa4] sm:$0xf] %vm3068_vm14, %v4590_v4 }
 0x3c6   : > { %v3210_v6 = vpop.permute.xlu2 %3209  ;;  %v2697_v12 = vpop.f32.mrf.mxu0  ;;  %v3119_v55 = vld [vmem:[#allocation3 + $0xd9] sm:$0xff] }
 0x3c7   : > { %3300 = vst.msk [vmem:[#allocation5 + $0x48] sm:$0xf] %vm3293_vm15, %v3210_v6  ;;  %v3022_v63 = vld [vmem:[#allocation3 + $0xd8] sm:$0xff]  ;;  %v2787_v23 = vadd.f32 %v2786_v58, %v2697_v12  ;;  %v3151_v47 = vpack.c.bf16 %v3119_v55, %v3119_v55  ;;  %v3206_v36 = vpop.permute.xlu0 %3205  ;;  %v2793_v6 = vpop.f32.mrf.mxu1 }
 0x3c8   : > { %2989 = vst.msk [vmem:[#allocation3 + $0xe1] sm:$0xff] %vm2925_vm11, %v2910_v8  ;;  %v8086_v42 = vpack.c.bf16 %v3022_v63, %v3022_v63  ;;  %v3792_v40 = vld [vmem:[#allocation3 + $0xd9] sm:$0xff] }
 0x3c9   : > { %v3824_v44 = vpack.c.bf16 %v3792_v40, %v3792_v40  ;;  %v2843_v53 = vmul.f32 %v7760_v10, %v2787_v23  ;;  %3233 = vrot.lane.b32.xlu2 %v3151_v47, %s6656_s23  ;;  %3298 = vst.msk [vmem:[#allocation5 + $0x30] sm:$0xf] %vm3293_vm15, %v3206_v36 }
 0x3ca   : > { %3087 = vst.msk [vmem:[#allocation5 + $0xd8] sm:$0xf] %vm3068_vm14, %v8086_v42 }
 0x3cb   : > { %3856 = vst.msk [vmem:[#allocation5 + $0xc4] sm:$0xf] %vm3068_vm14, %v3824_v44  ;;  %v2879_v34 = vadd.f32 %v7767_v26, %v2843_v53 }
 0x3cd   : > { %v2911_v58 = vmax.f32 %v2879_v34, 0.0 }
 0x3ce   : > { %v2699_v51 = vpop.f32.mrf.mxu0  ;;  %v3208_v60 = vpop.permute.xlu1 %3207 }
 0x3cf   : > { %v3120_v29 = vld [vmem:[#allocation3 + $0xe1] sm:$0xff]  ;;  %2990 = vst.msk [vmem:[#allocation3 + $0xf1] sm:$0xff] %vm2925_vm11, %v2911_v58  ;;  %v2789_v20 = vadd.f32 %v2788_v43, %v2699_v51 }
 0x3d0   : > { %v3023_v59 = vld [vmem:[#allocation3 + $0xe0] sm:$0xff]  ;;  %v8096_v0 = vpack.c.bf16 %v3120_v29, %v3120_v29  ;;  %3299 = vst.msk [vmem:[#allocation5 + $0x3c] sm:$0xf] %vm3293_vm15, %v3208_v60 }
 0x3d1   : > { %v8098_v56 = vpack.c.bf16 %v3023_v59, %v3023_v59  ;;  %v4559_v27 = vld [vmem:[#allocation3 + $0xda] sm:$0xff]  ;;  %v4560_v30 = vld [vmem:[#allocation3 + $0xe2] sm:$0xff]  ;;  %v2844_v4 = vmul.f32 %v7760_v10, %v2789_v20 }
 0x3d2   : > { %v8101_v31 = vpack.c.bf16 %v4559_v27, %v4559_v27  ;;  %v8103_v45 = vpack.c.bf16 %v4560_v30, %v4560_v30  ;;  %v3793_v13 = vld [vmem:[#allocation3 + $0xe1] sm:$0xff]  ;;  %3235 = vrot.lane.b32.xlu0 %v8096_v0, %s6656_s23 }
 0x3d3   : > { %3088 = vst.msk [vmem:[#allocation5 + $0xe4] sm:$0xf] %vm3068_vm14, %v8098_v56  ;;  %v3825_v43 = vpack.c.bf16 %v3793_v13, %v3793_v13  ;;  %v2880_v52 = vadd.f32 %v7767_v26, %v2844_v4  ;;  %v3345_v48 = vld [vmem:[#allocation3 + $0xe2] sm:$0xff] }
 0x3d4   : > { %9222 = vst [vmem:[#allocation26_spill] sm:$0xff] %v8101_v31 }
 0x3d5   : > { %9223 = vst [vmem:[#allocation27_spill] sm:$0xff] %v8103_v45  ;;  %v2912_v3 = vmax.f32 %v2880_v52, 0.0 }
 0x3d6   : > { %4623 = vst.msk [vmem:[#allocation5 + $0xb0] sm:$0xf] %vm3068_vm14, %v8101_v31  ;;  %v2702_v8 = vpop.f32.mrf.mxu0  ;;  %v3121_v12 = vld [vmem:[#allocation3 + $0xf1] sm:$0xff] }
 0x3d7   : > { %4624 = vst.msk [vmem:[#allocation5 + $0xbc] sm:$0xf] %vm3068_vm14, %v8103_v45  ;;  %v3024_v55 = vld [vmem:[#allocation3 + $0xf0] sm:$0xff]  ;;  %v2792_v63 = vadd.f32 %v2791_v46, %v2702_v8  ;;  %v3153_v23 = vpack.c.bf16 %v3121_v12, %v3121_v12  ;;  %v2796_v46 = vpop.f32.mrf.mxu1 }
 0x3d8   : > { %3857 = vst.msk [vmem:[#allocation5 + $0xd0] sm:$0xf] %vm3068_vm14, %v3825_v43  ;;  %v8117_v47 = vpack.c.bf16 %v3024_v55, %v3024_v55  ;;  %v4337_v40 = vld [vmem:[#allocation3 + $0xf1] sm:$0xff] }
 0x3d9   : > { %2991 = vst.msk [vmem:[#allocation3 + $0xf9] sm:$0xff] %vm2925_vm11, %v2912_v3  ;;  %v8119_v44 = vpack.c.bf16 %v4337_v40, %v4337_v40  ;;  %v2845_v53 = vmul.f32 %v7760_v10, %v2792_v63  ;;  %3237 = vrot.lane.b32.xlu1 %v3153_v23, %s6656_s23 }
 0x3da   : > { %3089 = vst.msk [vmem:[#allocation5 + $0xf0] sm:$0xf] %vm3068_vm14, %v8117_v47 }
 0x3db   : > { %9224 = vst [vmem:[#allocation28_spill] sm:$0xff] %v8119_v44  ;;  %v2881_v34 = vadd.f32 %v7767_v26, %v2845_v53  ;;  %v3216_v36 = vpop.permute.xlu2 %3215  ;;  %v8137_v26 = vld [vmem:[%s9154_s2] ss:$0 sm:$0xff] }
 0x3dc   : > { %3858 = vst.msk [vmem:[#allocation5 + $0xdc] sm:$0xf] %vm3068_vm14, %v8119_v44 }
 0x3dd   : > { %3303 = vst.msk [vmem:[#allocation5 + $0x6c] sm:$0xf] %vm3293_vm15, %v3216_v36  ;;  %v2913_v58 = vmax.f32 %v2881_v34, 0.0 }
 0x3de   : > { %v2704_v51 = vpop.f32.mrf.mxu0 }
 0x3df   : > { %2992 = vst.msk [vmem:[#allocation3 + $0x109] sm:$0xff] %vm2925_vm11, %v2913_v58  ;;  %v2794_v10 = vadd.f32 %v2793_v6, %v2704_v51  ;;  %v8152_v6 = vld [vmem:[%s9155_s3] ss:$0 sm:$0xff]  ;;  %v2798_v63 = vpop.f32.mrf.mxu1 }
 0x3e0   : > { %v3122_v29 = vld [vmem:[#allocation3 + $0xf9] sm:$0xff] }
 0x3e1   : > { %v3025_v60 = vld [vmem:[#allocation3 + $0xf8] sm:$0xff]  ;;  %v3154_v59 = vpack.c.bf16 %v3122_v29, %v3122_v29  ;;  %v2846_v43 = vmul.f32 %v8137_v26, %v2794_v10 }
 0x3e2   : > { %v8130_v20 = vpack.c.bf16 %v3025_v60, %v3025_v60  ;;  %v3890_v27 = vld [vmem:[#allocation3 + $0xf2] sm:$0xff]  ;;  %v3891_v30 = vld [vmem:[#allocation3 + $0xfa] sm:$0xff] }
 0x3e3   : > { %v8132_v13 = vpack.c.bf16 %v3890_v27, %v3890_v27  ;;  %v4338_v4 = vld [vmem:[#allocation3 + $0xf9] sm:$0xff]  ;;  %3239 = vrot.lane.b32.xlu2 %v3154_v59, %s6656_s23  ;;  %v8143_v52 = vpack.c.bf16 %v3891_v30, %v3891_v30  ;;  %v2882_v8 = vadd.f32 %v8152_v6, %v2846_v43  ;;  %v3212_v12 = vpop.permute.xlu0 %3211 }
 0x3e4   : > { %3090 = vst.msk [vmem:[#allocation5 + $0xfc] sm:$0xf] %vm3068_vm14, %v8130_v20  ;;  %v8145_v3 = vpack.c.bf16 %v4338_v4, %v4338_v4 }
 0x3e5   : > { %9225 = vst [vmem:[#allocation29_spill] sm:$0xff] %v8132_v13  ;;  %v2914_v55 = vmax.f32 %v2882_v8, 0.0 }
 0x3e6   : > { %9226 = vst [vmem:[#allocation30_spill] sm:$0xff] %v8143_v52  ;;  %v2707_v23 = vpop.f32.mrf.mxu0  ;;  %v3123_v40 = vld [vmem:[#allocation3 + $0x109] sm:$0xff] }
 0x3e7   : > { %9227 = vst [vmem:[#allocation31_spill] sm:$0xff] %v8145_v3  ;;  %v3026_v53 = vld [vmem:[#allocation3 + $0x108] sm:$0xff]  ;;  %v2797_v34 = vadd.f32 %v2796_v46, %v2707_v23  ;;  %v3155_v36 = vpack.c.bf16 %v3123_v40, %v3123_v40  ;;  %v2801_v27 = vpop.f32.mrf.mxu1 }
 0x3e8   : > { %4625 = vst.msk [vmem:[#allocation5 + $0xc8] sm:$0xf] %vm3068_vm14, %v8132_v13  ;;  %v8161_v58 = vpack.c.bf16 %v3026_v53, %v3026_v53  ;;  %v4339_v51 = vld [vmem:[#allocation3 + $0x109] sm:$0xff] }
 0x3e9   : > { %3859 = vst.msk [vmem:[#allocation5 + $0xe8] sm:$0xf] %vm3068_vm14, %v8145_v3  ;;  %v8163_v29 = vpack.c.bf16 %v4339_v51, %v4339_v51  ;;  %v2847_v60 = vmul.f32 %v8137_v26, %v2797_v34  ;;  %3241 = vrot.lane.b32.xlu0 %v3155_v36, %s6656_s23 }
 0x3ea   : > { %3301 = vst.msk [vmem:[#allocation5 + $0x54] sm:$0xf] %vm3293_vm15, %v3212_v12 }
 0x3eb   : > { %4626 = vst.msk [vmem:[#allocation5 + $0xd4] sm:$0xf] %vm3068_vm14, %v8143_v52  ;;  %v2883_v10 = vadd.f32 %v8152_v6, %v2847_v60 }
 0x3ec   : > { %2993 = vst.msk [vmem:[#allocation3 + $0x111] sm:$0xff] %vm2925_vm11, %v2914_v55  ;;  %v3214_v59 = vpop.permute.xlu1 %3213 }
 0x3ed   : > { %9228 = vst [vmem:[#allocation32_spill] sm:$0xff] %v8163_v29  ;;  %v2915_v46 = vmax.f32 %v2883_v10, 0.0 }
 0x3ee   : > { %3091 = vst.msk [vmem:[#allocation5 + $0x108] sm:$0xf] %vm3068_vm14, %v8161_v58  ;;  %v2709_v30 = vpop.f32.mrf.mxu0 }
 0x3ef   : > { %3860 = vst.msk [vmem:[#allocation5 + $0xf4] sm:$0xf] %vm3068_vm14, %v8163_v29  ;;  %v2799_v8 = vadd.f32 %v2798_v63, %v2709_v30  ;;  %v2803_v30 = vpop.f32.mrf.mxu1 }
 0x3f0   : > { %3302 = vst.msk [vmem:[#allocation5 + $0x60] sm:$0xf] %vm3293_vm15, %v3214_v59 }
 0x3f1   : > { %2994 = vst.msk [vmem:[#allocation3 + $0x121] sm:$0xff] %vm2925_vm11, %v2915_v46  ;;  %v2848_v36 = vmul.f32 %v8137_v26, %v2799_v8 }
 0x3f3   : > { %v3124_v4 = vld [vmem:[#allocation3 + $0x111] sm:$0xff]  ;;  %v2884_v63 = vadd.f32 %v8152_v6, %v2848_v36  ;;  %v3222_v10 = vpop.permute.xlu2 %3221 }
 0x3f4   : > { %v3027_v43 = vld [vmem:[#allocation3 + $0x110] sm:$0xff]  ;;  %v3156_v12 = vpack.c.bf16 %v3124_v4, %v3124_v4  ;;  %3306 = vst.msk [vmem:[#allocation5 + $0x90] sm:$0xf] %vm3293_vm15, %v3222_v10 }
 0x3f5   : > { %v8174_v55 = vpack.c.bf16 %v3027_v43, %v3027_v43  ;;  %v3892_v23 = vld [vmem:[#allocation3 + $0x10a] sm:$0xff]  ;;  %v3893_v40 = vld [vmem:[#allocation3 + $0x112] sm:$0xff]  ;;  %v2916_v59 = vmax.f32 %v2884_v63, 0.0 }
 0x3f6   : > { %v8176_v53 = vpack.c.bf16 %v3892_v23, %v3892_v23  ;;  %v4340_v34 = vld [vmem:[#allocation3 + $0x111] sm:$0xff]  ;;  %3243 = vrot.lane.b32.xlu1 %v3156_v12, %s6656_s23  ;;  %v8182_v51 = vpack.c.bf16 %v3893_v40, %v3893_v40  ;;  %v2712_v46 = vpop.f32.mrf.mxu0 }
 0x3f7   : > { %3092 = vst.msk [vmem:[#allocation5 + $0x114] sm:$0xf] %vm3068_vm14, %v8174_v55  ;;  %v8184_v60 = vpack.c.bf16 %v4340_v34, %v4340_v34  ;;  %v2802_v8 = vadd.f32 %v2801_v27, %v2712_v46  ;;  %v2806_v44 = vpop.f32.mrf.mxu1  ;;  %v3348_v15 = vld [vmem:[#allocation3 + $0x10a] sm:$0xff] }
 0x3f8   : > { %9229 = vst [vmem:[#allocation33_spill] sm:$0xff] %v8176_v53  ;;  %v3125_v4 = vld [vmem:[#allocation3 + $0x121] sm:$0xff]  ;;  %v3380_v37 = vpack.c.bf16 %v3348_v15, %v3348_v15 }
 0x3f9   : > { %9230 = vst [vmem:[#allocation34_spill] sm:$0xff] %v8182_v51  ;;  %v3028_v43 = vld [vmem:[#allocation3 + $0x120] sm:$0xff]  ;;  %v3157_v12 = vpack.c.bf16 %v3125_v4, %v3125_v4  ;;  %v2849_v36 = vmul.f32 %v8137_v26, %v2802_v8 }
 0x3fa   : > { %9231 = vst [vmem:[#allocation35_spill] sm:$0xff] %v8184_v60  ;;  %v8195_v23 = vpack.c.bf16 %v3028_v43, %v3028_v43  ;;  %v4341_v40 = vld [vmem:[#allocation3 + $0x121] sm:$0xff] }
 0x3fb   : > { %4627 = vst.msk [vmem:[#allocation5 + $0xe0] sm:$0xf] %vm3068_vm14, %v8176_v53  ;;  %v8197_v34 = vpack.c.bf16 %v4341_v40, %v4341_v40  ;;  %3245 = vrot.lane.b32.xlu2 %v3157_v12, %s6656_s23  ;;  %v2885_v63 = vadd.f32 %v8152_v6, %v2849_v36  ;;  %v3218_v10 = vpop.permute.xlu0 %3217 }
 0x3fc   : > { %3861 = vst.msk [vmem:[#allocation5 + $0x100] sm:$0xf] %vm3068_vm14, %v8184_v60 }
 0x3fd   : > { %4628 = vst.msk [vmem:[#allocation5 + $0xec] sm:$0xf] %vm3068_vm14, %v8182_v51  ;;  %v2917_v27 = vmax.f32 %v2885_v63, 0.0 }
 0x3fe   : > { %2995 = vst.msk [vmem:[#allocation3 + $0x129] sm:$0xff] %vm2925_vm11, %v2916_v59  ;;  %v2714_v59 = vpop.f32.mrf.mxu0 }
 0x3ff   : > { %9232 = vst [vmem:[#allocation36_spill] sm:$0xff] %v8197_v34  ;;  %v2804_v4 = vadd.f32 %v2803_v30, %v2714_v59 }
 0x400   : > { %3093 = vst.msk [vmem:[#allocation5 + $0x120] sm:$0xf] %vm3068_vm14, %v8195_v23 }
 0x401   : > { %3862 = vst.msk [vmem:[#allocation5 + $0x10c] sm:$0xf] %vm3068_vm14, %v8197_v34  ;;  %v2850_v31 = vmul.f32 %v8137_v26, %v2804_v4 }
 0x402   : > { %3304 = vst.msk [vmem:[#allocation5 + $0x78] sm:$0xf] %vm3293_vm15, %v3218_v10 }
 0x403   : > { %2996 = vst.msk [vmem:[#allocation3 + $0x139] sm:$0xff] %vm2925_vm11, %v2917_v27  ;;  %v2886_v10 = vadd.f32 %v8152_v6, %v2850_v31  ;;  %v3220_v27 = vpop.permute.xlu1 %3219 }
 0x404   : > { %3305 = vst.msk [vmem:[#allocation5 + $0x84] sm:$0xf] %vm3293_vm15, %v3220_v27  ;;  %v2808_v27 = vpop.f32.mrf.mxu1 }
 0x405   : > { %v3126_v46 = vld [vmem:[#allocation3 + $0x129] sm:$0xff]  ;;  %v2918_v59 = vmax.f32 %v2886_v10, 0.0 }
 0x406   : > { %v3158_v43 = vpack.c.bf16 %v3126_v46, %v3126_v46  ;;  %v3029_v8 = vld [vmem:[#allocation3 + $0x128] sm:$0xff]  ;;  %v2717_v46 = vpop.f32.mrf.mxu0 }
 0x407   : > { %v3894_v12 = vld [vmem:[#allocation3 + $0x122] sm:$0xff]  ;;  %v3895_v40 = vld [vmem:[#allocation3 + $0x12a] sm:$0xff]  ;;  %v8208_v3 = vpack.c.bf16 %v3029_v8, %v3029_v8  ;;  %2997 = vst.msk [vmem:[#allocation3 + $0x141] sm:$0xff] %vm2925_vm11, %v2918_v59 }
 0x408   : > { %v4342_v45 = vld [vmem:[#allocation3 + $0x129] sm:$0xff]  ;;  %3247 = vrot.lane.b32.xlu0 %v3158_v43, %s6656_s23  ;;  %v8212_v36 = vpack.c.bf16 %v3894_v12, %v3894_v12  ;;  %v8218_v30 = vpack.c.bf16 %v3895_v40, %v3895_v40  ;;  %v2807_v43 = vadd.f32 %v2806_v44, %v2717_v46 }
 0x409   : > { %v8214_v63 = vpack.c.bf16 %v4342_v45, %v4342_v45  ;;  %3094 = vst.msk [vmem:[#allocation5 + $0x12c] sm:$0xf] %vm3068_vm14, %v8208_v3 }
 0x40a   : > { %9233 = vst [vmem:[#allocation37_spill] sm:$0xff] %v8212_v36  ;;  %v3127_v45 = vld [vmem:[#allocation3 + $0x139] sm:$0xff]  ;;  %v2851_v10 = vmul.f32 %v8137_v26, %v2807_v43 }
 0x40b   : > { %9234 = vst [vmem:[#allocation38_spill] sm:$0xff] %v8214_v63  ;;  %v3030_v4 = vld [vmem:[#allocation3 + $0x138] sm:$0xff]  ;;  %v3159_v31 = vpack.c.bf16 %v3127_v45, %v3127_v45  ;;  %v3228_v44 = vpop.permute.xlu2 %3227 }
 0x40c   : > { %9235 = vst [vmem:[#allocation39_spill] sm:$0xff] %v8218_v30  ;;  %v8229_v8 = vpack.c.bf16 %v3030_v4, %v3030_v4  ;;  %v4343_v12 = vld [vmem:[#allocation3 + $0x139] sm:$0xff]  ;;  %v2887_v59 = vadd.f32 %v8152_v6, %v2851_v10 }
 0x40d   : > { %3863 = vst.msk [vmem:[#allocation5 + $0x118] sm:$0xf] %vm3068_vm14, %v8214_v63  ;;  %v8231_v40 = vpack.c.bf16 %v4343_v12, %v4343_v12  ;;  %3249 = vrot.lane.b32.xlu1 %v3159_v31, %s6656_s23 }
 0x40e   : > { %4629 = vst.msk [vmem:[#allocation5 + $0xf8] sm:$0xf] %vm3068_vm14, %v8212_v36  ;;  %v2919_v46 = vmax.f32 %v2887_v59, 0.0  ;;  %v2719_v45 = vpop.f32.mrf.mxu0  ;;  %v3128_v4 = vld [vmem:[#allocation3 + $0x141] sm:$0xff] }
 0x40f   : > { %4630 = vst.msk [vmem:[#allocation5 + $0x104] sm:$0xf] %vm3068_vm14, %v8218_v30  ;;  %v3031_v12 = vld [vmem:[#allocation3 + $0x140] sm:$0xff]  ;;  %v2809_v43 = vadd.f32 %v2808_v27, %v2719_v45  ;;  %v3160_v31 = vpack.c.bf16 %v3128_v4, %v3128_v4 }
 0x410   : > { %9236 = vst [vmem:[#allocation40_spill] sm:$0xff] %v8231_v40  ;;  %v8242_v29 = vpack.c.bf16 %v3031_v12, %v3031_v12  ;;  %v3897_v60 = vld [vmem:[#allocation3 + $0x142] sm:$0xff]  ;;  %v4567_v34 = vld [vmem:[#allocation3 + $0x13a] sm:$0xff] }
 0x411   : > { %3095 = vst.msk [vmem:[#allocation5 + $0x138] sm:$0xf] %vm3068_vm14, %v8229_v8  ;;  %v8244_v52 = vpack.c.bf16 %v3897_v60, %v3897_v60  ;;  %v4344_v13 = vld [vmem:[#allocation3 + $0x141] sm:$0xff]  ;;  %v2852_v10 = vmul.f32 %v8137_v26, %v2809_v43  ;;  %3251 = vrot.lane.b32.xlu2 %v3160_v31, %s6656_s23  ;;  %v2811_v60 = vpop.f32.mrf.mxu1 }
 0x412   : > { %3864 = vst.msk [vmem:[#allocation5 + $0x124] sm:$0xf] %vm3068_vm14, %v8231_v40  ;;  %v8250_v59 = vpack.c.bf16 %v4344_v13, %v4344_v13 }
 0x413   : > { %3309 = vst.msk [vmem:[#allocation5 + $0xb4] sm:$0xf] %vm3293_vm15, %v3228_v44  ;;  %v4599_v44 = vpack.c.bf16 %v4567_v34, %v4567_v34  ;;  %v2888_v27 = vadd.f32 %v8152_v6, %v2852_v10 }
 0x414   : > { %2998 = vst.msk [vmem:[#allocation3 + $0x151] sm:$0xff] %vm2925_vm11, %v2919_v46  ;;  %v3224_v46 = vpop.permute.xlu0 %3223 }
 0x415   : > { %9237 = vst [vmem:[#allocation41_spill] sm:$0xff] %v8244_v52  ;;  %v2920_v45 = vmax.f32 %v2888_v27, 0.0 }
 0x416   : > { %3096 = vst.msk [vmem:[#allocation5 + $0x144] sm:$0xf] %vm3068_vm14, %v8242_v29  ;;  %v2722_v4 = vpop.f32.mrf.mxu0 }
 0x417   : > { %9238 = vst [vmem:[#allocation42_spill] sm:$0xff] %v8250_v59  ;;  %v2812_v34 = vadd.f32 %v2811_v60, %v2722_v4 }
 0x418   : > { %4632 = vst.msk [vmem:[#allocation5 + $0x11c] sm:$0xf] %vm3068_vm14, %v8244_v52 }
 0x419   : > { %3865 = vst.msk [vmem:[#allocation5 + $0x130] sm:$0xf] %vm3068_vm14, %v8250_v59  ;;  %v2853_v51 = vmul.f32 %v8137_v26, %v2812_v34  ;;  %v2813_v60 = vpop.f32.mrf.mxu1  ;;  %v3326_v59 = vld [vmem:[#allocation3 + $0x2] sm:$0xff] }
 0x41a   : > { %3307 = vst.msk [vmem:[#allocation5 + $0x9c] sm:$0xf] %vm3293_vm15, %v3224_v46 }
 0x41b   : > { %4631 = vst.msk [vmem:[#allocation5 + $0x110] sm:$0xf] %vm3068_vm14, %v4599_v44  ;;  %v3129_v12 = vld [vmem:[#allocation3 + $0x151] sm:$0xff]  ;;  %v2889_v44 = vadd.f32 %v8152_v6, %v2853_v51  ;;  %v3226_v27 = vpop.permute.xlu1 %3225 }
 0x41c   : > { %v3032_v13 = vld [vmem:[#allocation3 + $0x150] sm:$0xff]  ;;  %2999 = vst.msk [vmem:[#allocation3 + $0x159] sm:$0xff] %vm2925_vm11, %v2920_v45  ;;  %v3161_v43 = vpack.c.bf16 %v3129_v12, %v3129_v12 }
 0x41d   : > { %v8260_v31 = vpack.c.bf16 %v3032_v13, %v3032_v13  ;;  %v4345_v10 = vld [vmem:[#allocation3 + $0x151] sm:$0xff]  ;;  %3308 = vst.msk [vmem:[#allocation5 + $0xa8] sm:$0xf] %vm3293_vm15, %v3226_v27  ;;  %v2921_v46 = vmax.f32 %v2889_v44, 0.0 }
 0x41e   : > { %v8262_v63 = vpack.c.bf16 %v4345_v10, %v4345_v10  ;;  %3253 = vrot.lane.b32.xlu0 %v3161_v43, %s6656_s23  ;;  %v2724_v45 = vpop.f32.mrf.mxu0 }
 0x41f   : > { %3097 = vst.msk [vmem:[#allocation5 + $0x150] sm:$0xf] %vm3068_vm14, %v8260_v31  ;;  %v2814_v12 = vadd.f32 %v2813_v60, %v2724_v45 }
 0x420   : > { %9239 = vst [vmem:[#allocation43_spill] sm:$0xff] %v8262_v63 }
 0x421   : > { %3866 = vst.msk [vmem:[#allocation5 + $0x13c] sm:$0xf] %vm3068_vm14, %v8262_v63  ;;  %v2854_v40 = vmul.f32 %v8137_v26, %v2814_v12  ;;  %v3358_v12 = vpack.c.bf16 %v3326_v59, %v3326_v59  ;;  %v3327_v59 = vld [vmem:[#allocation3 + $0xa] sm:$0xff] }
 0x422   : > { %3000 = vst.msk [vmem:[#allocation3 + $0x169] sm:$0xff] %vm2925_vm11, %v2921_v46 }
 0x423   : > { %v3130_v4 = vld [vmem:[#allocation3 + $0x159] sm:$0xff]  ;;  %v2890_v60 = vadd.f32 %v8152_v6, %v2854_v40  ;;  %v3234_v45 = vpop.permute.xlu2 %3233 }
 0x424   : > { %v3162_v13 = vpack.c.bf16 %v3130_v4, %v3130_v4  ;;  %v3033_v34 = vld [vmem:[#allocation3 + $0x158] sm:$0xff]  ;;  %3312 = vst.msk [vmem:[#allocation5 + $0xd8] sm:$0xf] %vm3293_vm15, %v3234_v45  ;;  %v6311_v45 = vld [vmem:[#allocation4 + $0xf4] sm:$0xf0] }
 0x425   : > { %v8273_v43 = vpack.c.bf16 %v3033_v34, %v3033_v34  ;;  %v4346_v10 = vld [vmem:[#allocation3 + $0x159] sm:$0xff]  ;;  %v2922_v4 = vmax.f32 %v2890_v60, 0.0 }
 0x426   : > { %v4569_v53 = vld [vmem:[#allocation3 + $0x152] sm:$0xff]  ;;  %3255 = vrot.lane.b32.xlu1 %v3162_v13, %s6656_s23  ;;  %v8277_v51 = vpack.c.bf16 %v4346_v10, %v4346_v10  ;;  %v4570_v27 = vld [vmem:[#allocation3 + $0x15a] sm:$0xff] }
 0x427   : > { %v4601_v44 = vpack.c.bf16 %v4569_v53, %v4569_v53  ;;  %3098 = vst.msk [vmem:[#allocation5 + $0x15c] sm:$0xf] %vm3068_vm14, %v8273_v43  ;;  %v4602_v46 = vpack.c.bf16 %v4570_v27, %v4570_v27  ;;  %v5916_v60 = vld [vmem:[#allocation4 + $0xf0] sm:$0xf] }
 0x428   : > { %9240 = vst [vmem:[#allocation44_spill] sm:$0xff] %v8277_v51 }
 0x429   : > { %3867 = vst.msk [vmem:[#allocation5 + $0x148] sm:$0xf] %vm3068_vm14, %v8277_v51  ;;  %v3131_v13 = vld [vmem:[#allocation3 + $0x169] sm:$0xff] }
 0x42a   : > { %4633 = vst.msk [vmem:[#allocation5 + $0x128] sm:$0xf] %vm3068_vm14, %v4601_v44  ;;  %v3034_v34 = vld [vmem:[#allocation3 + $0x168] sm:$0xff]  ;;  %v3163_v53 = vpack.c.bf16 %v3131_v13, %v3131_v13  ;;  %v5917_v13 = vor.u32 %v6311_v45, %v5916_v60  ;;  %v3328_v45 = vld [vmem:[#allocation3 + $0x1a] sm:$0xff] }
 0x42b   : > { %4634 = vst.msk [vmem:[#allocation5 + $0x134] sm:$0xf] %vm3068_vm14, %v4602_v46  ;;  %v8288_v10 = vpack.c.bf16 %v3034_v34, %v3034_v34  ;;  %v4347_v40 = vld [vmem:[#allocation3 + $0x169] sm:$0xff]  ;;  %v3230_v44 = vpop.permute.xlu0 %3229 }
 0x42c   : > { %3001 = vst.msk [vmem:[#allocation3 + $0x171] sm:$0xff] %vm2925_vm11, %v2922_v4  ;;  %v8290_v27 = vpack.c.bf16 %v4347_v40, %v4347_v40  ;;  %3257 = vrot.lane.b32.xlu2 %v3163_v53, %s6656_s23  ;;  %v3329_v46 = vld [vmem:[#allocation3 + $0x22] sm:$0xff]  ;;  %v3359_v4 = vpack.c.bf16 %v3327_v59, %v3327_v59  ;;  %v2281_v34 = vld [vmem:[#allocation2 + $0x19a] sm:$0xff]  ;;  %v2282_v40 = vld [vmem:[#allocation2 + $0x1a2] sm:$0xff]  ;;  %2726 = vmatmul.bf16.gmra.mxu0 %v5917_v13 }
 0x42d   : > { %3099 = vst.msk [vmem:[#allocation5 + $0x168] sm:$0xf] %vm3068_vm14, %v8288_v10  ;;  %v2313_v30 = vpack.c.bf16 %v2281_v34, %v2281_v34  ;;  %v2314_v53 = vpack.c.bf16 %v2282_v40, %v2282_v40  ;;  %v3361_v36 = vpack.c.bf16 %v3329_v46, %v3329_v46  ;;  %v3330_v46 = vld [vmem:[#allocation3 + $0x32] sm:$0xff] }
 0x42e   : > { %9241 = vst [vmem:[#allocation45_spill] sm:$0xff] %v8290_v27  ;;  %3422 = vrot.lane.b32.xlu1 %v3358_v12, %s6658_s30 }
 0x42f   : > { %3868 = vst.msk [vmem:[#allocation5 + $0x154] sm:$0xf] %vm3068_vm14, %v8290_v27 }
 0x430   : > { %3310 = vst.msk [vmem:[#allocation5 + $0xc0] sm:$0xf] %vm3293_vm15, %v3230_v44 }
 0x431   : > { %2345 = vst.msk [vmem:[#allocation4 + $0xf4] sm:$0xf] %vm642_vm3, %v2313_v30 }
 0x432   : > { %2346 = vst.msk [vmem:[#allocation4 + $0xfc] sm:$0xf] %vm642_vm3, %v2314_v53  ;;  %v3333_v53 = vld [vmem:[#allocation3 + $0x52] sm:$0xff]  ;;  %vm5239_vm3 = vcmask 31744  }
 0x433   : > { %v3132_v12 = vld [vmem:[#allocation3 + $0x171] sm:$0xff] }
 0x434   : > { %v3164_v63 = vpack.c.bf16 %v3132_v12, %v3132_v12  ;;  %v3035_v51 = vld [vmem:[#allocation3 + $0x170] sm:$0xff]  ;;  %3424 = vrot.lane.b32.xlu2 %v3359_v4, %s6658_s30  ;;  %v3360_v4 = vpack.c.bf16 %v3328_v45, %v3328_v45  ;;  %v3336_v45 = vld [vmem:[#allocation3 + $0x7a] sm:$0xff] }
 0x435   : > { %v8300_v52 = vpack.c.bf16 %v3035_v51, %v3035_v51  ;;  %v4348_v27 = vld [vmem:[#allocation3 + $0x171] sm:$0xff]  ;;  %v3232_v51 = vpop.permute.xlu1 %3231 }
 0x436   : > { %v4571_v7 = vld [vmem:[#allocation3 + $0x16a] sm:$0xff]  ;;  %3428 = vrot.lane.b32.xlu1 %v3361_v36, %s6658_s30  ;;  %v8305_v59 = vpack.c.bf16 %v4348_v27, %v4348_v27  ;;  %v4572_v44 = vld [vmem:[#allocation3 + $0x172] sm:$0xff]  ;;  %3259 = vrot.lane.b32.xlu0 %v3164_v63, %s6656_s23  ;;  %3311 = vst.msk [vmem:[#allocation5 + $0xcc] sm:$0xf] %vm3293_vm15, %v3232_v51  ;;  %v8317_v63 = vpack.c.bf16 %v3330_v46, %v3330_v46 }
 0x437   : > { %9242 = vst [vmem:[#allocation46_spill] sm:$0xff] %v8300_v52  ;;  %v4603_v60 = vpack.c.bf16 %v4571_v7, %v4571_v7  ;;  %v4604_v30 = vpack.c.bf16 %v4572_v44, %v4572_v44  ;;  %v3332_v36 = vld [vmem:[#allocation3 + $0x4a] sm:$0xff]  ;;  %v3331_v44 = vld [vmem:[#allocation3 + $0x3a] sm:$0xff]  ;;  %v3338_v46 = vld [vmem:[#allocation3 + $0x92] sm:$0xff] }
 0x438   : > { %9243 = vst [vmem:[#allocation47_spill] sm:$0xff] %v8305_v59  ;;  %v8315_v7 = vpack.c.bf16 %v3332_v36, %v3332_v36  ;;  %v6310_v27 = vld [vmem:[#allocation4 + $0xf4] sm:$0xf]  ;;  %v3335_v12 = vld [vmem:[#allocation3 + $0x6a] sm:$0xff]  ;;  %v3363_v51 = vpack.c.bf16 %v3331_v44, %v3331_v44 }
 0x439   : > { %3100 = vst.msk [vmem:[#allocation5 + $0x174] sm:$0xf] %vm3068_vm14, %v8300_v52  ;;  %v5918_v13 = vld [vmem:[#allocation4 + $0xf8] sm:$0xf0]  ;;  %v3337_v44 = vld [vmem:[#allocation3 + $0x82] sm:$0xff] }
 0x43a   : > { %3869 = vst.msk [vmem:[#allocation5 + $0x160] sm:$0xf] %vm3068_vm14, %v8305_v59  ;;  %v5921_v34 = vor.u32 %v6310_v27, %v5918_v13  ;;  %v3334_v27 = vld [vmem:[#allocation3 + $0x62] sm:$0xff]  ;;  %v8338_v13 = vpack.c.bf16 %v3336_v45, %v3336_v45 }
 0x43b   : > { %4635 = vst.msk [vmem:[#allocation5 + $0x140] sm:$0xf] %vm3068_vm14, %v4603_v60  ;;  %v8326_v60 = vpack.c.bf16 %v3335_v12, %v3335_v12  ;;  %v3341_v12 = vld [vmem:[#allocation3 + $0xb2] sm:$0xff] }
 0x43c   : > { %4636 = vst.msk [vmem:[#allocation5 + $0x14c] sm:$0xf] %vm3068_vm14, %v4604_v30  ;;  %3430 = vrot.lane.b32.xlu2 %v8317_v63, %s6658_s30  ;;  %5973 = vmatmul.msk.bf16.gmra.mxu1 %vm435_vm0, %v5921_v34  ;;  %v8328_v30 = vpack.c.bf16 %v3333_v53, %v3333_v53  ;;  %v8340_v34 = vpack.c.bf16 %v3334_v27, %v3334_v27  ;;  %v3339_v53 = vld [vmem:[#allocation3 + $0x9a] sm:$0xff] }
 0x43d   : > { %9244 = vst [vmem:[#allocation48_spill] sm:$0xff] %v8317_v63  ;;  %v3240_v40 = vpop.permute.xlu2 %3239  ;;  %v3344_v27 = vld [vmem:[#allocation3 + $0xda] sm:$0xff] }
 0x43e   : > { %3434 = vrot.lane.b32.xlu1 %v8315_v7, %s6658_s30  ;;  %3426 = vrot.lane.b32.xlu0 %v3360_v4, %s6658_s30  ;;  %3315 = vst.msk [vmem:[#allocation5 + $0xfc] sm:$0xf] %vm3293_vm15, %v3240_v40  ;;  %v8336_v4 = vpack.c.bf16 %v3338_v46, %v3338_v46  ;;  %v8353_v46 = vpack.c.bf16 %v3337_v44, %v3337_v44 }
 0x43f   : > { %v3376_v59 = vpack.c.bf16 %v3344_v27, %v3344_v27  ;;  %v3377_v27 = vpack.c.bf16 %v3345_v48, %v3345_v48  ;;  %v3353_v48 = vld [vmem:[#allocation3 + $0x142] sm:$0xff] }
 0x444   : > { %3436 = vrot.lane.b32.xlu2 %v8328_v30, %s6658_s30  ;;  %v3236_v36 = vpop.permute.xlu0 %3235 }
 0x445   : > { %3313 = vst.msk [vmem:[#allocation5 + $0xe4] sm:$0xf] %vm3293_vm15, %v3236_v36  ;;  %v8351_v36 = vpack.c.bf16 %v3339_v53, %v3339_v53 }
 0x446   : > { %3440 = vrot.lane.b32.xlu1 %v8326_v60, %s6658_s30  ;;  %3432 = vrot.lane.b32.xlu0 %v3363_v51, %s6658_s30  ;;  %v8349_v51 = vpack.c.bf16 %v3341_v12, %v3341_v12  ;;  %v3340_v12 = vld [vmem:[#allocation3 + $0xaa] sm:$0xff] }
 0x447   : > { %v8364_v44 = vpack.c.bf16 %v3340_v12, %v3340_v12  ;;  %v3350_v12 = vld [vmem:[#allocation3 + $0x122] sm:$0xff] }
 0x448   : > { %v3382_v63 = vpack.c.bf16 %v3350_v12, %v3350_v12 }
 0x44b   : > { %v3238_v40 = vpop.permute.xlu1 %3237 }
 0x44c   : > { %3442 = vrot.lane.b32.xlu2 %v8338_v13, %s6658_s30  ;;  %3314 = vst.msk [vmem:[#allocation5 + $0xf0] sm:$0xf] %vm3293_vm15, %v3238_v40  ;;  %v3342_v40 = vld [vmem:[#allocation3 + $0xc2] sm:$0xff] }
 0x44d   : > { %v8362_v53 = vpack.c.bf16 %v3342_v40, %v3342_v40  ;;  %v8372_v40 = vpack.c.bf16 %v3343_v24, %v3343_v24 }
 0x44e   : > { %3446 = vrot.lane.b32.xlu1 %v8336_v4, %s6658_s30  ;;  %3438 = vrot.lane.b32.xlu0 %v8340_v34, %s6658_s30 }
 0x454   : > { %3448 = vrot.lane.b32.xlu2 %v8351_v36, %s6658_s30 }
 0x455   : > { %v3246_v45 = vpop.permute.xlu2 %3245 }
 0x456   : > { %3452 = vrot.lane.b32.xlu1 %v8349_v51, %s6658_s30  ;;  %3444 = vrot.lane.b32.xlu0 %v8353_v46, %s6658_s30  ;;  %3318 = vst.msk [vmem:[#allocation5 + $0x120] sm:$0xf] %vm3293_vm15, %v3246_v45  ;;  %v3347_v45 = vld [vmem:[#allocation3 + $0xfa] sm:$0xff] }
 0x457   : > { %v3379_v9 = vpack.c.bf16 %v3347_v45, %v3347_v45  ;;  %v3349_v45 = vld [vmem:[#allocation3 + $0x112] sm:$0xff] }
 0x458   : > { %v3381_v17 = vpack.c.bf16 %v3349_v45, %v3349_v45 }
 0x45b   : > { %v3242_v18 = vpop.permute.xlu0 %3241 }
 0x45c   : > { %3454 = vrot.lane.b32.xlu2 %v8362_v53, %s6658_s30  ;;  %3316 = vst.msk [vmem:[#allocation5 + $0x108] sm:$0xf] %vm3293_vm15, %v3242_v18  ;;  %v3346_v18 = vld [vmem:[#allocation3 + $0xf2] sm:$0xff] }
 0x45d   : > { %v3378_v52 = vpack.c.bf16 %v3346_v18, %v3346_v18 }
 0x45e   : > { %3458 = vrot.lane.b32.xlu1 %v3376_v59, %s6658_s30  ;;  %3450 = vrot.lane.b32.xlu0 %v8364_v44, %s6658_s30 }
 0x464   : > { %3460 = vrot.lane.b32.xlu2 %v3377_v27, %s6658_s30  ;;  %v3385_v27 = vpack.c.bf16 %v3353_v48, %v3353_v48 }
 0x466   : > { %3464 = vrot.lane.b32.xlu1 %v3379_v9, %s6658_s30  ;;  %3456 = vrot.lane.b32.xlu0 %v8372_v40, %s6658_s30  ;;  %v3351_v9 = vld [vmem:[#allocation3 + $0x12a] sm:$0xff] }
 0x468   : > { %v3244_v59 = vpop.permute.xlu1 %3243 }
 0x469   : > { %3317 = vst.msk [vmem:[#allocation5 + $0x114] sm:$0xf] %vm3293_vm15, %v3244_v59  ;;  %v3383_v59 = vpack.c.bf16 %v3351_v9, %v3351_v9  ;;  %v3357_v9 = vld [vmem:[#allocation3 + $0x172] sm:$0xff] }
 0x46a   : > { %v3389_v45 = vpack.c.bf16 %v3357_v9, %v3357_v9 }
 0x46b   : > { %v3252_v24 = vpop.permute.xlu2 %3251 }
 0x46c   : > { %3466 = vrot.lane.b32.xlu2 %v3380_v37, %s6658_s30  ;;  %3321 = vst.msk [vmem:[#allocation5 + $0x144] sm:$0xf] %vm3293_vm15, %v3252_v24  ;;  %v3354_v37 = vld [vmem:[#allocation3 + $0x152] sm:$0xff] }
 0x46d   : > { %v3386_v12 = vpack.c.bf16 %v3354_v37, %v3354_v37 }
 0x46e   : > { %3470 = vrot.lane.b32.xlu1 %v3382_v63, %s6658_s30  ;;  %3462 = vrot.lane.b32.xlu0 %v3378_v52, %s6658_s30  ;;  %v3356_v52 = vld [vmem:[#allocation3 + $0x16a] sm:$0xff]  ;;  %v3352_v63 = vld [vmem:[#allocation3 + $0x13a] sm:$0xff] }
 0x46f   : > { %v3388_v18 = vpack.c.bf16 %v3356_v52, %v3356_v52  ;;  %v3384_v24 = vpack.c.bf16 %v3352_v63, %v3352_v63 }
 0x474   : > { %3472 = vrot.lane.b32.xlu2 %v3383_v59, %s6658_s30 }
 0x476   : > { %3476 = vrot.lane.b32.xlu1 %v3385_v27, %s6658_s30  ;;  %3468 = vrot.lane.b32.xlu0 %v3381_v17, %s6658_s30  ;;  %v3355_v17 = vld [vmem:[#allocation3 + $0x15a] sm:$0xff] }
 0x477   : > { %v3387_v27 = vpack.c.bf16 %v3355_v17, %v3355_v17 }
 0x47a   : > { %v3248_v15 = vpop.permute.xlu0 %3247 }
 0x47b   : > { %3319 = vst.msk [vmem:[#allocation5 + $0x12c] sm:$0xf] %vm3293_vm15, %v3248_v15 }
 0x47c   : > { %3478 = vrot.lane.b32.xlu2 %v3386_v12, %s6658_s30 }
 0x47e   : > { %3482 = vrot.lane.b32.xlu1 %v3388_v18, %s6658_s30  ;;  %3474 = vrot.lane.b32.xlu0 %v3384_v24, %s6658_s30 }
 0x47f   : > { %v3250_v48 = vpop.permute.xlu1 %3249 }
 0x480   : > { %3320 = vst.msk [vmem:[#allocation5 + $0x138] sm:$0xf] %vm3293_vm15, %v3250_v48 }
 0x484   : > { %3484 = vrot.lane.b32.xlu2 %v3389_v45, %s6658_s30 }
 0x486   : > { %3649 = vrot.lane.b32.xlu1 %v7842_v38, %s6660_s19  ;;  %3480 = vrot.lane.b32.xlu0 %v3387_v27, %s6658_s30  ;;  %v3258_v59 = vpop.permute.xlu2 %3257 }
 0x487   : > { %3324 = vst.msk [vmem:[#allocation5 + $0x168] sm:$0xf] %vm3293_vm15, %v3258_v59 }
 0x48c   : > { %3651 = vrot.lane.b32.xlu2 %v7853_v50, %s6660_s19 }
 0x48e   : > { %3655 = vrot.lane.b32.xlu1 %v7896_v62, %s6660_s19  ;;  %3647 = vrot.lane.b32.xlu0 %v7845_v39, %s6660_s19  ;;  %v3425_v37 = vpop.permute.xlu2 %3424 }
 0x48f   : > { %3520 = vst.msk [vmem:[#allocation5 + $0xc] sm:$0xf] %vm3518_vm1, %v3425_v37 }
 0x490   : > { %v3254_v15 = vpop.permute.xlu0 %3253 }
 0x491   : > { %3322 = vst.msk [vmem:[#allocation5 + $0x150] sm:$0xf] %vm3293_vm15, %v3254_v15 }
 0x494   : > { %3657 = vrot.lane.b32.xlu2 %v7913_v54, %s6660_s19 }
 0x496   : > { %3661 = vrot.lane.b32.xlu1 %v7948_v21, %s6660_s19  ;;  %3653 = vrot.lane.b32.xlu0 %v7866_v22, %s6660_s19  ;;  %v3431_v50 = vpop.permute.xlu2 %3430 }
 0x497   : > { %3523 = vst.msk [vmem:[#allocation5 + $0x30] sm:$0xf] %vm3518_vm1, %v3431_v50 }
 0x498   : > { %v3256_v38 = vpop.permute.xlu1 %3255 }
 0x499   : > { %3323 = vst.msk [vmem:[#allocation5 + $0x15c] sm:$0xf] %vm3293_vm15, %v3256_v38 }
 0x49c   : > { %3663 = vrot.lane.b32.xlu2 %v7966_v33, %s6660_s19 }
 0x49e   : > { %3667 = vrot.lane.b32.xlu1 %v7999_v57, %s6660_s19  ;;  %3659 = vrot.lane.b32.xlu0 %v7933_v14, %s6660_s19  ;;  %v3437_v62 = vpop.permute.xlu2 %3436 }
 0x49f   : > { %3526 = vst.msk [vmem:[#allocation5 + $0x54] sm:$0xf] %vm3518_vm1, %v3437_v62 }
 0x4a0   : > { %v3423_v39 = vpop.permute.xlu1 %3422 }
 0x4a1   : > { %3519 = vst.msk [vmem:[#allocation5] sm:$0xf] %vm3518_vm1, %v3423_v39 }
 0x4a4   : > { %3669 = vrot.lane.b32.xlu2 %v8013_v25, %s6660_s19 }
 0x4a6   : > { %3673 = vrot.lane.b32.xlu1 %v8043_v32, %s6660_s19  ;;  %3665 = vrot.lane.b32.xlu0 %v7981_v16, %s6660_s19  ;;  %v3443_v54 = vpop.permute.xlu2 %3442 }
 0x4a7   : > { %3529 = vst.msk [vmem:[#allocation5 + $0x78] sm:$0xf] %vm3518_vm1, %v3443_v54 }
 0x4a8   : > { %v3429_v22 = vpop.permute.xlu1 %3428  ;;  %v3260_v14 = vpop.permute.xlu0 %3259 }
 0x4a9   : > { %3522 = vst.msk [vmem:[#allocation5 + $0x24] sm:$0xf] %vm3518_vm1, %v3429_v22  ;;  %v2727_v12 = vpop.f32.mrf.mxu0 }
 0x4aa   : > { %3325 = vst.msk [vmem:[#allocation5 + $0x174] sm:$0xf] %vm3293_vm15, %v3260_v14 }
 0x4ac   : > { %3675 = vrot.lane.b32.xlu2 %v8057_v1, %s6660_s19 }
 0x4ae   : > { %3679 = vrot.lane.b32.xlu1 %v8086_v42, %s6660_s19  ;;  %3671 = vrot.lane.b32.xlu0 %v8029_v41, %s6660_s19  ;;  %v3449_v33 = vpop.permute.xlu2 %3448 }
 0x4af   : > { %3532 = vst.msk [vmem:[#allocation5 + $0x9c] sm:$0xf] %vm3518_vm1, %v3449_v33 }
 0x4b0   : > { %v3435_v21 = vpop.permute.xlu1 %3434  ;;  %v3427_v16 = vpop.permute.xlu0 %3426 }
 0x4b1   : > { %3525 = vst.msk [vmem:[#allocation5 + $0x48] sm:$0xf] %vm3518_vm1, %v3435_v21 }
 0x4b2   : > { %3521 = vst.msk [vmem:[#allocation5 + $0x18] sm:$0xf] %vm3518_vm1, %v3427_v16  ;;  %v4335_v16 = vld [vmem:[#allocation3 + $0xd9] sm:$0xff] }
 0x4b4   : > { %3681 = vrot.lane.b32.xlu2 %v8098_v56, %s6660_s19 }
 0x4b6   : > { %3685 = vrot.lane.b32.xlu1 %v8130_v20, %s6660_s19  ;;  %3677 = vrot.lane.b32.xlu0 %v8070_v28, %s6660_s19  ;;  %v3455_v52 = vpop.permute.xlu2 %3454 }
 0x4b7   : > { %3535 = vst.msk [vmem:[#allocation5 + $0xc0] sm:$0xf] %vm3518_vm1, %v3455_v52 }
 0x4b8   : > { %v3441_v57 = vpop.permute.xlu1 %3440  ;;  %v3433_v63 = vpop.permute.xlu0 %3432 }
 0x4b9   : > { %3528 = vst.msk [vmem:[#allocation5 + $0x6c] sm:$0xf] %vm3518_vm1, %v3441_v57  ;;  %v2816_v18 = vpop.f32.mrf.mxu1 }
 0x4ba   : > { %3524 = vst.msk [vmem:[#allocation5 + $0x3c] sm:$0xf] %vm3518_vm1, %v3433_v63  ;;  %v2817_v20 = vadd.f32 %v2816_v18, %v2727_v12  ;;  %v4105_v63 = vld [vmem:[#allocation3 + $0x90] sm:$0xff] }
 0x4bb   : > { %v4137_v12 = vpack.c.bf16 %v4105_v63, %v4105_v63  ;;  %v3872_v63 = vld [vmem:[#allocation3 + $0x1a] sm:$0xff] }
 0x4bc   : > { %3687 = vrot.lane.b32.xlu2 %v8161_v58, %s6660_s19  ;;  %v2855_v9 = vmul.f32 %v8137_v26, %v2817_v20  ;;  %v2729_v58 = vpop.f32.mrf.mxu0  ;;  %v4103_v20 = vld [vmem:[#allocation3 + $0x78] sm:$0xff] }
 0x4be   : > { %3691 = vrot.lane.b32.xlu1 %v8195_v23, %s6660_s19  ;;  %3683 = vrot.lane.b32.xlu0 %v8117_v47, %s6660_s19  ;;  %v3461_v48 = vpop.permute.xlu2 %3460  ;;  %v2891_v45 = vadd.f32 %v8152_v6, %v2855_v9 }
 0x4bf   : > { %3538 = vst.msk [vmem:[#allocation5 + $0xe4] sm:$0xf] %vm3518_vm1, %v3461_v48  ;;  %v4104_v48 = vld [vmem:[#allocation3 + $0x80] sm:$0xff] }
 0x4c0   : > { %v3447_v24 = vpop.permute.xlu1 %3446  ;;  %v3439_v17 = vpop.permute.xlu0 %3438  ;;  %v2923_v27 = vmax.f32 %v2891_v45, 0.0 }
 0x4c1   : > { %3531 = vst.msk [vmem:[#allocation5 + $0x90] sm:$0xf] %vm3518_vm1, %v3447_v24  ;;  %v2818_v23 = vpop.f32.mrf.mxu1  ;;  %v4135_v24 = vpack.c.bf16 %v4103_v20, %v4103_v20 }
 0x4c2   : > { %3527 = vst.msk [vmem:[#allocation5 + $0x60] sm:$0xf] %vm3518_vm1, %v3439_v17  ;;  %v2819_v47 = vadd.f32 %v2818_v23, %v2729_v58  ;;  %v4136_v17 = vpack.c.bf16 %v4104_v48, %v4104_v48  ;;  %v3873_v48 = vld [vmem:[#allocation3 + $0x22] sm:$0xff] }
 0x4c3   : > { %3002 = vst.msk [vmem:[#allocation3 + $0x181] sm:$0xff] %vm2925_vm11, %v2923_v27 }
 0x4c4   : > { %3693 = vrot.lane.b32.xlu2 %v8208_v3, %s6660_s19  ;;  %v2856_v37 = vmul.f32 %v8137_v26, %v2819_v47 }
 0x4c6   : > { %3697 = vrot.lane.b32.xlu1 %v8242_v29, %s6660_s19  ;;  %3689 = vrot.lane.b32.xlu0 %v8174_v55, %s6660_s19  ;;  %v3467_v15 = vpop.permute.xlu2 %3466  ;;  %v2892_v3 = vadd.f32 %v8152_v6, %v2856_v37 }
 0x4c7   : > { %3541 = vst.msk [vmem:[#allocation5 + $0x108] sm:$0xf] %vm3518_vm1, %v3467_v15  ;;  %v4102_v15 = vld [vmem:[#allocation3 + $0x68] sm:$0xff] }
 0x4c8   : > { %v3453_v59 = vpop.permute.xlu1 %3452  ;;  %v3445_v38 = vpop.permute.xlu0 %3444  ;;  %v2924_v29 = vmax.f32 %v2892_v3, 0.0  ;;  %v4134_v37 = vpack.c.bf16 %v4102_v15, %v4102_v15 }
 0x4c9   : > { %3534 = vst.msk [vmem:[#allocation5 + $0xb4] sm:$0xf] %vm3518_vm1, %v3453_v59 }
 0x4ca   : > { %3530 = vst.msk [vmem:[#allocation5 + $0x84] sm:$0xf] %vm3518_vm1, %v3445_v38  ;;  %v3581_v27 = vld [vmem:[#allocation3 + $0x180] sm:$0xff] }
 0x4cb   : > { %3003 = vst.msk [vmem:[#allocation3 + $0x189] sm:$0xff] %vm2925_vm11, %v2924_v29  ;;  %v8578_v23 = vpack.c.bf16 %v3581_v27, %v3581_v27  ;;  %v4101_v29 = vld [vmem:[#allocation3 + $0x60] sm:$0xff] }
 0x4cc   : > { %3699 = vrot.lane.b32.xlu2 %v8260_v31, %s6660_s19  ;;  %v4349_v31 = vld [vmem:[#allocation3 + $0x181] sm:$0xff] }
 0x4cd   : > { %v8486_v39 = vpack.c.bf16 %v4349_v31, %v4349_v31  ;;  %v9247_v31 = vld [vmem:[#allocation24_spill] sm:$0xff] }
 0x4ce   : > { %3703 = vrot.lane.b32.xlu1 %v8288_v10, %s6660_s19  ;;  %3695 = vrot.lane.b32.xlu0 %v8229_v8, %s6660_s19  ;;  %v3473_v55 = vpop.permute.xlu2 %3472 }
 0x4cf   : > { %3544 = vst.msk [vmem:[#allocation5 + $0x12c] sm:$0xf] %vm3518_vm1, %v3473_v55 }
 0x4d0   : > { %v3459_v26 = vpop.permute.xlu1 %3458  ;;  %v3451_v50 = vpop.permute.xlu0 %3450  ;;  %3870 = vst.msk [vmem:[#allocation5 + $0x16c] sm:$0xf] %vm3068_vm14, %v8486_v39 }
 0x4d1   : > { %3537 = vst.msk [vmem:[#allocation5 + $0xd8] sm:$0xf] %vm3518_vm1, %v3459_v26 }
 0x4d2   : > { %3533 = vst.msk [vmem:[#allocation5 + $0xa8] sm:$0xf] %vm3518_vm1, %v3451_v50  ;;  %v4350_v6 = vld [vmem:[#allocation3 + $0x189] sm:$0xff] }
 0x4d3   : > { %v8489_v22 = vpack.c.bf16 %v4350_v6, %v4350_v6  ;;  %v4574_v54 = vld [vmem:[#allocation3 + $0x18a] sm:$0xff]  ;;  %v3902_v15 = vld [vmem:[#allocation3 + $0x182] sm:$0xff] }
 0x4d4   : > { %3996 = vrot.lane.b32.xlu2 %v8362_v53, %s6656_s23  ;;  %v4573_v53 = vld [vmem:[#allocation3 + $0x182] sm:$0xff]  ;;  %v4606_v14 = vpack.c.bf16 %v4574_v54, %v4574_v54  ;;  %v9246_v6 = vld [vmem:[#allocation46_spill] sm:$0xff] }
 0x4d5   : > { %3871 = vst.msk [vmem:[#allocation5 + $0x178] sm:$0xf] %vm3068_vm14, %v8489_v22  ;;  %v3582_v9 = vld [vmem:[#allocation3 + $0x188] sm:$0xff] }
 0x4d6   : > { %4221 = vrot.lane.b32.xlu1 %v8086_v42, %s6658_s30  ;;  %3701 = vrot.lane.b32.xlu0 %v8273_v43, %s6660_s19  ;;  %v3479_v10 = vpop.permute.xlu2 %3478  ;;  %v4605_v42 = vpack.c.bf16 %v4573_v53, %v4573_v53  ;;  %4638 = vst.msk [vmem:[#allocation5 + $0x164] sm:$0xf] %vm3068_vm14, %v4606_v14  ;;  %v8568_v45 = vpack.c.bf16 %v3582_v9, %v3582_v9  ;;  %v4099_v54 = vld [vmem:[#allocation3 + $0x48] sm:$0xff] }
 0x4d7   : > { %3547 = vst.msk [vmem:[#allocation5 + $0x150] sm:$0xf] %vm3518_vm1, %v3479_v10 }
 0x4d8   : > { %v3465_v8 = vpop.permute.xlu1 %3464  ;;  %v3457_v62 = vpop.permute.xlu0 %3456  ;;  %4637 = vst.msk [vmem:[#allocation5 + $0x158] sm:$0xf] %vm3068_vm14, %v4605_v42 }
 0x4d9   : > { %3540 = vst.msk [vmem:[#allocation5 + $0xfc] sm:$0xf] %vm3518_vm1, %v3465_v8 }
 0x4da   : > { %3536 = vst.msk [vmem:[#allocation5 + $0xcc] sm:$0xf] %vm3518_vm1, %v3457_v62 }
 0x4dc   : > { %4223 = vrot.lane.b32.xlu2 %v8098_v56, %s6658_s30  ;;  %v4367_v56 = vpack.c.bf16 %v4335_v16, %v4335_v16 }
 0x4de   : > { %4447 = vrot.lane.b32.xlu1 %v8096_v0, %s6660_s19  ;;  %3998 = vrot.lane.b32.xlu0 %v8372_v40, %s6656_s23  ;;  %v3485_v21 = vpop.permute.xlu2 %3484 }
 0x4df   : > { %3550 = vst.msk [vmem:[#allocation5 + $0x174] sm:$0xf] %vm3518_vm1, %v3485_v21  ;;  %v9248_v21 = vld [vmem:[#allocation48_spill] sm:$0xff] }
 0x4e0   : > { %v3471_v43 = vpop.permute.xlu1 %3470  ;;  %v3463_v33 = vpop.permute.xlu0 %3462 }
 0x4e1   : > { %3543 = vst.msk [vmem:[#allocation5 + $0x120] sm:$0xf] %vm3518_vm1, %v3471_v43  ;;  %v4131_v43 = vpack.c.bf16 %v4099_v54, %v4099_v54 }
 0x4e2   : > { %3539 = vst.msk [vmem:[#allocation5 + $0xf0] sm:$0xf] %vm3518_vm1, %v3463_v33  ;;  %v9249_v33 = vld [vmem:[#allocation23_spill] sm:$0xff] }
 0x4e4   : > { %3992 = vrot.lane.b32.xlu2 %v8364_v44, %s6656_s23 }
 0x4e6   : > { %4217 = vrot.lane.b32.xlu1 %v8057_v1, %s6658_s30  ;;  %4445 = vrot.lane.b32.xlu0 %v4367_v56, %s6660_s19  ;;  %v3652_v40 = vpop.permute.xlu2 %3651 }
 0x4e7   : > { %3746 = vst.msk [vmem:[#allocation5 + $0x18] sm:$0xf] %vm3743_vm2, %v3652_v40 }
 0x4e8   : > { %v3477_v0 = vpop.permute.xlu1 %3476  ;;  %v3469_v57 = vpop.permute.xlu0 %3468 }
 0x4e9   : > { %3546 = vst.msk [vmem:[#allocation5 + $0x144] sm:$0xf] %vm3518_vm1, %v3477_v0 }
 0x4ea   : > { %3542 = vst.msk [vmem:[#allocation5 + $0x114] sm:$0xf] %vm3518_vm1, %v3469_v57  ;;  %v4100_v57 = vld [vmem:[#allocation3 + $0x50] sm:$0xff] }
 0x4ec   : > { %4219 = vrot.lane.b32.xlu2 %v8070_v28, %s6658_s30 }
 0x4ee   : > { %4443 = vrot.lane.b32.xlu1 %v8072_v11, %s6660_s19  ;;  %3994 = vrot.lane.b32.xlu0 %v8349_v51, %s6656_s23  ;;  %v3658_v1 = vpop.permute.xlu2 %3657 }
 0x4ef   : > { %3749 = vst.msk [vmem:[#allocation5 + $0x3c] sm:$0xf] %vm3743_vm2, %v3658_v1 }
 0x4f0   : > { %v3483_v44 = vpop.permute.xlu1 %3482  ;;  %v3475_v52 = vpop.permute.xlu0 %3474 }
 0x4f1   : > { %3549 = vst.msk [vmem:[#allocation5 + $0x168] sm:$0xf] %vm3518_vm1, %v3483_v44 }
 0x4f2   : > { %3545 = vst.msk [vmem:[#allocation5 + $0x138] sm:$0xf] %vm3518_vm1, %v3475_v52  ;;  %v4132_v52 = vpack.c.bf16 %v4100_v57, %v4100_v57 }
 0x4f4   : > { %3988 = vrot.lane.b32.xlu2 %v8336_v4, %s6656_s23 }
 0x4f6   : > { %4213 = vrot.lane.b32.xlu1 %v8029_v41, %s6658_s30  ;;  %4441 = vrot.lane.b32.xlu0 %v8059_v2, %s6660_s19  ;;  %v3664_v28 = vpop.permute.xlu2 %3663 }
 0x4f7   : > { %3752 = vst.msk [vmem:[#allocation5 + $0x60] sm:$0xf] %vm3743_vm2, %v3664_v28  ;;  %v9250_v28 = vld [vmem:[#allocation22_spill] sm:$0xff] }
 0x4f8   : > { %v3650_v11 = vpop.permute.xlu1 %3649  ;;  %v3481_v51 = vpop.permute.xlu0 %3480 }
 0x4f9   : > { %3745 = vst.msk [vmem:[#allocation5 + $0xc] sm:$0xf] %vm3743_vm2, %v3650_v11  ;;  %v9251_v11 = vld [vmem:[#allocation19_spill] sm:$0xff] }
 0x4fa   : > { %3548 = vst.msk [vmem:[#allocation5 + $0x15c] sm:$0xf] %vm3518_vm1, %v3481_v51 }
 0x4fc   : > { %4215 = vrot.lane.b32.xlu2 %v8043_v32, %s6658_s30 }
 0x4fe   : > { %4439 = vrot.lane.b32.xlu1 %v8045_v5, %s6660_s19  ;;  %3990 = vrot.lane.b32.xlu0 %v8351_v36, %s6656_s23  ;;  %v3670_v41 = vpop.permute.xlu2 %3669 }
 0x4ff   : > { %3755 = vst.msk [vmem:[#allocation5 + $0x84] sm:$0xf] %vm3743_vm2, %v3670_v41 }
 0x500   : > { %v3656_v2 = vpop.permute.xlu1 %3655  ;;  %v3648_v4 = vpop.permute.xlu0 %3647 }
 0x501   : > { %3748 = vst.msk [vmem:[#allocation5 + $0x30] sm:$0xf] %vm3743_vm2, %v3656_v2 }
 0x502   : > { %3744 = vst.msk [vmem:[#allocation5] sm:$0xf] %vm3743_vm2, %v3648_v4 }
 0x504   : > { %3984 = vrot.lane.b32.xlu2 %v8338_v13, %s6656_s23 }
 0x506   : > { %4209 = vrot.lane.b32.xlu1 %v4137_v12, %s6658_s30  ;;  %4437 = vrot.lane.b32.xlu0 %v8031_v61, %s6660_s19  ;;  %v3676_v32 = vpop.permute.xlu2 %3675  ;;  %v6343_v1 = vld [vmem:[#allocation5 + $0x80] sm:$0xf0] }
 0x507   : > { %3758 = vst.msk [vmem:[#allocation5 + $0xa8] sm:$0xf] %vm3743_vm2, %v3676_v32  ;;  %v4097_v12 = vld [vmem:[#allocation3 + $0x30] sm:$0xff] }
 0x508   : > { %v3662_v5 = vpop.permute.xlu1 %3661  ;;  %v3654_v36 = vpop.permute.xlu0 %3653  ;;  %v6048_v32 = vld [vmem:[#allocation5 + $0x60] sm:$0xf] }
 0x509   : > { %3751 = vst.msk [vmem:[#allocation5 + $0x54] sm:$0xf] %vm3743_vm2, %v3662_v5 }
 0x50a   : > { %3747 = vst.msk [vmem:[#allocation5 + $0x24] sm:$0xf] %vm3743_vm2, %v3654_v36  ;;  %v3904_v36 = vpack.c.bf16 %v3872_v63, %v3872_v63 }
 0x50c   : > { %4211 = vrot.lane.b32.xlu2 %v8013_v25, %s6658_s30 }
 0x50e   : > { %4435 = vrot.lane.b32.xlu1 %v8016_v35, %s6660_s19  ;;  %3986 = vrot.lane.b32.xlu0 %v8353_v46, %s6656_s23  ;;  %v3682_v13 = vpop.permute.xlu2 %3681  ;;  %v6084_v26 = vld [vmem:[#allocation5 + $0xa8] sm:$0xf] }
 0x50f   : > { %3761 = vst.msk [vmem:[#allocation5 + $0xcc] sm:$0xf] %vm3743_vm2, %v3682_v13  ;;  %v4129_v13 = vpack.c.bf16 %v4097_v12, %v4097_v12 }
 0x510   : > { %v3668_v61 = vpop.permute.xlu1 %3667  ;;  %v3660_v18 = vpop.permute.xlu0 %3659 }
 0x511   : > { %3754 = vst.msk [vmem:[#allocation5 + $0x78] sm:$0xf] %vm3743_vm2, %v3668_v61  ;;  %v9252_v61 = vld [vmem:[#allocation21_spill] sm:$0xff] }
 0x512   : > { %3750 = vst.msk [vmem:[#allocation5 + $0x48] sm:$0xf] %vm3743_vm2, %v3660_v18 }
 0x514   : > { %3980 = vrot.lane.b32.xlu2 %v8340_v34, %s6656_s23 }
 0x516   : > { %4205 = vrot.lane.b32.xlu1 %v4135_v24, %s6658_s30  ;;  %4433 = vrot.lane.b32.xlu0 %v8002_v49, %s6660_s19  ;;  %v3688_v25 = vpop.permute.xlu2 %3687 }
 0x517   : > { %3764 = vst.msk [vmem:[#allocation5 + $0xf0] sm:$0xf] %vm3743_vm2, %v3688_v25 }
 0x518   : > { %v3674_v35 = vpop.permute.xlu1 %3673  ;;  %v3666_v46 = vpop.permute.xlu0 %3665  ;;  %v6060_v0 = vld [vmem:[#allocation5 + $0x78] sm:$0xf] }
 0x519   : > { %3757 = vst.msk [vmem:[#allocation5 + $0x9c] sm:$0xf] %vm3743_vm2, %v3674_v35  ;;  %v6061_v44 = vor.u32 %v6343_v1, %v6060_v0  ;;  %v6036_v24 = vld [vmem:[#allocation5 + $0x48] sm:$0xf]  ;;  %v6000_v0 = vld [vmem:[#allocation5] sm:$0xf] }
 0x51a   : > { %3753 = vst.msk [vmem:[#allocation5 + $0x6c] sm:$0xf] %vm3743_vm2, %v3666_v46  ;;  %v4098_v35 = vld [vmem:[#allocation3 + $0x38] sm:$0xff]  ;;  %v6337_v46 = vld [vmem:[#allocation5 + $0x50] sm:$0xf0] }
 0x51b   : > { %v6037_v9 = vor.u32 %v6337_v46, %v6036_v24  ;;  %v6068_v24 = vld [vmem:[#allocation5 + $0x80] sm:$0xf] }
 0x51c   : > { %4207 = vrot.lane.b32.xlu2 %v4136_v17, %s6658_s30  ;;  %v4130_v17 = vpack.c.bf16 %v4098_v35, %v4098_v35 }
 0x51e   : > { %3709 = vrot.lane.b32.xlu1 %v8568_v45, %s6660_s19  ;;  %3982 = vrot.lane.b32.xlu0 %v8326_v60, %s6656_s23  ;;  %v3694_v49 = vpop.permute.xlu2 %3693 }
 0x51f   : > { %3767 = vst.msk [vmem:[#allocation5 + $0x114] sm:$0xf] %vm3743_vm2, %v3694_v49  ;;  %v3905_v49 = vpack.c.bf16 %v3873_v48, %v3873_v48 }
 0x520   : > { %v3680_v34 = vpop.permute.xlu1 %3679  ;;  %v3672_v58 = vpop.permute.xlu0 %3671  ;;  %v6346_v42 = vld [vmem:[#allocation5 + $0x98] sm:$0xf0] }
 0x521   : > { %3760 = vst.msk [vmem:[#allocation5 + $0xc0] sm:$0xf] %vm3743_vm2, %v3680_v34  ;;  %v6340_v2 = vld [vmem:[#allocation5 + $0x68] sm:$0xf0]  ;;  %v9253_v34 = vld [vmem:[#allocation20_spill] sm:$0xff] }
 0x522   : > { %3756 = vst.msk [vmem:[#allocation5 + $0x90] sm:$0xf] %vm3743_vm2, %v3672_v58  ;;  %v6049_v5 = vor.u32 %v6340_v2, %v6048_v32  ;;  %v4127_v58 = vld [vmem:[#allocation3 + $0x198] sm:$0xff]  ;;  %v6080_v2 = vld [vmem:[#allocation5 + $0x98] sm:$0xf] }
 0x524   : > { %4429 = vrot.lane.b32.xlu2 %v7968_v19, %s6660_s19  ;;  %v9245_v19 = vld [vmem:[#allocation25_spill] sm:$0xff] }
 0x526   : > { %3976 = vrot.lane.b32.xlu1 %v8315_v7, %s6656_s23  ;;  %3707 = vrot.lane.b32.xlu0 %v8578_v23, %s6660_s19  ;;  %v3700_v60 = vpop.permute.xlu2 %3699 }
 0x527   : > { %3770 = vst.msk [vmem:[#allocation5 + $0x138] sm:$0xf] %vm3743_vm2, %v3700_v60 }
 0x528   : > { %v3686_v47 = vpop.permute.xlu1 %3685  ;;  %v3678_v59 = vpop.permute.xlu0 %3677 }
 0x529   : > { %3763 = vst.msk [vmem:[#allocation5 + $0xe4] sm:$0xf] %vm3743_vm2, %v3686_v47  ;;  %v6072_v62 = vld [vmem:[#allocation5 + $0x90] sm:$0xf] }
 0x52a   : > { %3759 = vst.msk [vmem:[#allocation5 + $0xb4] sm:$0xf] %vm3743_vm2, %v3678_v59  ;;  %v6073_v14 = vor.u32 %v6346_v42, %v6072_v62  ;;  %v6024_v47 = vld [vmem:[#allocation5 + $0x30] sm:$0xf] }
 0x52c   : > { %3978 = vrot.lane.b32.xlu2 %v8328_v30, %s6656_s23  ;;  %v4133_v30 = vpack.c.bf16 %v4101_v29, %v4101_v29  ;;  %v4128_v29 = vld [vmem:[#allocation3 + $0x1a0] sm:$0xff] }
 0x52d   : > { %v4160_v54 = vpack.c.bf16 %v4128_v29, %v4128_v29 }
 0x52e   : > { %4203 = vrot.lane.b32.xlu1 %v4134_v37, %s6658_s30  ;;  %4431 = vrot.lane.b32.xlu0 %v9245_v19, %s6660_s19  ;;  %v3997_v7 = vpop.permute.xlu2 %3996  ;;  %v6334_v37 = vld [vmem:[#allocation5 + $0x38] sm:$0xf0]  ;;  %v4159_v19 = vpack.c.bf16 %v4127_v58, %v4127_v58 }
 0x52f   : > { %4078 = vst.msk [vmem:[#allocation5 + $0xac] sm:$0xf] %vm3293_vm15, %v3997_v7  ;;  %v6025_v7 = vor.u32 %v6334_v37, %v6024_v47 }
 0x530   : > { %v3692_v38 = vpop.permute.xlu1 %3691  ;;  %v3684_v3 = vpop.permute.xlu0 %3683 }
 0x531   : > { %3766 = vst.msk [vmem:[#allocation5 + $0x108] sm:$0xf] %vm3743_vm2, %v3692_v38  ;;  %v6349_v55 = vld [vmem:[#allocation5 + $0xb0] sm:$0xf0]  ;;  %v3934_v38 = vpack.c.bf16 %v3902_v15, %v3902_v15 }
 0x532   : > { %3762 = vst.msk [vmem:[#allocation5 + $0xd8] sm:$0xf] %vm3743_vm2, %v3684_v3  ;;  %v6085_v50 = vor.u32 %v6349_v55, %v6084_v26  ;;  %v9254_v3 = vld [vmem:[#allocation18_spill] sm:$0xff]  ;;  %v4352_v26 = vld [vmem:[#allocation3 + $0x1a1] sm:$0xff] }
 0x533   : > { %v4384_v42 = vpack.c.bf16 %v4352_v26, %v4352_v26 }
 0x534   : > { %5037 = vmatpush.bf16.xpose.msra.mxu2 %v6085_v50  ;;  %3705 = vrot.lane.b32.xlu2 %v9246_v6, %s6660_s19 }
 0x536   : > { %4427 = vrot.lane.b32.xlu1 %v9247_v31, %s6660_s19  ;;  %4201 = vrot.lane.b32.xlu0 %v4133_v30, %s6658_s30  ;;  %v4224_v8 = vpop.permute.xlu2 %4223  ;;  %v6331_v30 = vld [vmem:[#allocation5 + $0x20] sm:$0xf0] }
 0x538   : > { %v3698_v10 = vpop.permute.xlu1 %3697  ;;  %v3690_v53 = vpop.permute.xlu0 %3689 }
 0x539   : > { %3769 = vst.msk [vmem:[#allocation5 + $0x12c] sm:$0xf] %vm3743_vm2, %v3698_v10  ;;  %v6012_v10 = vld [vmem:[#allocation5 + $0x18] sm:$0xf] }
 0x53a   : > { %3765 = vst.msk [vmem:[#allocation5 + $0xfc] sm:$0xf] %vm3743_vm2, %v3690_v53  ;;  %v3903_v53 = vld [vmem:[#allocation3 + $0x18a] sm:$0xff] }
 0x53c   : > { %5038 = vmatpush.bf16.xpose.msra.mxu2 %v6073_v14  ;;  %3972 = vrot.lane.b32.xlu2 %v9248_v21, %s6656_s23  ;;  %v6013_v14 = vor.u32 %v6331_v30, %v6012_v10  ;;  %v6092_v21 = vld [vmem:[#allocation5 + $0xb0] sm:$0xf]  ;;  %v9255_v30 = vld [vmem:[#allocation47_spill] sm:$0xff] }
 0x53e   : > { %4197 = vrot.lane.b32.xlu1 %v4131_v43, %s6658_s30  ;;  %4425 = vrot.lane.b32.xlu0 %v9249_v33, %s6660_s19  ;;  %v3993_v16 = vpop.permute.xlu2 %3992  ;;  %v3935_v43 = vpack.c.bf16 %v3903_v53, %v3903_v53  ;;  %v6350_v33 = vld [vmem:[#allocation5 + $0xb8] sm:$0xf0]  ;;  %v4121_v53 = vld [vmem:[#allocation3 + $0x150] sm:$0xff] }
 0x53f   : > { %4076 = vst.msk [vmem:[#allocation5 + $0x94] sm:$0xf] %vm3293_vm15, %v3993_v16  ;;  %v6093_v1 = vor.u32 %v6350_v33, %v6092_v21  ;;  %v6335_v21 = vld [vmem:[#allocation5 + $0x40] sm:$0xf0]  ;;  %v9256_v33 = vld [vmem:[#allocation45_spill] sm:$0xff] }
 0x540   : > { %v3704_v56 = vpop.permute.xlu1 %3703  ;;  %v3696_v40 = vpop.permute.xlu0 %3695 }
 0x541   : > { %3772 = vst.msk [vmem:[#allocation5 + $0x150] sm:$0xf] %vm3743_vm2, %v3704_v56 }
 0x542   : > { %3768 = vst.msk [vmem:[#allocation5 + $0x120] sm:$0xf] %vm3743_vm2, %v3696_v40  ;;  %v4351_v40 = vld [vmem:[#allocation3 + $0x199] sm:$0xff] }
 0x544   : > { %5039 = vmatpush.bf16.xpose.msra.mxu2 %v6061_v44  ;;  %4199 = vrot.lane.b32.xlu2 %v4132_v52, %s6658_s30  ;;  %v3900_v44 = vld [vmem:[#allocation3 + $0x16a] sm:$0xff]  ;;  %v6328_v52 = vld [vmem:[#allocation5 + $0x8] sm:$0xf0] }
 0x546   : > { %4423 = vrot.lane.b32.xlu1 %v9250_v28, %s6660_s19  ;;  %3974 = vrot.lane.b32.xlu0 %v9251_v11, %s6656_s23  ;;  %v8617_v51 = vpop.permute.xlu2 %4219  ;;  %v6001_v28 = vor.u32 %v6328_v52, %v6000_v0  ;;  %v4383_v11 = vpack.c.bf16 %v4351_v40, %v4351_v40 }
 0x548   : > { %v4222_v41 = vpop.permute.xlu1 %4221  ;;  %v3702_v4 = vpop.permute.xlu0 %3701 }
 0x549   : > { %4303 = vst.msk [vmem:[#allocation5 + $0xac] sm:$0xf] %vm3518_vm1, %v4222_v41  ;;  %v5011_v41 = vsel %vm2925_vm11, %v6093_v1, 0 }
 0x54a   : > { %3771 = vst.msk [vmem:[#allocation5 + $0x144] sm:$0xf] %vm3743_vm2, %v3702_v4  ;;  %v6347_v4 = vld [vmem:[#allocation5 + $0xa0] sm:$0xf0] }
 0x54c   : > { %5040 = vmatpush.bf16.xpose.msra.mxu2 %v6049_v5  ;;  %3968 = vrot.lane.b32.xlu2 %v3904_v36, %s6656_s23 }
 0x54e   : > { %4193 = vrot.lane.b32.xlu1 %v4129_v13, %s6658_s30  ;;  %4421 = vrot.lane.b32.xlu0 %v9252_v61, %s6660_s19  ;;  %v3989_v18 = vpop.permute.xlu2 %3988  ;;  %v6081_v13 = vor.u32 %v6347_v4, %v6080_v2  ;;  %v9257_v2 = vld [vmem:[#allocation41_spill] sm:$0xff]  ;;  %v9258_v4 = vld [vmem:[#allocation44_spill] sm:$0xff] }
 0x54f   : > { %4074 = vst.msk [vmem:[#allocation5 + $0x7c] sm:$0xf] %vm3293_vm15, %v3989_v18  ;;  %v3901_v18 = vld [vmem:[#allocation3 + $0x172] sm:$0xff] }
 0x550   : > { %v4448_v20 = vpop.permute.xlu1 %4447  ;;  %v3999_v25 = vpop.permute.xlu0 %3998 }
 0x551   : > { %4079 = vst.msk [vmem:[#allocation5 + $0xb8] sm:$0xf] %vm3293_vm15, %v3999_v25  ;;  %v6344_v25 = vld [vmem:[#allocation5 + $0x88] sm:$0xf0] }
 0x552   : > { %4304 = vst.msk [vmem:[#allocation5 + $0xb8] sm:$0xf] %vm3518_vm1, %v4224_v8 }
 0x553   : > { %4528 = vst.msk [vmem:[#allocation5 + $0xb8] sm:$0xf] %vm3743_vm2, %v4448_v20  ;;  %v3933_v20 = vpack.c.bf16 %v3901_v18, %v3901_v18  ;;  %v6008_v18 = vld [vmem:[#allocation5 + $0x8] sm:$0xf] }
 0x554   : > { %5041 = vmatpush.bf16.xpose.msra.mxu2 %v6037_v9  ;;  %4195 = vrot.lane.b32.xlu2 %v4130_v17, %s6658_s30  ;;  %v6069_v9 = vor.u32 %v6344_v25, %v6068_v24  ;;  %v3898_v17 = vld [vmem:[#allocation3 + $0x152] sm:$0xff]  ;;  %v9260_v24 = vld [vmem:[#allocation37_spill] sm:$0xff] }
 0x556   : > { %4419 = vrot.lane.b32.xlu1 %v9253_v34, %s6660_s19  ;;  %3970 = vrot.lane.b32.xlu0 %v3905_v49, %s6656_s23  ;;  %v8633_v27 = vpop.permute.xlu2 %4215  ;;  %v4123_v49 = vld [vmem:[#allocation3 + $0x168] sm:$0xff]  ;;  %v3930_v34 = vpack.c.bf16 %v3898_v17, %v3898_v17 }
 0x557   : > { %v4155_v58 = vpack.c.bf16 %v4123_v49, %v4123_v49 }
 0x558   : > { %v4218_v60 = vpop.permute.xlu1 %4217  ;;  %v4446_v59 = vpop.permute.xlu0 %4445 }
 0x559   : > { %4301 = vst.msk [vmem:[#allocation5 + $0x94] sm:$0xf] %vm3518_vm1, %v4218_v60 }
 0x55a   : > { %4527 = vst.msk [vmem:[#allocation5 + $0xac] sm:$0xf] %vm3743_vm2, %v4446_v59  ;;  %v6086_v8 = vld [vmem:[#allocation5 + $0xb4] sm:$0xf0] }
 0x55c   : > { %5042 = vmatpush.bf16.xpose.msra.mxu2 %v6025_v7  ;;  %4028 = vrot.lane.b32.xlu2 %v3934_v38, %s6656_s23  ;;  %v4124_v7 = vld [vmem:[#allocation3 + $0x170] sm:$0xff] }
 0x55e   : > { %4253 = vrot.lane.b32.xlu1 %v4159_v19, %s6658_s30  ;;  %4417 = vrot.lane.b32.xlu0 %v9254_v3, %s6660_s19  ;;  %v3985_v55 = vpop.permute.xlu2 %3984  ;;  %v3899_v3 = vld [vmem:[#allocation3 + $0x15a] sm:$0xff] }
 0x55f   : > { %4072 = vst.msk [vmem:[#allocation5 + $0x64] sm:$0xf] %vm3293_vm15, %v3985_v55  ;;  %v3931_v26 = vpack.c.bf16 %v3899_v3, %v3899_v3  ;;  %v6044_v55 = vld [vmem:[#allocation5 + $0x50] sm:$0xf] }
 0x560   : > { %v4444_v50 = vpop.permute.xlu1 %4443  ;;  %v3995_v6 = vpop.permute.xlu0 %3994 }
 0x561   : > { %v6348_v31 = vld [vmem:[#allocation5 + $0xac] sm:$0xf]  ;;  %4077 = vst.msk [vmem:[#allocation5 + $0xa0] sm:$0xf] %vm3293_vm15, %v3995_v6 }
 0x562   : > { %v6089_v62 = vor.u32 %v6348_v31, %v6086_v8  ;;  %4302 = vst.msk [vmem:[#allocation5 + $0xa0] sm:$0xf] %vm3518_vm1, %v8617_v51  ;;  %v3932_v51 = vpack.c.bf16 %v3900_v44, %v3900_v44 }
 0x563   : > { %4526 = vst.msk [vmem:[#allocation5 + $0xa0] sm:$0xf] %vm3743_vm2, %v4444_v50  ;;  %v6338_v50 = vld [vmem:[#allocation5 + $0x58] sm:$0xf0] }
 0x564   : > { %5056 = vmatpush.bf16.xpose.msra.mxu3 %v6089_v62  ;;  %5043 = vmatpush.bf16.xpose.msra.mxu2 %v6013_v14  ;;  %v6045_v10 = vor.u32 %v6338_v50, %v6044_v55  ;;  %v3896_v62 = vld [vmem:[#allocation3 + $0x13a] sm:$0xff]  ;;  %v4153_v14 = vpack.c.bf16 %v4121_v53, %v4121_v53  ;;  %v9265_v55 = vld [vmem:[#allocation34_spill] sm:$0xff]  ;;  %v4115_v53 = vld [vmem:[#allocation3 + $0x108] sm:$0xff] }
 0x565   : > { %4255 = vrot.lane.b32.xlu2 %v4160_v54, %s6658_s30  ;;  %v3928_v54 = vpack.c.bf16 %v3896_v62, %v3896_v62  ;;  %v9266_v50 = vld [vmem:[#allocation38_spill] sm:$0xff] }
 0x566   : > { %4479 = vrot.lane.b32.xlu1 %v4384_v42, %s6660_s19  ;;  %4030 = vrot.lane.b32.xlu0 %v3935_v43, %s6656_s23  ;;  %v8649_v16 = vpop.permute.xlu2 %4211  ;;  %v4999_v42 = vsel %vm2925_vm11, %v6045_v10, 0  ;;  %v6032_v43 = vld [vmem:[#allocation5 + $0x38] sm:$0xf] }
 0x567   : > { %v6033_v40 = vor.u32 %v6335_v21, %v6032_v43 }
 0x568   : > { %v4214_v56 = vpop.permute.xlu1 %4213  ;;  %v4442_v57 = vpop.permute.xlu0 %4441 }
 0x569   : > { %4299 = vst.msk [vmem:[#allocation5 + $0x7c] sm:$0xf] %vm3518_vm1, %v4214_v56 }
 0x56a   : > { %4525 = vst.msk [vmem:[#allocation5 + $0x94] sm:$0xf] %vm3743_vm2, %v4442_v57  ;;  %v6074_v36 = vld [vmem:[#allocation5 + $0x9c] sm:$0xf0]  ;;  %v4122_v57 = vld [vmem:[#allocation3 + $0x158] sm:$0xff] }
 0x56c   : > { %5044 = vmatpush.bf16.xpose.msra.mxu2 %v6001_v28  ;;  %v4996_v28 = vsel %vm2925_vm11, %v6033_v40, 0  ;;  %v9270_v40 = vld [vmem:[#allocation35_spill] sm:$0xff] }
 0x56d   : > { %4024 = vrot.lane.b32.xlu2 %v3932_v51, %s6656_s23  ;;  %v6020_v51 = vld [vmem:[#allocation5 + $0x20] sm:$0xf] }
 0x56e   : > { %4477 = vrot.lane.b32.xlu0 %v4383_v11, %s6660_s19  ;;  %4249 = vrot.lane.b32.xlu1 %v8578_v23, %s6658_s30  ;;  %v3981_v63 = vpop.permute.xlu2 %3980  ;;  %v5008_v23 = vsel %vm2925_vm11, %v6081_v13, 0  ;;  %v4154_v11 = vpack.c.bf16 %v4122_v57, %v4122_v57 }
 0x56f   : > { %4070 = vst.msk [vmem:[#allocation5 + $0x4c] sm:$0xf] %vm3293_vm15, %v3981_v63 }
 0x570   : > { %v4440_v12 = vpop.permute.xlu1 %4439  ;;  %v3991_v32 = vpop.permute.xlu0 %3990 }
 0x571   : > { %v6345_v5 = vld [vmem:[#allocation5 + $0x94] sm:$0xf]  ;;  %4075 = vst.msk [vmem:[#allocation5 + $0x88] sm:$0xf] %vm3293_vm15, %v3991_v32 }
 0x572   : > { %v6077_v61 = vor.u32 %v6345_v5, %v6074_v36  ;;  %4300 = vst.msk [vmem:[#allocation5 + $0x88] sm:$0xf] %vm3518_vm1, %v8633_v27  ;;  %v6056_v27 = vld [vmem:[#allocation5 + $0x68] sm:$0xf] }
 0x573   : > { %4524 = vst.msk [vmem:[#allocation5 + $0x88] sm:$0xf] %vm3743_vm2, %v4440_v12  ;;  %v4119_v36 = vld [vmem:[#allocation3 + $0x138] sm:$0xff] }
 0x574   : > { %5075 = vmatpush.bf16.xpose.msrb.mxu2 %v5011_v41  ;;  %5057 = vmatpush.bf16.xpose.msra.mxu3 %v6077_v61  ;;  %v6332_v41 = vld [vmem:[#allocation5 + $0x28] sm:$0xf0]  ;;  %v4151_v61 = vpack.c.bf16 %v4119_v36, %v4119_v36 }
 0x575   : > { %4251 = vrot.lane.b32.xlu2 %v8568_v45, %s6658_s30  ;;  %v5005_v45 = vsel %vm2925_vm11, %v6069_v9, 0  ;;  %v6021_v5 = vor.u32 %v6332_v41, %v6020_v51  ;;  %v4120_v9 = vld [vmem:[#allocation3 + $0x140] sm:$0xff]  ;;  %v4113_v51 = vld [vmem:[#allocation3 + $0xf0] sm:$0xff] }
 0x576   : > { %4026 = vrot.lane.b32.xlu0 %v3933_v20, %s6656_s23  ;;  %4475 = vrot.lane.b32.xlu1 %v8489_v22, %s6660_s19  ;;  %v8669_v35 = vpop.permute.xlu2 %4207  ;;  %v6341_v22 = vld [vmem:[#allocation5 + $0x70] sm:$0xf0]  ;;  %v9259_v20 = vld [vmem:[#allocation43_spill] sm:$0xff]  ;;  %v4152_v49 = vpack.c.bf16 %v4120_v9, %v4120_v9  ;;  %v5976_v41 = vld [vmem:[%s9156_s4] sm:$0xf] }
 0x577   : > { %v6057_v19 = vor.u32 %v6341_v22, %v6056_v27  ;;  %v4993_v13 = vsel %vm2925_vm11, %v6021_v5, 0 }
 0x578   : > { %v4210_v46 = vpop.permute.xlu1 %4209  ;;  %v4438_v48 = vpop.permute.xlu0 %4437 }
 0x579   : > { %4297 = vst.msk [vmem:[#allocation5 + $0x64] sm:$0xf] %vm3518_vm1, %v4210_v46  ;;  %v5002_v29 = vsel %vm2925_vm11, %v6057_v19, 0  ;;  %v9263_v19 = vld [vmem:[#allocation40_spill] sm:$0xff] }
 0x57a   : > { %4523 = vst.msk [vmem:[#allocation5 + $0x7c] sm:$0xf] %vm3743_vm2, %v4438_v48  ;;  %v6062_v37 = vld [vmem:[#allocation5 + $0x84] sm:$0xf0] }
 0x57c   : > { %5076 = vmatpush.bf16.xpose.msrb.mxu2 %v5008_v23  ;;  %v6329_v23 = vld [vmem:[#allocation5 + $0x10] sm:$0xf0] }
 0x57d   : > { %4020 = vrot.lane.b32.xlu2 %v3930_v34, %s6656_s23  ;;  %v6009_v48 = vor.u32 %v6329_v23, %v6008_v18  ;;  %v9261_v34 = vld [vmem:[#allocation39_spill] sm:$0xff] }
 0x57e   : > { %4473 = vrot.lane.b32.xlu0 %v8486_v39, %s6660_s19  ;;  %4245 = vrot.lane.b32.xlu1 %v4155_v58, %s6658_s30  ;;  %v4430_v60 = vpop.permute.xlu2 %4429  ;;  %v4156_v39 = vpack.c.bf16 %v4124_v7, %v4124_v7  ;;  %v9264_v7 = vld [vmem:[#allocation33_spill] sm:$0xff]  ;;  %v9273_v23 = vld [vmem:[#allocation27_spill] sm:$0xff] }
 0x57f   : > { %v4990_v17 = vsel %vm2925_vm11, %v6009_v48, 0 }
 0x580   : > { %v4436_v47 = vpop.permute.xlu1 %4435  ;;  %v3987_v59 = vpop.permute.xlu0 %3986 }
 0x581   : > { %v6342_v15 = vld [vmem:[#allocation5 + $0x7c] sm:$0xf]  ;;  %4073 = vst.msk [vmem:[#allocation5 + $0x70] sm:$0xf] %vm3293_vm15, %v3987_v59 }
 0x582   : > { %v6065_v38 = vor.u32 %v6342_v15, %v6062_v37  ;;  %4298 = vst.msk [vmem:[#allocation5 + $0x70] sm:$0xf] %vm3518_vm1, %v8649_v16  ;;  %v4117_v15 = vld [vmem:[#allocation3 + $0x120] sm:$0xff] }
 0x583   : > { %4522 = vst.msk [vmem:[#allocation5 + $0x70] sm:$0xf] %vm3743_vm2, %v4436_v47  ;;  %v4149_v37 = vpack.c.bf16 %v4117_v15, %v4117_v15 }
 0x584   : > { %5077 = vmatpush.bf16.xpose.msrb.mxu2 %v5005_v45  ;;  %5058 = vmatpush.bf16.xpose.msra.mxu3 %v6065_v38  ;;  %v9262_v45 = vld [vmem:[#allocation42_spill] sm:$0xff] }
 0x585   : > { %4247 = vrot.lane.b32.xlu2 %v4156_v39, %s6658_s30 }
 0x586   : > { %4022 = vrot.lane.b32.xlu0 %v3931_v26, %s6656_s23  ;;  %4471 = vrot.lane.b32.xlu1 %v9255_v30, %s6660_s19  ;;  %v3979_v6 = vpop.permute.xlu2 %3978 }
 0x587   : > { %4069 = vst.msk [vmem:[#allocation5 + $0x40] sm:$0xf] %vm3293_vm15, %v3979_v6 }
 0x588   : > { %v4206_v31 = vpop.permute.xlu1 %4205  ;;  %v4434_v8 = vpop.permute.xlu0 %4433 }
 0x589   : > { %4295 = vst.msk [vmem:[#allocation5 + $0x4c] sm:$0xf] %vm3518_vm1, %v4206_v31 }
 0x58a   : > { %4519 = vst.msk [vmem:[#allocation5 + $0x4c] sm:$0xf] %vm3743_vm2, %v4430_v60  ;;  %v6050_v44 = vld [vmem:[#allocation5 + $0x6c] sm:$0xf0] }
 0x58b   : > { %4521 = vst.msk [vmem:[#allocation5 + $0x64] sm:$0xf] %vm3743_vm2, %v4434_v8 }
 0x58c   : > { %5078 = vmatpush.bf16.xpose.msrb.mxu2 %v5002_v29  ;;  %v4118_v29 = vld [vmem:[#allocation3 + $0x128] sm:$0xff] }
 0x58d   : > { %4016 = vrot.lane.b32.xlu2 %v3928_v54, %s6656_s23  ;;  %v4150_v26 = vpack.c.bf16 %v4118_v29, %v4118_v29  ;;  %v4147_v54 = vpack.c.bf16 %v4115_v53, %v4115_v53  ;;  %v6168_v29 = vld [vmem:[#allocation5 + $0x150] sm:$0xf]  ;;  %v6367_v53 = vld [vmem:[#allocation5 + $0x140] sm:$0xf0] }
 0x58e   : > { %4469 = vrot.lane.b32.xlu0 %v9256_v33, %s6660_s19  ;;  %4241 = vrot.lane.b32.xlu1 %v4153_v14, %s6658_s30  ;;  %v3706_v16 = vpop.permute.xlu2 %3705  ;;  %v9268_v14 = vld [vmem:[#allocation29_spill] sm:$0xff] }
 0x58f   : > { %3773 = vst.msk [vmem:[#allocation5 + $0x15c] sm:$0xf] %vm3743_vm2, %v3706_v16  ;;  %v4116_v16 = vld [vmem:[#allocation3 + $0x110] sm:$0xff] }
 0x590   : > { %v3710_v56 = vpop.permute.xlu1 %3709  ;;  %v3983_v0 = vpop.permute.xlu0 %3982 }
 0x591   : > { %4071 = vst.msk [vmem:[#allocation5 + $0x58] sm:$0xf] %vm3293_vm15, %v3983_v0  ;;  %v6336_v60 = vld [vmem:[#allocation5 + $0x4c] sm:$0xf]  ;;  %v9269_v0 = vld [vmem:[#allocation30_spill] sm:$0xff] }
 0x592   : > { %4296 = vst.msk [vmem:[#allocation5 + $0x58] sm:$0xf] %vm3518_vm1, %v8669_v35  ;;  %v6339_v1 = vld [vmem:[#allocation5 + $0x64] sm:$0xf] }
 0x593   : > { %3775 = vst.msk [vmem:[#allocation5 + $0x174] sm:$0xf] %vm3743_vm2, %v3710_v56  ;;  %v6053_v52 = vor.u32 %v6339_v1, %v6050_v44  ;;  %v4148_v56 = vpack.c.bf16 %v4116_v16, %v4116_v16 }
 0x594   : > { %5079 = vmatpush.bf16.xpose.msrb.mxu2 %v4999_v42  ;;  %v9267_v42 = vld [vmem:[#allocation36_spill] sm:$0xff] }
 0x595   : > { %5059 = vmatpush.bf16.xpose.msra.mxu3 %v6053_v52  ;;  %4243 = vrot.lane.b32.xlu2 %v4154_v11, %s6658_s30 }
 0x596   : > { %4018 = vrot.lane.b32.xlu0 %v9257_v2, %s6656_s23  ;;  %4467 = vrot.lane.b32.xlu1 %v9258_v4, %s6660_s19  ;;  %v3973_v63 = vpop.permute.xlu2 %3972  ;;  %v6322_v2 = vld [vmem:[%s9156_s4 + $0x8] sm:$0xf0] }
 0x597   : > { %4066 = vst.msk [vmem:[#allocation5 + $0x1c] sm:$0xf] %vm3293_vm15, %v3973_v63  ;;  %v8765_v4 = vor.u32 %v6322_v2, %v5976_v41  ;;  %v4145_v63 = vpack.c.bf16 %v4113_v51, %v4113_v51  ;;  %v6144_v2 = vld [vmem:[#allocation5 + $0x120] sm:$0xf] }
 0x598   : > { %v3977_v12 = vpop.permute.xlu1 %3976  ;;  %v3708_v32 = vpop.permute.xlu0 %3707 }
 0x599   : > { %3774 = vst.msk [vmem:[#allocation5 + $0x168] sm:$0xf] %vm3743_vm2, %v3708_v32  ;;  %v9272_v32 = vld [vmem:[#allocation26_spill] sm:$0xff]  ;;  %5045 = vmatmul.bf16.vlgmr.msra.gmra.mxu2 %v8765_v4 }
 0x59a   : > { %4068 = vst.msk [vmem:[#allocation5 + $0x34] sm:$0xf] %vm3293_vm15, %v3977_v12  ;;  %v9271_v12 = vld [vmem:[#allocation32_spill] sm:$0xff] }
 0x59c   : > { %5080 = vmatpush.bf16.xpose.msrb.mxu2 %v4996_v28 }
 0x59d   : > { %4012 = vrot.lane.b32.xlu2 %v9260_v24, %s6656_s23 }
 0x59e   : > { %4465 = vrot.lane.b32.xlu0 %v9259_v20, %s6660_s19  ;;  %4237 = vrot.lane.b32.xlu1 %v4151_v61, %s6658_s30  ;;  %v4200_v25 = vpop.permute.xlu2 %4199  ;;  %v4114_v61 = vld [vmem:[#allocation3 + $0xf8] sm:$0xff] }
 0x59f   : > { %v4146_v18 = vpack.c.bf16 %v4114_v61, %v4114_v61  ;;  %v9274_v20 = vld [vmem:[#allocation31_spill] sm:$0xff] }
 0x5a0   : > { %v4204_v35 = vpop.permute.xlu1 %4203  ;;  %v4432_v46 = vpop.permute.xlu0 %4431  ;;  %v6364_v61 = vld [vmem:[#allocation5 + $0x128] sm:$0xf0] }
 0x5a1   : > { %4294 = vst.msk [vmem:[#allocation5 + $0x40] sm:$0xf] %vm3518_vm1, %v4204_v35  ;;  %v6180_v35 = vld [vmem:[#allocation5 + $0x168] sm:$0xf] }
 0x5a2   : > { %4520 = vst.msk [vmem:[#allocation5 + $0x58] sm:$0xf] %vm3743_vm2, %v4432_v46  ;;  %v6236_v46 = vld [vmem:[#allocation4 + $0x70] sm:$0xf] }
 0x5a4   : > { %5081 = vmatpush.bf16.xpose.msrb.mxu2 %v4993_v13 }
 0x5a5   : > { %4239 = vrot.lane.b32.xlu2 %v4152_v49, %s6658_s30 }
 0x5a6   : > { %4014 = vrot.lane.b32.xlu0 %v9261_v34, %s6656_s23  ;;  %4463 = vrot.lane.b32.xlu1 %v9262_v45, %s6660_s19  ;;  %v3969_v58 = vpop.permute.xlu2 %3968  ;;  %v6373_v34 = vld [vmem:[#allocation5 + $0x170] sm:$0xf0]  ;;  %v6382_v45 = vld [vmem:[#allocation4 + $0x74] sm:$0xf0] }
 0x5a7   : > { %4064 = vst.msk [vmem:[#allocation5 + $0x4] sm:$0xf] %vm3293_vm15, %v3969_v58  ;;  %v6181_v58 = vor.u32 %v6373_v34, %v6180_v35  ;;  %v4576_v34 = vld [vmem:[#allocation3 + $0x1a2] sm:$0xff] }
 0x5a8   : > { %v4428_v27 = vpop.permute.xlu1 %4427  ;;  %v4202_v22 = vpop.permute.xlu0 %4201 }
 0x5a9   : > { %v6038_v47 = vld [vmem:[#allocation5 + $0x54] sm:$0xf0]  ;;  %4293 = vst.msk [vmem:[#allocation5 + $0x34] sm:$0xf] %vm3518_vm1, %v4202_v22  ;;  %v6381_v22 = vld [vmem:[#allocation4 + $0x64] sm:$0xf0] }
 0x5aa   : > { %v6041_v59 = vor.u32 %v6336_v60, %v6038_v47  ;;  %4518 = vst.msk [vmem:[#allocation5 + $0x40] sm:$0xf] %vm3743_vm2, %v4428_v27  ;;  %v6232_v27 = vld [vmem:[#allocation4 + $0x60] sm:$0xf]  ;;  %v6237_v60 = vor.u32 %v6382_v45, %v6236_v46  ;;  %v6321_v46 = vld [vmem:[%s9156_s4 + $0x4] sm:$0xf] }
 0x5ab   : > { %v6233_v47 = vor.u32 %v6381_v22, %v6232_v27  ;;  %v6132_v27 = vld [vmem:[#allocation5 + $0x108] sm:$0xf] }
 0x5ac   : > { %5082 = vmatpush.bf16.xpose.msrb.mxu2 %v4990_v17  ;;  %5060 = vmatpush.bf16.xpose.msra.mxu3 %v6041_v59  ;;  %v9275_v59 = vld [vmem:[#allocation28_spill] sm:$0xff]  ;;  %v6377_v22 = vld [vmem:[#allocation4 + $0x24] sm:$0xf0] }
 0x5ad   : > { %4008 = vrot.lane.b32.xlu2 %v9264_v7, %s6656_s23 }
 0x5ae   : > { %4461 = vrot.lane.b32.xlu0 %v9263_v19, %s6660_s19  ;;  %4233 = vrot.lane.b32.xlu1 %v4149_v37, %s6658_s30  ;;  %v4196_v38 = vpop.permute.xlu2 %4195  ;;  %v6370_v37 = vld [vmem:[#allocation5 + $0x158] sm:$0xf0] }
 0x5b0   : > { %v4198_v3 = vpop.permute.xlu1 %4197  ;;  %v4426_v39 = vpop.permute.xlu0 %4425 }
 0x5b1   : > { %4291 = vst.msk [vmem:[#allocation5 + $0x1c] sm:$0xf] %vm3518_vm1, %v4198_v3  ;;  %v6026_v10 = vld [vmem:[#allocation5 + $0x3c] sm:$0xf0] }
 0x5b2   : > { %4517 = vst.msk [vmem:[#allocation5 + $0x34] sm:$0xf] %vm3743_vm2, %v4426_v39  ;;  %v6264_v3 = vld [vmem:[#allocation4 + $0xe0] sm:$0xf]  ;;  %v6389_v39 = vld [vmem:[#allocation4 + $0xe4] sm:$0xf0] }
 0x5b5   : > { %4235 = vrot.lane.b32.xlu2 %v4150_v26, %s6658_s30  ;;  %v6390_v26 = vld [vmem:[#allocation4 + $0xf4] sm:$0xf0] }
 0x5b6   : > { %4010 = vrot.lane.b32.xlu0 %v9265_v55, %s6656_s23  ;;  %4459 = vrot.lane.b32.xlu1 %v9266_v50, %s6660_s19  ;;  %v4029_v30 = vpop.permute.xlu2 %4028  ;;  %v6169_v55 = vor.u32 %v6370_v37, %v6168_v29  ;;  %v6260_v50 = vld [vmem:[#allocation4 + $0xd0] sm:$0xf]  ;;  %v6216_v29 = vld [vmem:[#allocation4 + $0x20] sm:$0xf] }
 0x5b7   : > { %4094 = vst.msk [vmem:[#allocation5 + $0x16c] sm:$0xf] %vm3293_vm15, %v4029_v30  ;;  %v6388_v30 = vld [vmem:[#allocation4 + $0xd4] sm:$0xf0] }
 0x5b8   : > { %v4424_v6 = vpop.permute.xlu1 %4423  ;;  %v3975_v31 = vpop.permute.xlu0 %3974 }
 0x5b9   : > { %v6333_v8 = vld [vmem:[#allocation5 + $0x34] sm:$0xf]  ;;  %4067 = vst.msk [vmem:[#allocation5 + $0x28] sm:$0xf] %vm3293_vm15, %v3975_v31  ;;  %v6265_v31 = vor.u32 %v6389_v39, %v6264_v3 }
 0x5ba   : > { %v6029_v62 = vor.u32 %v6333_v8, %v6026_v10  ;;  %4292 = vst.msk [vmem:[#allocation5 + $0x28] sm:$0xf] %vm3518_vm1, %v4200_v25  ;;  %v6261_v8 = vor.u32 %v6388_v30, %v6260_v50  ;;  %v6361_v39 = vld [vmem:[#allocation5 + $0x110] sm:$0xf0]  ;;  %v6375_v50 = vld [vmem:[#allocation4 + $0x4] sm:$0xf0]  ;;  %v6217_v30 = vor.u32 %v6377_v22, %v6216_v29 }
 0x5bb   : > { %4516 = vst.msk [vmem:[#allocation5 + $0x28] sm:$0xf] %vm3743_vm2, %v4424_v6  ;;  %v5151_v22 = vld [vmem:[%s9157_s5] sm:$0xff] }
 0x5bc   : > { %5061 = vmatpush.bf16.xpose.msra.mxu3 %v6029_v62  ;;  %v6164_v29 = vld [vmem:[#allocation5 + $0x140] sm:$0xf] }
 0x5bd   : > { %4004 = vrot.lane.b32.xlu2 %v9268_v14, %s6656_s23 }
 0x5be   : > { %4457 = vrot.lane.b32.xlu0 %v9267_v42, %s6660_s19  ;;  %4229 = vrot.lane.b32.xlu1 %v4147_v54, %s6658_s30  ;;  %v6224_v54 = vld [vmem:[#allocation4 + $0x40] sm:$0xf]  ;;  %v6379_v42 = vld [vmem:[#allocation4 + $0x44] sm:$0xf0] }
 0x5bf   : > { %v4256_v43 = vpop.permute.xlu2 %4255 }
 0x5c0   : > { %v4194_v21 = vpop.permute.xlu1 %4193  ;;  %v4422_v33 = vpop.permute.xlu0 %4421 }
 0x5c1   : > { %4289 = vst.msk [vmem:[#allocation5 + $0x4] sm:$0xf] %vm3518_vm1, %v4194_v21 }
 0x5c2   : > { %4515 = vst.msk [vmem:[#allocation5 + $0x1c] sm:$0xf] %vm3743_vm2, %v4422_v33  ;;  %v6014_v28 = vld [vmem:[#allocation5 + $0x24] sm:$0xf0]  ;;  %v6228_v33 = vld [vmem:[#allocation4 + $0x50] sm:$0xf] }
 0x5c5   : > { %4231 = vrot.lane.b32.xlu2 %v4148_v56, %s6658_s30  ;;  %v6156_v56 = vld [vmem:[#allocation5 + $0x138] sm:$0xf] }
 0x5c6   : > { %4006 = vrot.lane.b32.xlu0 %v9269_v0, %s6656_s23  ;;  %4455 = vrot.lane.b32.xlu1 %v9270_v40, %s6660_s19  ;;  %v6380_v0 = vld [vmem:[#allocation4 + $0x54] sm:$0xf0]  ;;  %v6157_v40 = vor.u32 %v6367_v53, %v6156_v56 }
 0x5c7   : > { %v4025_v57 = vpop.permute.xlu2 %4024 }
 0x5c8   : > { %v4420_v1 = vpop.permute.xlu1 %4419  ;;  %v3971_v44 = vpop.permute.xlu0 %3970  ;;  %4092 = vst.msk [vmem:[#allocation5 + $0x154] sm:$0xf] %vm3293_vm15, %v4025_v57  ;;  %v6220_v57 = vld [vmem:[#allocation4 + $0x30] sm:$0xf] }
 0x5c9   : > { %v6330_v52 = vld [vmem:[#allocation5 + $0x1c] sm:$0xf]  ;;  %4065 = vst.msk [vmem:[#allocation5 + $0x10] sm:$0xf] %vm3293_vm15, %v3971_v44  ;;  %v6229_v44 = vor.u32 %v6380_v0, %v6228_v33  ;;  %v6120_v33 = vld [vmem:[#allocation5 + $0xf0] sm:$0xf] }
 0x5ca   : > { %v6017_v11 = vor.u32 %v6330_v52, %v6014_v28  ;;  %4290 = vst.msk [vmem:[#allocation5 + $0x10] sm:$0xf] %vm3518_vm1, %v4196_v38  ;;  %v6268_v38 = vld [vmem:[#allocation4 + $0xf0] sm:$0xf]  ;;  %v6225_v52 = vor.u32 %v6379_v42, %v6224_v54  ;;  %v5988_v28 = vld [vmem:[%s9156_s4 + $0x18] sm:$0xf] }
 0x5cb   : > { %4514 = vst.msk [vmem:[#allocation5 + $0x10] sm:$0xf] %vm3743_vm2, %v4420_v1  ;;  %v6269_v6 = vor.u32 %v6390_v26, %v6268_v38  ;;  %v6378_v1 = vld [vmem:[#allocation4 + $0x34] sm:$0xf0]  ;;  %v6133_v26 = vor.u32 %v6361_v39, %v6132_v27  ;;  %v6244_v42 = vld [vmem:[#allocation4 + $0x90] sm:$0xf] }
 0x5cc   : > { %5062 = vmatpush.bf16.xpose.msra.mxu3 %v6017_v11  ;;  %v6325_v11 = vld [vmem:[%s9156_s4 + $0x20] sm:$0xf0]  ;;  %v6221_v51 = vor.u32 %v6378_v1, %v6220_v57  ;;  %v6108_v57 = vld [vmem:[#allocation5 + $0xd8] sm:$0xf] }
 0x5cd   : > { %4000 = vrot.lane.b32.xlu2 %v9272_v32, %s6656_s23  ;;  %v8808_v41 = vor.u32 %v6325_v11, %v5988_v28  ;;  %v6256_v32 = vld [vmem:[#allocation4 + $0xc0] sm:$0xf]  ;;  %v6371_v27 = vld [vmem:[#allocation5 + $0x160] sm:$0xf0] }
 0x5ce   : > { %4453 = vrot.lane.b32.xlu0 %v9271_v12, %s6660_s19  ;;  %4225 = vrot.lane.b32.xlu1 %v4145_v63, %s6658_s30 }
 0x5cf   : > { %v8772_v5 = vpop.permute.xlu2 %4251  ;;  %5050 = vmatmul.bf16.gmra.mxu2 %v8808_v41 }
 0x5d0   : > { %v4254_v36 = vpop.permute.xlu1 %4253  ;;  %v4418_v13 = vpop.permute.xlu0 %4417 }
 0x5d1   : > { %4319 = vst.msk [vmem:[#allocation5 + $0x16c] sm:$0xf] %vm3518_vm1, %v4254_v36  ;;  %v6386_v36 = vld [vmem:[#allocation4 + $0xb4] sm:$0xf0] }
 0x5d2   : > { %4513 = vst.msk [vmem:[#allocation5 + $0x4] sm:$0xf] %vm3743_vm2, %v4418_v13  ;;  %v6002_v17 = vld [vmem:[#allocation5 + $0xc] sm:$0xf0] }
 0x5d5   : > { %4227 = vrot.lane.b32.xlu2 %v4146_v18, %s6658_s30  ;;  %v6387_v18 = vld [vmem:[#allocation4 + $0xc4] sm:$0xf0] }
 0x5d6   : > { %4002 = vrot.lane.b32.xlu0 %v9273_v23, %s6656_s23  ;;  %4451 = vrot.lane.b32.xlu1 %v9274_v20, %s6660_s19  ;;  %v6145_v23 = vor.u32 %v6364_v61, %v6144_v2  ;;  %v6248_v20 = vld [vmem:[#allocation4 + $0xa0] sm:$0xf]  ;;  %v6355_v2 = vld [vmem:[#allocation5 + $0xe0] sm:$0xf0] }
 0x5d7   : > { %v4021_v24 = vpop.permute.xlu2 %4020 }
 0x5d8   : > { %v4480_v25 = vpop.permute.xlu1 %4479  ;;  %v4031_v48 = vpop.permute.xlu0 %4030  ;;  %4090 = vst.msk [vmem:[#allocation5 + $0x13c] sm:$0xf] %vm3293_vm15, %v4021_v24  ;;  %v6385_v24 = vld [vmem:[#allocation4 + $0xa4] sm:$0xf0] }
 0x5d9   : > { %v6327_v9 = vld [vmem:[#allocation5 + $0x4] sm:$0xf]  ;;  %4095 = vst.msk [vmem:[#allocation5 + $0x178] sm:$0xf] %vm3293_vm15, %v4031_v48  ;;  %v5978_v48 = vld [vmem:[%s9156_s4 + $0xc] sm:$0xf0] }
 0x5da   : > { %v6005_v49 = vor.u32 %v6327_v9, %v6002_v17  ;;  %4320 = vst.msk [vmem:[#allocation5 + $0x178] sm:$0xf] %vm3518_vm1, %v4256_v43  ;;  %v4575_v9 = vld [vmem:[#allocation3 + $0x19a] sm:$0xff]  ;;  %v6249_v17 = vor.u32 %v6385_v24, %v6248_v20  ;;  %v6662_v24 = vmov 0  }
 0x5db   : > { %4544 = vst.msk [vmem:[#allocation5 + $0x178] sm:$0xf] %vm3743_vm2, %v4480_v25  ;;  %v6257_v25 = vor.u32 %v6387_v18, %v6256_v32  ;;  %v4607_v45 = vpack.c.bf16 %v4575_v9, %v4575_v9  ;;  %v6326_v18 = vld [vmem:[%s9156_s4 + $0x28] sm:$0xf0]  ;;  %6532 = vset.pattern.permute.xlu1 %v6662_v24  ;;  %6531 = vset.pattern.permute.xlu0 %v6662_v24 }
 0x5dc   : > { %5063 = vmatpush.bf16.xpose.msra.mxu3 %v6005_v49  ;;  %v8824_v49 = vor.u32 %v6321_v46, %v5978_v48  ;;  %6533 = vset.pattern.permute.xlu2 %v6662_v24  ;;  %v6352_v9 = vld [vmem:[#allocation5 + $0xc8] sm:$0xf0] }
 0x5dd   : > { %5490 = vrot.lane.b32.xlu2 %v6237_v60, %s6658_s30  ;;  %v6212_v60 = vld [vmem:[#allocation4 + $0x10] sm:$0xf]  ;;  %4639 = vst.msk [vmem:[#allocation5 + $0x170] sm:$0xf] %vm3068_vm14, %v4607_v45  ;;  %v5152_v45 = vld [vmem:[%s9157_s5 + $0x8] sm:$0xff] }
 0x5de   : > { %4449 = vrot.lane.b32.xlu0 %v9275_v59, %s6660_s19  ;;  %5488 = vrot.lane.b32.xlu1 %v6233_v47, %s6658_s30  ;;  %v6376_v47 = vld [vmem:[#allocation4 + $0x14] sm:$0xf0] }
 0x5df   : > { %v8790_v15 = vpop.permute.xlu2 %4247 }
 0x5e0   : > { %v4478_v19 = vpop.permute.xlu0 %4477  ;;  %v4250_v7 = vpop.permute.xlu1 %4249 }
 0x5e1   : > { %4543 = vst.msk [vmem:[#allocation5 + $0x16c] sm:$0xf] %vm3743_vm2, %v4478_v19 }
 0x5e2   : > { %4317 = vst.msk [vmem:[#allocation5 + $0x154] sm:$0xf] %vm3518_vm1, %v4250_v7  ;;  %v6182_v10 = vld [vmem:[#allocation5 + $0x174] sm:$0xf0] }
 0x5e3   : > { %5064 = vmatmul.bf16.vlgmr.msra.gmra.mxu3 %v8824_v49 }
 0x5e4   : > { %5094 = vmatpush.bf16.xpose.msrb.mxu3 %v6181_v58  ;;  %v4608_v58 = vpack.c.bf16 %v4576_v34, %v4576_v34  ;;  %v6188_v32 = vld [vmem:[#allocation5 + $0x170] sm:$0xf] }
 0x5e5   : > { %5504 = vrot.lane.b32.xlu2 %v6265_v31, %s6658_s30  ;;  %v5984_v31 = vld [vmem:[%s9156_s4 + $0x8] sm:$0xf] }
 0x5e6   : > { %5506 = vrot.lane.b32.xlu0 %v6269_v6, %s6658_s30  ;;  %5502 = vrot.lane.b32.xlu1 %v6261_v8, %s6658_s30  ;;  %4640 = vst.msk [vmem:[#allocation5 + $0x17c] sm:$0xf] %vm3068_vm14, %v4608_v58  ;;  %v6213_v6 = vor.u32 %v6376_v47, %v6212_v60  ;;  %v6323_v8 = vld [vmem:[%s9156_s4 + $0x10] sm:$0xf0]  ;;  %v6176_v58 = vld [vmem:[#allocation5 + $0x158] sm:$0xf] }
 0x5e7   : > { %v4017_v62 = vpop.permute.xlu2 %4016 }
 0x5e8   : > { %v4027_v14 = vpop.permute.xlu0 %4026  ;;  %4088 = vst.msk [vmem:[#allocation5 + $0x124] sm:$0xf] %vm3293_vm15, %v4017_v62  ;;  %v4476_v43 = vpop.permute.xlu1 %4475  ;;  %v6372_v21 = vld [vmem:[#allocation5 + $0x16c] sm:$0xf]  ;;  %v6358_v62 = vld [vmem:[#allocation5 + $0xf8] sm:$0xf0] }
 0x5e9   : > { %4093 = vst.msk [vmem:[#allocation5 + $0x160] sm:$0xf] %vm3293_vm15, %v4027_v14  ;;  %v6185_v16 = vor.u32 %v6372_v21, %v6182_v10  ;;  %v8843_v10 = vor.u32 %v6323_v8, %v5984_v31  ;;  %v6240_v14 = vld [vmem:[#allocation4 + $0x80] sm:$0xf]  ;;  %v6121_v56 = vor.u32 %v6358_v62, %v6120_v33  ;;  %v6152_v8 = vld [vmem:[#allocation5 + $0x128] sm:$0xf] }
 0x5ea   : > { %4318 = vst.msk [vmem:[#allocation5 + $0x160] sm:$0xf] %vm3518_vm1, %v8772_v5  ;;  %v6252_v5 = vld [vmem:[#allocation4 + $0xb0] sm:$0xf]  ;;  %v5154_v62 = vld [vmem:[%s9157_s5 + $0x18] sm:$0xff] }
 0x5eb   : > { %4542 = vst.msk [vmem:[#allocation5 + $0x160] sm:$0xf] %vm3743_vm2, %v4476_v43  ;;  %5113 = vmatpush.bf16.xpose.msra.mxu2 %v6185_v16  ;;  %v6253_v35 = vor.u32 %v6386_v36, %v6252_v5  ;;  %v6383_v43 = vld [vmem:[#allocation4 + $0x84] sm:$0xf0]  ;;  %v6384_v16 = vld [vmem:[#allocation4 + $0x94] sm:$0xf0] }
 0x5ec   : > { %5095 = vmatpush.bf16.xpose.msrb.mxu3 %v6169_v55  ;;  %v6208_v55 = vld [vmem:[#allocation4] sm:$0xf]  ;;  %6190 = vmatmul.msk.bf16.vlgmr.msrb.gmra.mxu2 %vm2925_vm11, %v8843_v10  ;;  %v6245_v0 = vor.u32 %v6384_v16, %v6244_v42  ;;  %v6324_v36 = vld [vmem:[%s9156_s4 + $0x1c] sm:$0xf]  ;;  %v5153_v33 = vld [vmem:[%s9157_s5 + $0x10] sm:$0xff] }
 0x5ed   : > { %5484 = vrot.lane.b32.xlu2 %v6225_v52, %s6658_s30  ;;  %v6374_v5 = vld [vmem:[#allocation5 + $0x178] sm:$0xf0]  ;;  %v5185_v16 = vld [vmem:[%s9158_s6 + $0x10] sm:$0xff] }
 0x5ee   : > { %5486 = vrot.lane.b32.xlu0 %v6229_v44, %s6658_s30  ;;  %5482 = vrot.lane.b32.xlu1 %v6221_v51, %s6658_s30 }
 0x5ef   : > { %v8814_v12 = vpop.permute.xlu2 %4243 }
 0x5f0   : > { %v4474_v63 = vpop.permute.xlu0 %4473  ;;  %v4246_v13 = vpop.permute.xlu1 %4245 }
 0x5f1   : > { %4541 = vst.msk [vmem:[#allocation5 + $0x154] sm:$0xf] %vm3743_vm2, %v4474_v63  ;;  %v6109_v63 = vor.u32 %v6355_v2, %v6108_v57 }
 0x5f2   : > { %4315 = vst.msk [vmem:[#allocation5 + $0x13c] sm:$0xf] %vm3518_vm1, %v4246_v13  ;;  %v6170_v7 = vld [vmem:[#allocation5 + $0x15c] sm:$0xf0]  ;;  %v5990_v13 = vld [vmem:[%s9156_s4 + $0x24] sm:$0xf0] }
 0x5f3   : > { %v8867_v61 = vor.u32 %v6324_v36, %v5990_v13 }
 0x5f4   : > { %5096 = vmatpush.bf16.xpose.msrb.mxu3 %v6157_v40  ;;  %v6241_v40 = vor.u32 %v6383_v43, %v6240_v14 }
 0x5f5   : > { %5498 = vrot.lane.b32.xlu2 %v6253_v35, %s6658_s30  ;;  %5069 = vmatmul.bf16.gmra.mxu3 %v8867_v61 }
 0x5f6   : > { %5500 = vrot.lane.b32.xlu0 %v6257_v25, %s6658_s30  ;;  %5496 = vrot.lane.b32.xlu1 %v6249_v17, %s6658_s30  ;;  %v6096_v25 = vld [vmem:[#allocation5 + $0xc0] sm:$0xf] }
 0x5f7   : > { %v4013_v37 = vpop.permute.xlu2 %4012  ;;  %v6097_v17 = vor.u32 %v6352_v9, %v6096_v25  ;;  %v6353_v9 = vld [vmem:[#allocation5 + $0xd0] sm:$0xf0] }
 0x5f8   : > { %v4023_v59 = vpop.permute.xlu0 %4022  ;;  %v6369_v19 = vld [vmem:[#allocation5 + $0x154] sm:$0xf]  ;;  %v4472_v38 = vpop.permute.xlu1 %4471  ;;  %4086 = vst.msk [vmem:[#allocation5 + $0x10c] sm:$0xf] %vm3293_vm15, %v4013_v37 }
 0x5f9   : > { %4091 = vst.msk [vmem:[#allocation5 + $0x148] sm:$0xf] %vm3293_vm15, %v4023_v59  ;;  %v6173_v3 = vor.u32 %v6369_v19, %v6170_v7  ;;  %v6177_v19 = vor.u32 %v6371_v27, %v6176_v58 }
 0x5fa   : > { %4316 = vst.msk [vmem:[#allocation5 + $0x148] sm:$0xf] %vm3518_vm1, %v8790_v15  ;;  %v6209_v15 = vor.u32 %v6375_v50, %v6208_v55 }
 0x5fb   : > { %5114 = vmatpush.bf16.xpose.msra.mxu2 %v6173_v3  ;;  %4540 = vst.msk [vmem:[#allocation5 + $0x148] sm:$0xf] %vm3743_vm2, %v4472_v38  ;;  %v5183_v3 = vld [vmem:[%s9158_s6] sm:$0xff]  ;;  %v5032_v39 = vsel %vm2925_vm11, %v6177_v19, 0 }
 0x5fc   : > { %5097 = vmatpush.bf16.xpose.msrb.mxu3 %v6145_v23  ;;  %v6189_v23 = vor.u32 %v6374_v5, %v6188_v32 }
 0x5fd   : > { %5478 = vrot.lane.b32.xlu2 %v6213_v6, %s6658_s30 }
 0x5fe   : > { %5480 = vrot.lane.b32.xlu0 %v6217_v30, %s6658_s30  ;;  %5476 = vrot.lane.b32.xlu1 %v6209_v15, %s6658_s30  ;;  %v5035_v34 = vsel %vm2925_vm11, %v6189_v23, 0  ;;  %v6365_v15 = vld [vmem:[#allocation5 + $0x130] sm:$0xf0] }
 0x5ff   : > { %v8850_v54 = vpop.permute.xlu2 %4239  ;;  %v6153_v14 = vor.u32 %v6365_v15, %v6152_v8 }
 0x600   : > { %v4470_v53 = vpop.permute.xlu0 %4469  ;;  %v4242_v21 = vpop.permute.xlu1 %4241 }
 0x601   : > { %4539 = vst.msk [vmem:[#allocation5 + $0x13c] sm:$0xf] %vm3743_vm2, %v4470_v53 }
 0x602   : > { %4313 = vst.msk [vmem:[#allocation5 + $0x124] sm:$0xf] %vm3518_vm1, %v4242_v21  ;;  %v6158_v28 = vld [vmem:[#allocation5 + $0x144] sm:$0xf0] }
 0x604   : > { %5098 = vmatpush.bf16.xpose.msrb.mxu3 %v6133_v26  ;;  %v6368_v26 = vld [vmem:[#allocation5 + $0x148] sm:$0xf0] }
 0x605   : > { %5492 = vrot.lane.b32.xlu2 %v6241_v40, %s6658_s30  ;;  %v6165_v30 = vor.u32 %v6368_v26, %v6164_v29  ;;  %v6362_v40 = vld [vmem:[#allocation5 + $0x118] sm:$0xf0] }
 0x606   : > { %5494 = vrot.lane.b32.xlu0 %v6245_v0, %s6658_s30  ;;  %5162 = vperm.xlu1 %6532, %v5152_v45   ;;  %v6140_v0 = vld [vmem:[#allocation5 + $0x110] sm:$0xf]  ;;  %s5708_s30 = scalar_lea.hbm %s9164_s12, %s6393_s14 }
 0x607   : > { %v4009_v44 = vpop.permute.xlu2 %4008  ;;  %v5029_v31 = vsel %vm2925_vm11, %v6165_v30, 0  ;;  %s5711_s19 = sshll.u32 %s5708_s30, 4  ;;  %s5712_s19 = int_to_ptr.hbm [resolvable:$true] %s5711_s19 }
 0x608   : > { %v4019_v1 = vpop.permute.xlu0 %4018  ;;  %v6366_v52 = vld [vmem:[#allocation5 + $0x13c] sm:$0xf]  ;;  %v4468_v11 = vpop.permute.xlu1 %4467  ;;  %4084 = vst.msk [vmem:[#allocation5 + $0xf4] sm:$0xf] %vm3293_vm15, %v4009_v44  ;;  %s6598_s17 = sshra.s32 %s5712_s19, 4  ;;  %s6599_s17 = int_to_ptr.hbm [resolvable:$true] %s6598_s17 }
 0x609   : > { %4089 = vst.msk [vmem:[#allocation5 + $0x130] sm:$0xf] %vm3293_vm15, %v4019_v1  ;;  %v6161_v51 = vor.u32 %v6366_v52, %v6158_v28  ;;  %v6141_v1 = vor.u32 %v6362_v40, %v6140_v0  ;;  %v5184_v52 = vld [vmem:[%s9158_s6 + $0x8] sm:$0xff]  ;;  %s6600_s29 = scalar_lea.hbm %s6599_s17, 64  ;;  %p6605_p0 = scmp.lt.s32.totalorder %s6599_s17, %s9164_s12 }
 0x60a   : > { %4314 = vst.msk [vmem:[#allocation5 + $0x130] sm:$0xf] %vm3518_vm1, %v8814_v12  ;;  %v5996_v12 = vld [vmem:[%s9156_s4 + $0x20] sm:$0xf]  ;;  %p6601_p6 = scmp.ne.s32.totalorder %s6599_s17, %s6600_s29  ;;  %p6606_p1 = scmp.lt.s32.totalorder %s6604_s18, %s6600_s29 }
 0x60b   : > { %5115 = vmatpush.bf16.xpose.msra.mxu2 %v6161_v51  ;;  %4538 = vst.msk [vmem:[#allocation5 + $0x130] sm:$0xf] %vm3743_vm2, %v4468_v11  ;;  %v8875_v20 = vor.u32 %v6326_v18, %v5996_v12  ;;  %v5023_v28 = vsel %vm2925_vm11, %v6141_v1, 0  ;;  %v6128_v11 = vld [vmem:[#allocation5 + $0xf8] sm:$0xf] }
 0x60c   : > { %5099 = vmatpush.bf16.xpose.msrb.mxu3 %v6121_v56  ;;  %v5026_v56 = vsel %vm2925_vm11, %v6153_v14, 0  ;;  %v6359_v51 = vld [vmem:[#allocation5 + $0x100] sm:$0xf0]  ;;  %v6116_v12 = vld [vmem:[#allocation5 + $0xe0] sm:$0xf]  ;;  %p6602_p9 = pnand %p6601_p6, %p6779_p11  ;;  %p6607_p3 = por %p6606_p1, %p6605_p0 }
 0x60d   : > { %6191 = vmatmul.msk.bf16.gmra.mxu2 %vm2925_vm11, %v8875_v20  ;;  %5167 = vperm.xlu2 %6533, %v5153_v33   ;;  %v6129_v32 = vor.u32 %v6359_v51, %v6128_v11  ;;  %v6356_v18 = vld [vmem:[#allocation5 + $0xe8] sm:$0xf0] }
 0x60e   : > { %5157 = vperm.xlu0 %6531, %v5151_v22   ;;  %5189 = vperm.xlu1 %6532, %v5183_v3   ;;  %v6117_v24 = vor.u32 %v6356_v18, %v6116_v12  ;;  %p6603_p13 = pneg %p6602_p9 }
 0x60f   : > { %v4236_v46 = vpop.permute.xlu2 %4235  ;;  %v5020_v13 = vsel %vm2925_vm11, %v6129_v32, 0 }
 0x610   : > { %v4466_v35 = vpop.permute.xlu0 %4465  ;;  %v4238_v48 = vpop.permute.xlu1 %4237  ;;  %p6608_p4 = pnand %p6607_p3, %p6603_p13 }
 0x611   : > { %4537 = vst.msk [vmem:[#allocation5 + $0x124] sm:$0xf] %vm3743_vm2, %v4466_v35  ;;  %v5186_v35 = vld [vmem:[%s9158_s6 + $0x18] sm:$0xff] }
 0x612   : > { %4311 = vst.msk [vmem:[#allocation5 + $0x10c] sm:$0xf] %vm3518_vm1, %v4238_v48  ;;  %v6146_v37 = vld [vmem:[#allocation5 + $0x12c] sm:$0xf0]  ;;  %v6104_v48 = vld [vmem:[#allocation5 + $0xc8] sm:$0xf] }
 0x613   : > { %v6105_v58 = vor.u32 %v6353_v9, %v6104_v48 }
 0x614   : > { %5100 = vmatpush.bf16.xpose.msrb.mxu3 %v6109_v63 }
 0x615   : > { %5194 = vperm.xlu2 %6533, %v5184_v52  }
 0x616   : > { %5172 = vperm.xlu0 %6531, %v5154_v62   ;;  %5199 = vperm.xlu1 %6532, %v5185_v16  }
 0x617   : > { %v4005_v47 = vpop.permute.xlu2 %4004 }
 0x618   : > { %v4015_v60 = vpop.permute.xlu0 %4014  ;;  %v6363_v59 = vld [vmem:[#allocation5 + $0x124] sm:$0xf]  ;;  %v4464_v7 = vpop.permute.xlu1 %4463  ;;  %4082 = vst.msk [vmem:[#allocation5 + $0xdc] sm:$0xf] %vm3293_vm15, %v4005_v47  ;;  %v5014_v47 = vsel %vm2925_vm11, %v6105_v58, 0 }
 0x619   : > { %4087 = vst.msk [vmem:[#allocation5 + $0x118] sm:$0xf] %vm3293_vm15, %v4015_v60  ;;  %v6149_v38 = vor.u32 %v6363_v59, %v6146_v37 }
 0x61a   : > { %4312 = vst.msk [vmem:[#allocation5 + $0x118] sm:$0xf] %vm3518_vm1, %v8850_v54 }
 0x61b   : > { %5116 = vmatpush.bf16.xpose.msra.mxu2 %v6149_v38  ;;  %4536 = vst.msk [vmem:[#allocation5 + $0x118] sm:$0xf] %vm3743_vm2, %v4464_v7 }
 0x61c   : > { %5101 = vmatpush.bf16.xpose.msrb.mxu3 %v6097_v17 }
 0x61d   : > { %5204 = vperm.xlu2 %6533, %v5186_v35  }
 0x61f   : > { %v4232_v50 = vpop.permute.xlu2 %4231 }
 0x620   : > { %v4462_v55 = vpop.permute.xlu0 %4461  ;;  %v4234_v6 = vpop.permute.xlu1 %4233 }
 0x621   : > { %4535 = vst.msk [vmem:[#allocation5 + $0x10c] sm:$0xf] %vm3743_vm2, %v4462_v55 }
 0x622   : > { %4309 = vst.msk [vmem:[#allocation5 + $0xf4] sm:$0xf] %vm3518_vm1, %v4234_v6  ;;  %v6134_v42 = vld [vmem:[#allocation5 + $0x114] sm:$0xf0] }
 0x623   : > { %5102 = vmatmul.bf16.vlgmr.msrb.gmra.mxu3 %v8765_v4 }
 0x624   : > { %5132 = vmatpush.bf16.xpose.msra.mxu3 %v5035_v34 }
 0x627   : > { %v4001_v4 = vpop.permute.xlu2 %4000 }
 0x628   : > { %v4011_v53 = vpop.permute.xlu0 %4010  ;;  %v6360_v54 = vld [vmem:[#allocation5 + $0x10c] sm:$0xf]  ;;  %v4460_v43 = vpop.permute.xlu1 %4459  ;;  %4080 = vst.msk [vmem:[#allocation5 + $0xc4] sm:$0xf] %vm3293_vm15, %v4001_v4 }
 0x629   : > { %4085 = vst.msk [vmem:[#allocation5 + $0x100] sm:$0xf] %vm3293_vm15, %v4011_v53  ;;  %v6137_v21 = vor.u32 %v6360_v54, %v6134_v42 }
 0x62a   : > { %4310 = vst.msk [vmem:[#allocation5 + $0x100] sm:$0xf] %vm3518_vm1, %v4236_v46  ;;  %v5017_v46 = vsel %vm2925_vm11, %v6117_v24, 0 }
 0x62b   : > { %5117 = vmatpush.bf16.xpose.msra.mxu2 %v6137_v21  ;;  %4534 = vst.msk [vmem:[#allocation5 + $0x100] sm:$0xf] %vm3743_vm2, %v4460_v43 }
 0x62c   : > { %5133 = vmatpush.bf16.xpose.msra.mxu3 %v5032_v39 }
 0x62f   : > { %v4228_v27 = vpop.permute.xlu2 %4227 }
 0x630   : > { %v4458_v57 = vpop.permute.xlu0 %4457  ;;  %v4230_v44 = vpop.permute.xlu1 %4229 }
 0x631   : > { %4533 = vst.msk [vmem:[#allocation5 + $0xf4] sm:$0xf] %vm3743_vm2, %v4458_v57 }
 0x632   : > { %4307 = vst.msk [vmem:[#allocation5 + $0xdc] sm:$0xf] %vm3518_vm1, %v4230_v44 }
 0x633   : > { %5107 = vmatmul.bf16.gmra.mxu3 %v8808_v41  ;;  %v6122_v41 = vld [vmem:[#allocation5 + $0xfc] sm:$0xf0] }
 0x634   : > { %5134 = vmatpush.bf16.xpose.msra.mxu3 %v5029_v31 }
 0x637   : > { %v5491_v37 = vpop.permute.xlu2 %5490 }
 0x638   : > { %v4007_v2 = vpop.permute.xlu0 %4006  ;;  %v6357_v63 = vld [vmem:[#allocation5 + $0xf4] sm:$0xf]  ;;  %v4456_v5 = vpop.permute.xlu1 %4455  ;;  %v5536_v29 = vsel %vm435_vm0, %v5491_v37, 0 }
 0x639   : > { %4083 = vst.msk [vmem:[#allocation5 + $0xe8] sm:$0xf] %vm3293_vm15, %v4007_v2  ;;  %v6125_v36 = vor.u32 %v6357_v63, %v6122_v41 }
 0x63a   : > { %4308 = vst.msk [vmem:[#allocation5 + $0xe8] sm:$0xf] %vm3518_vm1, %v4232_v50 }
 0x63b   : > { %4532 = vst.msk [vmem:[#allocation5 + $0xe8] sm:$0xf] %vm3743_vm2, %v4456_v5  ;;  %5118 = vmatpush.bf16.xpose.msra.mxu2 %v6125_v36 }
 0x63c   : > { %5135 = vmatpush.bf16.xpose.msra.mxu3 %v5026_v56 }
 0x63f   : > { %v5505_v55 = vpop.permute.xlu2 %5504 }
 0x640   : > { %v4454_v23 = vpop.permute.xlu0 %4453  ;;  %v4226_v25 = vpop.permute.xlu1 %4225  ;;  %v5557_v50 = vsel %vm435_vm0, %v5505_v55, 0 }
 0x641   : > { %4531 = vst.msk [vmem:[#allocation5 + $0xdc] sm:$0xf] %vm3743_vm2, %v4454_v23 }
 0x642   : > { %4305 = vst.msk [vmem:[#allocation5 + $0xc4] sm:$0xf] %vm3518_vm1, %v4226_v25  ;;  %v6110_v45 = vld [vmem:[#allocation5 + $0xe4] sm:$0xf0] }
 0x644   : > { %5136 = vmatpush.bf16.xpose.msra.mxu3 %v5023_v28  ;;  %v5046_v28 = vpop.f32.mrf.mxu2 }
 0x647   : > { %v5485_v15 = vpop.permute.xlu2 %5484 }
 0x648   : > { %v4003_v17 = vpop.permute.xlu0 %4002  ;;  %v6354_v34 = vld [vmem:[#allocation5 + $0xdc] sm:$0xf]  ;;  %v4452_v60 = vpop.permute.xlu1 %4451 }
 0x649   : > { %4081 = vst.msk [vmem:[#allocation5 + $0xd0] sm:$0xf] %vm3293_vm15, %v4003_v17  ;;  %v6113_v22 = vor.u32 %v6354_v34, %v6110_v45 }
 0x64a   : > { %4306 = vst.msk [vmem:[#allocation5 + $0xd0] sm:$0xf] %vm3518_vm1, %v4228_v27 }
 0x64b   : > { %4530 = vst.msk [vmem:[#allocation5 + $0xd0] sm:$0xf] %vm3743_vm2, %v4452_v60  ;;  %5119 = vmatpush.bf16.xpose.msra.mxu2 %v6113_v22 }
 0x64c   : > { %5137 = vmatpush.bf16.xpose.msra.mxu3 %v5020_v13  ;;  %v5048_v51 = vpop.f32.mrf.mxu2 }
 0x64f   : > { %v5499_v54 = vpop.permute.xlu2 %5498 }
 0x650   : > { %v4450_v59 = vpop.permute.xlu0 %4449  ;;  %v5489_v26 = vpop.permute.xlu1 %5488 }
 0x651   : > { %4529 = vst.msk [vmem:[#allocation5 + $0xc4] sm:$0xf] %vm3743_vm2, %v4450_v59 }
 0x652   : > { %v6098_v38 = vld [vmem:[#allocation5 + $0xcc] sm:$0xf0] }
 0x654   : > { %5138 = vmatpush.bf16.xpose.msra.mxu3 %v5017_v46  ;;  %v5051_v63 = vpop.f32.mrf.mxu2 }
 0x658   : > { %v5507_v19 = vpop.permute.xlu0 %5506  ;;  %v6351_v7 = vld [vmem:[#allocation5 + $0xc4] sm:$0xf]  ;;  %v5503_v6 = vpop.permute.xlu1 %5502 }
 0x659   : > { %v5560_v3 = vsel %vm435_vm0, %v5507_v19, 0  ;;  %v6101_v39 = vor.u32 %v6351_v7, %v6098_v38  ;;  %v5554_v31 = vsel %vm435_vm0, %v5503_v6, 0 }
 0x65b   : > { %5120 = vmatpush.bf16.xpose.msra.mxu2 %v6101_v39 }
 0x65c   : > { %5139 = vmatpush.bf16.xpose.msra.mxu3 %v5014_v47  ;;  %v5053_v32 = vpop.f32.mrf.mxu2 }
 0x660   : > { %v5487_v30 = vpop.permute.xlu0 %5486  ;;  %v5483_v4 = vpop.permute.xlu1 %5482 }
 0x661   : > { %v5530_v8 = vsel %vm435_vm0, %v5487_v30, 0  ;;  %v5524_v42 = vsel %vm435_vm0, %v5483_v4, 0 }
 0x662   : > { %5121 = vmatmul.bf16.vlgmr.msra.gmra.mxu2 %v8824_v49  ;;  %v5527_v49 = vsel %vm435_vm0, %v5485_v15, 0 }
 0x663   : > { %6192 = vmatmul.msk.bf16.vlgmr.msra.gmra.mxu3 %vm2925_vm11, %v8843_v10  ;;  %5562 = vmatpush.bf16.xpose.msrb.mxu2 %v5536_v29  ;;  %v5533_v10 = vsel %vm435_vm0, %v5489_v26, 0 }
 0x664   : > { %5581 = vmatpush.bf16.xpose.msrb.mxu3 %v5560_v3 }
 0x666   : > { %v5065_v52 = vpop.f32.mrf.mxu3 }
 0x667   : > { %v5066_v46 = vadd.f32 %v5065_v52, %v5046_v28 }
 0x668   : > { %v5501_v62 = vpop.permute.xlu0 %5500  ;;  %v5497_v43 = vpop.permute.xlu1 %5496 }
 0x669   : > { %v5551_v53 = vsel %vm435_vm0, %v5501_v62, 0  ;;  %v5545_v21 = vsel %vm435_vm0, %v5497_v43, 0 }
 0x66b   : > { %5563 = vmatpush.bf16.xpose.msrb.mxu2 %v5533_v10 }
 0x66c   : > { %5582 = vmatpush.bf16.xpose.msrb.mxu3 %v5557_v50 }
 0x66e   : > { %v5067_v11 = vpop.f32.mrf.mxu3 }
 0x66f   : > { %v5084_v36 = vpop.f32.mrf.mxu2  ;;  %v5068_v27 = vadd.f32 %v5067_v11, %v5048_v51 }
 0x670   : > { %v5481_v14 = vpop.permute.xlu0 %5480  ;;  %v5477_v57 = vpop.permute.xlu1 %5476  ;;  %v5085_v9 = vadd.f32 %v5084_v36, %v5066_v46 }
 0x671   : > { %v5521_v33 = vsel %vm435_vm0, %v5481_v14, 0  ;;  %v5515_v44 = vsel %vm435_vm0, %v5477_v57, 0 }
 0x672   : > { %5126 = vmatmul.bf16.gmra.mxu2 %v8867_v61  ;;  %v5479_v61 = vpop.permute.xlu2 %5478 }
 0x673   : > { %6193 = vmatmul.msk.bf16.gmra.mxu3 %vm2925_vm11, %v8875_v20  ;;  %5564 = vmatpush.bf16.xpose.msrb.mxu2 %v5530_v8  ;;  %v5548_v20 = vsel %vm435_vm0, %v5499_v54, 0  ;;  %v5518_v0 = vsel %vm435_vm0, %v5479_v61, 0 }
 0x674   : > { %5583 = vmatpush.bf16.xpose.msrb.mxu3 %v5554_v31 }
 0x677   : > { %v5086_v12 = vpop.f32.mrf.mxu2 }
 0x678   : > { %v5495_v16 = vpop.permute.xlu0 %5494  ;;  %v5070_v2 = vpop.f32.mrf.mxu3  ;;  %v5087_v19 = vadd.f32 %v5086_v12, %v5068_v27 }
 0x679   : > { %v5542_v56 = vsel %vm435_vm0, %v5495_v16, 0  ;;  %v5163_v35 = vpop.permute.xlu1 %5162  ;;  %v5071_v55 = vadd.f32 %v5070_v2, %v5051_v63  ;;  %v6391_v2 = vld [vmem:[%s9161_s9] sm:$0xff] }
 0x67a   : > { %v5493_v40 = vpop.permute.xlu2 %5492  ;;  %v5177_v26 = vmul.f32 %v5163_v35, %v5087_v19 }
 0x67b   : > { %5565 = vmatpush.bf16.xpose.msrb.mxu2 %v5527_v49  ;;  %v5539_v1 = vsel %vm435_vm0, %v5493_v40, 0 }
 0x67c   : > { %5584 = vmatpush.bf16.xpose.msrb.mxu3 %v5551_v53 }
 0x680   : > { %v5072_v41 = vpop.f32.mrf.mxu3  ;;  %v5158_v17 = vpop.permute.xlu0 %5157 }
 0x681   : > { %v5175_v22 = vmul.f32 %v5158_v17, %v5085_v9  ;;  %v5190_v47 = vpop.permute.xlu1 %5189  ;;  %v5073_v54 = vadd.f32 %v5072_v41, %v5053_v32 }
 0x682   : > { %v5168_v58 = vpop.permute.xlu2 %5167 }
 0x683   : > { %5566 = vmatpush.bf16.xpose.msrb.mxu2 %v5524_v42  ;;  %v8960_v7 = vadd.f32 %v5190_v47, %v5175_v22 }
 0x684   : > { %5585 = vmatpush.bf16.xpose.msrb.mxu3 %v5548_v20 }
 0x688   : > { %v5173_v61 = vpop.permute.xlu0 %5172 }
 0x689   : > { %v5200_v42 = vpop.permute.xlu1 %5199 }
 0x68a   : > { %v5195_v10 = vpop.permute.xlu2 %5194 }
 0x68b   : > { %5567 = vmatpush.bf16.xpose.msrb.mxu2 %v5521_v33  ;;  %v8966_v6 = vadd.f32 %v5195_v10, %v5177_v26 }
 0x68c   : > { %5586 = vmatpush.bf16.xpose.msrb.mxu3 %v5545_v21 }
 0x690   : > { %v5089_v23 = vpop.f32.mrf.mxu2 }
 0x691   : > { %v5090_v31 = vadd.f32 %v5089_v23, %v5071_v55  ;;  %v5233_v23 = vld [vmem:[%s9159_s7 + $0x10] sm:$0xff] }
 0x692   : > { %v5256_v55 = vld [vmem:[%s9160_s8 + $0x10] sm:$0xff] }
 0x693   : > { %5568 = vmatpush.bf16.xpose.msrb.mxu2 %v5518_v0  ;;  %v5179_v4 = vmul.f32 %v5168_v58, %v5090_v31 }
 0x694   : > { %5587 = vmatpush.bf16.xpose.msrb.mxu3 %v5542_v56 }
 0x695   : > { %v8972_v21 = vadd.f32 %v5200_v42, %v5179_v4 }
 0x698   : > { %v5091_v25 = vpop.f32.mrf.mxu2 }
 0x699   : > { %v5092_v43 = vadd.f32 %v5091_v25, %v5073_v54  ;;  %v5257_v54 = vld [vmem:[%s9160_s8 + $0x18] sm:$0xff] }
 0x69b   : > { %5569 = vmatpush.bf16.xpose.msrb.mxu2 %v5515_v44  ;;  %v5181_v57 = vmul.f32 %v5173_v61, %v5092_v43  ;;  %v5205_v44 = vpop.permute.xlu2 %5204  ;;  %v5600_v43 = vld [vmem:[%s9162_s10] sm:$0xff] }
 0x69c   : > { %5588 = vmatpush.bf16.xpose.msrb.mxu3 %v5539_v1 }
 0x69d   : > { %v8978_v28 = vadd.f32 %v5205_v44, %v5181_v57  ;;  %v5635_v57 = vld [vmem:[%s9163_s11 + $0x18] sm:$0xff] }
 0x6a2   : > { %6270 = vmatmul.msk.bf16.vlgmr.msrb.gmra.mxu2 %vm435_vm0, %v6391_v2 }
 0x6a3   : > { %6272 = vmatmul.msk.bf16.vlgmr.msrb.gmra.mxu3 %vm435_vm0, %v6391_v2 }
 0x6a6   : > { %v5103_v5 = vpop.f32.mrf.mxu3 }
 0x6ae   : > { %v5105_v13 = vpop.f32.mrf.mxu3 }
 0x6b6   : > { %v5108_v18 = vpop.f32.mrf.mxu3 }
 0x6be   : > { %v5110_v24 = vpop.f32.mrf.mxu3 }
 0x6e5   : > { %v5122_v34 = vpop.f32.mrf.mxu2 }
 0x6e6   : > { %v5141_v48 = vpop.f32.mrf.mxu3  ;;  %v5123_v45 = vadd.f32 %v5122_v34, %v5103_v5  ;;  %v5232_v5 = vld [vmem:[%s9159_s7 + $0x8] sm:$0xff] }
 0x6e8   : > { %v5142_v60 = vadd.f32 %v5141_v48, %v5123_v45  ;;  %v5234_v48 = vld [vmem:[%s9159_s7 + $0x18] sm:$0xff] }
 0x6ea   : > { %v5176_v59 = vmul.f32 %v5158_v17, %v5142_v60  ;;  %v6392_v17 = vld [vmem:[%s9161_s9 + $0x8] sm:$0xff] }
 0x6eb   : > { %6271 = vmatmul.msk.bf16.gmra.mxu2 %vm435_vm0, %v6392_v17  ;;  %6273 = vmatmul.msk.bf16.gmra.mxu3 %vm435_vm0, %v6392_v17 }
 0x6ec   : > { %v8962_v38 = vadd.f32 %v5190_v47, %v5176_v59 }
 0x6ed   : > { %v5124_v3 = vpop.f32.mrf.mxu2 }
 0x6ee   : > { %v5143_v37 = vpop.f32.mrf.mxu3  ;;  %v5125_v39 = vadd.f32 %v5124_v3, %v5105_v13  ;;  %v5215_v29 = vadd.f32 %v8962_v38, %v8960_v7 }
 0x6f0   : > { %v5144_v50 = vadd.f32 %v5143_v37, %v5125_v39  ;;  %5216 = vadd.xlane.f32.xlu0 %v5215_v29 }
 0x6f2   : > { %v5178_v30 = vmul.f32 %v5163_v35, %v5144_v50  ;;  %v5255_v50 = vld [vmem:[%s9160_s8 + $0x8] sm:$0xff] }
 0x6f4   : > { %v8968_v8 = vadd.f32 %v5195_v10, %v5178_v30  ;;  %v5254_v10 = vld [vmem:[%s9160_s8] sm:$0xff] }
 0x6f5   : > { %v5127_v62 = vpop.f32.mrf.mxu2 }
 0x6f6   : > { %v5146_v15 = vpop.f32.mrf.mxu3  ;;  %v5128_v53 = vadd.f32 %v5127_v62, %v5108_v18  ;;  %v5218_v49 = vadd.f32 %v8968_v8, %v8966_v6  ;;  %v5231_v18 = vld [vmem:[%s9159_s7] sm:$0xff] }
 0x6f8   : > { %v5147_v20 = vadd.f32 %v5146_v15, %v5128_v53  ;;  %5219 = vadd.xlane.f32.xlu1 %v5218_v49 }
 0x6fa   : > { %v5180_v14 = vmul.f32 %v5168_v58, %v5147_v20 }
 0x6fc   : > { %v8974_v33 = vadd.f32 %v5200_v42, %v5180_v14  ;;  %v5601_v14 = vld [vmem:[%s9162_s10 + $0x8] sm:$0xff] }
 0x6fd   : > { %v5129_v16 = vpop.f32.mrf.mxu2 }
 0x6fe   : > { %v5130_v56 = vadd.f32 %v5129_v16, %v5110_v24  ;;  %v5221_v0 = vadd.f32 %v8974_v33, %v8972_v21  ;;  %v5148_v40 = vpop.f32.mrf.mxu3  ;;  %v5633_v16 = vld [vmem:[%s9163_s11 + $0x8] sm:$0xff] }
 0x700   : > { %v5149_v1 = vadd.f32 %v5148_v40, %v5130_v56  ;;  %5222 = vadd.xlane.f32.xlu2 %v5221_v0  ;;  %v5603_v56 = vld [vmem:[%s9162_s10 + $0x18] sm:$0xff]  ;;  %v5632_v0 = vld [vmem:[%s9163_s11] sm:$0xff]  ;;  %v5634_v40 = vld [vmem:[%s9163_s11 + $0x10] sm:$0xff] }
 0x702   : > { %v5182_v52 = vmul.f32 %v5173_v61, %v5149_v1  ;;  %v5602_v61 = vld [vmem:[%s9162_s10 + $0x10] sm:$0xff] }
 0x704   : > { %v8980_v11 = vadd.f32 %v5205_v44, %v5182_v52 }
 0x706   : > { %v5224_v51 = vadd.f32 %v8980_v11, %v8978_v28 }
 0x708   : > { %5225 = vadd.xlane.f32.xlu2 %v5224_v51 }
 0x763   : > { %v5217_v41 = vpop.xlane.xlu0 %5216 }
 0x764   : > { %v5227_v13 = vmul.f32 0.00390625, %v5217_v41 }
 0x766   : > { %v5235_v25 = vmul.f32 %v5231_v18, %v5227_v13 }
 0x768   : > { %v5240_v34 = vsel %vm5239_vm3, %v5235_v25, 0.0 }
 0x76b   : > { %v5220_v63 = vpop.xlane.xlu1 %5219 }
 0x76c   : > { %v5228_v32 = vmul.f32 0.00390625, %v5220_v63 }
 0x76e   : > { %v5236_v24 = vmul.f32 %v5232_v5, %v5228_v32 }
 0x770   : > { %v5241_v46 = vsel %vm5239_vm3, %v5236_v24, 0.0  ;;  %v9054_v24 = vpop.f32.mrf.mxu3 }
 0x771   : > { %v5242_v27 = vadd.f32 %v5241_v46, %v5240_v34 }
 0x773   : > { %v5223_v36 = vpop.xlane.xlu2 %5222 }
 0x774   : > { %v5229_v12 = vmul.f32 0.00390625, %v5223_v36 }
 0x776   : > { %v5237_v35 = vmul.f32 %v5233_v23, %v5229_v12  ;;  %v9052_v12 = vpop.f32.mrf.mxu2 }
 0x778   : > { %v5243_v45 = vsel %vm5239_vm3, %v5237_v35, 0.0 }
 0x779   : > { %v5244_v60 = vadd.f32 %v5243_v45, %v5242_v27 }
 0x77b   : > { %v5226_v9 = vpop.xlane.xlu2 %5225 }
 0x77c   : > { %v5230_v58 = vmul.f32 0.00390625, %v5226_v9 }
 0x77e   : > { %v5238_v22 = vmul.f32 %v5234_v48, %v5230_v58 }
 0x780   : > { %v5245_v47 = vsel %vm5239_vm3, %v5238_v22, 0.0  ;;  %v5573_v22 = vpop.f32.mrf.mxu2 }
 0x781   : > { %v5246_v59 = vadd.f32 %v5245_v47, %v5244_v60  ;;  %v5592_v47 = vpop.f32.mrf.mxu3 }
 0x783   : > { %v5247_v37 = vrot.slane %v5246_v59, 4 }
 0x785   : > { %v5248_v19 = vadd.f32 %v5247_v37, %v5246_v59 }
 0x787   : > { %v5249_v3 = vrot.slane %v5248_v19, 2 }
 0x789   : > { %v5250_v39 = vadd.f32 %v5249_v3, %v5248_v19 }
 0x78b   : > { %v5251_v29 = vrot.slane %v5250_v39, 1 }
 0x78d   : > { %v5252_v26 = vadd.f32 %v5251_v29, %v5250_v39 }
 0x78f   : > { %v5253_v30 = vmax.f32 %v5252_v26, 0.0 }
 0x791   : > { %v5260_v31 = vmul.f32 %v5256_v55, %v5253_v30  ;;  %v5259_v15 = vmul.f32 %v5255_v50, %v5253_v30  ;;  %v5258_v62 = vmul.f32 %v5254_v10, %v5253_v30  ;;  %v5261_v20 = vmul.f32 %v5257_v54, %v5253_v30 }
 0x793   : > { %v5268_v53 = vsel %vm5239_vm3, %v5260_v31, 0.0  ;;  %v5265_v49 = vsel %vm5239_vm3, %v5259_v15, 0.0  ;;  %v5262_v4 = vsel %vm5239_vm3, %v5258_v62, 0.0  ;;  %v5271_v42 = vsel %vm5239_vm3, %v5261_v20, 0.0 }
 0x794   : > { %5269 = vadd.xlane.f32.xlu2 %v5268_v53  ;;  %5266 = vadd.xlane.f32.xlu1 %v5265_v49 }
 0x795   : > { %5263 = vadd.xlane.f32.xlu0 %v5262_v4 }
 0x79d   : > { %5272 = vadd.xlane.f32.xlu0 %v5271_v42 }
 0x7ac   : > { %5611 = vperm.xlu2 %6533, %v5601_v14  }
 0x7ad   : > { %5606 = vperm.xlu1 %6532, %v5600_v43  }
 0x7b1   : > { %5616 = vperm.xlu0 %6531, %v5602_v61   ;;  %v5576_v61 = vpop.f32.mrf.mxu2 }
 0x7b4   : > { %5643 = vperm.xlu2 %6533, %v5633_v16  }
 0x7b5   : > { %5621 = vperm.xlu1 %6532, %v5603_v56  }
 0x7b9   : > { %5638 = vperm.xlu0 %6531, %v5632_v0  }
 0x7bd   : > { %5648 = vperm.xlu1 %6532, %v5634_v40  }
 0x7c1   : > { %5653 = vperm.xlu0 %6531, %v5635_v57  }
 0x807   : > { %v5270_v1 = vpop.xlane.xlu2 %5269  ;;  %v5267_v44 = vpop.xlane.xlu1 %5266 }
 0x808   : > { %v6196_v52 = vmul.f32 -1.442695, %v5270_v1  ;;  %v6195_v51 = vmul.f32 -1.442695, %v5267_v44  ;;  %v5264_v2 = vpop.xlane.xlu0 %5263  ;;  %v5595_v44 = vpop.f32.mrf.mxu3 }
 0x809   : > { %v6194_v63 = vmul.f32 -1.442695, %v5264_v2 }
 0x80a   : > { %6536 = vpow2.f32 %v6196_v52 }
 0x80b   : > { %6538 = vpow2.f32 %v6195_v51 }
 0x80c   : > { %6540 = vpow2.f32 %v6194_v63 }
 0x80f   : > { %v5612_v35 = vpop.permute.xlu2 %5611 }
 0x810   : > { %v6537_v41 = vpop.eup %6536  ;;  %v5273_v32 = vpop.xlane.xlu0 %5272  ;;  %v5626_v26 = vmul.f32 %v5612_v35, %v5573_v22  ;;  %v5627_v55 = vmul.f32 %v5612_v35, %v5592_v47 }
 0x811   : > { %v6539_v5 = vpop.eup %6538  ;;  %v9050_v36 = vadd.f32 1.0, %v6537_v41  ;;  %v6197_v23 = vmul.f32 -1.442695, %v5273_v32 }
 0x812   : > { %v6541_v13 = vpop.eup %6540  ;;  %v5287_v18 = vadd.f32 1.0, %v6539_v5 }
 0x813   : > { %6542 = vrcp.f32 %v9050_v36  ;;  %v5286_v25 = vadd.f32 1.0, %v6541_v13  ;;  %v5329_v15 = vand.u32 2147483647, %v9050_v36  ;;  %v5331_v42 = vand.u32 2147483648, %v9050_v36 }
 0x814   : > { %6544 = vrcp.f32 %v5287_v18  ;;  %v5316_v19 = vand.u32 2147483648, %v5287_v18  ;;  %v5314_v39 = vand.u32 2147483647, %v5287_v18  ;;  %vm5310_vm4 = vweird.f32 %v5287_v18 }
 0x815   : > { %6546 = vrcp.f32 %v5286_v25  ;;  %vm5295_vm7 = vweird.f32 %v5286_v25  ;;  %v5301_v49 = vand.u32 2147483648, %v5286_v25  ;;  %v5299_v20 = vand.u32 2147483647, %v5286_v25 }
 0x816   : > { %6548 = vpow2.f32 %v6197_v23  ;;  %v5317_v62 = vor.u32 1.1754944e-38, %v5316_v19  ;;  %vm5315_vm8 = vcmp.eq.f32.partialorder %v5314_v39, 8.507059e+37  ;;  %vm5325_vm11 = vweird.f32 %v9050_v36  ;;  %v5578_v19 = vpop.f32.mrf.mxu2 }
 0x817   : > { %v5644_v30 = vpop.permute.xlu2 %5643  ;;  %v5302_v2 = vor.u32 1.1754944e-38, %v5301_v49  ;;  %vm5300_vm12 = vcmp.eq.f32.partialorder %v5299_v20, 8.507059e+37  ;;  %vm9087_vm14 = vcmp.eq.f32.partialorder %v5329_v15, 8.507059e+37 }
 0x818   : > { %v5658_v43 = vadd.f32 %v5644_v30, %v5626_v26  ;;  %v5659_v40 = vadd.f32 %v5644_v30, %v5627_v55 }
 0x819   : > { %v9057_v46 = vpop.eup %6542 }
 0x81a   : > { %v6545_v48 = vpop.eup %6544  ;;  %v5321_v9 = vmul.f32 %v9057_v46, %v9050_v36  ;;  %vm5326_vm10 = vweird.f32 %v9057_v46 }
 0x81b   : > { %v6547_v17 = vpop.eup %6546  ;;  %v5306_v34 = vmul.f32 %v6545_v48, %v5287_v18  ;;  %vm5311_vm0 = vweird.f32 %v6545_v48  ;;  %vm9083_vm13 = vmor %vm5325_vm11, %vm5326_vm10  ;;  %v5332_v18 = vor.u32 1.1754944e-38, %v5331_v42 }
 0x81c   : > { %v6549_v45 = vpop.eup %6548  ;;  %v5322_v58 = vsub.f32 1.0, %v5321_v9  ;;  %v5291_v27 = vmul.f32 %v6547_v17, %v5286_v25  ;;  %vm5296_vm5 = vweird.f32 %v6547_v17  ;;  %vm5312_vm6 = vmor %vm5310_vm4, %vm5311_vm0 }
 0x81d   : > { %v5307_v60 = vsub.f32 1.0, %v5306_v34  ;;  %v9061_v59 = vadd.f32 1.0, %v6549_v45  ;;  %vm9068_vm9 = vmor %vm5295_vm7, %vm5296_vm5 }
 0x81e   : > { %v5292_v37 = vsub.f32 1.0, %v5291_v27  ;;  %v5323_v10 = vmul.f32 %v9057_v46, %v5322_v58 }
 0x81f   : > { %6550 = vrcp.f32 %v9061_v59  ;;  %v5308_v3 = vmul.f32 %v6545_v48, %v5307_v60  ;;  %v5607_v29 = vpop.permute.xlu1 %5606  ;;  %v5344_v35 = vand.u32 2147483647, %v9061_v59  ;;  %vm5340_vm1 = vweird.f32 %v9061_v59 }
 0x820   : > { %v5293_v50 = vmul.f32 %v6547_v17, %v5292_v37  ;;  %v5324_v56 = vadd.f32 %v9057_v46, %v5323_v10  ;;  %v5624_v9 = vmul.f32 %v5607_v29, %v9052_v12 }
 0x821   : > { %v5309_v31 = vadd.f32 %v6545_v48, %v5308_v3  ;;  %vm5345_vm3 = vcmp.eq.f32.partialorder %v5344_v35, 8.507059e+37 }
 0x822   : > { %v5294_v53 = vadd.f32 %v6547_v17, %v5293_v50  ;;  %v5328_v36 = vsel %vm9083_vm13, %v9057_v46, %v5324_v56 }
 0x823   : > { %v5313_v4 = vsel %vm5312_vm6, %v6545_v48, %v5309_v31  ;;  %v5617_v54 = vpop.permute.xlu0 %5616  ;;  %v5346_v48 = vand.u32 2147483648, %v9061_v59  ;;  %v5333_v58 = vsel %vm9087_vm14, %v5332_v18, %v5328_v36 }
 0x824   : > { %v5318_v14 = vsel %vm5315_vm8, %v5317_v62, %v5313_v4  ;;  %v5298_v52 = vsel %vm9068_vm9, %v6547_v17, %v5294_v53  ;;  %v5625_v17 = vmul.f32 %v5607_v29, %v9054_v24  ;;  %v5628_v60 = vmul.f32 %v5617_v54, %v5576_v61  ;;  %v5597_v29 = vpop.f32.mrf.mxu3 }
 0x825   : > { %v6551_v0 = vpop.eup %6550  ;;  %v5666_v57 = vmul.f32 %v5318_v14, %v8966_v6  ;;  %v5667_v1 = vmul.f32 %v5318_v14, %v8968_v8  ;;  %v5303_v13 = vsel %vm5300_vm12, %v5302_v2, %v5298_v52  ;;  %v5347_v47 = vor.u32 1.1754944e-38, %v5346_v48 }
 0x826   : > { %v5336_v51 = vmul.f32 %v6551_v0, %v9061_v59  ;;  %vm5341_vm15 = vweird.f32 %v6551_v0  ;;  %v5664_v46 = vmul.f32 %v5303_v13, %v8960_v7  ;;  %v5665_v12 = vmul.f32 %v5303_v13, %v8962_v38 }
 0x827   : > { %v5674_v63 = vadd.f32 %v5666_v57, %v5658_v43  ;;  %v5675_v41 = vadd.f32 %v5667_v1, %v5659_v40  ;;  %v5622_v32 = vpop.permute.xlu1 %5621  ;;  %vm5342_vm2 = vmor %vm5340_vm1, %vm5341_vm15  ;;  %v5629_v37 = vmul.f32 %v5617_v54, %v5595_v44  ;;  %v5668_v59 = vmul.f32 %v5333_v58, %v8972_v21 }
 0x828   : > { %v5337_v8 = vsub.f32 1.0, %v5336_v51  ;;  %v5669_v38 = vmul.f32 %v5333_v58, %v8974_v33  ;;  %v5630_v15 = vmul.f32 %v5622_v32, %v5578_v19  ;;  %v5631_v62 = vmul.f32 %v5622_v32, %v5597_v29 }
 0x829   : > { %v5682_v23 = vmax.f32 %v5674_v63, 0.0  ;;  %v5683_v25 = vmax.f32 %v5675_v41, 0.0 }
 0x82a   : > { %v5338_v34 = vmul.f32 %v6551_v0, %v5337_v8 }
 0x82b   : > { %5690 = vst [vmem:[%s9098_s27 + $0x10] sm:$0xff] %v5682_v23  ;;  %v5639_v45 = vpop.permute.xlu0 %5638 }
 0x82c   : > { %5691 = vst [vmem:[%s9098_s27 + $0x18] sm:$0xff] %v5683_v25  ;;  %v5656_v27 = vadd.f32 %v5639_v45, %v5624_v9  ;;  %v5657_v24 = vadd.f32 %v5639_v45, %v5625_v17  ;;  %v5339_v22 = vadd.f32 %v6551_v0, %v5338_v34 }
 0x82e   : > { %v5672_v7 = vadd.f32 %v5664_v46, %v5656_v27  ;;  %v5673_v3 = vadd.f32 %v5665_v12, %v5657_v24  ;;  %v5343_v39 = vsel %vm5342_vm2, %v6551_v0, %v5339_v22 }
 0x82f   : > { %v5649_v26 = vpop.permute.xlu1 %5648  ;;  %v5348_v55 = vsel %vm5345_vm3, %v5347_v47, %v5343_v39 }
 0x830   : > { %v5680_v50 = vmax.f32 %v5672_v7, 0.0  ;;  %v5681_v10 = vmax.f32 %v5673_v3, 0.0  ;;  %v5660_v30 = vadd.f32 %v5649_v26, %v5628_v60  ;;  %v5661_v31 = vadd.f32 %v5649_v26, %v5629_v37 }
 0x831   : > { %v5670_v21 = vmul.f32 %v5348_v55, %v8978_v28  ;;  %v5671_v33 = vmul.f32 %v5348_v55, %v8980_v11 }
 0x832   : > { %5688 = vst [vmem:[%s9098_s27] sm:$0xff] %v5680_v50  ;;  %v5676_v53 = vadd.f32 %v5668_v59, %v5660_v30  ;;  %v5677_v49 = vadd.f32 %v5669_v38, %v5661_v31 }
 0x833   : > { %5689 = vst [vmem:[%s9098_s27 + $0x8] sm:$0xff] %v5681_v10  ;;  %v5654_v4 = vpop.permute.xlu0 %5653 }
 0x834   : > { %v5684_v54 = vmax.f32 %v5676_v53, 0.0  ;;  %v5685_v20 = vmax.f32 %v5677_v49, 0.0  ;;  %v5662_v42 = vadd.f32 %v5654_v4, %v5630_v15  ;;  %v5663_v14 = vadd.f32 %v5654_v4, %v5631_v62 }
 0x836   : > { %5692 = vst [vmem:[%s9098_s27 + $0x20] sm:$0xff] %v5684_v54  ;;  %v5678_v43 = vadd.f32 %v5670_v21, %v5662_v42  ;;  %v5679_v61 = vadd.f32 %v5671_v33, %v5663_v14 }
 0x837   : > { %5693 = vst [vmem:[%s9098_s27 + $0x28] sm:$0xff] %v5685_v20 }
 0x838   : > { %v5686_v28 = vmax.f32 %v5678_v43, 0.0  ;;  %v5687_v11 = vmax.f32 %v5679_v61, 0.0 }
 0x83a   : > { %5694 = vst [vmem:[%s9098_s27 + $0x30] sm:$0xff] %v5686_v28 }
 0x83b   : > { %5695 = vst [vmem:[%s9098_s27 + $0x38] sm:$0xff] %v5687_v11 }
 0x83c   : > { %6611 = shalt.err (!%p6608_p4)
}
 0x83d   : > { %s6663_s26 = smov 256  }
 0x83e   : > { %6475 = dma.vmem_to_hbm [thread:$0]  (%p6779_p11), %s5710_s25, 1024, %s5712_s19, %s5697_s13, %s6663_s26, %s6663_s26, %s6655_s21  }
 0x83f PF: > { %s9283_s27 = sld [smem:[#allocation12_spill]]  ;;  %p9285_p7 = scmp.ge.s32.totalorder %s6650_s24, 2 }
 0x841   : > { %p6482_p5 = pnand %p9285_p7, %p6783_p12 }
 0x843   : > { %p6483_p8 = pneg %p6482_p5 }
 0x845   : > { %s5726_s30 = sand.u32 1, %s9283_s27  }
 0x846   : > { %s5727_s15 = scalar_lea.sflag [#allocation8], %s5726_s30 }
 0x847   : > { %6633 = dma.done.wait (%p6483_p8), %s5727_s15, 1024  }
 0x848   : > { %6635 = vsyncadd (%p6483_p8), %s5727_s15, 4294966272  ;;  %s9286_s24 = sld [smem:[#allocation14_spill]]  ;;  %s9289_s21 = smov %s6642_s22 }
 0x849   : > { %s9287_s17 = sld [smem:[#allocation13_spill]] }
 0x84a   : > { %s9288_s23 = sld [smem:[#allocation15_spill]] }
 0x84e   : > { %p25_p10 = scmp.ge.s32.totalorder %s9286_s24, 4  }
 0x84f   : > { %s9290_s22 = smov %s9287_s17 }
 0x850   :  { %27 = sbr.rel (!%p25_p10) target bundleno = 5 (0x5), region = 119 }
 0x855   :  { %5733 = vsyncpa [#allocation7], 1 }
 0x856   :  { %5735 = vsyncpa [#allocation7 + $0x1], 1 }
 0x857   :  { %5736 = vsyncpa [#allocation8], 1 }
 0x858   :  { %5738 = vsyncpa [#allocation8 + $0x1], 1 }

</bundles_post_ra>
